<compile_context>
chip_gen: v5e
topology: v5e:2x2
jax: 0.10.0
libtpu: 0.0.40
codegen_flags: <defaults>
</compile_context>

<pallas_src>
import jax
import jax.numpy as jnp
from jax.experimental import pallas as pl
from jax.experimental.pallas import tpu as pltpu

EPS = 1e-5


def _fused_kernel(x190_ref, w62t_ref, b62_ref, x187_ref,
                  w63_ref, g37_ref,
                  w64_ref, g38_ref, b38_ref,
                  out_ref):
    # --- SE gate (conv62 + sigmoid), produced directly as a [1, 528] row. -------------
    s = jnp.sum(w62t_ref[...] * x190_ref[...], axis=0, keepdims=True) + b62_ref[...]
    gate = 1.0 / (1.0 + jnp.exp(-s))                                        # [1, 528]

    # --- Fold the gate into w63's columns (exact: 1x1 conv is linear). ----------------
    w63g = (w63_ref[...].astype(jnp.float32) * gate).astype(jnp.bfloat16)   # [120, 528]
    x = x187_ref[...].astype(jnp.bfloat16)                                  # [528, P]

    # conv63 on the MXU: bf16 x bf16 -> f32 accumulate.
    z1 = jnp.dot(w63g, x, preferred_element_type=jnp.float32)               # [120, P]

    # BN37 batch stats (training mode, biased variance) via single-pass sums.
    inv_p = 1.0 / z1.shape[-1]
    m1 = jnp.sum(z1, axis=-1, keepdims=True) * inv_p
    e1 = jnp.sum(z1 * z1, axis=-1, keepdims=True) * inv_p
    v1 = e1 - m1 * m1
    a1 = jax.lax.rsqrt(v1 + EPS) * g37_ref[...]
    # BN37's shift (b37 - m1*a1) is a per-channel constant; it cancels exactly through
    # the bias-free conv64 + BN38's mean subtraction, so only the scale is applied here.
    z1s = (z1 * a1).astype(jnp.bfloat16)                                    # [120, P]

    # conv64 on the MXU + BN38 as a fused scale+shift.
    z2 = jnp.dot(w64_ref[...], z1s, preferred_element_type=jnp.float32)     # [720, P]
    m2 = jnp.sum(z2, axis=-1, keepdims=True) * inv_p
    e2 = jnp.sum(z2 * z2, axis=-1, keepdims=True) * inv_p
    v2 = e2 - m2 * m2
    a2 = jax.lax.rsqrt(v2 + EPS) * g38_ref[...]
    out_ref[...] = z2 * a2 + (b38_ref[...] - m2 * a2)


@jax.jit
def fused_forward(x190, x187, params):
    """x190: [1,22,1,1], x187: [1,528,H,W] (NCHW, float32). Returns [1,720,H,W] f32."""
    N, C_mid, H, W = x187.shape
    assert N == 1  # TODO(synk): per-image SE gate + per-batch BN stats needed for N > 1.
    P = H * W

    # Free reshapes (no data movement): NCHW with N==1 -> channel-major [C, H*W].
    x187_cm = x187.reshape(C_mid, P)                 # [528, 196]
    x190_col = x190.reshape(x190.shape[1], 1)        # [22, 1]

    w64 = params["w64"]
    C_out = w64.shape[0]                             # 720

    operands = (x190_col, params["w62t"], params["b62"], x187_cm,
                params["w63"], params["g37"],
                w64, params["g38"], params["b38"])

    def full(a):
        return pl.BlockSpec(a.shape, lambda i: (0,) * a.ndim)

    out_cm = pl.pallas_call(
        _fused_kernel,
        out_shape=jax.ShapeDtypeStruct((C_out, P), jnp.float32),
        grid=(1,),
        in_specs=[full(a) for a in operands],
        out_specs=pl.BlockSpec((C_out, P), lambda i: (0, 0)),
        compiler_params=pltpu.CompilerParams(dimension_semantics=("arbitrary",)),
    )(*operands)

    # Free reshape back to NCHW.
    return out_cm.reshape(N, C_out, H, W)


def _reference(x190, x187, params):
    """Pure-JAX f32 reference with the module's exact semantics (training-mode BN)."""
    N, C, H, W = x187.shape
    P = H * W
    x = x187.reshape(C, P)
    w62t = params["w62t"]
    w63 = params["w63"].astype(jnp.float32)
    w64 = params["w64"].astype(jnp.float32)
    s = x190.reshape(1, -1) @ w62t + params["b62"]                       # [1, 528]
    gate = jax.nn.sigmoid(s)
    y = gate.reshape(-1, 1) * x                                          # [528, P]
    z1 = w63 @ y
    m1, v1 = jnp.mean(z1, 1, keepdims=True), jnp.var(z1, 1, keepdims=True)
    z1n = (z1 - m1) / jnp.sqrt(v1 + EPS) * params["g37"] + params["b37"]
    z2 = w64 @ z1n
    m2, v2 = jnp.mean(z2, 1, keepdims=True), jnp.var(z2, 1, keepdims=True)
    out = (z2 - m2) / jnp.sqrt(v2 + EPS) * params["g38"] + params["b38"]
    return out.reshape(N, -1, H, W)


def make_params(key):
    """Deterministic parameter init matching the module's shapes (channel-major)."""
    ks = jax.random.split(key, 8)
    # Conv2d62: weight [528,22,1,1] + bias [528]; weight stored transposed [22,528] (f32,
    # tiny) so the SE gate is computed directly as a [1,528] lane-row.
    w62t = jax.random.normal(ks[0], (22, 528), jnp.float32) * 0.1
    b62 = jax.random.normal(ks[1], (528,), jnp.float32) * 0.1
    # Conv2d63 [120,528,1,1] and Conv2d64 [720,120,1,1] weights: bf16 in HBM (halves
    # their DMA and feeds the bf16 MXU path with no in-kernel upcast).
    w63 = (jax.random.normal(ks[2], (120, 528), jnp.float32) * 0.05).astype(jnp.bfloat16)
    w64 = (jax.random.normal(ks[3], (720, 120), jnp.float32) * 0.05).astype(jnp.bfloat16)
    # BatchNorm affine params (column vectors for channel-major broadcast).
    g37 = 1.0 + 0.1 * jax.random.normal(ks[4], (120,), jnp.float32)
    b37 = 0.1 * jax.random.normal(ks[5], (120,), jnp.float32)   # only used by the reference
    g38 = 1.0 + 0.1 * jax.random.normal(ks[6], (720,), jnp.float32)
    b38 = 0.1 * jax.random.normal(ks[7], (720,), jnp.float32)
    # TODO(synk): BatchNorm running_mean/running_var momentum updates (module state)
    # are not produced; only the forward activation (x197) is computed.
    return {
        "w62t": w62t, "b62": b62.reshape(1, -1),
        "w63": w63, "g37": g37.reshape(-1, 1), "b37": b37.reshape(-1, 1),
        "w64": w64, "g38": g38.reshape(-1, 1), "b38": b38.reshape(-1, 1),
    }


if __name__ == "__main__":
    key = jax.random.PRNGKey(0)
    k_params, k_x190, k_x187 = jax.random.split(key, 3)

    params = make_params(k_params)
    # Shapes implied by the module's forward:
    x190 = jax.random.normal(k_x190, (1, 22, 1, 1), jnp.float32)
    x187 = jax.random.normal(k_x187, (1, 528, 14, 14), jnp.float32)

    out = jax.block_until_ready(fused_forward(x190, x187, params))
    ref = jax.block_until_ready(_reference(x190, x187, params))

    assert out.shape == (1, 720, 14, 14), out.shape
    # Tolerance covers the bf16 MXU operand path (f32 accumulation) vs. the f32 reference.
    max_err = float(jnp.max(jnp.abs(out - ref)))
    assert jnp.allclose(out, ref, atol=2e-2, rtol=2e-2), max_err

    print("KERNEL_OK")
</pallas_src>

<mosaic_0001>
module attributes {stable_mosaic.version = 11 : i64} {
  func.func @_fused_kernel(%arg0: i32, %arg1: memref<22x1xf32, #tpu.memory_space<vmem>>, %arg2: memref<22x528xf32, #tpu.memory_space<vmem>>, %arg3: memref<1x528xf32, #tpu.memory_space<vmem>>, %arg4: memref<528x196xf32, #tpu.memory_space<vmem>>, %arg5: memref<120x528xbf16, #tpu.memory_space<vmem>>, %arg6: memref<120x1xf32, #tpu.memory_space<vmem>>, %arg7: memref<720x120xbf16, #tpu.memory_space<vmem>>, %arg8: memref<720x1xf32, #tpu.memory_space<vmem>>, %arg9: memref<720x1xf32, #tpu.memory_space<vmem>>, %arg10: memref<720x196xf32, #tpu.memory_space<vmem>>) attributes {dimension_semantics = [#tpu.dimension_semantics<arbitrary>], iteration_bounds = array<i64: 1>, scalar_prefetch = 0 : i64, scratch_operands = 0 : i64, tpu.core_type = #tpu.core_type<tc>, window_params = [{pipeline_mode = #tpu.pipeline_mode<synchronous>, transform_indices = @transform_0, window_bounds = array<i64: 22, 1>}, {pipeline_mode = #tpu.pipeline_mode<synchronous>, transform_indices = @transform_1, window_bounds = array<i64: 22, 528>}, {pipeline_mode = #tpu.pipeline_mode<synchronous>, transform_indices = @transform_2, window_bounds = array<i64: 1, 528>}, {pipeline_mode = #tpu.pipeline_mode<synchronous>, transform_indices = @transform_3, window_bounds = array<i64: 528, 196>}, {pipeline_mode = #tpu.pipeline_mode<synchronous>, transform_indices = @transform_4, window_bounds = array<i64: 120, 528>}, {pipeline_mode = #tpu.pipeline_mode<synchronous>, transform_indices = @transform_5, window_bounds = array<i64: 120, 1>}, {pipeline_mode = #tpu.pipeline_mode<synchronous>, transform_indices = @transform_6, window_bounds = array<i64: 720, 120>}, {pipeline_mode = #tpu.pipeline_mode<synchronous>, transform_indices = @transform_7, window_bounds = array<i64: 720, 1>}, {pipeline_mode = #tpu.pipeline_mode<synchronous>, transform_indices = @transform_8, window_bounds = array<i64: 720, 1>}, {pipeline_mode = #tpu.pipeline_mode<synchronous>, transform_indices = @transform_9, window_bounds = array<i64: 720, 196>}]} {
    %c0 = arith.constant 0 : index
    %c0_0 = arith.constant 0 : index
    %0 = vector.load %arg2[%c0, %c0_0] : memref<22x528xf32, #tpu.memory_space<vmem>>, vector<22x528xf32>
    %c0_1 = arith.constant 0 : index
    %c0_2 = arith.constant 0 : index
    %1 = vector.load %arg1[%c0_1, %c0_2] : memref<22x1xf32, #tpu.memory_space<vmem>>, vector<22x1xf32>
    %2 = vector.broadcast %1 : vector<22x1xf32> to vector<22x528xf32>
    %3 = arith.mulf %0, %2 : vector<22x528xf32>
    %cst = arith.constant dense<0.000000e+00> : vector<528xf32>
    %4 = vector.multi_reduction <add>, %3, %cst [0] : vector<22x528xf32> to vector<528xf32>
    %5 = vector.shape_cast %4 : vector<528xf32> to vector<1x528xf32>
    %c0_3 = arith.constant 0 : index
    %c0_4 = arith.constant 0 : index
    %6 = vector.load %arg3[%c0_3, %c0_4] : memref<1x528xf32, #tpu.memory_space<vmem>>, vector<1x528xf32>
    %7 = arith.addf %5, %6 : vector<1x528xf32>
    %cst_5 = arith.constant 0.000000e+00 : f32
    %8 = vector.broadcast %cst_5 : f32 to vector<1x528xf32>
    %9 = arith.subf %8, %7 : vector<1x528xf32>
    %10 = math.exp %9 : vector<1x528xf32>
    %cst_6 = arith.constant 1.000000e+00 : f32
    %11 = vector.broadcast %cst_6 : f32 to vector<1x528xf32>
    %12 = arith.addf %11, %10 : vector<1x528xf32>
    %cst_7 = arith.constant 1.000000e+00 : f32
    %13 = vector.broadcast %cst_7 : f32 to vector<1x528xf32>
    %14 = arith.divf %13, %12 : vector<1x528xf32>
    %c0_8 = arith.constant 0 : index
    %c0_9 = arith.constant 0 : index
    %15 = vector.load %arg5[%c0_8, %c0_9] : memref<120x528xbf16, #tpu.memory_space<vmem>>, vector<120x528xbf16>
    %16 = arith.extf %15 : vector<120x528xbf16> to vector<120x528xf32>
    %17 = vector.broadcast %14 : vector<1x528xf32> to vector<120x528xf32>
    %18 = arith.mulf %16, %17 : vector<120x528xf32>
    %19 = arith.truncf %18 : vector<120x528xf32> to vector<120x528xbf16>
    %c0_10 = arith.constant 0 : index
    %c0_11 = arith.constant 0 : index
    %20 = vector.load %arg4[%c0_10, %c0_11] : memref<528x196xf32, #tpu.memory_space<vmem>>, vector<528x196xf32>
    %21 = arith.truncf %20 : vector<528x196xf32> to vector<528x196xbf16>
    %cst_12 = arith.constant dense<0.000000e+00> : vector<120x196xf32>
    %22 = tpu.matmul %19, %21, %cst_12 {dimension_numbers = #tpu.dot_dimension_numbers<[1], [0], [0], [1], [0, 0, 1, 1], [], []>} : vector<120x528xbf16>, vector<528x196xbf16>, vector<120x196xf32> -> vector<120x196xf32>
    %cst_13 = arith.constant dense<0.000000e+00> : vector<120xf32>
    %23 = vector.multi_reduction <add>, %22, %cst_13 [1] : vector<120x196xf32> to vector<120xf32>
    %24 = vector.shape_cast %23 : vector<120xf32> to vector<120x1xf32>
    %cst_14 = arith.constant 0.00510204071 : f32
    %25 = vector.broadcast %cst_14 : f32 to vector<120x1xf32>
    %26 = arith.mulf %24, %25 : vector<120x1xf32>
    %27 = arith.mulf %22, %22 : vector<120x196xf32>
    %cst_15 = arith.constant dense<0.000000e+00> : vector<120xf32>
    %28 = vector.multi_reduction <add>, %27, %cst_15 [1] : vector<120x196xf32> to vector<120xf32>
    %29 = vector.shape_cast %28 : vector<120xf32> to vector<120x1xf32>
    %cst_16 = arith.constant 0.00510204071 : f32
    %30 = vector.broadcast %cst_16 : f32 to vector<120x1xf32>
    %31 = arith.mulf %29, %30 : vector<120x1xf32>
    %32 = arith.mulf %26, %26 : vector<120x1xf32>
    %33 = arith.subf %31, %32 : vector<120x1xf32>
    %cst_17 = arith.constant 9.99999974E-6 : f32
    %34 = vector.broadcast %cst_17 : f32 to vector<120x1xf32>
    %35 = arith.addf %33, %34 : vector<120x1xf32>
    %36 = math.rsqrt %35 : vector<120x1xf32>
    %c0_18 = arith.constant 0 : index
    %c0_19 = arith.constant 0 : index
    %37 = vector.load %arg6[%c0_18, %c0_19] : memref<120x1xf32, #tpu.memory_space<vmem>>, vector<120x1xf32>
    %38 = arith.mulf %36, %37 : vector<120x1xf32>
    %39 = vector.broadcast %38 : vector<120x1xf32> to vector<120x196xf32>
    %40 = arith.mulf %22, %39 : vector<120x196xf32>
    %41 = arith.truncf %40 : vector<120x196xf32> to vector<120x196xbf16>
    %c0_20 = arith.constant 0 : index
    %c0_21 = arith.constant 0 : index
    %42 = vector.load %arg7[%c0_20, %c0_21] : memref<720x120xbf16, #tpu.memory_space<vmem>>, vector<720x120xbf16>
    %cst_22 = arith.constant dense<0.000000e+00> : vector<720x196xf32>
    %43 = tpu.matmul %42, %41, %cst_22 {dimension_numbers = #tpu.dot_dimension_numbers<[1], [0], [0], [1], [0, 0, 1, 1], [], []>} : vector<720x120xbf16>, vector<120x196xbf16>, vector<720x196xf32> -> vector<720x196xf32>
    %cst_23 = arith.constant dense<0.000000e+00> : vector<720xf32>
    %44 = vector.multi_reduction <add>, %43, %cst_23 [1] : vector<720x196xf32> to vector<720xf32>
    %45 = vector.shape_cast %44 : vector<720xf32> to vector<720x1xf32>
    %cst_24 = arith.constant 0.00510204071 : f32
    %46 = vector.broadcast %cst_24 : f32 to vector<720x1xf32>
    %47 = arith.mulf %45, %46 : vector<720x1xf32>
    %48 = arith.mulf %43, %43 : vector<720x196xf32>
    %cst_25 = arith.constant dense<0.000000e+00> : vector<720xf32>
    %49 = vector.multi_reduction <add>, %48, %cst_25 [1] : vector<720x196xf32> to vector<720xf32>
    %50 = vector.shape_cast %49 : vector<720xf32> to vector<720x1xf32>
    %cst_26 = arith.constant 0.00510204071 : f32
    %51 = vector.broadcast %cst_26 : f32 to vector<720x1xf32>
    %52 = arith.mulf %50, %51 : vector<720x1xf32>
    %53 = arith.mulf %47, %47 : vector<720x1xf32>
    %54 = arith.subf %52, %53 : vector<720x1xf32>
    %cst_27 = arith.constant 9.99999974E-6 : f32
    %55 = vector.broadcast %cst_27 : f32 to vector<720x1xf32>
    %56 = arith.addf %54, %55 : vector<720x1xf32>
    %57 = math.rsqrt %56 : vector<720x1xf32>
    %c0_28 = arith.constant 0 : index
    %c0_29 = arith.constant 0 : index
    %58 = vector.load %arg8[%c0_28, %c0_29] : memref<720x1xf32, #tpu.memory_space<vmem>>, vector<720x1xf32>
    %59 = arith.mulf %57, %58 : vector<720x1xf32>
    %60 = vector.broadcast %59 : vector<720x1xf32> to vector<720x196xf32>
    %61 = arith.mulf %43, %60 : vector<720x196xf32>
    %c0_30 = arith.constant 0 : index
    %c0_31 = arith.constant 0 : index
    %62 = vector.load %arg9[%c0_30, %c0_31] : memref<720x1xf32, #tpu.memory_space<vmem>>, vector<720x1xf32>
    %63 = arith.mulf %47, %59 : vector<720x1xf32>
    %64 = arith.subf %62, %63 : vector<720x1xf32>
    %65 = vector.broadcast %64 : vector<720x1xf32> to vector<720x196xf32>
    %66 = arith.addf %61, %65 : vector<720x196xf32>
    %c0_32 = arith.constant 0 : index
    %c0_33 = arith.constant 0 : index
    %67 = vector.load %arg10[%c0_32, %c0_33] : memref<720x196xf32, #tpu.memory_space<vmem>>, vector<720x196xf32>
    tpu.vector_store %arg10[%c0_32, %c0_33], %66 {strides = array<i32>} : memref<720x196xf32, #tpu.memory_space<vmem>>, vector<720x196xf32>,
    return
  }
  func.func @transform_0(%arg0: i32) -> (i32, i32) {
    %c0_i32 = arith.constant 0 : i32
    %c0_i32_0 = arith.constant 0 : i32
    %c0_i32_1 = arith.constant 0 : i32
    return %c0_i32, %c0_i32_0 : i32, i32
  }
  func.func @transform_1(%arg0: i32) -> (i32, i32) {
    %c0_i32 = arith.constant 0 : i32
    %c0_i32_0 = arith.constant 0 : i32
    %c0_i32_1 = arith.constant 0 : i32
    return %c0_i32, %c0_i32_0 : i32, i32
  }
  func.func @transform_2(%arg0: i32) -> (i32, i32) {
    %c0_i32 = arith.constant 0 : i32
    %c0_i32_0 = arith.constant 0 : i32
    %c0_i32_1 = arith.constant 0 : i32
    return %c0_i32, %c0_i32_0 : i32, i32
  }
  func.func @transform_3(%arg0: i32) -> (i32, i32) {
    %c0_i32 = arith.constant 0 : i32
    %c0_i32_0 = arith.constant 0 : i32
    %c0_i32_1 = arith.constant 0 : i32
    return %c0_i32, %c0_i32_0 : i32, i32
  }
  func.func @transform_4(%arg0: i32) -> (i32, i32) {
    %c0_i32 = arith.constant 0 : i32
    %c0_i32_0 = arith.constant 0 : i32
    %c0_i32_1 = arith.constant 0 : i32
    return %c0_i32, %c0_i32_0 : i32, i32
  }
  func.func @transform_5(%arg0: i32) -> (i32, i32) {
    %c0_i32 = arith.constant 0 : i32
    %c0_i32_0 = arith.constant 0 : i32
    %c0_i32_1 = arith.constant 0 : i32
    return %c0_i32, %c0_i32_0 : i32, i32
  }
  func.func @transform_6(%arg0: i32) -> (i32, i32) {
    %c0_i32 = arith.constant 0 : i32
    %c0_i32_0 = arith.constant 0 : i32
    %c0_i32_1 = arith.constant 0 : i32
    return %c0_i32, %c0_i32_0 : i32, i32
  }
  func.func @transform_7(%arg0: i32) -> (i32, i32) {
    %c0_i32 = arith.constant 0 : i32
    %c0_i32_0 = arith.constant 0 : i32
    %c0_i32_1 = arith.constant 0 : i32
    return %c0_i32, %c0_i32_0 : i32, i32
  }
  func.func @transform_8(%arg0: i32) -> (i32, i32) {
    %c0_i32 = arith.constant 0 : i32
    %c0_i32_0 = arith.constant 0 : i32
    %c0_i32_1 = arith.constant 0 : i32
    return %c0_i32, %c0_i32_0 : i32, i32
  }
  func.func @transform_9(%arg0: i32) -> (i32, i32) {
    %c0_i32 = arith.constant 0 : i32
    %c0_i32_0 = arith.constant 0 : i32
    %c0_i32_1 = arith.constant 0 : i32
    return %c0_i32, %c0_i32_0 : i32, i32
  }
}

</mosaic_0001>

<bundles_post_ra>
// kernel: fused_forward.1
= control target key start
LH: loop header
LB: loop body
LE: loop exit
PB: predicated region body
PF: predicated region fallthrough
CT: control target
= control target key end

     0   :  { %v7363_v0 = vmov 0   ;;  %vm118_vm0 = vcmask 130048   ;;  %vm82_vm1 = vcmask 1045504   ;;  %vm122_vm2 = vcmask 128000   ;;  %s12924_s0 = inlined_call_operand.vmem [shape: f32[22,1], index: 0, kind: input, shape index: {}]   ;;  %s12925_s1 = inlined_call_operand.vmem [shape: f32[22,528], index: 1, kind: input, shape index: {}]   ;;  %s12926_s3 = inlined_call_operand.vmem [shape: f32[528,196], index: 3, kind: input, shape index: {}]   ;;  %s12927_s2 = inlined_call_operand.vmem [shape: f32[1,528], index: 2, kind: input, shape index: {}]   ;;  %s12928_s4 = inlined_call_operand.vmem [shape: bf16[120,528], index: 4, kind: input, shape index: {}]   ;;  %s12929_s5 = inlined_call_operand.vmem [shape: f32[120,1], index: 5, kind: input, shape index: {}]   ;;  %s12930_s6 = inlined_call_operand.vmem [shape: bf16[720,120], index: 6, kind: input, shape index: {}]   ;;  %s12931_s7 = inlined_call_operand.vmem [shape: f32[720,1], index: 7, kind: input, shape index: {}]   ;;  %s12932_s8 = inlined_call_operand.vmem [shape: f32[720,1], index: 8, kind: input, shape index: {}]   ;;  %s12933_s9 = inlined_call_operand.vmem [shape: f32[720,196], index: 9, kind: output, shape index: {}]  }
   0x1   :  { %7130 = vset.pattern.permute.xlu0 %v7363_v0  ;;  %v48_v1 = vld [vmem:[%s12924_s0] sm:$0xff]  ;;  %7131 = vset.pattern.permute.xlu1 %v7363_v0  ;;  %v50_v2 = vld [vmem:[%s12924_s0 + $0x10] sm:$0x3f]  ;;  %v49_v3 = vld [vmem:[%s12924_s0 + $0x8] sm:$0xff] }
   0x2   :  { %53 = vperm.xlu0 %7130, %v48_v1   ;;  %63 = vperm.xlu1 %7131, %v50_v2   ;;  %v37_v4 = vld [vmem:[%s12925_s1 + $0x20] sm:$0xff]  ;;  %v43_v6 = vld [vmem:[%s12925_s1 + $0x50] sm:$0x3f]  ;;  %v44_v8 = vld [vmem:[%s12925_s1 + $0x58] sm:$0x3f] }
   0x3   :  { %7132 = vset.pattern.permute.xlu2 %v7363_v0  ;;  %v45_v9 = vld [vmem:[%s12925_s1 + $0x60] sm:$0x3f]  ;;  %v34_v11 = vld [vmem:[%s12925_s1 + $0x8] sm:$0xff]  ;;  %v35_v12 = vld [vmem:[%s12925_s1 + $0x10] sm:$0xff] }
   0x4   :  { %v33_v10 = vld [vmem:[%s12925_s1] sm:$0xff]  ;;  %v46_v14 = vld [vmem:[%s12925_s1 + $0x68] sm:$0x3f]  ;;  %v47_v15 = vld [vmem:[%s12925_s1 + $0x70] sm:$0x3f] }
   0x5   :  { %v36_v17 = vld [vmem:[%s12925_s1 + $0x18] sm:$0xff]  ;;  %v38_v18 = vld [vmem:[%s12925_s1 + $0x28] sm:$0xff]  ;;  %v39_v19 = vld [vmem:[%s12925_s1 + $0x30] sm:$0xff] }
   0x6   :  { %v40_v23 = vld [vmem:[%s12925_s1 + $0x38] sm:$0xff]  ;;  %v41_v24 = vld [vmem:[%s12925_s1 + $0x40] sm:$0xff]  ;;  %v42_v25 = vld [vmem:[%s12925_s1 + $0x48] sm:$0xff] }
   0x7   :  { %v511_v30 = vld [vmem:[%s12926_s3 + $0xe0] sm:$0xff]  ;;  %v513_v31 = vld [vmem:[%s12926_s3 + $0xf0] sm:$0xff] }
   0x8   :  { %v543_v32 = vld [vmem:[%s12926_s3 + $0x1e0] sm:$0xff]  ;;  %v629_v36 = vpack.c.bf16 %v513_v31, %v511_v30  ;;  %v545_v37 = vld [vmem:[%s12926_s3 + $0x1f0] sm:$0xff] }
   0x9   :  { %v575_v38 = vld [vmem:[%s12926_s3 + $0x2e0] sm:$0xff]  ;;  %v577_v39 = vld [vmem:[%s12926_s3 + $0x2f0] sm:$0xff]  ;;  %v645_v43 = vpack.c.bf16 %v545_v37, %v543_v32 }
   0xa   :  { %58 = vperm.xlu0 %7130, %v49_v3   ;;  %v661_v44 = vpack.c.bf16 %v577_v39, %v575_v38  ;;  %v607_v45 = vld [vmem:[%s12926_s3 + $0x3e0] sm:$0xff]  ;;  %v609_v46 = vld [vmem:[%s12926_s3 + $0x3f0] sm:$0xff]  ;;  %705 = vmatpush.bf16.msra.mxu0 %v629_v36 }
   0xb   :  { %v7499_v51 = vld [vmem:[%s12927_s2] sm:$0x1f]  ;;  %753 = vmatpush.bf16.msra.mxu1 %v645_v43  ;;  %v677_v55 = vpack.c.bf16 %v609_v46, %v607_v45  ;;  %v509_v57 = vld [vmem:[%s12926_s3 + $0xd0] sm:$0xff] }
   0xc   :  { %801 = vmatpush.bf16.msra.mxu2 %v661_v44  ;;  %v507_v56 = vld [vmem:[%s12926_s3 + $0xc0] sm:$0xff]  ;;  %v541_v63 = vld [vmem:[%s12926_s3 + $0x1d0] sm:$0xff]  ;;  %v135_v36 = vperm.slane %v7499_v51, 2 }
   0xd   :  { %v539_v58 = vld [vmem:[%s12926_s3 + $0x1c0] sm:$0xff]  ;;  %v573_v1 = vld [vmem:[%s12926_s3 + $0x2d0] sm:$0xff]  ;;  %849 = vmatpush.bf16.msra.mxu3 %v677_v55  ;;  %v627_v3 = vpack.c.bf16 %v509_v57, %v507_v56 }
   0xe   :  { %v571_v0 = vld [vmem:[%s12926_s3 + $0x2c0] sm:$0xff]  ;;  %v601_v30 = vld [vmem:[%s12926_s3 + $0x3b0] sm:$0xff] }
   0xf   :  { %706 = vmatpush.bf16.msra.mxu0 %v627_v3  ;;  %v499_v39 = vld [vmem:[%s12926_s3 + $0x80] sm:$0xff]  ;;  %v533_v46 = vld [vmem:[%s12926_s3 + $0x190] sm:$0xff] }
  0x10   :  { %v597_v55 = vld [vmem:[%s12926_s3 + $0x390] sm:$0xff] }
  0x74   :  { %v54_v5 = vpop.permute.xlu0 %53  ;;  %v64_v7 = vpop.permute.xlu1 %63 }
  0x75   :  { %v70_v13 = vmul.f32 %v54_v5, %v37_v4  ;;  %v76_v16 = vmul.f32 %v64_v7, %v43_v6  ;;  %v77_v20 = vmul.f32 %v64_v7, %v44_v8  ;;  %v78_v21 = vmul.f32 %v64_v7, %v45_v9  ;;  %v603_v6 = vld [vmem:[%s12926_s3 + $0x3c0] sm:$0xff] }
  0x76   :  { %v66_v22 = vmul.f32 %v54_v5, %v33_v10  ;;  %v67_v26 = vmul.f32 %v54_v5, %v34_v11  ;;  %v68_v27 = vmul.f32 %v54_v5, %v35_v12  ;;  %v79_v28 = vmul.f32 %v64_v7, %v46_v14 }
  0x77   :  { %v80_v29 = vmul.f32 %v64_v7, %v47_v15  ;;  %v69_v33 = vmul.f32 %v54_v5, %v36_v17  ;;  %v119_v34 = vsel %vm118_vm0, %v70_v13, 0.0  ;;  %v83_v35 = vsel %vm82_vm1, %v76_v16, 0.0  ;;  %v605_v7 = vld [vmem:[%s12926_s3 + $0x3d0] sm:$0xff]  ;;  %v503_v15 = vld [vmem:[%s12926_s3 + $0xa0] sm:$0xff] }
  0x78   :  { %v92_v41 = vsel %vm82_vm1, %v77_v20, 0.0  ;;  %v101_v42 = vsel %vm82_vm1, %v78_v21, 0.0  ;;  %v110_v53 = vsel %vm82_vm1, %v79_v28, 0.0  ;;  %v643_v4 = vpack.c.bf16 %v541_v63, %v539_v58  ;;  %v505_v16 = vld [vmem:[%s12926_s3 + $0xb0] sm:$0xff]  ;;  %v535_v17 = vld [vmem:[%s12926_s3 + $0x1a0] sm:$0xff] }
  0x79   :  { %v123_v54 = vsel %vm122_vm2, %v80_v29, 0.0  ;;  %v659_v5 = vpack.c.bf16 %v573_v1, %v571_v0  ;;  %v133_v12 = vperm.slane %v7499_v51, 0  ;;  %v675_v14 = vpack.c.bf16 %v605_v7, %v603_v6  ;;  %v599_v29 = vld [vmem:[%s12926_s3 + $0x3a0] sm:$0xff]  ;;  %v497_v1 = vld [vmem:[%s12926_s3 + $0x70] sm:$0xff] }
  0x7a   :  { %754 = vmatpush.bf16.msra.mxu1 %v643_v4  ;;  %v673_v38 = vpack.c.bf16 %v601_v30, %v599_v29  ;;  %v495_v0 = vld [vmem:[%s12926_s3 + $0x60] sm:$0xff]  ;;  %v529_v7 = vld [vmem:[%s12926_s3 + $0x170] sm:$0xff] }
  0x7b   :  { %802 = vmatpush.bf16.msra.mxu2 %v659_v5  ;;  %850 = vmatpush.bf16.msra.mxu3 %v675_v14  ;;  %v525_v30 = vld [vmem:[%s12926_s3 + $0x150] sm:$0xff] }
  0x7c   :  { %v59_v40 = vpop.permute.xlu0 %58 }
  0x7d   :  { %v71_v47 = vmul.f32 %v59_v40, %v38_v18  ;;  %v72_v48 = vmul.f32 %v59_v40, %v39_v19  ;;  %v73_v49 = vmul.f32 %v59_v40, %v40_v23  ;;  %v74_v50 = vmul.f32 %v59_v40, %v41_v24  ;;  %v567_v23 = vld [vmem:[%s12926_s3 + $0x2a0] sm:$0xff]  ;;  %v569_v24 = vld [vmem:[%s12926_s3 + $0x2b0] sm:$0xff] }
  0x7e   :  { %v75_v52 = vmul.f32 %v59_v40, %v42_v25  ;;  %v657_v28 = vpack.c.bf16 %v569_v24, %v567_v23  ;;  %v501_v40 = vld [vmem:[%s12926_s3 + $0x90] sm:$0xff]  ;;  %v491_v23 = vld [vmem:[%s12926_s3 + $0x40] sm:$0xff] }
  0x7f   :  { %v81_v59 = vadd.f32 %v71_v47, %v66_v22  ;;  %v91_v60 = vadd.f32 %v72_v48, %v67_v26  ;;  %v100_v61 = vadd.f32 %v73_v49, %v68_v27  ;;  %v109_v62 = vadd.f32 %v74_v50, %v69_v33  ;;  %v537_v22 = vld [vmem:[%s12926_s3 + $0x1b0] sm:$0xff]  ;;  %v563_v47 = vld [vmem:[%s12926_s3 + $0x280] sm:$0xff]  ;;  %851 = vmatpush.bf16.msra.mxu3 %v673_v38 }
  0x80   :  { %v120_v2 = vsel %vm118_vm0, %v75_v52, 0.0  ;;  %v625_v26 = vpack.c.bf16 %v505_v16, %v503_v15  ;;  %v641_v27 = vpack.c.bf16 %v537_v22, %v535_v17  ;;  %803 = vmatpush.bf16.msra.mxu2 %v657_v28  ;;  %v565_v48 = vld [vmem:[%s12926_s3 + $0x290] sm:$0xff]  ;;  %v623_v50 = vpack.c.bf16 %v501_v40, %v499_v39  ;;  %v591_v15 = vld [vmem:[%s12926_s3 + $0x360] sm:$0xff] }
  0x81   :  { %v121_v8 = vadd.f32 %v120_v2, %v119_v34  ;;  %v84_v9 = vadd.f32 %v83_v35, %v81_v59  ;;  %v93_v10 = vadd.f32 %v92_v41, %v91_v60  ;;  %v102_v11 = vadd.f32 %v101_v42, %v100_v61  ;;  %v531_v41 = vld [vmem:[%s12926_s3 + $0x180] sm:$0xff]  ;;  %v593_v16 = vld [vmem:[%s12926_s3 + $0x370] sm:$0xff] }
  0x82   :  { %v111_v13 = vadd.f32 %v110_v53, %v109_v62  ;;  %v134_v35 = vperm.slane %v7499_v51, 1  ;;  %707 = vmatpush.bf16.msra.mxu0 %v625_v26  ;;  %755 = vmatpush.bf16.msra.mxu1 %v641_v27  ;;  %v639_v52 = vpack.c.bf16 %v533_v46, %v531_v41  ;;  %v655_v53 = vpack.c.bf16 %v565_v48, %v563_v47  ;;  %v527_v2 = vld [vmem:[%s12926_s3 + $0x160] sm:$0xff]  ;;  %v493_v24 = vld [vmem:[%s12926_s3 + $0x50] sm:$0xff] }
  0x83   :  { %v85_v18 = vrot.slane %v84_v9, 4  ;;  %v94_v19 = vrot.slane %v93_v10, 4  ;;  %v103_v20 = vrot.slane %v102_v11, 4  ;;  %v124_v21 = vadd.f32 %v123_v54, %v121_v8  ;;  %v595_v54 = vld [vmem:[%s12926_s3 + $0x380] sm:$0xff] }
  0x84   :  { %v112_v25 = vrot.slane %v111_v13, 4  ;;  %v136_v60 = vperm.slane %v7499_v51, 3  ;;  %v137_v61 = vperm.slane %v7499_v51, 4  ;;  %v671_v63 = vpack.c.bf16 %v597_v55, %v595_v54  ;;  %804 = vmatpush.bf16.msra.mxu2 %v655_v53  ;;  %v559_v8 = vld [vmem:[%s12926_s3 + $0x260] sm:$0xff] }
  0x85   :  { %v86_v31 = vadd.f32 %v85_v18, %v84_v9  ;;  %v95_v32 = vadd.f32 %v94_v19, %v93_v10  ;;  %v104_v33 = vadd.f32 %v103_v20, %v102_v11  ;;  %v125_v34 = vrot.slane %v124_v21, 4  ;;  %v561_v9 = vld [vmem:[%s12926_s3 + $0x270] sm:$0xff]  ;;  %v587_v51 = vld [vmem:[%s12926_s3 + $0x340] sm:$0xff] }
  0x86   :  { %v113_v37 = vadd.f32 %v112_v25, %v111_v13  ;;  %708 = vmatpush.bf16.msra.mxu0 %v623_v50  ;;  %756 = vmatpush.bf16.msra.mxu1 %v639_v52  ;;  %v621_v11 = vpack.c.bf16 %v497_v1, %v495_v0  ;;  %v637_v13 = vpack.c.bf16 %v529_v7, %v527_v2  ;;  %v523_v25 = vld [vmem:[%s12926_s3 + $0x140] sm:$0xff]  ;;  %v521_v50 = vld [vmem:[%s12926_s3 + $0x130] sm:$0xff] }
  0x87   :  { %v87_v42 = vrot.slane %v86_v31, 2  ;;  %v96_v43 = vrot.slane %v95_v32, 2  ;;  %v105_v44 = vrot.slane %v104_v33, 2  ;;  %v126_v45 = vadd.f32 %v125_v34, %v124_v21  ;;  %852 = vmatpush.bf16.msra.mxu3 %v671_v63  ;;  %v551_v55 = vld [vmem:[%s12926_s3 + $0x220] sm:$0xff]  ;;  %v485_v63 = vld [vmem:[%s12926_s3 + $0x10] sm:$0xff] }
  0x88   :  { %v114_v49 = vrot.slane %v113_v37, 2  ;;  %v653_v14 = vpack.c.bf16 %v561_v9, %v559_v8  ;;  %v669_v22 = vpack.c.bf16 %v593_v16, %v591_v15  ;;  %v635_v34 = vpack.c.bf16 %v525_v30, %v523_v25  ;;  %v515_v0 = vld [vmem:[%s12926_s3 + $0x100] sm:$0xff]  ;;  %v517_v1 = vld [vmem:[%s12926_s3 + $0x110] sm:$0xff] }
  0x89   :  { %v88_v56 = vadd.f32 %v87_v42, %v86_v31  ;;  %v97_v57 = vadd.f32 %v96_v43, %v95_v32  ;;  %v106_v58 = vadd.f32 %v105_v44, %v104_v33  ;;  %v127_v59 = vrot.slane %v126_v45, 2  ;;  %v555_v31 = vld [vmem:[%s12926_s3 + $0x240] sm:$0xff]  ;;  %v557_v32 = vld [vmem:[%s12926_s3 + $0x250] sm:$0xff] }
  0x8a   :  { %v115_v62 = vadd.f32 %v114_v49, %v113_v37  ;;  %709 = vmatpush.bf16.msra.mxu0 %v621_v11  ;;  %757 = vmatpush.bf16.msra.mxu1 %v637_v13  ;;  %v619_v33 = vpack.c.bf16 %v493_v24, %v491_v23  ;;  %v487_v43 = vld [vmem:[%s12926_s3 + $0x20] sm:$0xff]  ;;  %v489_v44 = vld [vmem:[%s12926_s3 + $0x30] sm:$0xff] }
  0x8b   :  { %v89_v3 = vrot.slane %v88_v56, 1  ;;  %v98_v4 = vrot.slane %v97_v57, 1  ;;  %v107_v5 = vrot.slane %v106_v58, 1  ;;  %v128_v6 = vadd.f32 %v127_v59, %v126_v45  ;;  %805 = vmatpush.bf16.msra.mxu2 %v653_v14  ;;  %853 = vmatpush.bf16.msra.mxu3 %v669_v22  ;;  %v519_v45 = vld [vmem:[%s12926_s3 + $0x120] sm:$0xff]  ;;  %v581_v8 = vld [vmem:[%s12926_s3 + $0x310] sm:$0xff]  ;;  %v7706_v22 = vld [vmem:[%s12928_s4 + $0x8] sm:$0xff] }
  0x8c   :  { %v116_v10 = vrot.slane %v115_v62, 1  ;;  %v617_v49 = vpack.c.bf16 %v489_v44, %v487_v43  ;;  %v633_v54 = vpack.c.bf16 %v521_v50, %v519_v45  ;;  %v583_v59 = vld [vmem:[%s12926_s3 + $0x320] sm:$0xff] }
  0x8d   :  { %v90_v17 = vadd.f32 %v89_v3, %v88_v56  ;;  %v99_v18 = vadd.f32 %v98_v4, %v97_v57  ;;  %v108_v19 = vadd.f32 %v107_v5, %v106_v58  ;;  %v129_v20 = vrot.slane %v128_v6, 1  ;;  %v553_v56 = vld [vmem:[%s12926_s3 + $0x230] sm:$0xff]  ;;  %v547_v4 = vld [vmem:[%s12926_s3 + $0x200] sm:$0xff] }
  0x8e   :  { %v117_v21 = vadd.f32 %v116_v10, %v115_v62  ;;  %710 = vmatpush.bf16.msra.mxu0 %v619_v33  ;;  %758 = vmatpush.bf16.msra.mxu1 %v635_v34  ;;  %v649_v58 = vpack.c.bf16 %v553_v56, %v551_v55  ;;  %v631_v3 = vpack.c.bf16 %v517_v1, %v515_v0  ;;  %v549_v5 = vld [vmem:[%s12926_s3 + $0x210] sm:$0xff]  ;;  %v7690_v16 = vld [vmem:[%s12928_s4] sm:$0xff] }
  0x8f   :  { %v130_v26 = vadd.f32 %v129_v20, %v128_v6  ;;  %v143_v27 = vadd.f32 %v133_v12, %v90_v17  ;;  %v144_v28 = vadd.f32 %v134_v35, %v99_v18  ;;  %v145_v29 = vadd.f32 %v135_v36, %v108_v19  ;;  %v589_v36 = vld [vmem:[%s12926_s3 + $0x350] sm:$0xff]  ;;  %v579_v6 = vld [vmem:[%s12926_s3 + $0x300] sm:$0xff] }
  0x90   :  { %v146_v12 = vadd.f32 %v136_v60, %v117_v21  ;;  %v651_v35 = vpack.c.bf16 %v557_v32, %v555_v31  ;;  %v667_v42 = vpack.c.bf16 %v589_v36, %v587_v51  ;;  %v585_v60 = vld [vmem:[%s12926_s3 + $0x330] sm:$0xff]  ;;  %v647_v7 = vpack.c.bf16 %v549_v5, %v547_v4  ;;  %v7711_v23 = vld [vmem:[%s12928_s4 + $0x1c] sm:$0xff] }
  0x91   :  { %v147_v37 = vadd.f32 %v137_v61, %v130_v26  ;;  %v148_v38 = vsub.f32 0.0, %v143_v27  ;;  %v149_v39 = vsub.f32 0.0, %v144_v28  ;;  %v150_v40 = vsub.f32 0.0, %v145_v29  ;;  %v483_v61 = vld [vmem:[%s12926_s3] sm:$0xff]  ;;  %v7698_v19 = vld [vmem:[%s12928_s4 + $0x14] sm:$0xff]  ;;  %v7723_v29 = vld [vmem:[%s12928_s4 + $0x28] sm:$0xff] }
  0x92   :  { %v151_v41 = vsub.f32 0.0, %v146_v12  ;;  %806 = vmatpush.bf16.msra.mxu2 %v651_v35  ;;  %854 = vmatpush.bf16.msra.mxu3 %v667_v42  ;;  %v665_v62 = vpack.c.bf16 %v585_v60, %v583_v59  ;;  %v615_v2 = vpack.c.bf16 %v485_v63, %v483_v61  ;;  %v663_v9 = vpack.c.bf16 %v581_v8, %v579_v6  ;;  %v7728_v30 = vld [vmem:[%s12928_s4 + $0x3c] sm:$0xff] }
  0x93   :  { %v152_v46 = vsub.f32 0.0, %v147_v37  ;;  %v153_v47 = vmul.f32 1.442695, %v148_v38  ;;  %v155_v48 = vmul.f32 1.442695, %v149_v39  ;;  %711 = vmatpush.bf16.msra.mxu0 %v617_v49  ;;  %759 = vmatpush.bf16.msra.mxu1 %v633_v54  ;;  %v288_v25 = vunpack.c.l.bf16 %v7690_v16 }
  0x94   :  { %v157_v52 = vmul.f32 1.442695, %v150_v40  ;;  %v159_v53 = vmul.f32 1.442695, %v151_v41  ;;  %v293_v26 = vunpack.c.l.bf16 %v7698_v19  ;;  %v289_v27 = vunpack.c.h.bf16 %v7690_v16  ;;  %v253_v16 = vld [vmem:[%s12928_s4 + $0x44] sm:$0xff] }
  0x95   :  { %7133 = vpow2.f32 %v153_v47  ;;  %v161_v57 = vmul.f32 1.442695, %v152_v46  ;;  %v294_v28 = vunpack.c.h.bf16 %v7698_v19  ;;  %v290_v32 = vunpack.c.l.bf16 %v7706_v22 }
  0x96   :  { %7135 = vpow2.f32 %v155_v48  ;;  %807 = vmatpush.bf16.msra.mxu2 %v649_v58  ;;  %855 = vmatpush.bf16.msra.mxu3 %v665_v62  ;;  %v295_v12 = vunpack.c.l.bf16 %v7711_v23  ;;  %v291_v35 = vunpack.c.h.bf16 %v7706_v22  ;;  %v296_v51 = vunpack.c.h.bf16 %v7711_v23 }
  0x97   :  { %7137 = vpow2.f32 %v157_v52  ;;  %712 = vmatpush.bf16.msra.mxu0 %v615_v2  ;;  %760 = vmatpush.bf16.msra.mxu1 %v631_v3  ;;  %v298_v38 = vunpack.c.l.bf16 %v7723_v29  ;;  %v303_v39 = vunpack.c.l.bf16 %v7728_v30  ;;  %v299_v43 = vunpack.c.h.bf16 %v7723_v29 }
  0x98   :  { %7139 = vpow2.f32 %v159_v53  ;;  %v304_v44 = vunpack.c.h.bf16 %v7728_v30  ;;  %v267_v30 = vld [vmem:[%s12928_s4 + $0xa0] sm:$0xff] }
  0x99   :  { %7141 = vpow2.f32 %v161_v57 }
  0x9a   :  { %808 = vmatpush.bf16.msra.mxu2 %v647_v7  ;;  %856 = vmatpush.bf16.msra.mxu3 %v663_v9 }
  0x9b   :  { %v7134_v10 = vpop.eup %7133 }
  0x9c   :  { %v7136_v11 = vpop.eup %7135  ;;  %v7683_v13 = vadd.f32 1.0, %v7134_v10 }
  0x9d   :  { %v7138_v14 = vpop.eup %7137  ;;  %v7685_v15 = vadd.f32 1.0, %v7136_v11 }
  0x9e   :  { %v7140_v17 = vpop.eup %7139  ;;  %v7692_v18 = vadd.f32 1.0, %v7138_v14  ;;  %7143 = vrcp.f32 %v7683_v13  ;;  %v177_v31 = vand.u32 2147483647, %v7683_v13  ;;  %v179_v33 = vand.u32 2147483648, %v7683_v13 }
  0x9f   :  { %v7142_v20 = vpop.eup %7141  ;;  %v7700_v21 = vadd.f32 1.0, %v7140_v17  ;;  %7145 = vrcp.f32 %v7685_v15  ;;  %v192_v34 = vand.u32 2147483647, %v7685_v15  ;;  %v194_v37 = vand.u32 2147483648, %v7685_v15 }
  0xa0   :  { %v7713_v24 = vadd.f32 1.0, %v7142_v20  ;;  %7147 = vrcp.f32 %v7692_v18  ;;  %v207_v42 = vand.u32 2147483647, %v7692_v18  ;;  %vm173_vm3 = vweird.f32 %v7683_v13 }
  0xa1   :  { %7149 = vrcp.f32 %v7700_v21  ;;  %vm7747_vm4 = vcmp.eq.f32.partialorder %v177_v31, 8.507059e+37  ;;  %vm188_vm5 = vweird.f32 %v7685_v15  ;;  %v180_v49 = vor.u32 1.1754944e-38, %v179_v33 }
  0xa2   :  { %7151 = vrcp.f32 %v7713_v24  ;;  %vm7753_vm6 = vcmp.eq.f32.partialorder %v192_v34, 8.507059e+37  ;;  %vm203_vm7 = vweird.f32 %v7692_v18  ;;  %v195_v54 = vor.u32 1.1754944e-38, %v194_v37 }
  0xa3   :  { %v209_v56 = vand.u32 2147483648, %v7692_v18  ;;  %vm7760_vm9 = vcmp.eq.f32.partialorder %v207_v42, 8.507059e+37  ;;  %vm218_vm11 = vweird.f32 %v7700_v21  ;;  %v222_v1 = vand.u32 2147483647, %v7700_v21 }
  0xa4   :  { %v7144_v36 = vpop.eup %7143  ;;  %v224_v5 = vand.u32 2147483648, %v7700_v21  ;;  %v237_v34 = vand.u32 2147483647, %v7713_v24 }
  0xa5   :  { %v7146_v40 = vpop.eup %7145  ;;  %v169_v41 = vmul.f32 %v7144_v36, %v7683_v13  ;;  %vm174_vm8 = vweird.f32 %v7144_v36  ;;  %v210_v14 = vor.u32 1.1754944e-38, %v209_v56 }
  0xa6   :  { %v184_v46 = vmul.f32 %v7146_v40, %v7685_v15  ;;  %v7148_v47 = vpop.eup %7147  ;;  %vm189_vm10 = vweird.f32 %v7146_v40  ;;  %vm175_vm12 = vmor %vm173_vm3, %vm174_vm8  ;;  %v225_v33 = vor.u32 1.1754944e-38, %v224_v5  ;;  %vm223_vm3 = vcmp.eq.f32.partialorder %v222_v1, 8.507059e+37 }
  0xa7   :  { %v170_v48 = vsub.f32 1.0, %v169_v41  ;;  %v7150_v52 = vpop.eup %7149  ;;  %v199_v55 = vmul.f32 %v7148_v47, %v7692_v18  ;;  %vm204_vm13 = vweird.f32 %v7148_v47  ;;  %vm190_vm14 = vmor %vm188_vm5, %vm189_vm10  ;;  %vm233_vm5 = vweird.f32 %v7713_v24 }
  0xa8   :  { %v185_v53 = vsub.f32 1.0, %v184_v46  ;;  %v214_v59 = vmul.f32 %v7150_v52, %v7700_v21  ;;  %v7765_v60 = vpop.eup %7151  ;;  %vm219_vm15 = vweird.f32 %v7150_v52  ;;  %vm205_vm1 = vmor %vm203_vm7, %vm204_vm13  ;;  %vm238_vm7 = vcmp.eq.f32.partialorder %v237_v34, 8.507059e+37 }
  0xa9   :  { %v171_v57 = vmul.f32 %v7144_v36, %v170_v48  ;;  %v200_v62 = vsub.f32 1.0, %v199_v55  ;;  %v229_v2 = vmul.f32 %v7765_v60, %v7713_v24  ;;  %vm220_vm2 = vmor %vm218_vm11, %vm219_vm15  ;;  %v250_v48 = vld [vmem:[%s12928_s4 + $0x30] sm:$0xff]  ;;  %v306_v55 = vunpack.c.h.bf16 %v253_v16 }
  0xaa   :  { %v186_v61 = vmul.f32 %v7146_v40, %v185_v53  ;;  %v215_v0 = vsub.f32 1.0, %v214_v59  ;;  %v300_v23 = vunpack.c.l.bf16 %v250_v48  ;;  %v256_v59 = vld [vmem:[%s12928_s4 + $0x58] sm:$0xff]  ;;  %vm1185_vm8 = vcmask 556032  }
  0xab   :  { %v172_v63 = vadd.f32 %v7144_v36, %v171_v57  ;;  %v201_v4 = vmul.f32 %v7148_v47, %v200_v62  ;;  %v230_v8 = vsub.f32 1.0, %v229_v2  ;;  %v311_v5 = vunpack.c.h.bf16 %v256_v59 }
  0xac   :  { %v187_v3 = vadd.f32 %v7146_v40, %v186_v61  ;;  %v216_v7 = vmul.f32 %v7150_v52, %v215_v0  ;;  %v259_v0 = vld [vmem:[%s12928_s4 + $0x6c] sm:$0xff] }
  0xad   :  { %v176_v6 = vsel %vm175_vm12, %v7144_v36, %v172_v63  ;;  %v202_v11 = vadd.f32 %v7148_v47, %v201_v4  ;;  %v231_v20 = vmul.f32 %v7765_v60, %v230_v8 }
  0xae   :  { %v181_v9 = vsel %vm7747_vm4, %v180_v49, %v176_v6  ;;  %v191_v10 = vsel %vm190_vm14, %v7146_v40, %v187_v3  ;;  %v217_v17 = vadd.f32 %v7150_v52, %v216_v7  ;;  %vm234_vm4 = vweird.f32 %v7765_v60  ;;  %v270_v7 = vld [vmem:[%s12928_s4 + $0xb4] sm:$0xff] }
  0xaf   :  { %v196_v13 = vsel %vm7753_vm6, %v195_v54, %v191_v10  ;;  %v7783_v15 = vperm.slane %v181_v9, 0  ;;  %v206_v31 = vsel %vm205_vm1, %v7148_v47, %v202_v11  ;;  %v232_v46 = vadd.f32 %v7765_v60, %v231_v20  ;;  %vm7842_vm6 = vmor %vm233_vm5, %vm234_vm4 }
  0xb0   :  { %v7788_v36 = vperm.slane %v196_v13, 0  ;;  %v211_v37 = vsel %vm7760_vm9, %v210_v14, %v206_v31  ;;  %v221_v40 = vsel %vm220_vm2, %v7150_v52, %v217_v17  ;;  %v301_v54 = vunpack.c.h.bf16 %v250_v48  ;;  %v268_v31 = vld [vmem:[%s12928_s4 + $0xa8] sm:$0xff] }
  0xb1   :  { %v368_v18 = vmul.f32 %v7783_v15, %v288_v25  ;;  %v226_v41 = vsel %vm223_vm3, %v225_v33, %v221_v40  ;;  %v7795_v42 = vperm.slane %v211_v37, 0  ;;  %v373_v21 = vmul.f32 %v7783_v15, %v293_v26  ;;  %v271_v33 = vld [vmem:[%s12928_s4 + $0xbc] sm:$0xff] }
  0xb2   :  { %v369_v45 = vmul.f32 %v7788_v36, %v289_v27  ;;  %v7805_v47 = vperm.slane %v226_v41, 0  ;;  %v374_v25 = vmul.f32 %v7788_v36, %v294_v28  ;;  %v239_v26 = vand.u32 2147483648, %v7713_v24 }
  0xb3   :  { %v7817_v27 = vpack.c.bf16 %v373_v21, %v368_v18  ;;  %v370_v49 = vmul.f32 %v7795_v42, %v290_v32  ;;  %v375_v19 = vmul.f32 %v7795_v42, %v295_v12  ;;  %v255_v32 = vld [vmem:[%s12928_s4 + $0x50] sm:$0xff]  ;;  %v258_v12 = vld [vmem:[%s12928_s4 + $0x64] sm:$0xff]  ;;  %v383_v61 = vmul.f32 %v7783_v15, %v303_v39 }
  0xb4   :  { %v7826_v28 = vpack.c.bf16 %v374_v25, %v369_v45  ;;  %v371_v50 = vmul.f32 %v7805_v47, %v291_v35  ;;  %v376_v52 = vmul.f32 %v7805_v47, %v296_v51  ;;  %v305_v35 = vunpack.c.l.bf16 %v253_v16 }
  0xb5   :  { %713 = vmatmul.bf16.vlgmr.msra.gmra.mxu0 %v7817_v27  ;;  %v7847_v22 = vpack.c.bf16 %v375_v19, %v370_v49  ;;  %v236_v51 = vsel %vm7842_vm6, %v7765_v60, %v232_v46  ;;  %v240_v56 = vor.u32 1.1754944e-38, %v239_v26  ;;  %v308_v57 = vunpack.c.l.bf16 %v255_v32  ;;  %v273_v49 = vld [vmem:[%s12928_s4 + $0xc8] sm:$0xff]  ;;  %v276_v19 = vld [vmem:[%s12928_s4 + $0xdc] sm:$0xff] }
  0xb6   :  { %761 = vmatmul.bf16.vlgmr.msra.gmra.mxu1 %v7826_v28  ;;  %v7853_v53 = vpack.c.bf16 %v376_v52, %v371_v50  ;;  %v313_v58 = vunpack.c.l.bf16 %v258_v12  ;;  %v378_v60 = vmul.f32 %v7783_v15, %v298_v38  ;;  %v379_v62 = vmul.f32 %v7788_v36, %v299_v43 }
  0xb7   :  { %809 = vmatmul.bf16.vlgmr.msra.gmra.mxu2 %v7847_v22  ;;  %v384_v63 = vmul.f32 %v7788_v36, %v304_v44  ;;  %v241_v1 = vsel %vm238_vm7, %v240_v56, %v236_v51  ;;  %v380_v2 = vmul.f32 %v7795_v42, %v300_v23  ;;  %v385_v38 = vmul.f32 %v7795_v42, %v305_v35 }
  0xb8   :  { %857 = vmatmul.bf16.vlgmr.msra.gmra.mxu3 %v7853_v53  ;;  %v309_v3 = vunpack.c.h.bf16 %v255_v32  ;;  %v381_v39 = vmul.f32 %v7805_v47, %v301_v54  ;;  %v386_v29 = vmul.f32 %v7805_v47, %v306_v55  ;;  %v314_v4 = vunpack.c.h.bf16 %v258_v12  ;;  %v274_v54 = vld [vmem:[%s12928_s4 + $0xd0] sm:$0xff]  ;;  %v277_v55 = vld [vmem:[%s12928_s4 + $0xe4] sm:$0xff] }
  0xb9   :  { %v310_v43 = vunpack.c.l.bf16 %v256_v59  ;;  %v315_v44 = vunpack.c.l.bf16 %v259_v0  ;;  %v316_v6 = vunpack.c.h.bf16 %v259_v0  ;;  %v7885_v8 = vperm.slane %v241_v1, 0 }
  0xba   :  { %v7887_v9 = vpack.c.bf16 %v383_v61, %v378_v60  ;;  %v7889_v10 = vpack.c.bf16 %v384_v63, %v379_v62  ;;  %v7892_v11 = vmul.f32 %v7783_v15, %v308_v57  ;;  %v7894_v14 = vpack.c.bf16 %v385_v38, %v380_v2 }
  0xbb   :  { %v7897_v13 = vmul.f32 %v7783_v15, %v313_v58  ;;  %v7900_v17 = vmul.f32 %v7788_v36, %v309_v3  ;;  %v328_v20 = vunpack.c.l.bf16 %v267_v30  ;;  %v7908_v34 = vpack.c.bf16 %v386_v29, %v381_v39  ;;  %v279_v3 = vld [vmem:[%s12928_s4 + $0xf0] sm:$0xff]  ;;  %v282_v39 = vld [vmem:[%s12928_s4 + $0x104] sm:$0xff] }
  0xbc   :  { %v7911_v37 = vmul.f32 %v7788_v36, %v314_v4  ;;  %v7914_v40 = vmul.f32 %v7795_v42, %v310_v43  ;;  %v333_v18 = vunpack.c.l.bf16 %v270_v7  ;;  %v7917_v41 = vmul.f32 %v7795_v42, %v315_v44 }
  0xbd   :  { %v408_v21 = vmul.f32 %v7783_v15, %v328_v20  ;;  %v329_v45 = vunpack.c.h.bf16 %v267_v30  ;;  %v334_v46 = vunpack.c.h.bf16 %v270_v7  ;;  %v7921_v25 = vmul.f32 %v7805_v47, %v311_v5  ;;  %v280_v20 = vld [vmem:[%s12928_s4 + $0xf8] sm:$0xff] }
  0xbe   :  { %v413_v48 = vmul.f32 %v7783_v15, %v333_v18  ;;  %v330_v16 = vunpack.c.l.bf16 %v268_v31  ;;  %v335_v26 = vunpack.c.l.bf16 %v271_v33  ;;  %v7931_v50 = vmul.f32 %v7805_v47, %v316_v6 }
  0xbf   :  { %v409_v52 = vmul.f32 %v7788_v36, %v329_v45  ;;  %v414_v32 = vmul.f32 %v7788_v36, %v334_v46  ;;  %v331_v12 = vunpack.c.h.bf16 %v268_v31  ;;  %v336_v51 = vunpack.c.h.bf16 %v271_v33  ;;  %v283_v31 = vld [vmem:[%s12928_s4 + $0x10c] sm:$0xff] }
  0xc0   :  { %v7935_v24 = vpack.c.bf16 %v413_v48, %v408_v21  ;;  %v410_v23 = vmul.f32 %v7795_v42, %v330_v16  ;;  %v415_v35 = vmul.f32 %v7795_v42, %v335_v26  ;;  %v338_v58 = vunpack.c.l.bf16 %v273_v49 }
  0xc1   :  { %v7945_v56 = vpack.c.bf16 %v414_v32, %v409_v52  ;;  %v411_v57 = vmul.f32 %v7805_v47, %v331_v12  ;;  %v343_v59 = vunpack.c.l.bf16 %v276_v19  ;;  %v416_v61 = vmul.f32 %v7805_v47, %v336_v51  ;;  %v285_v12 = vld [vmem:[%s12928_s4 + $0x118] sm:$0xff] }
  0xc2   :  { %v7948_v60 = vpack.c.bf16 %v415_v35, %v410_v23  ;;  %v339_v62 = vunpack.c.h.bf16 %v273_v49  ;;  %v344_v63 = vunpack.c.h.bf16 %v276_v19  ;;  %v418_v0 = vmul.f32 %v7783_v15, %v338_v58 }
  0xc3   :  { %v423_v1 = vmul.f32 %v7783_v15, %v343_v59  ;;  %v340_v2 = vunpack.c.l.bf16 %v274_v54  ;;  %v345_v38 = vunpack.c.l.bf16 %v277_v55  ;;  %v7961_v29 = vpack.c.bf16 %v416_v61, %v411_v57 }
  0xc4   :  { %v419_v4 = vmul.f32 %v7788_v36, %v339_v62  ;;  %v424_v43 = vmul.f32 %v7788_v36, %v344_v63  ;;  %v341_v30 = vunpack.c.h.bf16 %v274_v54  ;;  %v346_v7 = vunpack.c.h.bf16 %v277_v55  ;;  %v286_v55 = vld [vmem:[%s12928_s4 + $0x120] sm:$0xff]  ;;  %v245_v62 = vld [vmem:[%s12928_s4 + $0x10] sm:$0xf] }
  0xc5   :  { %718 = vmatmul.bf16.gmra.mxu0 %v7887_v9  ;;  %v7966_v44 = vpack.c.bf16 %v423_v1, %v418_v0  ;;  %v420_v5 = vmul.f32 %v7795_v42, %v340_v2  ;;  %v425_v6 = vmul.f32 %v7795_v42, %v345_v38  ;;  %v348_v21 = vunpack.c.l.bf16 %v279_v3  ;;  %v248_v63 = vld [vmem:[%s12928_s4 + $0x24] sm:$0xf] }
  0xc6   :  { %766 = vmatmul.bf16.gmra.mxu1 %v7889_v10  ;;  %v7977_v33 = vpack.c.bf16 %v424_v43, %v419_v4  ;;  %v421_v18 = vmul.f32 %v7805_v47, %v341_v30  ;;  %v353_v45 = vunpack.c.l.bf16 %v282_v39  ;;  %v426_v48 = vmul.f32 %v7805_v47, %v346_v7 }
  0xc7   :  { %814 = vmatmul.bf16.gmra.mxu2 %v7894_v14  ;;  %v7980_v46 = vpack.c.bf16 %v425_v6, %v420_v5  ;;  %v349_v16 = vunpack.c.h.bf16 %v279_v3  ;;  %v354_v26 = vunpack.c.h.bf16 %v282_v39  ;;  %v428_v49 = vmul.f32 %v7783_v15, %v348_v21  ;;  %v251_v3 = vld [vmem:[%s12928_s4 + $0x38] sm:$0xf] }
  0xc8   :  { %862 = vmatmul.bf16.gmra.mxu3 %v7908_v34  ;;  %v433_v19 = vmul.f32 %v7783_v15, %v353_v45  ;;  %v350_v52 = vunpack.c.l.bf16 %v280_v20  ;;  %v355_v32 = vunpack.c.l.bf16 %v283_v31  ;;  %v7988_v23 = vpack.c.bf16 %v426_v48, %v421_v18 }
  0xc9   :  { %v429_v35 = vmul.f32 %v7788_v36, %v349_v16  ;;  %v434_v51 = vmul.f32 %v7788_v36, %v354_v26  ;;  %v351_v54 = vunpack.c.h.bf16 %v280_v20  ;;  %v356_v61 = vunpack.c.h.bf16 %v283_v31  ;;  %v254_v31 = vld [vmem:[%s12928_s4 + $0x4c] sm:$0xf]  ;;  %v257_v16 = vld [vmem:[%s12928_s4 + $0x60] sm:$0xf]  ;;  %v260_v26 = vld [vmem:[%s12928_s4 + $0x74] sm:$0xf] }
  0xca   :  { %v7995_v57 = vpack.c.bf16 %v433_v19, %v428_v49  ;;  %v430_v58 = vmul.f32 %v7795_v42, %v350_v52  ;;  %v435_v59 = vmul.f32 %v7795_v42, %v355_v32  ;;  %v358_v2 = vunpack.c.l.bf16 %v285_v12  ;;  %v263_v49 = vld [vmem:[%s12928_s4 + $0x88] sm:$0xf] }
  0xcb   :  { %v8005_v0 = vpack.c.bf16 %v434_v51, %v429_v35  ;;  %v431_v1 = vmul.f32 %v7805_v47, %v351_v54  ;;  %v359_v38 = vunpack.c.h.bf16 %v285_v12  ;;  %v436_v4 = vmul.f32 %v7805_v47, %v356_v61  ;;  %v266_v35 = vld [vmem:[%s12928_s4 + $0x9c] sm:$0xf]  ;;  %v269_v51 = vld [vmem:[%s12928_s4 + $0xb0] sm:$0xf] }
  0xcc   :  { %v8011_v39 = vpack.c.bf16 %v435_v59, %v430_v58  ;;  %v360_v43 = vunpack.c.l.bf16 %v286_v55  ;;  %v361_v30 = vunpack.c.h.bf16 %v286_v55  ;;  %v8015_v5 = vmul.f32 %v7783_v15, %v358_v2  ;;  %v275_v55 = vld [vmem:[%s12928_s4 + $0xd8] sm:$0xf] }
  0xcd   :  { %v8018_v6 = vmul.f32 %v7788_v36, %v359_v38  ;;  %v292_v7 = vunpack.c.l.bf16 %v245_v62  ;;  %v297_v20 = vunpack.c.l.bf16 %v248_v63  ;;  %v8023_v18 = vpack.c.bf16 %v436_v4, %v431_v1 }
  0xce   :  { %v8026_v21 = vmul.f32 %v7795_v42, %v360_v43  ;;  %v8029_v45 = vmul.f32 %v7805_v47, %v361_v30  ;;  %v302_v48 = vunpack.c.l.bf16 %v251_v3  ;;  %v8042_v19 = vpack.c.bf16 %v7897_v13, %v7892_v11  ;;  %v272_v11 = vld [vmem:[%s12928_s4 + $0xc4] sm:$0xf]  ;;  %v284_v43 = vld [vmem:[%s12928_s4 + $0x114] sm:$0xf]  ;;  %v287_v30 = vld [vmem:[%s12928_s4 + $0x128] sm:$0xf] }
  0xcf   :  { %v8046_v52 = vpack.c.bf16 %v7911_v37, %v7900_v17  ;;  %v372_v32 = vmul.f32 %v7885_v8, %v292_v7  ;;  %v377_v12 = vmul.f32 %v7885_v8, %v297_v20  ;;  %v8061_v13 = vpack.c.bf16 %v7917_v41, %v7914_v40 }
  0xd0   :  { %v8065_v17 = vpack.c.bf16 %v7931_v50, %v7921_v25  ;;  %v307_v37 = vunpack.c.l.bf16 %v254_v31  ;;  %v382_v54 = vmul.f32 %v7885_v8, %v302_v48  ;;  %v312_v59 = vunpack.c.l.bf16 %v257_v16  ;;  %v278_v25 = vld [vmem:[%s12928_s4 + $0xec] sm:$0xf]  ;;  %v281_v50 = vld [vmem:[%s12928_s4 + $0x100] sm:$0xf] }
  0xd1   :  { %v8071_v58 = vpack.c.bf16 %v377_v12, %v372_v32  ;;  %v317_v61 = vunpack.c.l.bf16 %v260_v26  ;;  %v322_v62 = vunpack.c.l.bf16 %v263_v49  ;;  %v327_v40 = vunpack.c.l.bf16 %v266_v35  ;;  %v261_v12 = vld [vmem:[%s12928_s4 + $0x78] sm:$0xff]  ;;  %v264_v35 = vld [vmem:[%s12928_s4 + $0x8c] sm:$0xff] }
  0xd2   :  { %v387_v63 = vmul.f32 %v7885_v8, %v307_v37  ;;  %v332_v41 = vunpack.c.l.bf16 %v269_v51  ;;  %v337_v1 = vunpack.c.l.bf16 %v272_v11  ;;  %v392_v2 = vmul.f32 %v7885_v8, %v312_v59 }
  0xd3   :  { %v397_v38 = vmul.f32 %v7885_v8, %v317_v61  ;;  %v402_v3 = vmul.f32 %v7885_v8, %v322_v62  ;;  %v342_v4 = vunpack.c.l.bf16 %v275_v55  ;;  %v407_v20 = vmul.f32 %v7885_v8, %v327_v40  ;;  %v262_v61 = vld [vmem:[%s12928_s4 + $0x80] sm:$0xff]  ;;  %v265_v62 = vld [vmem:[%s12928_s4 + $0x94] sm:$0xff] }
  0xd4   :  { %v8091_v7 = vpack.c.bf16 %v387_v63, %v382_v54  ;;  %v412_v31 = vmul.f32 %v7885_v8, %v332_v41  ;;  %v417_v48 = vmul.f32 %v7885_v8, %v337_v1  ;;  %v347_v26 = vunpack.c.l.bf16 %v278_v25 }
  0xd5   :  { %723 = vmatmul.bf16.gmra.mxu0 %v8042_v19  ;;  %v8097_v16 = vpack.c.bf16 %v397_v38, %v392_v2  ;;  %v422_v49 = vmul.f32 %v7885_v8, %v342_v4  ;;  %v352_v32 = vunpack.c.l.bf16 %v281_v50  ;;  %v8107_v51 = vpack.c.bf16 %v407_v20, %v402_v3 }
  0xd6   :  { %771 = vmatmul.bf16.gmra.mxu1 %v8046_v52  ;;  %v8109_v11 = vpack.c.bf16 %v417_v48, %v412_v31  ;;  %v357_v37 = vunpack.c.l.bf16 %v284_v43  ;;  %v362_v54 = vunpack.c.l.bf16 %v287_v30  ;;  %v427_v55 = vmul.f32 %v7885_v8, %v347_v26 }
  0xd7   :  { %819 = vmatmul.bf16.gmra.mxu2 %v8061_v13  ;;  %v432_v59 = vmul.f32 %v7885_v8, %v352_v32  ;;  %v318_v41 = vunpack.c.l.bf16 %v261_v12  ;;  %v323_v1 = vunpack.c.l.bf16 %v264_v35  ;;  %v319_v50 = vunpack.c.h.bf16 %v261_v12 }
  0xd8   :  { %867 = vmatmul.bf16.gmra.mxu3 %v8065_v17  ;;  %v437_v63 = vmul.f32 %v7885_v8, %v357_v37  ;;  %v8121_v40 = vmul.f32 %v7885_v8, %v362_v54  ;;  %v8123_v25 = vpack.c.bf16 %v427_v55, %v422_v49  ;;  %v324_v2 = vunpack.c.h.bf16 %v264_v35 }
  0xd9   :  { %v320_v3 = vunpack.c.l.bf16 %v262_v61  ;;  %v325_v4 = vunpack.c.l.bf16 %v265_v62  ;;  %v321_v43 = vunpack.c.h.bf16 %v262_v61  ;;  %v326_v30 = vunpack.c.h.bf16 %v265_v62  ;;  %v544_v62 = vld [vmem:[%s12926_s3 + $0x1e8] sm:$0xff] }
  0xda   :  { %v8125_v38 = vpack.c.bf16 %v437_v63, %v432_v59  ;;  %v398_v20 = vmul.f32 %v7783_v15, %v318_v41  ;;  %v403_v31 = vmul.f32 %v7783_v15, %v323_v1  ;;  %v399_v48 = vmul.f32 %v7788_v36, %v319_v50  ;;  %v514_v59 = vld [vmem:[%s12926_s3 + $0xf8] sm:$0xff]  ;;  %v576_v41 = vld [vmem:[%s12926_s3 + $0x2e8] sm:$0xff] }
  0xdb   :  { %v404_v8 = vmul.f32 %v7788_v36, %v324_v2  ;;  %v400_v26 = vmul.f32 %v7795_v42, %v320_v3  ;;  %v405_v49 = vmul.f32 %v7795_v42, %v325_v4  ;;  %v401_v32 = vmul.f32 %v7805_v47, %v321_v43  ;;  %v611_v36 = vld [vmem:[%s12926_s3 + $0x400] sm:$0xff]  ;;  %v613_v42 = vld [vmem:[%s12926_s3 + $0x410] sm:$0xff]  ;;  %v546_v63 = vld [vmem:[%s12926_s3 + $0x1f8] sm:$0xff] }
  0xdc   :  { %v406_v12 = vmul.f32 %v7805_v47, %v326_v30  ;;  %v8135_v35 = vpack.c.bf16 %v403_v31, %v398_v20  ;;  %v512_v47 = vld [vmem:[%s12926_s3 + $0xe8] sm:$0xff]  ;;  %v679_v55 = vpack.c.bf16 %v613_v42, %v611_v36  ;;  %v646_v1 = vpack.c.bf16 %v546_v63, %v544_v62  ;;  %v578_v50 = vld [vmem:[%s12926_s3 + $0x2f8] sm:$0xff] }
  0xdd   :  { %v8137_v37 = vpack.c.bf16 %v404_v8, %v399_v48  ;;  %v8140_v54 = vpack.c.bf16 %v405_v49, %v400_v26  ;;  %v630_v61 = vpack.c.bf16 %v514_v59, %v512_v47  ;;  %v508_v2 = vld [vmem:[%s12926_s3 + $0xc8] sm:$0xff]  ;;  %v510_v3 = vld [vmem:[%s12926_s3 + $0xd8] sm:$0xff]  ;;  %v662_v4 = vpack.c.bf16 %v578_v50, %v576_v41 }
  0xde   :  { %v8143_v15 = vpack.c.bf16 %v406_v12, %v401_v32  ;;  %904 = vmatpush.bf16.msrb.mxu0 %v679_v55  ;;  %v628_v43 = vpack.c.bf16 %v510_v3, %v508_v2  ;;  %v540_v30 = vld [vmem:[%s12926_s3 + $0x1c8] sm:$0xff]  ;;  %v542_v20 = vld [vmem:[%s12926_s3 + $0x1d8] sm:$0xff]  ;;  %993 = vmatpush.bf16.msrb.mxu2 %v646_v1 }
  0xdf   :  { %945 = vmatpush.bf16.msrb.mxu1 %v630_v61  ;;  %v572_v31 = vld [vmem:[%s12926_s3 + $0x2c8] sm:$0xff]  ;;  %v644_v48 = vpack.c.bf16 %v542_v20, %v540_v30  ;;  %v574_v8 = vld [vmem:[%s12926_s3 + $0x2d8] sm:$0xff]  ;;  %1041 = vmatpush.bf16.msrb.mxu3 %v662_v4 }
  0xe0   :  { %v504_v26 = vld [vmem:[%s12926_s3 + $0xa8] sm:$0xff]  ;;  %v506_v49 = vld [vmem:[%s12926_s3 + $0xb8] sm:$0xff]  ;;  %v660_v32 = vpack.c.bf16 %v574_v8, %v572_v31 }
  0xe1   :  { %v626_v12 = vpack.c.bf16 %v506_v49, %v504_v26  ;;  %v536_v36 = vld [vmem:[%s12926_s3 + $0x1a8] sm:$0xff]  ;;  %v538_v42 = vld [vmem:[%s12926_s3 + $0x1b8] sm:$0xff] }
  0xe2   :  { %v568_v47 = vld [vmem:[%s12926_s3 + $0x2a8] sm:$0xff]  ;;  %v570_v55 = vld [vmem:[%s12926_s3 + $0x2b8] sm:$0xff]  ;;  %994 = vmatpush.bf16.msrb.mxu2 %v644_v48  ;;  %v642_v62 = vpack.c.bf16 %v538_v42, %v536_v36 }
  0xe3   :  { %946 = vmatpush.bf16.msrb.mxu1 %v628_v43  ;;  %v500_v59 = vld [vmem:[%s12926_s3 + $0x88] sm:$0xff]  ;;  %v502_v61 = vld [vmem:[%s12926_s3 + $0x98] sm:$0xff]  ;;  %1042 = vmatpush.bf16.msrb.mxu3 %v660_v32  ;;  %v658_v63 = vpack.c.bf16 %v570_v55, %v568_v47 }
  0xe4   :  { %v624_v41 = vpack.c.bf16 %v502_v61, %v500_v59  ;;  %v532_v1 = vld [vmem:[%s12926_s3 + $0x188] sm:$0xff]  ;;  %v534_v50 = vld [vmem:[%s12926_s3 + $0x198] sm:$0xff] }
  0xe5   :  { %728 = vmatmul.bf16.gmra.mxu0 %v8135_v35  ;;  %v564_v2 = vld [vmem:[%s12926_s3 + $0x288] sm:$0xff]  ;;  %v566_v3 = vld [vmem:[%s12926_s3 + $0x298] sm:$0xff]  ;;  %v640_v4 = vpack.c.bf16 %v534_v50, %v532_v1 }
  0xe6   :  { %776 = vmatmul.bf16.gmra.mxu1 %v8137_v37  ;;  %995 = vmatpush.bf16.msrb.mxu2 %v642_v62  ;;  %v656_v43 = vpack.c.bf16 %v566_v3, %v564_v2  ;;  %v496_v30 = vld [vmem:[%s12926_s3 + $0x68] sm:$0xff]  ;;  %v498_v20 = vld [vmem:[%s12926_s3 + $0x78] sm:$0xff] }
  0xe7   :  { %824 = vmatmul.bf16.gmra.mxu2 %v8140_v54  ;;  %947 = vmatpush.bf16.msrb.mxu1 %v626_v12  ;;  %v528_v31 = vld [vmem:[%s12926_s3 + $0x168] sm:$0xff]  ;;  %v622_v48 = vpack.c.bf16 %v498_v20, %v496_v30  ;;  %v530_v8 = vld [vmem:[%s12926_s3 + $0x178] sm:$0xff] }
  0xe8   :  { %872 = vmatmul.bf16.gmra.mxu3 %v8143_v15  ;;  %v560_v26 = vld [vmem:[%s12926_s3 + $0x268] sm:$0xff]  ;;  %v562_v49 = vld [vmem:[%s12926_s3 + $0x278] sm:$0xff]  ;;  %v638_v32 = vpack.c.bf16 %v530_v8, %v528_v31 }
  0xe9   :  { %1043 = vmatpush.bf16.msrb.mxu3 %v658_v63  ;;  %v654_v12 = vpack.c.bf16 %v562_v49, %v560_v26  ;;  %v492_v36 = vld [vmem:[%s12926_s3 + $0x48] sm:$0xff]  ;;  %v494_v42 = vld [vmem:[%s12926_s3 + $0x58] sm:$0xff] }
  0xea   :  { %996 = vmatpush.bf16.msrb.mxu2 %v640_v4  ;;  %v524_v47 = vld [vmem:[%s12926_s3 + $0x148] sm:$0xff]  ;;  %v620_v55 = vpack.c.bf16 %v494_v42, %v492_v36  ;;  %v526_v59 = vld [vmem:[%s12926_s3 + $0x158] sm:$0xff] }
  0xeb   :  { %948 = vmatpush.bf16.msrb.mxu1 %v624_v41  ;;  %v556_v61 = vld [vmem:[%s12926_s3 + $0x248] sm:$0xff]  ;;  %v558_v62 = vld [vmem:[%s12926_s3 + $0x258] sm:$0xff]  ;;  %v636_v63 = vpack.c.bf16 %v526_v59, %v524_v47  ;;  %v8315_v59 = vpack.c.bf16 %v8018_v6, %v8018_v6 }
  0xec   :  { %v488_v41 = vld [vmem:[%s12926_s3 + $0x28] sm:$0xff]  ;;  %v490_v1 = vld [vmem:[%s12926_s3 + $0x38] sm:$0xff]  ;;  %v652_v50 = vpack.c.bf16 %v558_v62, %v556_v61  ;;  %v8320_v61 = vpack.c.bf16 %v8026_v21, %v8026_v21  ;;  %v8325_v62 = vpack.c.bf16 %v8029_v45, %v8029_v45 }
  0xed   :  { %1044 = vmatpush.bf16.msrb.mxu3 %v656_v43  ;;  %v520_v2 = vld [vmem:[%s12926_s3 + $0x128] sm:$0xff]  ;;  %v522_v3 = vld [vmem:[%s12926_s3 + $0x138] sm:$0xff]  ;;  %v618_v30 = vpack.c.bf16 %v490_v1, %v488_v41 }
  0xee   :  { %997 = vmatpush.bf16.msrb.mxu2 %v638_v32  ;;  %v552_v4 = vld [vmem:[%s12926_s3 + $0x228] sm:$0xff]  ;;  %v554_v43 = vld [vmem:[%s12926_s3 + $0x238] sm:$0xff]  ;;  %v634_v20 = vpack.c.bf16 %v522_v3, %v520_v2 }
  0xef   :  { %949 = vmatpush.bf16.msrb.mxu1 %v622_v48  ;;  %v650_v31 = vpack.c.bf16 %v554_v43, %v552_v4  ;;  %v484_v48 = vld [vmem:[%s12926_s3 + $0x8] sm:$0xff]  ;;  %v486_v8 = vld [vmem:[%s12926_s3 + $0x18] sm:$0xff] }
  0xf0   :  { %v516_v26 = vld [vmem:[%s12926_s3 + $0x108] sm:$0xff]  ;;  %v616_v49 = vpack.c.bf16 %v486_v8, %v484_v48  ;;  %v518_v32 = vld [vmem:[%s12926_s3 + $0x118] sm:$0xff] }
  0xf1   :  { %1045 = vmatpush.bf16.msrb.mxu3 %v654_v12  ;;  %v548_v12 = vld [vmem:[%s12926_s3 + $0x208] sm:$0xff]  ;;  %v550_v36 = vld [vmem:[%s12926_s3 + $0x218] sm:$0xff]  ;;  %v632_v42 = vpack.c.bf16 %v518_v32, %v516_v26 }
  0xf2   :  { %998 = vmatpush.bf16.msrb.mxu2 %v636_v63  ;;  %v648_v47 = vpack.c.bf16 %v550_v36, %v548_v12 }
  0xf3   :  { %950 = vmatpush.bf16.msrb.mxu1 %v620_v55  ;;  %v8311_v55 = vpack.c.bf16 %v8015_v5, %v8015_v5 }
  0xf5   :  { %733 = vmatmul.bf16.gmra.mxu0 %v7935_v24  ;;  %1046 = vmatpush.bf16.msrb.mxu3 %v652_v50 }
  0xf6   :  { %781 = vmatmul.bf16.gmra.mxu1 %v7945_v56  ;;  %999 = vmatpush.bf16.msrb.mxu2 %v634_v20 }
  0xf7   :  { %829 = vmatmul.bf16.gmra.mxu2 %v7948_v60  ;;  %951 = vmatpush.bf16.msrb.mxu1 %v618_v30 }
  0xf8   :  { %877 = vmatmul.bf16.gmra.mxu3 %v7961_v29 }
  0xf9   :  { %1047 = vmatpush.bf16.msrb.mxu3 %v650_v31 }
  0xfa   :  { %1000 = vmatpush.bf16.msrb.mxu2 %v632_v42 }
  0xfb   :  { %952 = vmatpush.bf16.msrb.mxu1 %v616_v49 }
  0xfd   :  { %1048 = vmatpush.bf16.msrb.mxu3 %v648_v47 }
 0x105   :  { %738 = vmatmul.bf16.gmra.mxu0 %v7966_v44 }
 0x106   :  { %786 = vmatmul.bf16.gmra.mxu1 %v7977_v33 }
 0x107   :  { %834 = vmatmul.bf16.gmra.mxu2 %v7980_v46 }
 0x108   :  { %882 = vmatmul.bf16.gmra.mxu3 %v7988_v23 }
 0x115   :  { %743 = vmatmul.bf16.gmra.mxu0 %v7995_v57 }
 0x116   :  { %791 = vmatmul.bf16.gmra.mxu1 %v8005_v0 }
 0x117   :  { %839 = vmatmul.bf16.gmra.mxu2 %v8011_v39 }
 0x118   :  { %887 = vmatmul.bf16.gmra.mxu3 %v8023_v18 }
 0x125   :  { %748 = vmatmul.bf16.gmra.mxu0 %v8311_v55 }
 0x126   :  { %796 = vmatmul.bf16.gmra.mxu1 %v8315_v59 }
 0x127   :  { %844 = vmatmul.bf16.gmra.mxu2 %v8320_v61 }
 0x128   :  { %892 = vmatmul.bf16.gmra.mxu3 %v8325_v62 }
 0x132   :  { %v714_v5 = vpop.f32.mrf.mxu0 }
 0x133   :  { %v762_v63 = vpop.f32.mrf.mxu1 }
 0x134   :  { %v763_v6 = vadd.f32 %v762_v63, %v714_v5 }
 0x135   :  { %6782 = vmatmul.msk.bf16.vlgmr.msrb.gmra.mxu0 %vm118_vm0, %v8071_v58 }
 0x136   :  { %953 = vmatmul.bf16.vlgmr.msrb.gmra.mxu1 %v7817_v27 }
 0x137   :  { %1001 = vmatmul.bf16.vlgmr.msrb.gmra.mxu2 %v7826_v28 }
 0x138   :  { %1049 = vmatmul.bf16.vlgmr.msrb.gmra.mxu3 %v7847_v22 }
 0x13a   :  { %v810_v21 = vpop.f32.mrf.mxu2  ;;  %v716_v41 = vpop.f32.mrf.mxu0 }
 0x13b   :  { %v811_v45 = vadd.f32 %v810_v21, %v763_v6  ;;  %v858_v1 = vpop.f32.mrf.mxu3  ;;  %v764_v50 = vpop.f32.mrf.mxu1 }
 0x13c   :  { %v765_v2 = vadd.f32 %v764_v50, %v716_v41 }
 0x13d   :  { %v8334_v3 = vadd.f32 %v858_v1, %v811_v45 }
 0x142   :  { %v812_v4 = vpop.f32.mrf.mxu2  ;;  %v719_v43 = vpop.f32.mrf.mxu0 }
 0x143   :  { %v813_v30 = vadd.f32 %v812_v4, %v765_v2  ;;  %v860_v20 = vpop.f32.mrf.mxu3  ;;  %v767_v31 = vpop.f32.mrf.mxu1 }
 0x144   :  { %v768_v48 = vadd.f32 %v767_v31, %v719_v43 }
 0x145   :  { %v8336_v8 = vadd.f32 %v860_v20, %v813_v30  ;;  %6783 = vmatmul.msk.bf16.gmra.mxu0 %vm118_vm0, %v8091_v7 }
 0x146   :  { %958 = vmatmul.bf16.gmra.mxu1 %v7887_v9 }
 0x147   :  { %1006 = vmatmul.bf16.gmra.mxu2 %v7889_v10 }
 0x148   :  { %1054 = vmatmul.bf16.gmra.mxu3 %v7894_v14 }
 0x14a   :  { %v815_v27 = vpop.f32.mrf.mxu2  ;;  %v721_v28 = vpop.f32.mrf.mxu0 }
 0x14b   :  { %v816_v22 = vadd.f32 %v815_v27, %v768_v48  ;;  %v863_v26 = vpop.f32.mrf.mxu3  ;;  %v769_v49 = vpop.f32.mrf.mxu1 }
 0x14c   :  { %v770_v32 = vadd.f32 %v769_v49, %v721_v28  ;;  %v608_v49 = vld [vmem:[%s12926_s3 + $0x3e8] sm:$0xff] }
 0x14d   :  { %v8343_v12 = vadd.f32 %v863_v26, %v816_v22 }
 0x152   :  { %v817_v36 = vpop.f32.mrf.mxu2  ;;  %v724_v42 = vpop.f32.mrf.mxu0 }
 0x153   :  { %v818_v47 = vadd.f32 %v817_v36, %v770_v32  ;;  %v865_v5 = vpop.f32.mrf.mxu3  ;;  %v772_v63 = vpop.f32.mrf.mxu1  ;;  %v614_v32 = vld [vmem:[%s12926_s3 + $0x418] sm:$0xff] }
 0x154   :  { %v773_v6 = vadd.f32 %v772_v63, %v724_v42 }
 0x155   :  { %v8345_v21 = vadd.f32 %v865_v5, %v818_v47  ;;  %6784 = vmatmul.msk.bf16.gmra.mxu0 %vm118_vm0, %v8097_v16 }
 0x156   :  { %963 = vmatmul.bf16.gmra.mxu1 %v8042_v19 }
 0x157   :  { %1011 = vmatmul.bf16.gmra.mxu2 %v8046_v52 }
 0x158   :  { %1059 = vmatmul.bf16.gmra.mxu3 %v8061_v13 }
 0x15a   :  { %v820_v9 = vpop.f32.mrf.mxu2  ;;  %v726_v10 = vpop.f32.mrf.mxu0 }
 0x15b   :  { %v821_v14 = vadd.f32 %v820_v9, %v773_v6  ;;  %v868_v41 = vpop.f32.mrf.mxu3  ;;  %v774_v45 = vpop.f32.mrf.mxu1 }
 0x15c   :  { %v775_v1 = vadd.f32 %v774_v45, %v726_v10 }
 0x15d   :  { %v8352_v50 = vadd.f32 %v868_v41, %v821_v14 }
 0x162   :  { %v822_v2 = vpop.f32.mrf.mxu2  ;;  %v729_v4 = vpop.f32.mrf.mxu0 }
 0x163   :  { %v823_v43 = vadd.f32 %v822_v2, %v775_v1  ;;  %v870_v30 = vpop.f32.mrf.mxu3  ;;  %v777_v20 = vpop.f32.mrf.mxu1 }
 0x164   :  { %v778_v31 = vadd.f32 %v777_v20, %v729_v4  ;;  %v602_v20 = vld [vmem:[%s12926_s3 + $0x3b8] sm:$0xff] }
 0x165   :  { %v8354_v48 = vadd.f32 %v870_v30, %v823_v43  ;;  %6785 = vmatmul.msk.bf16.gmra.mxu0 %vm118_vm0, %v8107_v51  ;;  %v604_v30 = vld [vmem:[%s12926_s3 + $0x3c8] sm:$0xff] }
 0x166   :  { %968 = vmatmul.bf16.gmra.mxu1 %v8135_v35  ;;  %v610_v35 = vld [vmem:[%s12926_s3 + $0x3f8] sm:$0xff] }
 0x167   :  { %1016 = vmatmul.bf16.gmra.mxu2 %v8137_v37  ;;  %v612_v37 = vld [vmem:[%s12926_s3 + $0x408] sm:$0xff] }
 0x168   :  { %1064 = vmatmul.bf16.gmra.mxu3 %v8140_v54  ;;  %v678_v54 = vpack.c.bf16 %v610_v35, %v608_v49  ;;  %v680_v36 = vpack.c.bf16 %v614_v32, %v612_v37  ;;  %v598_v49 = vld [vmem:[%s12926_s3 + $0x398] sm:$0xff]  ;;  %v592_v37 = vld [vmem:[%s12926_s3 + $0x368] sm:$0xff] }
 0x16a   :  { %v825_v19 = vpop.f32.mrf.mxu2  ;;  %v731_v52 = vpop.f32.mrf.mxu0  ;;  %1089 = vmatpush.bf16.msra.mxu0 %v678_v54  ;;  %1144 = vmatpush.bf16.msra.mxu1 %v680_v36  ;;  %v594_v54 = vld [vmem:[%s12926_s3 + $0x378] sm:$0xff] }
 0x16b   :  { %v826_v13 = vadd.f32 %v825_v19, %v778_v31  ;;  %v873_v27 = vpop.f32.mrf.mxu3  ;;  %v779_v28 = vpop.f32.mrf.mxu1  ;;  %v670_v32 = vpack.c.bf16 %v594_v54, %v592_v37 }
 0x16c   :  { %v780_v22 = vadd.f32 %v779_v28, %v731_v52 }
 0x16d   :  { %v8361_v26 = vadd.f32 %v873_v27, %v826_v13 }
 0x172   :  { %v827_v42 = vpop.f32.mrf.mxu2  ;;  %v734_v47 = vpop.f32.mrf.mxu0 }
 0x173   :  { %v828_v5 = vadd.f32 %v827_v42, %v780_v22  ;;  %v875_v63 = vpop.f32.mrf.mxu3  ;;  %v782_v6 = vpop.f32.mrf.mxu1  ;;  %v596_v22 = vld [vmem:[%s12926_s3 + $0x388] sm:$0xff] }
 0x174   :  { %v783_v9 = vadd.f32 %v782_v6, %v734_v47  ;;  %v672_v35 = vpack.c.bf16 %v598_v49, %v596_v22  ;;  %v590_v6 = vld [vmem:[%s12926_s3 + $0x358] sm:$0xff] }
 0x175   :  { %v8375_v10 = vadd.f32 %v875_v63, %v828_v5  ;;  %6786 = vmatmul.msk.bf16.gmra.mxu0 %vm118_vm0, %v8109_v11 }
 0x176   :  { %973 = vmatmul.bf16.gmra.mxu1 %v7935_v24  ;;  %v606_v24 = vld [vmem:[%s12926_s3 + $0x3d8] sm:$0xff] }
 0x177   :  { %1021 = vmatmul.bf16.gmra.mxu2 %v7945_v56  ;;  %v600_v56 = vld [vmem:[%s12926_s3 + $0x3a8] sm:$0xff] }
 0x178   :  { %1069 = vmatmul.bf16.gmra.mxu3 %v7948_v60  ;;  %v676_v60 = vpack.c.bf16 %v606_v24, %v604_v30  ;;  %v674_v31 = vpack.c.bf16 %v602_v20, %v600_v56  ;;  %v580_v56 = vld [vmem:[%s12926_s3 + $0x308] sm:$0xff] }
 0x17a   :  { %v830_v14 = vpop.f32.mrf.mxu2  ;;  %v736_v41 = vpop.f32.mrf.mxu0  ;;  %1090 = vmatpush.bf16.msra.mxu0 %v676_v60  ;;  %v582_v60 = vld [vmem:[%s12926_s3 + $0x318] sm:$0xff] }
 0x17b   :  { %v831_v45 = vadd.f32 %v830_v14, %v783_v9  ;;  %v878_v1 = vpop.f32.mrf.mxu3  ;;  %v784_v2 = vpop.f32.mrf.mxu1  ;;  %v584_v9 = vld [vmem:[%s12926_s3 + $0x328] sm:$0xff] }
 0x17c   :  { %v8382_v4 = vadd.f32 %v784_v2, %v736_v41  ;;  %v586_v41 = vld [vmem:[%s12926_s3 + $0x338] sm:$0xff] }
 0x17d   :  { %v8384_v43 = vadd.f32 %v878_v1, %v831_v45  ;;  %v666_v45 = vpack.c.bf16 %v586_v41, %v584_v9 }
 0x17e   :  { %1091 = vmatpush.bf16.msra.mxu0 %v674_v31  ;;  %v664_v31 = vpack.c.bf16 %v582_v60, %v580_v56 }
 0x182   :  { %v8398_v19 = vpop.f32.mrf.mxu2  ;;  %v739_v52 = vpop.f32.mrf.mxu0  ;;  %1092 = vmatpush.bf16.msra.mxu0 %v672_v35 }
 0x183   :  { %v8400_v13 = vpop.f32.mrf.mxu3  ;;  %v787_v27 = vpop.f32.mrf.mxu1 }
 0x184   :  { %v788_v28 = vadd.f32 %v787_v27, %v739_v52 }
 0x185   :  { %6787 = vmatmul.msk.bf16.gmra.mxu0 %vm118_vm0, %v8123_v25 }
 0x186   :  { %978 = vmatmul.bf16.gmra.mxu1 %v7966_v44  ;;  %1093 = vmatpush.bf16.msra.mxu0 %v670_v32 }
 0x187   :  { %1026 = vmatmul.bf16.gmra.mxu2 %v7977_v33 }
 0x188   :  { %1074 = vmatmul.bf16.gmra.mxu3 %v7980_v46  ;;  %v588_v46 = vld [vmem:[%s12926_s3 + $0x348] sm:$0xff] }
 0x189   :  { %v668_v14 = vpack.c.bf16 %v590_v6, %v588_v46 }
 0x18a   :  { %v835_v36 = vpop.f32.mrf.mxu2  ;;  %v741_v42 = vpop.f32.mrf.mxu0 }
 0x18b   :  { %v836_v47 = vadd.f32 %v835_v36, %v788_v28  ;;  %v883_v5 = vpop.f32.mrf.mxu3  ;;  %v789_v44 = vpop.f32.mrf.mxu1  ;;  %1094 = vmatpush.bf16.msra.mxu0 %v668_v14 }
 0x18c   :  { %v8419_v63 = vadd.f32 %v789_v44, %v741_v42 }
 0x18d   :  { %v8421_v33 = vadd.f32 %v883_v5, %v836_v47 }
 0x18f   :  { %1095 = vmatpush.bf16.msra.mxu0 %v666_v45 }
 0x192   :  { %v8435_v1 = vpop.f32.mrf.mxu2  ;;  %v744_v2 = vpop.f32.mrf.mxu0 }
 0x193   :  { %v8437_v30 = vpop.f32.mrf.mxu3  ;;  %v792_v24 = vpop.f32.mrf.mxu1  ;;  %1096 = vmatpush.bf16.msra.mxu0 %v664_v31 }
 0x194   :  { %v793_v20 = vadd.f32 %v792_v24, %v744_v2 }
 0x195   :  { %6788 = vmatmul.msk.bf16.gmra.mxu0 %vm118_vm0, %v8125_v38 }
 0x196   :  { %983 = vmatmul.bf16.gmra.mxu1 %v7995_v57 }
 0x197   :  { %1031 = vmatmul.bf16.gmra.mxu2 %v8005_v0  ;;  %v8460_v0 = vpack.c.bf16 %v8121_v40, %v8121_v40 }
 0x198   :  { %1079 = vmatmul.bf16.gmra.mxu3 %v8011_v39 }
 0x19a   :  { %v840_v52 = vpop.f32.mrf.mxu2  ;;  %v746_v27 = vpop.f32.mrf.mxu0 }
 0x19b   :  { %v841_v28 = vadd.f32 %v840_v52, %v793_v20  ;;  %v888_v22 = vpop.f32.mrf.mxu3  ;;  %v794_v49 = vpop.f32.mrf.mxu1 }
 0x19c   :  { %v8450_v35 = vadd.f32 %v794_v49, %v746_v27 }
 0x19d   :  { %v8452_v37 = vadd.f32 %v888_v22, %v841_v28 }
 0x1a2   :  { %v8454_v54 = vpop.f32.mrf.mxu2  ;;  %v749_v32 = vpop.f32.mrf.mxu0 }
 0x1a3   :  { %v8456_v36 = vpop.f32.mrf.mxu3  ;;  %v797_v57 = vpop.f32.mrf.mxu1 }
 0x1a4   :  { %13081 = vst [vmem:[#allocation2_spill] sm:$0xff] %v8456_v36  ;;  %v798_v39 = vadd.f32 %v797_v57, %v749_v32 }
 0x1a5   :  { %6789 = vmatmul.msk.bf16.gmra.mxu0 %vm118_vm0, %v8460_v0 }
 0x1a6   :  { %988 = vmatmul.bf16.gmra.mxu1 %v8311_v55 }
 0x1a7   :  { %1036 = vmatmul.bf16.gmra.mxu2 %v8315_v59 }
 0x1a8   :  { %1084 = vmatmul.bf16.gmra.mxu3 %v8320_v61 }
 0x1aa   :  { %v845_v42 = vpop.f32.mrf.mxu2  ;;  %v751_v47 = vpop.f32.mrf.mxu0 }
 0x1ab   :  { %v846_v5 = vadd.f32 %v845_v42, %v798_v39  ;;  %v893_v44 = vpop.f32.mrf.mxu3  ;;  %v799_v46 = vpop.f32.mrf.mxu1 }
 0x1ad   :  { %v8467_v6 = vadd.f32 %v893_v44, %v846_v5 }
 0x1b2   :  { %v847_v9 = vpop.f32.mrf.mxu2  ;;  %v906_v40 = vpop.f32.mrf.mxu0 }
 0x1b3   :  { %v895_v14 = vpop.f32.mrf.mxu3  ;;  %v8470_v41 = vadd.f32 %v906_v40, %v8334_v3  ;;  %v954_v45 = vpop.f32.mrf.mxu1 }
 0x1b5   :  { %1097 = vmatmul.bf16.vlgmr.msra.gmra.mxu0 %v7853_v53 }
 0x1b6   :  { %6790 = vmatmul.msk.bf16.vlgmr.msra.gmra.mxu1 %vm118_vm0, %v8071_v58 }
 0x1ba   :  { %v1002_v55 = vpop.f32.mrf.mxu2  ;;  %v908_v59 = vpop.f32.mrf.mxu0 }
 0x1bb   :  { %v1003_v61 = vadd.f32 %v1002_v55, %v954_v45  ;;  %v1050_v2 = vpop.f32.mrf.mxu3  ;;  %v8476_v24 = vadd.f32 %v908_v59, %v8336_v8  ;;  %v8478_v56 = vpop.f32.mrf.mxu1 }
 0x1bd   :  { %v8480_v60 = vadd.f32 %v1050_v2, %v1003_v61 }
 0x1c2   :  { %v8482_v20 = vpop.f32.mrf.mxu2  ;;  %v911_v3 = vpop.f32.mrf.mxu0 }
 0x1c3   :  { %v8484_v31 = vpop.f32.mrf.mxu3  ;;  %v8487_v53 = vadd.f32 %v911_v3, %v8343_v12  ;;  %v959_v58 = vpop.f32.mrf.mxu1 }
 0x1c5   :  { %1102 = vmatmul.bf16.gmra.mxu0 %v7908_v34 }
 0x1c6   :  { %6791 = vmatmul.msk.bf16.gmra.mxu1 %vm118_vm0, %v8091_v7 }
 0x1ca   :  { %v1007_v8 = vpop.f32.mrf.mxu2  ;;  %v913_v52 = vpop.f32.mrf.mxu0 }
 0x1cb   :  { %v1008_v27 = vadd.f32 %v1007_v8, %v959_v58  ;;  %v1055_v28 = vpop.f32.mrf.mxu3  ;;  %v8493_v22 = vadd.f32 %v913_v52, %v8345_v21  ;;  %v8495_v49 = vpop.f32.mrf.mxu1 }
 0x1cd   :  { %v8497_v32 = vadd.f32 %v1055_v28, %v1008_v27 }
 0x1d2   :  { %v8499_v57 = vpop.f32.mrf.mxu2  ;;  %v916_v12 = vpop.f32.mrf.mxu0 }
 0x1d3   :  { %v8501_v39 = vpop.f32.mrf.mxu3  ;;  %v8504_v34 = vadd.f32 %v916_v12, %v8352_v50  ;;  %v964_v7 = vpop.f32.mrf.mxu1 }
 0x1d5   :  { %1107 = vmatmul.bf16.gmra.mxu0 %v8065_v17 }
 0x1d6   :  { %6792 = vmatmul.msk.bf16.gmra.mxu1 %vm118_vm0, %v8097_v16 }
 0x1da   :  { %v1012_v21 = vpop.f32.mrf.mxu2  ;;  %v918_v42 = vpop.f32.mrf.mxu0 }
 0x1db   :  { %v1013_v47 = vadd.f32 %v1012_v21, %v964_v7  ;;  %v1060_v5 = vpop.f32.mrf.mxu3  ;;  %v8510_v44 = vadd.f32 %v918_v42, %v8354_v48  ;;  %v8512_v46 = vpop.f32.mrf.mxu1 }
 0x1dd   :  { %v8514_v9 = vadd.f32 %v1060_v5, %v1013_v47 }
 0x1e2   :  { %v8516_v40 = vpop.f32.mrf.mxu2  ;;  %v921_v50 = vpop.f32.mrf.mxu0 }
 0x1e3   :  { %v8518_v14 = vpop.f32.mrf.mxu3  ;;  %v8521_v17 = vadd.f32 %v921_v50, %v8361_v26  ;;  %v969_v16 = vpop.f32.mrf.mxu1 }
 0x1e5   :  { %1112 = vmatmul.bf16.gmra.mxu0 %v8143_v15 }
 0x1e6   :  { %6793 = vmatmul.msk.bf16.gmra.mxu1 %vm118_vm0, %v8107_v51 }
 0x1ea   :  { %v1017_v48 = vpop.f32.mrf.mxu2  ;;  %v923_v45 = vpop.f32.mrf.mxu0 }
 0x1eb   :  { %v1018_v55 = vadd.f32 %v1017_v48, %v969_v16  ;;  %v1065_v59 = vpop.f32.mrf.mxu3  ;;  %v8527_v61 = vadd.f32 %v923_v45, %v8375_v10  ;;  %v8529_v2 = vpop.f32.mrf.mxu1 }
 0x1ed   :  { %v8531_v3 = vadd.f32 %v1065_v59, %v1018_v55 }
 0x1f2   :  { %v8533_v58 = vpop.f32.mrf.mxu2  ;;  %v926_v26 = vpop.f32.mrf.mxu0 }
 0x1f3   :  { %v8535_v8 = vpop.f32.mrf.mxu3  ;;  %v8538_v15 = vadd.f32 %v926_v26, %v8384_v43  ;;  %v974_v51 = vpop.f32.mrf.mxu1 }
 0x1f5   :  { %1117 = vmatmul.bf16.gmra.mxu0 %v7961_v29 }
 0x1f6   :  { %6794 = vmatmul.msk.bf16.gmra.mxu1 %vm118_vm0, %v8109_v11 }
 0x1fa   :  { %v1022_v10 = vpop.f32.mrf.mxu2  ;;  %v8543_v52 = vpop.f32.mrf.mxu0 }
 0x1fb   :  { %v1023_v27 = vadd.f32 %v1022_v10, %v974_v51  ;;  %v1070_v28 = vpop.f32.mrf.mxu3  ;;  %v8545_v12 = vpop.f32.mrf.mxu1 }
 0x1fd   :  { %v8547_v7 = vadd.f32 %v1070_v28, %v1023_v27 }
 0x202   :  { %v8549_v21 = vpop.f32.mrf.mxu2  ;;  %v931_v42 = vpop.f32.mrf.mxu0 }
 0x203   :  { %v8551_v43 = vpop.f32.mrf.mxu3  ;;  %v8554_v47 = vadd.f32 %v931_v42, %v8421_v33  ;;  %v979_v29 = vpop.f32.mrf.mxu1 }
 0x205   :  { %1122 = vmatmul.bf16.gmra.mxu0 %v7988_v23 }
 0x206   :  { %6795 = vmatmul.msk.bf16.gmra.mxu1 %vm118_vm0, %v8123_v25 }
 0x20a   :  { %v1027_v11 = vpop.f32.mrf.mxu2  ;;  %v8559_v5 = vpop.f32.mrf.mxu0 }
 0x20b   :  { %v1028_v50 = vadd.f32 %v1027_v11, %v979_v29  ;;  %v1075_v16 = vpop.f32.mrf.mxu3  ;;  %v8561_v48 = vpop.f32.mrf.mxu1 }
 0x20d   :  { %v8563_v45 = vadd.f32 %v1075_v16, %v1028_v50 }
 0x212   :  { %v8565_v55 = vpop.f32.mrf.mxu2  ;;  %v936_v59 = vpop.f32.mrf.mxu0 }
 0x213   :  { %v8567_v33 = vpop.f32.mrf.mxu3  ;;  %v8570_v26 = vadd.f32 %v936_v59, %v8452_v37  ;;  %v984_v23 = vpop.f32.mrf.mxu1 }
 0x215   :  { %1127 = vmatmul.bf16.gmra.mxu0 %v8023_v18 }
 0x216   :  { %6796 = vmatmul.msk.bf16.gmra.mxu1 %vm118_vm0, %v8125_v38 }
 0x21a   :  { %v1032_v25 = vpop.f32.mrf.mxu2  ;;  %v8575_v51 = vpop.f32.mrf.mxu0 }
 0x21b   :  { %13082 = vst [vmem:[#allocation3_spill] sm:$0xff] %v8575_v51  ;;  %v1033_v10 = vadd.f32 %v1032_v25, %v984_v23  ;;  %v1080_v27 = vpop.f32.mrf.mxu3  ;;  %v8577_v28 = vpop.f32.mrf.mxu1 }
 0x21d   :  { %v8579_v42 = vadd.f32 %v1080_v27, %v1033_v10 }
 0x222   :  { %v8581_v29 = vpop.f32.mrf.mxu2  ;;  %v941_v11 = vpop.f32.mrf.mxu0 }
 0x223   :  { %v8583_v37 = vpop.f32.mrf.mxu3  ;;  %v8586_v50 = vadd.f32 %v941_v11, %v8467_v6  ;;  %v989_v18 = vpop.f32.mrf.mxu1 }
 0x224   :  { %13083 = vst [vmem:[#allocation4_spill] sm:$0xff] %v8583_v37 }
 0x225   :  { %1132 = vmatmul.bf16.gmra.mxu0 %v8325_v62  ;;  %v1005_v62 = vadd.f32 %v8482_v20, %v8478_v56  ;;  %v1261_v20 = vmul.f32 %v8470_v41, %v8470_v41 }
 0x226   :  { %6797 = vmatmul.msk.bf16.gmra.mxu1 %vm118_vm0, %v8460_v0 }
 0x22a   :  { %v1037_v38 = vpop.f32.mrf.mxu2  ;;  %v943_v16 = vpop.f32.mrf.mxu0 }
 0x22b   :  { %v1038_v59 = vadd.f32 %v1037_v38, %v989_v18  ;;  %v1085_v23 = vpop.f32.mrf.mxu3  ;;  %v991_v25 = vpop.f32.mrf.mxu1  ;;  %v1053_v38 = vadd.f32 %v8484_v31, %v1005_v62 }
 0x22d   :  { %v8591_v10 = vadd.f32 %v1085_v23, %v1038_v59 }
 0x232   :  { %v1039_v27 = vpop.f32.mrf.mxu2  ;;  %v1098_v51 = vpop.f32.mrf.mxu0 }
 0x233   :  { %v1087_v36 = vpop.f32.mrf.mxu3  ;;  %v1099_v37 = vadd.f32 %v1098_v51, %v8480_v60  ;;  %v1146_v6 = vpop.f32.mrf.mxu1 }
 0x235   :  { %v8596_v11 = vadd.f32 %v1146_v6, %v1099_v37 }
 0x237   :  { %v1186_v0 = vsel %vm1185_vm8, %v8596_v11, 0.0  ;;  %v1262_v16 = vmul.f32 %v8596_v11, %v8596_v11 }
 0x238   :  { %v1187_v18 = vadd.f32 %v1186_v0, %v8470_v41  ;;  %v1010_v0 = vadd.f32 %v8499_v57, %v8495_v49 }
 0x239   :  { %v1291_v56 = vsel %vm1185_vm8, %v1262_v16, 0.0  ;;  %v1263_v16 = vmul.f32 %v8476_v24, %v8476_v24 }
 0x23a   :  { %v1100_v36 = vpop.f32.mrf.mxu0  ;;  %1188 = vadd.xlane.f32.xlu1 %v1187_v18  ;;  %v1292_v31 = vadd.f32 %v1291_v56, %v1261_v20 }
 0x23b   :  { %v1101_v60 = vadd.f32 %v1100_v36, %v1053_v38  ;;  %v1148_v51 = vpop.f32.mrf.mxu1 }
 0x23d   :  { %v8604_v59 = vadd.f32 %v1148_v51, %v1101_v60  ;;  %v1265_v51 = vmul.f32 %v8487_v53, %v8487_v53 }
 0x23f   :  { %v1190_v37 = vsel %vm1185_vm8, %v8604_v59, 0.0  ;;  %v1264_v25 = vmul.f32 %v8604_v59, %v8604_v59 }
 0x240   :  { %v1191_v23 = vadd.f32 %v1190_v37, %v8476_v24 }
 0x241   :  { %v1295_v38 = vsel %vm1185_vm8, %v1264_v25, 0.0 }
 0x242   :  { %v1103_v27 = vpop.f32.mrf.mxu0  ;;  %1192 = vadd.xlane.f32.xlu2 %v1191_v23  ;;  %1293 = vadd.xlane.f32.xlu1 %v1292_v31  ;;  %v1296_v60 = vadd.f32 %v1295_v38, %v1263_v16 }
 0x243   :  { %v1104_v6 = vadd.f32 %v1103_v27, %v8497_v32  ;;  %v1151_v62 = vpop.f32.mrf.mxu1  ;;  %v1058_v32 = vadd.f32 %v8501_v39, %v1010_v0 }
 0x245   :  { %v8617_v18 = vadd.f32 %v1151_v62, %v1104_v6  ;;  %v1267_v6 = vmul.f32 %v8493_v22, %v8493_v22 }
 0x247   :  { %v1266_v36 = vmul.f32 %v8617_v18, %v8617_v18  ;;  %v1194_v31 = vsel %vm1185_vm8, %v8617_v18, 0.0 }
 0x248   :  { %v1195_v39 = vadd.f32 %v1194_v31, %v8487_v53 }
 0x249   :  { %v1299_v56 = vsel %vm1185_vm8, %v1266_v36, 0.0 }
 0x24a   :  { %v1105_v20 = vpop.f32.mrf.mxu0  ;;  %1297 = vadd.xlane.f32.xlu2 %v1296_v60  ;;  %v1300_v49 = vadd.f32 %v1299_v56, %v1265_v51  ;;  %v1015_v51 = vadd.f32 %v8516_v40, %v8512_v46  ;;  %v1269_v40 = vmul.f32 %v8504_v34, %v8504_v34 }
 0x24b   :  { %v1106_v57 = vadd.f32 %v1105_v20, %v1058_v32  ;;  %v1153_v37 = vpop.f32.mrf.mxu1 }
 0x24c   :  { %1301 = vadd.xlane.f32.xlu0 %v1300_v49  ;;  %v1063_v49 = vadd.f32 %v8518_v14, %v1015_v51  ;;  %v1271_v14 = vmul.f32 %v8510_v44, %v8510_v44  ;;  %v1020_v51 = vadd.f32 %v8533_v58, %v8529_v2 }
 0x24d   :  { %v8628_v23 = vadd.f32 %v1153_v37, %v1106_v57 }
 0x24f   :  { %v1198_v25 = vsel %vm1185_vm8, %v8628_v23, 0.0  ;;  %v1268_v27 = vmul.f32 %v8628_v23, %v8628_v23 }
 0x250   :  { %v1199_v38 = vadd.f32 %v1198_v25, %v8493_v22 }
 0x251   :  { %v1303_v62 = vsel %vm1185_vm8, %v1268_v27, 0.0 }
 0x252   :  { %v1108_v0 = vpop.f32.mrf.mxu0  ;;  %1196 = vadd.xlane.f32.xlu2 %v1195_v39  ;;  %v1304_v16 = vadd.f32 %v1303_v62, %v1267_v6 }
 0x253   :  { %v1109_v36 = vadd.f32 %v1108_v0, %v8514_v9  ;;  %v1156_v60 = vpop.f32.mrf.mxu1 }
 0x254   :  { %1200 = vadd.xlane.f32.xlu0 %v1199_v38  ;;  %1305 = vadd.xlane.f32.xlu1 %v1304_v16 }
 0x255   :  { %v8644_v32 = vadd.f32 %v1156_v60, %v1109_v36 }
 0x257   :  { %v1202_v56 = vsel %vm1185_vm8, %v8644_v32, 0.0  ;;  %v1270_v57 = vmul.f32 %v8644_v32, %v8644_v32 }
 0x258   :  { %v1203_v20 = vadd.f32 %v1202_v56, %v8504_v34 }
 0x259   :  { %v1307_v46 = vsel %vm1185_vm8, %v1270_v57, 0.0 }
 0x25a   :  { %v1110_v37 = vpop.f32.mrf.mxu0  ;;  %1204 = vadd.xlane.f32.xlu2 %v1203_v20  ;;  %v1308_v39 = vadd.f32 %v1307_v46, %v1269_v40 }
 0x25b   :  { %v1111_v9 = vadd.f32 %v1110_v37, %v1063_v49  ;;  %v1158_v31 = vpop.f32.mrf.mxu1  ;;  %v1273_v49 = vmul.f32 %v8521_v17, %v8521_v17 }
 0x25d   :  { %v8652_v25 = vadd.f32 %v1158_v31, %v1111_v9  ;;  %v1068_v9 = vadd.f32 %v8535_v8, %v1020_v51 }
 0x25f   :  { %v1272_v27 = vmul.f32 %v8652_v25, %v8652_v25  ;;  %v1206_v60 = vsel %vm1185_vm8, %v8652_v25, 0.0 }
 0x260   :  { %v1207_v20 = vadd.f32 %v1206_v60, %v8510_v44 }
 0x261   :  { %v1311_v6 = vsel %vm1185_vm8, %v1272_v27, 0.0 }
 0x262   :  { %v1113_v62 = vpop.f32.mrf.mxu0  ;;  %1309 = vadd.xlane.f32.xlu2 %v1308_v39  ;;  %v1312_v0 = vadd.f32 %v1311_v6, %v1271_v14  ;;  %v1025_v6 = vadd.f32 %v8549_v21, %v8545_v12 }
 0x263   :  { %v1114_v38 = vadd.f32 %v1113_v62, %v8531_v3  ;;  %v1161_v16 = vpop.f32.mrf.mxu1 }
 0x264   :  { %1313 = vadd.xlane.f32.xlu0 %v1312_v0  ;;  %v1073_v60 = vadd.f32 %v8551_v43, %v1025_v6  ;;  %v1275_v43 = vmul.f32 %v8527_v61, %v8527_v61  ;;  %v838_v6 = vadd.f32 %v8435_v1, %v8419_v63 }
 0x265   :  { %v8663_v36 = vadd.f32 %v1161_v16, %v1114_v38  ;;  %v833_v38 = vadd.f32 %v8398_v19, %v8382_v4 }
 0x267   :  { %v1274_v56 = vmul.f32 %v8663_v36, %v8663_v36  ;;  %v1210_v2 = vsel %vm1185_vm8, %v8663_v36, 0.0 }
 0x268   :  { %v1211_v58 = vadd.f32 %v1210_v2, %v8521_v17 }
 0x269   :  { %v1315_v3 = vsel %vm1185_vm8, %v1274_v56, 0.0 }
 0x26a   :  { %v1115_v57 = vpop.f32.mrf.mxu0  ;;  %1208 = vadd.xlane.f32.xlu2 %v1207_v20  ;;  %v1316_v37 = vadd.f32 %v1315_v3, %v1273_v49  ;;  %v881_v3 = vadd.f32 %v8400_v13, %v833_v38 }
 0x26b   :  { %v1163_v31 = vpop.f32.mrf.mxu1  ;;  %v1116_v46 = vadd.f32 %v1115_v57, %v1068_v9 }
 0x26c   :  { %1317 = vadd.xlane.f32.xlu1 %v1316_v37  ;;  %v8704_v57 = vadd.f32 %v8543_v52, %v881_v3  ;;  %v1030_v52 = vadd.f32 %v8565_v55, %v8561_v48 }
 0x26d   :  { %v8679_v40 = vadd.f32 %v1163_v31, %v1116_v46 }
 0x26e   :  { %v1078_v38 = vadd.f32 %v8567_v33, %v1030_v52 }
 0x26f   :  { %v1214_v8 = vsel %vm1185_vm8, %v8679_v40, 0.0  ;;  %v1276_v21 = vmul.f32 %v8679_v40, %v8679_v40 }
 0x270   :  { %v1215_v16 = vadd.f32 %v1214_v8, %v8527_v61 }
 0x271   :  { %v1319_v19 = vsel %vm1185_vm8, %v1276_v21, 0.0 }
 0x272   :  { %v1118_v27 = vpop.f32.mrf.mxu0  ;;  %1212 = vadd.xlane.f32.xlu2 %v1211_v58  ;;  %v1320_v9 = vadd.f32 %v1319_v19, %v1275_v43 }
 0x273   :  { %v1119_v39 = vadd.f32 %v1118_v27, %v8547_v7  ;;  %v1166_v14 = vpop.f32.mrf.mxu1  ;;  %v1277_v7 = vmul.f32 %v8538_v15, %v8538_v15 }
 0x275   :  { %v8684_v62 = vadd.f32 %v1166_v14, %v1119_v39  ;;  %v1279_v14 = vmul.f32 %v8704_v57, %v8704_v57 }
 0x277   :  { %v1278_v0 = vmul.f32 %v8684_v62, %v8684_v62  ;;  %v1218_v27 = vsel %vm1185_vm8, %v8684_v62, 0.0 }
 0x278   :  { %v1219_v8 = vadd.f32 %v1218_v27, %v8538_v15 }
 0x279   :  { %v1323_v12 = vsel %vm1185_vm8, %v1278_v0, 0.0 }
 0x27a   :  { %v1120_v51 = vpop.f32.mrf.mxu0  ;;  %1216 = vadd.xlane.f32.xlu2 %v1215_v16  ;;  %v1324_v56 = vadd.f32 %v1323_v12, %v1277_v7  ;;  %v886_v7 = vadd.f32 %v8437_v30, %v838_v6 }
 0x27b   :  { %v1121_v20 = vadd.f32 %v1120_v51, %v1073_v60  ;;  %v1168_v49 = vpop.f32.mrf.mxu1 }
 0x27c   :  { %1325 = vadd.xlane.f32.xlu0 %v1324_v56  ;;  %v8733_v63 = vadd.f32 %v8559_v5, %v886_v7 }
 0x27d   :  { %v8700_v4 = vadd.f32 %v1168_v49, %v1121_v20  ;;  %v1035_v49 = vadd.f32 %v8581_v29, %v8577_v28 }
 0x27f   :  { %v1222_v37 = vsel %vm1185_vm8, %v8700_v4, 0.0  ;;  %v1280_v13 = vmul.f32 %v8700_v4, %v8700_v4 }
 0x280   :  { %v1223_v31 = vadd.f32 %v1222_v37, %v8704_v57  ;;  %v1283_v37 = vmul.f32 %v8733_v63, %v8733_v63 }
 0x281   :  { %v1327_v39 = vsel %vm1185_vm8, %v1280_v13, 0.0 }
 0x282   :  { %v1123_v46 = vpop.f32.mrf.mxu0  ;;  %1321 = vadd.xlane.f32.xlu2 %v1320_v9  ;;  %1224 = vadd.xlane.f32.xlu1 %v1223_v31  ;;  %v1328_v0 = vadd.f32 %v1327_v39, %v1279_v14  ;;  %v1281_v9 = vmul.f32 %v8554_v47, %v8554_v47  ;;  %v13085_v14 = vld [vmem:[#allocation2_spill] sm:$0xff] }
 0x283   :  { %v1171_v2 = vpop.f32.mrf.mxu1  ;;  %v1124_v58 = vadd.f32 %v1123_v46, %v8563_v45  ;;  %v13084_v46 = vld [vmem:[#allocation4_spill] sm:$0xff] }
 0x285   :  { %v8725_v16 = vadd.f32 %v1171_v2, %v1124_v58  ;;  %v1083_v2 = vadd.f32 %v13084_v46, %v1035_v49 }
 0x287   :  { %v1226_v12 = vsel %vm1185_vm8, %v8725_v16, 0.0  ;;  %v1282_v30 = vmul.f32 %v8725_v16, %v8725_v16 }
 0x288   :  { %v1227_v21 = vadd.f32 %v1226_v12, %v8554_v47 }
 0x289   :  { %v1331_v43 = vsel %vm1185_vm8, %v1282_v30, 0.0 }
 0x28a   :  { %v1125_v48 = vpop.f32.mrf.mxu0  ;;  %1220 = vadd.xlane.f32.xlu2 %v1219_v8  ;;  %1329 = vadd.xlane.f32.xlu1 %v1328_v0  ;;  %v1332_v28 = vadd.f32 %v1331_v43, %v1281_v9  ;;  %v1289_v9 = vmul.f32 %v8586_v50, %v8586_v50 }
 0x28b   :  { %v1126_v45 = vadd.f32 %v1125_v48, %v1078_v38  ;;  %v1173_v55 = vpop.f32.mrf.mxu1  ;;  %v1285_v48 = vmul.f32 %v8570_v26, %v8570_v26 }
 0x28d   :  { %v8728_v60 = vadd.f32 %v1173_v55, %v1126_v45 }
 0x28f   :  { %v1230_v1 = vsel %vm1185_vm8, %v8728_v60, 0.0  ;;  %v1284_v51 = vmul.f32 %v8728_v60, %v8728_v60 }
 0x290   :  { %v1231_v33 = vadd.f32 %v1230_v1, %v8733_v63 }
 0x291   :  { %v1335_v19 = vsel %vm1185_vm8, %v1284_v51, 0.0 }
 0x292   :  { %v1128_v56 = vpop.f32.mrf.mxu0  ;;  %1232 = vadd.xlane.f32.xlu0 %v1231_v33  ;;  %1228 = vadd.xlane.f32.xlu2 %v1227_v21  ;;  %v1336_v13 = vadd.f32 %v1335_v19, %v1283_v37 }
 0x293   :  { %v1129_v20 = vadd.f32 %v1128_v56, %v8579_v42  ;;  %v1176_v5 = vpop.f32.mrf.mxu1  ;;  %v843_v42 = vadd.f32 %v8454_v54, %v8450_v35  ;;  %v13086_v35 = vld [vmem:[#allocation3_spill] sm:$0xff] }
 0x295   :  { %v8746_v3 = vadd.f32 %v1176_v5, %v1129_v20  ;;  %v891_v6 = vadd.f32 %v13085_v14, %v843_v42 }
 0x297   :  { %v1234_v31 = vsel %vm1185_vm8, %v8746_v3, 0.0  ;;  %v1286_v58 = vmul.f32 %v8746_v3, %v8746_v3  ;;  %v8766_v54 = vadd.f32 %v13086_v35, %v891_v6 }
 0x298   :  { %v1235_v29 = vadd.f32 %v1234_v31, %v8570_v26 }
 0x299   :  { %v1339_v0 = vsel %vm1185_vm8, %v1286_v58, 0.0  ;;  %v1287_v30 = vmul.f32 %v8766_v54, %v8766_v54 }
 0x29a   :  { %v1130_v52 = vpop.f32.mrf.mxu0  ;;  %1337 = vadd.xlane.f32.xlu0 %v1336_v13  ;;  %1333 = vadd.xlane.f32.xlu2 %v1332_v28  ;;  %v1340_v55 = vadd.f32 %v1339_v0, %v1285_v48 }
 0x29b   :  { %v1131_v27 = vadd.f32 %v1130_v52, %v1083_v2  ;;  %v1178_v39 = vpop.f32.mrf.mxu1  ;;  %1236 = vadd.xlane.f32.xlu1 %v1235_v29 }
 0x29d   :  { %v8763_v8 = vadd.f32 %v1178_v39, %v1131_v27 }
 0x29f   :  { %v1238_v38 = vsel %vm1185_vm8, %v8763_v8, 0.0  ;;  %v1288_v7 = vmul.f32 %v8763_v8, %v8763_v8 }
 0x2a0   :  { %v1239_v45 = vadd.f32 %v1238_v38, %v8766_v54 }
 0x2a1   :  { %v1343_v51 = vsel %vm1185_vm8, %v1288_v7, 0.0 }
 0x2a2   :  { %v1133_v12 = vpop.f32.mrf.mxu0  ;;  %1240 = vadd.xlane.f32.xlu2 %v1239_v45  ;;  %v1344_v5 = vadd.f32 %v1343_v51, %v1287_v30 }
 0x2a3   :  { %v1134_v1 = vadd.f32 %v1133_v12, %v8591_v10  ;;  %v1181_v33 = vpop.f32.mrf.mxu1  ;;  %1341 = vadd.xlane.f32.xlu1 %v1340_v55 }
 0x2a5   :  { %v8777_v21 = vadd.f32 %v1181_v33, %v1134_v1 }
 0x2a7   :  { %v1242_v56 = vsel %vm1185_vm8, %v8777_v21, 0.0  ;;  %v1290_v49 = vmul.f32 %v8777_v21, %v8777_v21 }
 0x2a8   :  { %v1243_v20 = vadd.f32 %v1242_v56, %v8586_v50 }
 0x2a9   :  { %v1347_v37 = vsel %vm1185_vm8, %v1290_v49, 0.0 }
 0x2aa   :  { %v1135_v19 = vpop.f32.mrf.mxu0  ;;  %1244 = vadd.xlane.f32.xlu0 %v1243_v20  ;;  %1345 = vadd.xlane.f32.xlu2 %v1344_v5  ;;  %v1348_v31 = vadd.f32 %v1347_v37, %v1289_v9  ;;  %v1561_v9 = vld [vmem:[%s12929_s5] sm:$0xff] }
 0x2ab   :  { %v1183_v10 = vpop.f32.mrf.mxu1 }
 0x2ad   :  { %v1189_v43 = vpop.xlane.xlu1 %1188 }
 0x2ae   :  { %v1246_v42 = vmul.f32 0.0051020407, %v1189_v43 }
 0x2b0   :  { %v1366_v29 = vmul.f32 %v1246_v42, %v1246_v42 }
 0x2b2   :  { %1349 = vadd.xlane.f32.xlu0 %v1348_v31 }
 0x2b5   :  { %v1193_v13 = vpop.xlane.xlu2 %1192  ;;  %v1294_v28 = vpop.xlane.xlu1 %1293 }
 0x2b6   :  { %v1351_v46 = vmul.f32 0.0051020407, %v1294_v28  ;;  %v1247_v52 = vmul.f32 0.0051020407, %v1193_v13 }
 0x2b8   :  { %v1381_v2 = vsub.f32 %v1351_v46, %v1366_v29  ;;  %v1367_v39 = vmul.f32 %v1247_v52, %v1247_v52 }
 0x2ba   :  { %v1396_v58 = vadd.f32 1e-05, %v1381_v2 }
 0x2bc   :  { %7153 = vrsqrt.f32 %v1396_v58  ;;  %vm1417_vm9 = vweird.f32 %v1396_v58 }
 0x2bd   :  { %v1298_v27 = vpop.xlane.xlu2 %1297 }
 0x2be   :  { %v1352_v14 = vmul.f32 0.0051020407, %v1298_v27 }
 0x2bf   :  { %v1302_v6 = vpop.xlane.xlu0 %1301 }
 0x2c0   :  { %v1382_v35 = vsub.f32 %v1352_v14, %v1367_v39  ;;  %v1353_v51 = vmul.f32 0.0051020407, %v1302_v6  ;;  %v1562_v14 = vld [vmem:[%s12929_s5 + $0x8] sm:$0xff] }
 0x2c2   :  { %v7154_v0 = vpop.eup %7153  ;;  %v1397_v38 = vadd.f32 1e-05, %v1382_v35 }
 0x2c3   :  { %v1412_v48 = vmul.f32 %v7154_v0, %v1396_v58  ;;  %vm1418_vm0 = vweird.f32 %v7154_v0 }
 0x2c4   :  { %7155 = vrsqrt.f32 %v1397_v38  ;;  %vm1419_vm10 = vmor %vm1417_vm9, %vm1418_vm0  ;;  %vm1427_vm12 = vweird.f32 %v1397_v38 }
 0x2c5   :  { %v1413_v45 = vmul.f32 %v7154_v0, %v1412_v48  ;;  %v1197_v55 = vpop.xlane.xlu2 %1196 }
 0x2c6   :  { %v1248_v7 = vmul.f32 0.0051020407, %v1197_v55 }
 0x2c7   :  { %v1414_v12 = vmul.f32 0.5, %v1413_v45  ;;  %v1201_v1 = vpop.xlane.xlu0 %1200  ;;  %v1306_v33 = vpop.xlane.xlu1 %1305 }
 0x2c8   :  { %v1368_v30 = vmul.f32 %v1248_v7, %v1248_v7  ;;  %v1249_v56 = vmul.f32 0.0051020407, %v1201_v1  ;;  %v1354_v10 = vmul.f32 0.0051020407, %v1306_v33 }
 0x2c9   :  { %v1415_v20 = vsub.f32 1.5, %v1414_v12 }
 0x2ca   :  { %v7156_v5 = vpop.eup %7155  ;;  %v1383_v49 = vsub.f32 %v1353_v51, %v1368_v30  ;;  %v1369_v19 = vmul.f32 %v1249_v56, %v1249_v56 }
 0x2cb   :  { %v1422_v43 = vmul.f32 %v7156_v5, %v1397_v38  ;;  %v1416_v37 = vmul.f32 %v7154_v0, %v1415_v20  ;;  %vm1428_vm11 = vweird.f32 %v7156_v5 }
 0x2cc   :  { %v1398_v31 = vadd.f32 1e-05, %v1383_v49  ;;  %v1384_v42 = vsub.f32 %v1354_v10, %v1369_v19  ;;  %vm1429_vm13 = vmor %vm1427_vm12, %vm1428_vm11 }
 0x2cd   :  { %v1423_v13 = vmul.f32 %v7156_v5, %v1422_v43  ;;  %v1205_v28 = vpop.xlane.xlu2 %1204  ;;  %v1420_v29 = vsel %vm1419_vm10, %v7154_v0, %v1416_v37 }
 0x2ce   :  { %7157 = vrsqrt.f32 %v1398_v31  ;;  %v1399_v46 = vadd.f32 1e-05, %v1384_v42  ;;  %v1576_v2 = vmul.f32 %v1561_v9, %v1420_v29  ;;  %v1250_v39 = vmul.f32 0.0051020407, %v1205_v28  ;;  %v1564_v28 = vld [vmem:[%s12929_s5 + $0x18] sm:$0xff] }
 0x2cf   :  { %v1424_v52 = vmul.f32 0.5, %v1423_v13  ;;  %vm1437_vm15 = vweird.f32 %v1398_v31 }
 0x2d0   :  { %7159 = vrsqrt.f32 %v1399_v46  ;;  %1593 = vperm.xlu1 %7131, %v1576_v2   ;;  %v1370_v55 = vmul.f32 %v1250_v39, %v1250_v39  ;;  %vm1447_vm3 = vweird.f32 %v1399_v46 }
 0x2d1   :  { %v1425_v27 = vsub.f32 1.5, %v1424_v52 }
 0x2d3   :  { %v1426_v58 = vmul.f32 %v7156_v5, %v1425_v27 }
 0x2d4   :  { %v7158_v6 = vpop.eup %7157 }
 0x2d5   :  { %v1432_v35 = vmul.f32 %v7158_v6, %v1398_v31  ;;  %v1310_v48 = vpop.xlane.xlu2 %1309  ;;  %v1430_v0 = vsel %vm1429_vm13, %v7156_v5, %v1426_v58  ;;  %vm1438_vm14 = vweird.f32 %v7158_v6  ;;  %v1563_v5 = vld [vmem:[%s12929_s5 + $0x10] sm:$0xff] }
 0x2d6   :  { %v7160_v45 = vpop.eup %7159  ;;  %v1355_v7 = vmul.f32 0.0051020407, %v1310_v48  ;;  %v1577_v12 = vmul.f32 %v1562_v14, %v1430_v0  ;;  %vm1439_vm2 = vmor %vm1437_vm15, %vm1438_vm14 }
 0x2d7   :  { %v1433_v1 = vmul.f32 %v7158_v6, %v1432_v35  ;;  %v1442_v33 = vmul.f32 %v7160_v45, %v1399_v46  ;;  %v1314_v19 = vpop.xlane.xlu0 %1313  ;;  %vm1448_vm1 = vweird.f32 %v7160_v45 }
 0x2d8   :  { %v1385_v51 = vsub.f32 %v1355_v7, %v1370_v55  ;;  %1598 = vperm.xlu2 %7132, %v1577_v12   ;;  %v1356_v29 = vmul.f32 0.0051020407, %v1314_v19  ;;  %vm1449_vm4 = vmor %vm1447_vm3, %vm1448_vm1 }
 0x2d9   :  { %v1434_v30 = vmul.f32 0.5, %v1433_v1  ;;  %v1443_v56 = vmul.f32 %v7160_v45, %v1442_v33 }
 0x2da   :  { %v1400_v38 = vadd.f32 1e-05, %v1385_v51 }
 0x2db   :  { %v1444_v20 = vmul.f32 0.5, %v1443_v56  ;;  %v1435_v49 = vsub.f32 1.5, %v1434_v30 }
 0x2dc   :  { %7161 = vrsqrt.f32 %v1400_v38  ;;  %vm1457_vm6 = vweird.f32 %v1400_v38 }
 0x2dd   :  { %v1209_v10 = vpop.xlane.xlu2 %1208  ;;  %v1436_v43 = vmul.f32 %v7158_v6, %v1435_v49  ;;  %v1445_v37 = vsub.f32 1.5, %v1444_v20 }
 0x2de   :  { %v1251_v9 = vmul.f32 0.0051020407, %v1209_v10 }
 0x2df   :  { %v1440_v42 = vsel %vm1439_vm2, %v7158_v6, %v1436_v43  ;;  %v1446_v13 = vmul.f32 %v7160_v45, %v1445_v37  ;;  %v1318_v6 = vpop.xlane.xlu1 %1317 }
 0x2e0   :  { %v1371_v2 = vmul.f32 %v1251_v9, %v1251_v9  ;;  %v1578_v52 = vmul.f32 %v1563_v5, %v1440_v42  ;;  %v1357_v7 = vmul.f32 0.0051020407, %v1318_v6 }
 0x2e1   :  { %v1450_v31 = vsel %vm1449_vm4, %v7160_v45, %v1446_v13  ;;  %v1565_v45 = vld [vmem:[%s12929_s5 + $0x20] sm:$0xff] }
 0x2e2   :  { %v7162_v27 = vpop.eup %7161  ;;  %v1386_v39 = vsub.f32 %v1356_v29, %v1371_v2  ;;  %1603 = vperm.xlu0 %7130, %v1578_v52   ;;  %v1579_v58 = vmul.f32 %v1564_v28, %v1450_v31  ;;  %v1566_v2 = vld [vmem:[%s12929_s5 + $0x28] sm:$0xff] }
 0x2e3   :  { %v1452_v14 = vmul.f32 %v7162_v27, %v1400_v38  ;;  %vm1458_vm5 = vweird.f32 %v7162_v27 }
 0x2e4   :  { %v1401_v35 = vadd.f32 1e-05, %v1386_v39  ;;  %1608 = vperm.xlu1 %7131, %v1579_v58   ;;  %vm1459_vm7 = vmor %vm1457_vm6, %vm1458_vm5 }
 0x2e5   :  { %v1453_v48 = vmul.f32 %v7162_v27, %v1452_v14  ;;  %v1213_v0 = vpop.xlane.xlu2 %1212 }
 0x2e6   :  { %7163 = vrsqrt.f32 %v1401_v35  ;;  %v1252_v46 = vmul.f32 0.0051020407, %v1213_v0  ;;  %vm1467_vm9 = vweird.f32 %v1401_v35 }
 0x2e7   :  { %v1454_v55 = vmul.f32 0.5, %v1453_v48 }
 0x2e8   :  { %v1372_v12 = vmul.f32 %v1252_v46, %v1252_v46 }
 0x2e9   :  { %v1455_v1 = vsub.f32 1.5, %v1454_v55 }
 0x2ea   :  { %v1387_v33 = vsub.f32 %v1357_v7, %v1372_v12 }
 0x2eb   :  { %v1456_v51 = vmul.f32 %v7162_v27, %v1455_v1  ;;  %v1567_v1 = vld [vmem:[%s12929_s5 + $0x30] sm:$0xff] }
 0x2ec   :  { %v7164_v30 = vpop.eup %7163  ;;  %v1402_v56 = vadd.f32 1e-05, %v1387_v33 }
 0x2ed   :  { %v1462_v20 = vmul.f32 %v7164_v30, %v1401_v35  ;;  %v1217_v49 = vpop.xlane.xlu2 %1216  ;;  %v1460_v19 = vsel %vm1459_vm7, %v7162_v27, %v1456_v51  ;;  %vm1468_vm0 = vweird.f32 %v7164_v30 }
 0x2ee   :  { %7165 = vrsqrt.f32 %v1402_v56  ;;  %v1580_v10 = vmul.f32 %v1565_v45, %v1460_v19  ;;  %v1253_v37 = vmul.f32 0.0051020407, %v1217_v49  ;;  %vm1469_vm10 = vmor %vm1467_vm9, %vm1468_vm0  ;;  %vm1477_vm12 = vweird.f32 %v1402_v56 }
 0x2ef   :  { %v1463_v43 = vmul.f32 %v7164_v30, %v1462_v20  ;;  %v1326_v55 = vpop.xlane.xlu0 %1325 }
 0x2f0   :  { %1613 = vperm.xlu0 %7130, %v1580_v10   ;;  %v1373_v52 = vmul.f32 %v1253_v37, %v1253_v37  ;;  %v1359_v20 = vmul.f32 0.0051020407, %v1326_v55 }
 0x2f1   :  { %v1464_v5 = vmul.f32 0.5, %v1463_v43 }
 0x2f3   :  { %v1465_v9 = vsub.f32 1.5, %v1464_v5 }
 0x2f4   :  { %v7166_v42 = vpop.eup %7165 }
 0x2f5   :  { %v1472_v38 = vmul.f32 %v7166_v42, %v1402_v56  ;;  %v1322_v13 = vpop.xlane.xlu2 %1321  ;;  %v1225_v28 = vpop.xlane.xlu1 %1224  ;;  %v1466_v29 = vmul.f32 %v7164_v30, %v1465_v9  ;;  %vm1478_vm11 = vweird.f32 %v7166_v42 }
 0x2f6   :  { %v1358_v31 = vmul.f32 0.0051020407, %v1322_v13  ;;  %v1255_v0 = vmul.f32 0.0051020407, %v1225_v28  ;;  %vm1479_vm13 = vmor %vm1477_vm12, %vm1478_vm11 }
 0x2f7   :  { %v1473_v27 = vmul.f32 %v7166_v42, %v1472_v38  ;;  %v1470_v39 = vsel %vm1469_vm10, %v7164_v30, %v1466_v29 }
 0x2f8   :  { %v1388_v58 = vsub.f32 %v1358_v31, %v1373_v52  ;;  %v1581_v14 = vmul.f32 %v1566_v2, %v1470_v39  ;;  %v1375_v33 = vmul.f32 %v1255_v0, %v1255_v0 }
 0x2f9   :  { %v1474_v48 = vmul.f32 0.5, %v1473_v27 }
 0x2fa   :  { %v1403_v6 = vadd.f32 1e-05, %v1388_v58  ;;  %1618 = vperm.xlu2 %7132, %v1581_v14   ;;  %v1568_v58 = vld [vmem:[%s12929_s5 + $0x38] sm:$0xff] }
 0x2fb   :  { %v1475_v46 = vsub.f32 1.5, %v1474_v48 }
 0x2fc   :  { %7167 = vrsqrt.f32 %v1403_v6  ;;  %vm1487_vm15 = vweird.f32 %v1403_v6 }
 0x2fd   :  { %v1221_v35 = vpop.xlane.xlu2 %1220  ;;  %v1330_v7 = vpop.xlane.xlu1 %1329  ;;  %v1476_v12 = vmul.f32 %v7166_v42, %v1475_v46 }
 0x2fe   :  { %v1254_v51 = vmul.f32 0.0051020407, %v1221_v35  ;;  %v1360_v45 = vmul.f32 0.0051020407, %v1330_v7 }
 0x2ff   :  { %v1480_v30 = vsel %vm1479_vm13, %v7166_v42, %v1476_v12 }
 0x300   :  { %v1374_v49 = vmul.f32 %v1254_v51, %v1254_v51  ;;  %v1390_v19 = vsub.f32 %v1360_v45, %v1375_v33  ;;  %v1582_v10 = vmul.f32 %v1567_v1, %v1480_v30 }
 0x302   :  { %v7168_v43 = vpop.eup %7167  ;;  %v1389_v5 = vsub.f32 %v1359_v20, %v1374_v49  ;;  %v1405_v37 = vadd.f32 1e-05, %v1390_v19  ;;  %1623 = vperm.xlu1 %7131, %v1582_v10  }
 0x303   :  { %v1482_v9 = vmul.f32 %v7168_v43, %v1403_v6  ;;  %vm1488_vm14 = vweird.f32 %v7168_v43 }
 0x304   :  { %v1404_v38 = vadd.f32 1e-05, %v1389_v5  ;;  %7169 = vrsqrt.f32 %v1405_v37  ;;  %vm1489_vm1 = vmor %vm1487_vm15, %vm1488_vm14  ;;  %vm1507_vm3 = vweird.f32 %v1405_v37 }
 0x305   :  { %v1483_v56 = vmul.f32 %v7168_v43, %v1482_v9  ;;  %v1233_v13 = vpop.xlane.xlu0 %1232  ;;  %v1229_v28 = vpop.xlane.xlu2 %1228 }
 0x306   :  { %7171 = vrsqrt.f32 %v1404_v38  ;;  %v1257_v2 = vmul.f32 0.0051020407, %v1233_v13  ;;  %v1256_v31 = vmul.f32 0.0051020407, %v1229_v28  ;;  %vm1497_vm6 = vweird.f32 %v1404_v38 }
 0x307   :  { %v1484_v29 = vmul.f32 0.5, %v1483_v56 }
 0x308   :  { %v1377_v46 = vmul.f32 %v1257_v2, %v1257_v2  ;;  %v1376_v12 = vmul.f32 %v1256_v31, %v1256_v31  ;;  %v1569_v31 = vld [vmem:[%s12929_s5 + $0x40] sm:$0xff] }
 0x309   :  { %v1485_v52 = vsub.f32 1.5, %v1484_v29 }
 0x30a   :  { %v7170_v42 = vpop.eup %7169 }
 0x30b   :  { %v1502_v27 = vmul.f32 %v7170_v42, %v1405_v37  ;;  %v1486_v39 = vmul.f32 %v7168_v43, %v1485_v52  ;;  %vm1508_vm2 = vweird.f32 %v7170_v42 }
 0x30c   :  { %v7172_v14 = vpop.eup %7171  ;;  %vm1509_vm5 = vmor %vm1507_vm3, %vm1508_vm2 }
 0x30d   :  { %v1492_v48 = vmul.f32 %v7172_v14, %v1404_v38  ;;  %v1503_v0 = vmul.f32 %v7170_v42, %v1502_v27  ;;  %v1338_v55 = vpop.xlane.xlu0 %1337  ;;  %v1334_v35 = vpop.xlane.xlu2 %1333  ;;  %v1490_v7 = vsel %vm1489_vm1, %v7168_v43, %v1486_v39  ;;  %v1570_v43 = vld [vmem:[%s12929_s5 + $0x48] sm:$0xff]  ;;  %vm1498_vm4 = vweird.f32 %v7172_v14 }
 0x30e   :  { %v1362_v1 = vmul.f32 0.0051020407, %v1338_v55  ;;  %v1361_v33 = vmul.f32 0.0051020407, %v1334_v35  ;;  %v1237_v51 = vpop.xlane.xlu1 %1236  ;;  %v1583_v45 = vmul.f32 %v1568_v58, %v1490_v7  ;;  %vm1499_vm7 = vmor %vm1497_vm6, %vm1498_vm4 }
 0x30f   :  { %v1493_v30 = vmul.f32 %v7172_v14, %v1492_v48  ;;  %v1504_v20 = vmul.f32 0.5, %v1503_v0  ;;  %v1258_v56 = vmul.f32 0.0051020407, %v1237_v51 }
 0x310   :  { %v1392_v6 = vsub.f32 %v1362_v1, %v1377_v46  ;;  %v1391_v49 = vsub.f32 %v1361_v33, %v1376_v12  ;;  %1628 = vperm.xlu0 %7130, %v1583_v45  }
 0x311   :  { %v1494_v19 = vmul.f32 0.5, %v1493_v30  ;;  %v1505_v10 = vsub.f32 1.5, %v1504_v20  ;;  %v1378_v39 = vmul.f32 %v1258_v56, %v1258_v56 }
 0x312   :  { %v1407_v5 = vadd.f32 1e-05, %v1392_v6  ;;  %v1406_v9 = vadd.f32 1e-05, %v1391_v49 }
 0x313   :  { %v1506_v13 = vmul.f32 %v7170_v42, %v1505_v10  ;;  %v1495_v28 = vsub.f32 1.5, %v1494_v19 }
 0x314   :  { %7173 = vrsqrt.f32 %v1407_v5  ;;  %vm1527_vm10 = vweird.f32 %v1407_v5  ;;  %vm1517_vm12 = vweird.f32 %v1406_v9 }
 0x315   :  { %7175 = vrsqrt.f32 %v1406_v9  ;;  %v1241_v29 = vpop.xlane.xlu2 %1240  ;;  %v1510_v2 = vsel %vm1509_vm5, %v7170_v42, %v1506_v13  ;;  %v1496_v52 = vmul.f32 %v7172_v14, %v1495_v28 }
 0x316   :  { %v1342_v37 = vpop.xlane.xlu1 %1341  ;;  %v1585_v27 = vmul.f32 %v1570_v43, %v1510_v2  ;;  %v1259_v35 = vmul.f32 0.0051020407, %v1241_v29  ;;  %v1572_v29 = vld [vmem:[%s12929_s5 + $0x58] sm:$0xff] }
 0x317   :  { %v1363_v58 = vmul.f32 0.0051020407, %v1342_v37  ;;  %v1500_v48 = vsel %vm1499_vm7, %v7172_v14, %v1496_v52 }
 0x318   :  { %1638 = vperm.xlu1 %7131, %v1585_v27   ;;  %v1584_v0 = vmul.f32 %v1569_v31, %v1500_v48  ;;  %v1379_v30 = vmul.f32 %v1259_v35, %v1259_v35  ;;  %v1571_v31 = vld [vmem:[%s12929_s5 + $0x50] sm:$0xff] }
 0x319   :  { %v1393_v46 = vsub.f32 %v1363_v58, %v1378_v39 }
 0x31a   :  { %v7174_v55 = vpop.eup %7173  ;;  %1633 = vperm.xlu2 %7132, %v1584_v0  }
 0x31b   :  { %v7176_v7 = vpop.eup %7175  ;;  %v1522_v42 = vmul.f32 %v7174_v55, %v1407_v5  ;;  %v1408_v12 = vadd.f32 1e-05, %v1393_v46  ;;  %vm1528_vm0 = vweird.f32 %v7174_v55 }
 0x31c   :  { %v1512_v38 = vmul.f32 %v7176_v7, %v1406_v9  ;;  %vm1518_vm9 = vweird.f32 %v7176_v7  ;;  %vm1529_vm11 = vmor %vm1527_vm10, %vm1528_vm0  ;;  %vm2163_vm0 = vcmask 1043456  }
 0x31d   :  { %v1523_v1 = vmul.f32 %v7174_v55, %v1522_v42  ;;  %7177 = vrsqrt.f32 %v1408_v12  ;;  %v1245_v33 = vpop.xlane.xlu0 %1244  ;;  %v1346_v51 = vpop.xlane.xlu2 %1345  ;;  %vm1519_vm13 = vmor %vm1517_vm12, %vm1518_vm9  ;;  %vm1537_vm15 = vweird.f32 %v1408_v12  ;;  %vm2027_vm9 = vcmask 982016  }
 0x31e   :  { %v1513_v45 = vmul.f32 %v7176_v7, %v1512_v38  ;;  %v1364_v20 = vmul.f32 0.0051020407, %v1346_v51  ;;  %v1260_v19 = vmul.f32 0.0051020407, %v1245_v33 }
 0x31f   :  { %v1524_v6 = vmul.f32 0.5, %v1523_v1 }
 0x320   :  { %v1514_v49 = vmul.f32 0.5, %v1513_v45  ;;  %v1394_v14 = vsub.f32 %v1364_v20, %v1379_v30  ;;  %v1380_v37 = vmul.f32 %v1260_v19, %v1260_v19 }
 0x321   :  { %v1525_v10 = vsub.f32 1.5, %v1524_v6 }
 0x322   :  { %v1409_v56 = vadd.f32 1e-05, %v1394_v14  ;;  %v1515_v13 = vsub.f32 1.5, %v1514_v49 }
 0x323   :  { %v7178_v43 = vpop.eup %7177  ;;  %v1526_v28 = vmul.f32 %v7174_v55, %v1525_v10 }
 0x324   :  { %v1532_v2 = vmul.f32 %v7178_v43, %v1408_v12  ;;  %7179 = vrsqrt.f32 %v1409_v56  ;;  %v1516_v52 = vmul.f32 %v7176_v7, %v1515_v13  ;;  %vm1538_vm14 = vweird.f32 %v7178_v43  ;;  %v1574_v12 = vld [vmem:[%s12929_s5 + $0x68] sm:$0xff] }
 0x325   :  { %v1350_v27 = vpop.xlane.xlu0 %1349  ;;  %v1530_v39 = vsel %vm1529_vm11, %v7174_v55, %v1526_v28  ;;  %v1573_v55 = vld [vmem:[%s12929_s5 + $0x60] sm:$0xff]  ;;  %vm1539_vm1 = vmor %vm1537_vm15, %vm1538_vm14  ;;  %vm1547_vm3 = vweird.f32 %v1409_v56 }
 0x326   :  { %v1533_v58 = vmul.f32 %v7178_v43, %v1532_v2  ;;  %v1365_v48 = vmul.f32 0.0051020407, %v1350_v27  ;;  %v1587_v5 = vmul.f32 %v1572_v29, %v1530_v39  ;;  %v1520_v0 = vsel %vm1519_vm13, %v7176_v7, %v1516_v52  ;;  %v1575_v52 = vld [vmem:[%s12929_s5 + $0x70] sm:$0xff] }
 0x327   :  { %v1586_v46 = vmul.f32 %v1571_v31, %v1520_v0 }
 0x328   :  { %v1534_v35 = vmul.f32 0.5, %v1533_v58  ;;  %v1395_v42 = vsub.f32 %v1365_v48, %v1380_v37  ;;  %1648 = vperm.xlu2 %7132, %v1587_v5  }
 0x329   :  { %1643 = vperm.xlu0 %7130, %v1586_v46  }
 0x32a   :  { %v7180_v38 = vpop.eup %7179  ;;  %v1410_v1 = vadd.f32 1e-05, %v1395_v42  ;;  %v1535_v9 = vsub.f32 1.5, %v1534_v35 }
 0x32b   :  { %v1542_v33 = vmul.f32 %v7180_v38, %v1409_v56  ;;  %vm1548_vm2 = vweird.f32 %v7180_v38 }
 0x32c   :  { %7181 = vrsqrt.f32 %v1410_v1  ;;  %v1536_v51 = vmul.f32 %v7178_v43, %v1535_v9  ;;  %vm1549_vm4 = vmor %vm1547_vm3, %vm1548_vm2  ;;  %vm1557_vm6 = vweird.f32 %v1410_v1 }
 0x32d   :  { %v1543_v45 = vmul.f32 %v7180_v38, %v1542_v33 }
 0x32e   :  { %v1540_v7 = vsel %vm1539_vm1, %v7178_v43, %v1536_v51 }
 0x32f   :  { %v1544_v30 = vmul.f32 0.5, %v1543_v45  ;;  %v1588_v20 = vmul.f32 %v1573_v55, %v1540_v7 }
 0x331   :  { %1653 = vperm.xlu1 %7131, %v1588_v20   ;;  %v1545_v6 = vsub.f32 1.5, %v1544_v30 }
 0x332   :  { %v7182_v49 = vpop.eup %7181  ;;  %v8835_v37 = vpop.permute.xlu2 %1598 }
 0x333   :  { %v1552_v14 = vmul.f32 %v7182_v49, %v1410_v1  ;;  %v1546_v19 = vmul.f32 %v7180_v38, %v1545_v6  ;;  %vm1558_vm5 = vweird.f32 %v7182_v49 }
 0x334   :  { %vm1559_vm7 = vmor %vm1557_vm6, %vm1558_vm5 }
 0x335   :  { %v1553_v10 = vmul.f32 %v7182_v49, %v1552_v14  ;;  %v1550_v13 = vsel %vm1549_vm4, %v7180_v38, %v1546_v19 }
 0x336   :  { %v1589_v28 = vmul.f32 %v1574_v12, %v1550_v13 }
 0x337   :  { %v1554_v29 = vmul.f32 0.5, %v1553_v10 }
 0x338   :  { %1658 = vperm.xlu0 %7130, %v1589_v28  }
 0x339   :  { %v1555_v43 = vsub.f32 1.5, %v1554_v29 }
 0x33b   :  { %v1556_v2 = vmul.f32 %v7182_v49, %v1555_v43 }
 0x33d   :  { %v1560_v56 = vsel %vm1559_vm7, %v7182_v49, %v1556_v2 }
 0x33e   :  { %v1590_v31 = vmul.f32 %v1575_v52, %v1560_v56 }
 0x340   :  { %1663 = vperm.xlu2 %7132, %v1590_v31  }
 0x342   :  { %v8839_v39 = vpop.permute.xlu1 %1593 }
 0x354   :  { %v8837_v27 = vpop.permute.xlu2 %1618  ;;  %v8841_v58 = vpop.permute.xlu0 %1603 }
 0x356   :  { %v8843_v5 = vpop.permute.xlu1 %1608 }
 0x362   :  { %v1614_v0 = vpop.permute.xlu0 %1613 }
 0x374   :  { %v1634_v48 = vpop.permute.xlu2 %1633  ;;  %v1624_v35 = vpop.permute.xlu1 %1623 }
 0x382   :  { %v1649_v46 = vpop.permute.xlu2 %1648  ;;  %v1629_v42 = vpop.permute.xlu0 %1628 }
 0x383   :  { %v1688_v28 = vmul.f32 %v1649_v46, %v8733_v63  ;;  %v1689_v29 = vmul.f32 %v1649_v46, %v8728_v60  ;;  %v1680_v63 = vmul.f32 %v1629_v42, %v8527_v61  ;;  %v1681_v60 = vmul.f32 %v1629_v42, %v8679_v40  ;;  %v7072_v46 = vld [vmem:[%s12930_s6 + $0x20] sm:$0xff]  ;;  %v7073_v42 = vld [vmem:[%s12930_s6 + $0x28] sm:$0xff] }
 0x384   :  { %v1676_v61 = vmul.f32 %v8837_v27, %v8510_v44  ;;  %v1671_v44 = vmul.f32 %v8841_v58, %v8617_v18 }
 0x38a   :  { %v1639_v7 = vpop.permute.xlu1 %1638 }
 0x39a   :  { %v1664_v38 = vpop.permute.xlu2 %1663 }
 0x39b   :  { %v1694_v1 = vmul.f32 %v1664_v38, %v8586_v50  ;;  %v1695_v9 = vmul.f32 %v1664_v38, %v8777_v21  ;;  %v1644_v30 = vpop.permute.xlu0 %1643  ;;  %v7091_v38 = vld [vmem:[%s12930_s6 + $0xb8] sm:$0xff] }
 0x39c   :  { %v1686_v19 = vmul.f32 %v1644_v30, %v8554_v47  ;;  %v1687_v13 = vmul.f32 %v1644_v30, %v8725_v16  ;;  %v1682_v47 = vmul.f32 %v1634_v48, %v8538_v15  ;;  %v1683_v16 = vmul.f32 %v1634_v48, %v8684_v62 }
 0x39d   :  { %v1710_v33 = vpack.c.bf16 %v1694_v1, %v1694_v1  ;;  %v1711_v51 = vpack.c.bf16 %v1695_v9, %v1695_v9  ;;  %v1674_v15 = vmul.f32 %v1614_v0, %v8504_v34  ;;  %v1675_v62 = vmul.f32 %v1614_v0, %v8644_v32  ;;  %v7089_v0 = vld [vmem:[%s12930_s6 + $0xa8] sm:$0xff]  ;;  %v7074_v1 = vld [vmem:[%s12930_s6 + $0x30] sm:$0xff]  ;;  %v7092_v9 = vld [vmem:[%s12930_s6 + $0xc0] sm:$0xff] }
 0x39e   :  { %v1673_v34 = vmul.f32 %v8843_v5, %v8628_v23  ;;  %v1670_v32 = vmul.f32 %v8841_v58, %v8487_v53  ;;  %v1668_v23 = vmul.f32 %v8835_v37, %v8476_v24  ;;  %v1669_v53 = vmul.f32 %v8835_v37, %v8604_v59  ;;  %v7069_v24 = vld [vmem:[%s12930_s6 + $0x8] sm:$0xff]  ;;  %v7087_v59 = vld [vmem:[%s12930_s6 + $0x98] sm:$0xff]  ;;  %v7070_v37 = vld [vmem:[%s12930_s6 + $0x10] sm:$0xff] }
 0x39f   :  { %v2165_v55 = vsel %vm2163_vm0, %v1710_v33, 0  ;;  %v2168_v45 = vsel %vm2163_vm0, %v1711_v51, 0  ;;  %v1700_v40 = vpack.c.bf16 %v1676_v61, %v1674_v15  ;;  %v7075_v33 = vld [vmem:[%s12930_s6 + $0x38] sm:$0xff]  ;;  %v7093_v51 = vld [vmem:[%s12930_s6 + $0xc8] sm:$0xff]  ;;  %v7094_v15 = vld [vmem:[%s12930_s6 + $0xd0] sm:$0xff] }
 0x3a0   :  { %2170 = vmatpush.bf16.msrb.mxu0 %v2165_v55  ;;  %7113 = vmatpush.bf16.msra.mxu2 %v2165_v55  ;;  %v1699_v48 = vpack.c.bf16 %v1673_v34, %v1671_v44 }
 0x3a1   :  { %2404 = vmatpush.bf16.msrb.mxu1 %v2168_v45  ;;  %7121 = vmatpush.bf16.msra.mxu3 %v2168_v45 }
 0x3a3   :  { %v1654_v20 = vpop.permute.xlu1 %1653 }
 0x3a4   :  { %v1690_v49 = vmul.f32 %v1654_v20, %v8570_v26  ;;  %v1691_v14 = vmul.f32 %v1654_v20, %v8746_v3  ;;  %v1684_v26 = vmul.f32 %v1639_v7, %v8704_v57  ;;  %v1706_v3 = vpack.c.bf16 %v1688_v28, %v1686_v19 }
 0x3a5   :  { %v1678_v57 = vmul.f32 %v1624_v35, %v8521_v17  ;;  %v1677_v17 = vmul.f32 %v8837_v27, %v8652_v25  ;;  %v1666_v25 = vmul.f32 %v8839_v39, %v8470_v41  ;;  %v7068_v41 = vld [vmem:[%s12930_s6] sm:$0xff] }
 0x3a6   :  { %v1704_v43 = vpack.c.bf16 %v1684_v26, %v1682_v47 }
 0x3a7   :  { %v1702_v52 = vpack.c.bf16 %v1680_v63, %v1678_v57  ;;  %v1701_v31 = vpack.c.bf16 %v1677_v17, %v1675_v62  ;;  %v1696_v18 = vpack.c.bf16 %v1668_v23, %v1666_v25 }
 0x3aa   :  { %v1659_v6 = vpop.permute.xlu0 %1658 }
 0x3ab   :  { %v1692_v50 = vmul.f32 %v1659_v6, %v8766_v54  ;;  %v1693_v21 = vmul.f32 %v1659_v6, %v8763_v8  ;;  %v1685_v54 = vmul.f32 %v1639_v7, %v8700_v4  ;;  %v1707_v8 = vpack.c.bf16 %v1689_v29, %v1687_v13  ;;  %v7076_v6 = vld [vmem:[%s12930_s6 + $0x40] sm:$0xff] }
 0x3ac   :  { %v1679_v4 = vmul.f32 %v1624_v35, %v8663_v36  ;;  %v1672_v36 = vmul.f32 %v8843_v5, %v8493_v22  ;;  %v1667_v22 = vmul.f32 %v8839_v39, %v8596_v11  ;;  %v7086_v11 = vld [vmem:[%s12930_s6 + $0x90] sm:$0xff]  ;;  %v7088_v39 = vld [vmem:[%s12930_s6 + $0xa0] sm:$0xff]  ;;  %v7071_v5 = vld [vmem:[%s12930_s6 + $0x18] sm:$0xff] }
 0x3ad   :  { %v1708_v12 = vpack.c.bf16 %v1692_v50, %v1690_v49  ;;  %v1709_v10 = vpack.c.bf16 %v1693_v21, %v1691_v14  ;;  %v1705_v2 = vpack.c.bf16 %v1685_v54, %v1683_v16  ;;  %v7090_v35 = vld [vmem:[%s12930_s6 + $0xb0] sm:$0xff] }
 0x3ae   :  { %v1703_v56 = vpack.c.bf16 %v1681_v60, %v1679_v4  ;;  %v1698_v27 = vpack.c.bf16 %v1672_v36, %v1670_v32  ;;  %v1697_v58 = vpack.c.bf16 %v1669_v53, %v1667_v22  ;;  %v7077_v22 = vld [vmem:[%s12930_s6 + $0x48] sm:$0xff] }
 0x3af   :  { %2171 = vmatpush.bf16.msrb.mxu0 %v1708_v12  ;;  %7114 = vmatpush.bf16.msra.mxu2 %v1708_v12 }
 0x3b0   :  { %2405 = vmatpush.bf16.msrb.mxu1 %v1709_v10  ;;  %7122 = vmatpush.bf16.msra.mxu3 %v1709_v10 }
 0x3b3   :  { %2172 = vmatpush.bf16.msrb.mxu0 %v1706_v3  ;;  %7115 = vmatpush.bf16.msra.mxu2 %v1706_v3 }
 0x3b4   :  { %2406 = vmatpush.bf16.msrb.mxu1 %v1707_v8  ;;  %7123 = vmatpush.bf16.msra.mxu3 %v1707_v8 }
 0x3b7   :  { %2173 = vmatpush.bf16.msrb.mxu0 %v1704_v43  ;;  %7116 = vmatpush.bf16.msra.mxu2 %v1704_v43 }
 0x3b8   :  { %2407 = vmatpush.bf16.msrb.mxu1 %v1705_v2  ;;  %7124 = vmatpush.bf16.msra.mxu3 %v1705_v2 }
 0x3bb   :  { %2174 = vmatpush.bf16.msrb.mxu0 %v1702_v52  ;;  %7117 = vmatpush.bf16.msra.mxu2 %v1702_v52 }
 0x3bc   :  { %2408 = vmatpush.bf16.msrb.mxu1 %v1703_v56  ;;  %7125 = vmatpush.bf16.msra.mxu3 %v1703_v56 }
 0x3bf   :  { %2175 = vmatpush.bf16.msrb.mxu0 %v1700_v40  ;;  %7118 = vmatpush.bf16.msra.mxu2 %v1700_v40 }
 0x3c0   :  { %2409 = vmatpush.bf16.msrb.mxu1 %v1701_v31  ;;  %7126 = vmatpush.bf16.msra.mxu3 %v1701_v31 }
 0x3c3   :  { %2176 = vmatpush.bf16.msrb.mxu0 %v1698_v27  ;;  %7119 = vmatpush.bf16.msra.mxu2 %v1698_v27 }
 0x3c4   :  { %2410 = vmatpush.bf16.msrb.mxu1 %v1699_v48  ;;  %7127 = vmatpush.bf16.msra.mxu3 %v1699_v48 }
 0x3c7   :  { %2177 = vmatpush.bf16.msrb.mxu0 %v1696_v18  ;;  %7120 = vmatpush.bf16.msra.mxu2 %v1696_v18 }
 0x3c8   :  { %2411 = vmatpush.bf16.msrb.mxu1 %v1697_v58  ;;  %7128 = vmatpush.bf16.msra.mxu3 %v1697_v58 }
 0x3ca   :  { %6978 = vmatmul.msk.bf16.vlgmr.msrb.gmra.mxu0 %vm2027_vm9, %v7068_v41  ;;  %6996 = vmatmul.msk.bf16.vlgmr.msra.gmra.mxu2 %vm2027_vm9, %v7086_v11 }
 0x3cb   :  { %7023 = vmatmul.msk.bf16.vlgmr.msrb.gmra.mxu1 %vm2027_vm9, %v7068_v41  ;;  %7041 = vmatmul.msk.bf16.vlgmr.msra.gmra.mxu3 %vm2027_vm9, %v7086_v11 }
 0x3da   :  { %6979 = vmatmul.msk.bf16.gmra.mxu0 %vm2027_vm9, %v7069_v24  ;;  %6997 = vmatmul.msk.bf16.gmra.mxu2 %vm2027_vm9, %v7087_v59 }
 0x3db   :  { %7024 = vmatmul.msk.bf16.gmra.mxu1 %vm2027_vm9, %v7069_v24  ;;  %7042 = vmatmul.msk.bf16.gmra.mxu3 %vm2027_vm9, %v7087_v59 }
 0x3ea   :  { %6980 = vmatmul.msk.bf16.gmra.mxu0 %vm2027_vm9, %v7070_v37  ;;  %6998 = vmatmul.msk.bf16.gmra.mxu2 %vm2027_vm9, %v7088_v39 }
 0x3eb   :  { %7025 = vmatmul.msk.bf16.gmra.mxu1 %vm2027_vm9, %v7070_v37  ;;  %7043 = vmatmul.msk.bf16.gmra.mxu3 %vm2027_vm9, %v7088_v39 }
 0x3fa   :  { %6981 = vmatmul.msk.bf16.gmra.mxu0 %vm2027_vm9, %v7071_v5  ;;  %6999 = vmatmul.msk.bf16.gmra.mxu2 %vm2027_vm9, %v7089_v0 }
 0x3fb   :  { %7026 = vmatmul.msk.bf16.gmra.mxu1 %vm2027_vm9, %v7071_v5  ;;  %7044 = vmatmul.msk.bf16.gmra.mxu3 %vm2027_vm9, %v7089_v0 }
 0x40a   :  { %6982 = vmatmul.msk.bf16.gmra.mxu0 %vm2027_vm9, %v7072_v46  ;;  %7000 = vmatmul.msk.bf16.gmra.mxu2 %vm2027_vm9, %v7090_v35 }
 0x40b   :  { %7027 = vmatmul.msk.bf16.gmra.mxu1 %vm2027_vm9, %v7072_v46  ;;  %7045 = vmatmul.msk.bf16.gmra.mxu3 %vm2027_vm9, %v7090_v35 }
 0x41a   :  { %6983 = vmatmul.msk.bf16.gmra.mxu0 %vm2027_vm9, %v7073_v42  ;;  %7001 = vmatmul.msk.bf16.gmra.mxu2 %vm2027_vm9, %v7091_v38 }
 0x41b   :  { %7028 = vmatmul.msk.bf16.gmra.mxu1 %vm2027_vm9, %v7073_v42  ;;  %7046 = vmatmul.msk.bf16.gmra.mxu3 %vm2027_vm9, %v7091_v38 }
 0x42a   :  { %6984 = vmatmul.msk.bf16.gmra.mxu0 %vm2027_vm9, %v7074_v1  ;;  %7002 = vmatmul.msk.bf16.gmra.mxu2 %vm2027_vm9, %v7092_v9 }
 0x42b   :  { %7029 = vmatmul.msk.bf16.gmra.mxu1 %vm2027_vm9, %v7074_v1  ;;  %7047 = vmatmul.msk.bf16.gmra.mxu3 %vm2027_vm9, %v7092_v9 }
 0x43a   :  { %6985 = vmatmul.msk.bf16.gmra.mxu0 %vm2027_vm9, %v7075_v33  ;;  %7003 = vmatmul.msk.bf16.gmra.mxu2 %vm2027_vm9, %v7093_v51 }
 0x43b   :  { %7030 = vmatmul.msk.bf16.gmra.mxu1 %vm2027_vm9, %v7075_v33  ;;  %7048 = vmatmul.msk.bf16.gmra.mxu3 %vm2027_vm9, %v7093_v51 }
 0x447   :  { %v8963_v55 = vpop.f32.mrf.mxu0 }
 0x448   :  { %v8967_v45 = vpop.f32.mrf.mxu1  ;;  %v3088_v49 = vmul.f32 %v8963_v55, %v8963_v55 }
 0x449   :  { %v2638_v7 = vsel %vm1185_vm8, %v8967_v45, 0.0  ;;  %v3089_v20 = vmul.f32 %v8967_v45, %v8967_v45 }
 0x44a   :  { %v2639_v30 = vadd.f32 %v2638_v7, %v8963_v55  ;;  %6986 = vmatmul.msk.bf16.gmra.mxu0 %vm2027_vm9, %v7076_v6  ;;  %7004 = vmatmul.msk.bf16.gmra.mxu2 %vm2027_vm9, %v7094_v15 }
 0x44b   :  { %v3268_v50 = vsel %vm1185_vm8, %v3089_v20, 0.0  ;;  %7031 = vmatmul.msk.bf16.gmra.mxu1 %vm2027_vm9, %v7076_v6  ;;  %7049 = vmatmul.msk.bf16.gmra.mxu3 %vm2027_vm9, %v7094_v15  ;;  %v7078_v20 = vld [vmem:[%s12930_s6 + $0x50] sm:$0xff] }
 0x44c   :  { %2640 = vadd.xlane.f32.xlu1 %v2639_v30  ;;  %v3269_v10 = vadd.f32 %v3268_v50, %v3088_v49 }
 0x44d   :  { %v8993_v29 = vpop.f32.mrf.mxu2 }
 0x44e   :  { %v8988_v12 = vpop.f32.mrf.mxu3  ;;  %v3160_v62 = vmul.f32 %v8993_v29, %v8993_v29 }
 0x44f   :  { %v8979_v14 = vpop.f32.mrf.mxu0  ;;  %v2782_v26 = vsel %vm1185_vm8, %v8988_v12, 0.0  ;;  %v3161_v2 = vmul.f32 %v8988_v12, %v8988_v12 }
 0x450   :  { %v8984_v21 = vpop.f32.mrf.mxu1  ;;  %v3090_v3 = vmul.f32 %v8979_v14, %v8979_v14  ;;  %v2783_v16 = vadd.f32 %v2782_v26, %v8993_v29 }
 0x451   :  { %v2642_v19 = vsel %vm1185_vm8, %v8984_v21, 0.0  ;;  %v3091_v28 = vmul.f32 %v8984_v21, %v8984_v21  ;;  %v3412_v56 = vsel %vm1185_vm8, %v3161_v2, 0.0 }
 0x452   :  { %v2643_v13 = vadd.f32 %v2642_v19, %v8979_v14  ;;  %v3413_v34 = vadd.f32 %v3412_v56, %v3160_v62 }
 0x453   :  { %v3272_v8 = vsel %vm1185_vm8, %v3091_v28, 0.0 }
 0x454   :  { %3270 = vadd.xlane.f32.xlu1 %v3269_v10  ;;  %2644 = vadd.xlane.f32.xlu0 %v2643_v13  ;;  %v3273_v43 = vadd.f32 %v3272_v8, %v3090_v3 }
 0x455   :  { %v9017_v52 = vpop.f32.mrf.mxu2 }
 0x456   :  { %v9010_v57 = vpop.f32.mrf.mxu3  ;;  %v3162_v48 = vmul.f32 %v9017_v52, %v9017_v52 }
 0x457   :  { %v8999_v54 = vpop.f32.mrf.mxu0  ;;  %v2786_v61 = vsel %vm1185_vm8, %v9010_v57, 0.0  ;;  %v3163_v44 = vmul.f32 %v9010_v57, %v9010_v57 }
 0x458   :  { %v9002_v47 = vpop.f32.mrf.mxu1  ;;  %v3092_v17 = vmul.f32 %v8999_v54, %v8999_v54  ;;  %v2787_v31 = vadd.f32 %v2786_v61, %v9017_v52 }
 0x459   :  { %v2646_v63 = vsel %vm1185_vm8, %v9002_v47, 0.0  ;;  %v3093_v4 = vmul.f32 %v9002_v47, %v9002_v47  ;;  %v3416_v53 = vsel %vm1185_vm8, %v3163_v44, 0.0 }
 0x45a   :  { %v2647_v60 = vadd.f32 %v2646_v63, %v8999_v54  ;;  %6987 = vmatmul.msk.bf16.gmra.mxu0 %vm2027_vm9, %v7077_v22  ;;  %v3417_v11 = vadd.f32 %v3416_v53, %v3162_v48 }
 0x45b   :  { %v3276_v36 = vsel %vm1185_vm8, %v3093_v4, 0.0  ;;  %7032 = vmatmul.msk.bf16.gmra.mxu1 %vm2027_vm9, %v7077_v22 }
 0x45c   :  { %2784 = vadd.xlane.f32.xlu1 %v2783_v16  ;;  %3274 = vadd.xlane.f32.xlu0 %v3273_v43  ;;  %v3277_v32 = vadd.f32 %v3276_v36, %v3092_v17 }
 0x45d   :  { %2648 = vadd.xlane.f32.xlu2 %v2647_v60  ;;  %v9050_v58 = vpop.f32.mrf.mxu2 }
 0x45e   :  { %v9036_v27 = vpop.f32.mrf.mxu3  ;;  %v3164_v35 = vmul.f32 %v9050_v58, %v9050_v58 }
 0x45f   :  { %v9034_v25 = vpop.f32.mrf.mxu0  ;;  %v2790_v23 = vsel %vm1185_vm8, %v9036_v27, 0.0  ;;  %v3165_v39 = vmul.f32 %v9036_v27, %v9036_v27 }
 0x460   :  { %v9029_v40 = vpop.f32.mrf.mxu1  ;;  %v2791_v41 = vadd.f32 %v2790_v23, %v9050_v58  ;;  %v3094_v46 = vmul.f32 %v9034_v25, %v9034_v25 }
 0x461   :  { %v2650_v18 = vsel %vm1185_vm8, %v9029_v40, 0.0  ;;  %v3095_v37 = vmul.f32 %v9029_v40, %v9029_v40  ;;  %v3420_v38 = vsel %vm1185_vm8, %v3165_v39, 0.0 }
 0x462   :  { %v2651_v24 = vadd.f32 %v2650_v18, %v9034_v25  ;;  %v3421_v51 = vadd.f32 %v3420_v38, %v3164_v35 }
 0x463   :  { %v3280_v42 = vsel %vm1185_vm8, %v3095_v37, 0.0 }
 0x464   :  { %3414 = vadd.xlane.f32.xlu1 %v3413_v34  ;;  %2788 = vadd.xlane.f32.xlu0 %v2787_v31  ;;  %v3281_v9 = vadd.f32 %v3280_v42, %v3094_v46 }
 0x465   :  { %3278 = vadd.xlane.f32.xlu2 %v3277_v32  ;;  %v9080_v6 = vpop.f32.mrf.mxu2 }
 0x466   :  { %v9073_v7 = vpop.f32.mrf.mxu3  ;;  %13089 = vst [vmem:[#allocation3_spill] sm:$0xff] %v9080_v6  ;;  %v3166_v2 = vmul.f32 %v9080_v6, %v9080_v6 }
 0x467   :  { %v9062_v0 = vpop.f32.mrf.mxu0  ;;  %13087 = vst [vmem:[#allocation4_spill] sm:$0xff] %v9073_v7  ;;  %v2794_v50 = vsel %vm1185_vm8, %v9073_v7, 0.0  ;;  %v3167_v16 = vmul.f32 %v9073_v7, %v9073_v7 }
 0x468   :  { %v9054_v59 = vpop.f32.mrf.mxu1  ;;  %v3096_v49 = vmul.f32 %v9062_v0, %v9062_v0  ;;  %v2795_v28 = vadd.f32 %v2794_v50, %v9080_v6 }
 0x469   :  { %v2654_v5 = vsel %vm1185_vm8, %v9054_v59, 0.0  ;;  %v3097_v33 = vmul.f32 %v9054_v59, %v9054_v59  ;;  %v3424_v4 = vsel %vm1185_vm8, %v3167_v16, 0.0 }
 0x46a   :  { %v2655_v1 = vadd.f32 %v2654_v5, %v9062_v0  ;;  %6988 = vmatmul.msk.bf16.gmra.mxu0 %vm2027_vm9, %v7078_v20  ;;  %v3425_v17 = vadd.f32 %v3424_v4, %v3166_v2 }
 0x46b   :  { %v3284_v19 = vsel %vm1185_vm8, %v3097_v33, 0.0  ;;  %7033 = vmatmul.msk.bf16.gmra.mxu1 %vm2027_vm9, %v7078_v20 }
 0x46c   :  { %3418 = vadd.xlane.f32.xlu0 %v3417_v11  ;;  %2652 = vadd.xlane.f32.xlu1 %v2651_v24  ;;  %v3285_v26 = vadd.f32 %v3284_v19, %v3096_v49 }
 0x46d   :  { %2792 = vadd.xlane.f32.xlu2 %v2791_v41  ;;  %v9103_v60 = vpop.f32.mrf.mxu2 }
 0x46e   :  { %v9095_v8 = vpop.f32.mrf.mxu3  ;;  %13092 = vst [vmem:[#allocation7_spill] sm:$0xff] %v9103_v60  ;;  %v3168_v22 = vmul.f32 %v9103_v60, %v9103_v60 }
 0x46f   :  { %v9089_v10 = vpop.f32.mrf.mxu0  ;;  %13091 = vst [vmem:[#allocation6_spill] sm:$0xff] %v9095_v8  ;;  %v2798_v43 = vsel %vm1185_vm8, %v9095_v8, 0.0  ;;  %v3169_v36 = vmul.f32 %v9095_v8, %v9095_v8 }
 0x470   :  { %v9075_v30 = vpop.f32.mrf.mxu1  ;;  %13090 = vst [vmem:[#allocation5_spill] sm:$0xff] %v9089_v10  ;;  %v3098_v15 = vmul.f32 %v9089_v10, %v9089_v10  ;;  %v2799_v62 = vadd.f32 %v2798_v43, %v9103_v60 }
 0x471   :  { %13088 = vst [vmem:[#allocation2_spill] sm:$0xff] %v9075_v30  ;;  %v2658_v13 = vsel %vm1185_vm8, %v9075_v30, 0.0  ;;  %v3099_v63 = vmul.f32 %v9075_v30, %v9075_v30  ;;  %v3428_v48 = vsel %vm1185_vm8, %v3169_v36, 0.0 }
 0x472   :  { %v2659_v3 = vadd.f32 %v2658_v13, %v9089_v10  ;;  %v3429_v41 = vadd.f32 %v3428_v48, %v3168_v22 }
 0x473   :  { %v3288_v56 = vsel %vm1185_vm8, %v3099_v63, 0.0 }
 0x474   :  { %3282 = vadd.xlane.f32.xlu1 %v3281_v9  ;;  %2656 = vadd.xlane.f32.xlu0 %v2655_v1  ;;  %v3289_v34 = vadd.f32 %v3288_v56, %v3098_v15 }
 0x475   :  { %3422 = vadd.xlane.f32.xlu2 %v3421_v51  ;;  %v9125_v23 = vpop.f32.mrf.mxu2 }
 0x476   :  { %v9118_v32 = vpop.f32.mrf.mxu3  ;;  %13096 = vst [vmem:[#allocation11_spill] sm:$0xff] %v9125_v23  ;;  %v3170_v35 = vmul.f32 %v9125_v23, %v9125_v23 }
 0x477   :  { %v9116_v31 = vpop.f32.mrf.mxu0  ;;  %13095 = vst [vmem:[#allocation10_spill] sm:$0xff] %v9118_v32  ;;  %v2802_v53 = vsel %vm1185_vm8, %v9118_v32, 0.0  ;;  %v3171_v39 = vmul.f32 %v9118_v32, %v9118_v32 }
 0x478   :  { %v9112_v61 = vpop.f32.mrf.mxu1  ;;  %13094 = vst [vmem:[#allocation9_spill] sm:$0xff] %v9116_v31  ;;  %v2803_v24 = vadd.f32 %v2802_v53, %v9125_v23  ;;  %v3100_v46 = vmul.f32 %v9116_v31, %v9116_v31 }
 0x479   :  { %13093 = vst [vmem:[#allocation8_spill] sm:$0xff] %v9112_v61  ;;  %v2662_v44 = vsel %vm1185_vm8, %v9112_v61, 0.0  ;;  %v3101_v11 = vmul.f32 %v9112_v61, %v9112_v61  ;;  %v3432_v1 = vsel %vm1185_vm8, %v3171_v39, 0.0 }
 0x47a   :  { %v2663_v18 = vadd.f32 %v2662_v44, %v9116_v31  ;;  %v3433_v20 = vadd.f32 %v3432_v1, %v3170_v35 }
 0x47b   :  { %v3292_v42 = vsel %vm1185_vm8, %v3101_v11, 0.0 }
 0x47c   :  { %2796 = vadd.xlane.f32.xlu1 %v2795_v28  ;;  %3286 = vadd.xlane.f32.xlu0 %v3285_v26  ;;  %v3293_v33 = vadd.f32 %v3292_v42, %v3100_v46 }
 0x47d   :  { %2660 = vadd.xlane.f32.xlu2 %v2659_v3  ;;  %v9152_v50 = vpop.f32.mrf.mxu2 }
 0x47e   :  { %v9147_v9 = vpop.f32.mrf.mxu3  ;;  %13100 = vst [vmem:[#allocation15_spill] sm:$0xff] %v9152_v50 }
 0x47f   :  { %v9137_v5 = vpop.f32.mrf.mxu0  ;;  %13099 = vst [vmem:[#allocation14_spill] sm:$0xff] %v9147_v9  ;;  %v2806_v13 = vsel %vm1185_vm8, %v9147_v9, 0.0  ;;  %v3173_v4 = vmul.f32 %v9147_v9, %v9147_v9 }
 0x480   :  { %v9133_v37 = vpop.f32.mrf.mxu1  ;;  %13098 = vst [vmem:[#allocation13_spill] sm:$0xff] %v9137_v5  ;;  %v3102_v28 = vmul.f32 %v9137_v5, %v9137_v5  ;;  %v2807_v63 = vadd.f32 %v2806_v13, %v9152_v50 }
 0x481   :  { %13097 = vst [vmem:[#allocation12_spill] sm:$0xff] %v9133_v37  ;;  %v2666_v38 = vsel %vm1185_vm8, %v9133_v37, 0.0  ;;  %v3103_v49 = vmul.f32 %v9133_v37, %v9133_v37  ;;  %v3436_v36 = vsel %vm1185_vm8, %v3173_v4, 0.0 }
 0x482   :  { %v2667_v51 = vadd.f32 %v2666_v38, %v9137_v5 }
 0x483   :  { %v3296_v3 = vsel %vm1185_vm8, %v3103_v49, 0.0 }
 0x484   :  { %3426 = vadd.xlane.f32.xlu1 %v3425_v17  ;;  %2800 = vadd.xlane.f32.xlu0 %v2799_v62  ;;  %v3297_v2 = vadd.f32 %v3296_v3, %v3102_v28  ;;  %v3172_v17 = vmul.f32 %v9152_v50, %v9152_v50 }
 0x485   :  { %3290 = vadd.xlane.f32.xlu2 %v3289_v34  ;;  %v9173_v56 = vpop.f32.mrf.mxu2 }
 0x486   :  { %v9169_v15 = vpop.f32.mrf.mxu3  ;;  %13104 = vst [vmem:[#allocation19_spill] sm:$0xff] %v9173_v56  ;;  %v3437_v48 = vadd.f32 %v3436_v36, %v3172_v17  ;;  %v3174_v46 = vmul.f32 %v9173_v56, %v9173_v56 }
 0x487   :  { %v9163_v16 = vpop.f32.mrf.mxu0  ;;  %13103 = vst [vmem:[#allocation18_spill] sm:$0xff] %v9169_v15  ;;  %v2810_v34 = vsel %vm1185_vm8, %v9169_v15, 0.0  ;;  %v3175_v11 = vmul.f32 %v9169_v15, %v9169_v15 }
 0x488   :  { %v9154_v19 = vpop.f32.mrf.mxu1  ;;  %13102 = vst [vmem:[#allocation17_spill] sm:$0xff] %v9163_v16  ;;  %v3104_v44 = vmul.f32 %v9163_v16, %v9163_v16  ;;  %v2811_v53 = vadd.f32 %v2810_v34, %v9173_v56 }
 0x489   :  { %13101 = vst [vmem:[#allocation16_spill] sm:$0xff] %v9154_v19  ;;  %v2670_v26 = vsel %vm1185_vm8, %v9154_v19, 0.0  ;;  %v3105_v62 = vmul.f32 %v9154_v19, %v9154_v19  ;;  %v3440_v42 = vsel %vm1185_vm8, %v3175_v11, 0.0 }
 0x48a   :  { %v2671_v43 = vadd.f32 %v2670_v26, %v9163_v16 }
 0x48b   :  { %v3300_v22 = vsel %vm1185_vm8, %v3105_v62, 0.0 }
 0x48c   :  { %3430 = vadd.xlane.f32.xlu0 %v3429_v41  ;;  %2664 = vadd.xlane.f32.xlu1 %v2663_v18  ;;  %v3301_v18 = vadd.f32 %v3300_v22, %v3104_v44  ;;  %v7095_v22 = vld [vmem:[%s12930_s6 + $0xd8] sm:$0xff] }
 0x48d   :  { %2804 = vadd.xlane.f32.xlu2 %v2803_v24  ;;  %v9199_v1 = vpop.f32.mrf.mxu2  ;;  %7050 = vmatmul.msk.bf16.gmra.mxu3 %vm2027_vm9, %v7095_v22 }
 0x48e   :  { %v9188_v24 = vpop.f32.mrf.mxu3  ;;  %13108 = vst [vmem:[#allocation23_spill] sm:$0xff] %v9199_v1  ;;  %7005 = vmatmul.msk.bf16.gmra.mxu2 %vm2027_vm9, %v7095_v22 }
 0x48f   :  { %13106 = vst [vmem:[#allocation21_spill] sm:$0xff] %v9188_v24  ;;  %v9190_v39 = vpop.f32.mrf.mxu0  ;;  %v2814_v35 = vsel %vm1185_vm8, %v9188_v24, 0.0  ;;  %v3177_v28 = vmul.f32 %v9188_v24, %v9188_v24 }
 0x490   :  { %v9184_v41 = vpop.f32.mrf.mxu1  ;;  %13107 = vst [vmem:[#allocation22_spill] sm:$0xff] %v9190_v39 }
 0x491   :  { %13105 = vst [vmem:[#allocation20_spill] sm:$0xff] %v9184_v41  ;;  %v2674_v38 = vsel %vm1185_vm8, %v9184_v41, 0.0  ;;  %v3107_v13 = vmul.f32 %v9184_v41, %v9184_v41  ;;  %v3444_v4 = vsel %vm1185_vm8, %v3177_v28, 0.0 }
 0x494   :  { %3294 = vadd.xlane.f32.xlu1 %v3293_v33  ;;  %2668 = vadd.xlane.f32.xlu0 %v2667_v51  ;;  %v2815_v33 = vadd.f32 %v2814_v35, %v9199_v1  ;;  %v3441_v51 = vadd.f32 %v3440_v42, %v3174_v46 }
 0x495   :  { %3434 = vadd.xlane.f32.xlu2 %v3433_v20  ;;  %v2675_v20 = vadd.f32 %v2674_v38, %v9190_v39 }
 0x496   :  { %v9222_v44 = vpop.f32.mrf.mxu3 }
 0x497   :  { %v9211_v3 = vpop.f32.mrf.mxu0  ;;  %13111 = vst [vmem:[#allocation26_spill] sm:$0xff] %v9222_v44  ;;  %v2818_v11 = vsel %vm1185_vm8, %v9222_v44, 0.0 }
 0x498   :  { %v9203_v49 = vpop.f32.mrf.mxu1  ;;  %13110 = vst [vmem:[#allocation25_spill] sm:$0xff] %v9211_v3 }
 0x499   :  { %13109 = vst [vmem:[#allocation24_spill] sm:$0xff] %v9203_v49  ;;  %v2678_v26 = vsel %vm1185_vm8, %v9203_v49, 0.0  ;;  %v3109_v36 = vmul.f32 %v9203_v49, %v9203_v49 }
 0x49a   :  { %v2679_v62 = vadd.f32 %v2678_v26, %v9211_v3 }
 0x49b   :  { %v3308_v46 = vsel %vm1185_vm8, %v3109_v36, 0.0 }
 0x49c   :  { %2808 = vadd.xlane.f32.xlu1 %v2807_v63  ;;  %3298 = vadd.xlane.f32.xlu0 %v3297_v2  ;;  %v3106_v63 = vmul.f32 %v9190_v39, %v9190_v39  ;;  %v3304_v2 = vsel %vm1185_vm8, %v3107_v13, 0.0  ;;  %v3179_v13 = vmul.f32 %v9222_v44, %v9222_v44 }
 0x49d   :  { %2672 = vadd.xlane.f32.xlu2 %v2671_v43  ;;  %v3176_v43 = vmul.f32 %v9199_v1, %v9199_v1 }
 0x49e   :  { %v3305_v17 = vadd.f32 %v3304_v2, %v3106_v63  ;;  %v3448_v2 = vsel %vm1185_vm8, %v3179_v13, 0.0 }
 0x49f   :  { %v3445_v34 = vadd.f32 %v3444_v4, %v3176_v43  ;;  %v9238_v35 = vpop.f32.mrf.mxu0 }
 0x4a0   :  { %13114 = vst [vmem:[#allocation29_spill] sm:$0xff] %v9238_v35  ;;  %v3110_v4 = vmul.f32 %v9238_v35, %v9238_v35 }
 0x4a4   :  { %3438 = vadd.xlane.f32.xlu1 %v3437_v48  ;;  %2812 = vadd.xlane.f32.xlu0 %v2811_v53  ;;  %v9227_v48 = vpop.f32.mrf.mxu1  ;;  %v9230_v53 = vpop.f32.mrf.mxu2 }
 0x4a5   :  { %3302 = vadd.xlane.f32.xlu2 %v3301_v18  ;;  %13112 = vst [vmem:[#allocation27_spill] sm:$0xff] %v9227_v48  ;;  %v3108_v18 = vmul.f32 %v9211_v3, %v9211_v3  ;;  %v2682_v42 = vsel %vm1185_vm8, %v9227_v48, 0.0  ;;  %v2819_v38 = vadd.f32 %v2818_v11, %v9230_v53  ;;  %v3111_v28 = vmul.f32 %v9227_v48, %v9227_v48 }
 0x4a6   :  { %13113 = vst [vmem:[#allocation28_spill] sm:$0xff] %v9230_v53  ;;  %v3178_v43 = vmul.f32 %v9230_v53, %v9230_v53 }
 0x4a7   :  { %v3312_v36 = vsel %vm1185_vm8, %v3111_v28, 0.0 }
 0x4a8   :  { %v3449_v22 = vadd.f32 %v3448_v2, %v3178_v43  ;;  %v3313_v11 = vadd.f32 %v3312_v36, %v3110_v4 }
 0x4ac   :  { %3442 = vadd.xlane.f32.xlu0 %v3441_v51  ;;  %2676 = vadd.xlane.f32.xlu1 %v2675_v20  ;;  %v2683_v51 = vadd.f32 %v2682_v42, %v9238_v35  ;;  %v9244_v20 = vpop.f32.mrf.mxu3  ;;  %v9252_v63 = vpop.f32.mrf.mxu2 }
 0x4ad   :  { %2816 = vadd.xlane.f32.xlu2 %v2815_v33  ;;  %v3309_v33 = vadd.f32 %v3308_v46, %v3108_v18  ;;  %13115 = vst [vmem:[#allocation30_spill] sm:$0xff] %v9244_v20  ;;  %v2822_v26 = vsel %vm1185_vm8, %v9244_v20, 0.0  ;;  %v3181_v18 = vmul.f32 %v9244_v20, %v9244_v20  ;;  %v9267_v46 = vpop.f32.mrf.mxu0 }
 0x4ae   :  { %13116 = vst [vmem:[#allocation31_spill] sm:$0xff] %v9252_v63  ;;  %v3112_v48 = vmul.f32 %v9267_v46, %v9267_v46 }
 0x4af   :  { %13118 = vst [vmem:[#allocation33_spill] sm:$0xff] %v9267_v46 }
 0x4b4   :  { %3306 = vadd.xlane.f32.xlu1 %v3305_v17  ;;  %2680 = vadd.xlane.f32.xlu0 %v2679_v62  ;;  %v2823_v17 = vadd.f32 %v2822_v26, %v9252_v63  ;;  %v9269_v42 = vpop.f32.mrf.mxu3  ;;  %v9280_v26 = vpop.f32.mrf.mxu2 }
 0x4b5   :  { %3446 = vadd.xlane.f32.xlu2 %v3445_v34  ;;  %v9263_v34 = vpop.f32.mrf.mxu1  ;;  %13119 = vst [vmem:[#allocation34_spill] sm:$0xff] %v9269_v42  ;;  %v2826_v43 = vsel %vm1185_vm8, %v9269_v42, 0.0 }
 0x4b6   :  { %13117 = vst [vmem:[#allocation32_spill] sm:$0xff] %v9263_v34  ;;  %v2827_v36 = vadd.f32 %v2826_v43, %v9280_v26 }
 0x4b7   :  { %13120 = vst [vmem:[#allocation35_spill] sm:$0xff] %v9280_v26 }
 0x4bc   :  { %2820 = vadd.xlane.f32.xlu1 %v2819_v38  ;;  %3310 = vadd.xlane.f32.xlu0 %v3309_v33  ;;  %v2686_v38 = vsel %vm1185_vm8, %v9263_v34, 0.0  ;;  %v3180_v33 = vmul.f32 %v9252_v63, %v9252_v63 }
 0x4bd   :  { %2684 = vadd.xlane.f32.xlu2 %v2683_v51  ;;  %v3452_v51 = vsel %vm1185_vm8, %v3181_v18, 0.0  ;;  %v2687_v2 = vadd.f32 %v2686_v38, %v9267_v46  ;;  %v3183_v18 = vmul.f32 %v9269_v42, %v9269_v42  ;;  %v3182_v38 = vmul.f32 %v9280_v26, %v9280_v26  ;;  %v9306_v42 = vpop.f32.mrf.mxu3 }
 0x4be   :  { %v3453_v4 = vadd.f32 %v3452_v51, %v3180_v33  ;;  %13123 = vst [vmem:[#allocation38_spill] sm:$0xff] %v9306_v42 }
 0x4bf   :  { %v9259_v62 = vpop.xlane.xlu1 %2640 }
 0x4c4   :  { %3450 = vadd.xlane.f32.xlu1 %v3449_v22  ;;  %2824 = vadd.xlane.f32.xlu0 %v2823_v17  ;;  %v3113_v17 = vmul.f32 %v9263_v34, %v9263_v34  ;;  %v9288_v22 = vpop.f32.mrf.mxu1 }
 0x4c5   :  { %3314 = vadd.xlane.f32.xlu2 %v3313_v11  ;;  %13121 = vst [vmem:[#allocation36_spill] sm:$0xff] %v9288_v22  ;;  %v9292_v11 = vpop.f32.mrf.mxu0  ;;  %v2690_v51 = vsel %vm1185_vm8, %v9288_v22, 0.0  ;;  %v3115_v26 = vmul.f32 %v9288_v22, %v9288_v22  ;;  %v9336_v22 = vpop.f32.mrf.mxu3 }
 0x4c6   :  { %13122 = vst [vmem:[#allocation37_spill] sm:$0xff] %v9292_v11  ;;  %v3316_v33 = vsel %vm1185_vm8, %v3113_v17, 0.0  ;;  %v2691_v24 = vadd.f32 %v2690_v51, %v9292_v11  ;;  %v9311_v17 = vpop.f32.mrf.mxu2 }
 0x4c7   :  { %v9276_v13 = vpop.xlane.xlu0 %2644  ;;  %v9278_v28 = vpop.xlane.xlu1 %3270  ;;  %v3317_v35 = vadd.f32 %v3316_v33, %v3112_v48  ;;  %13124 = vst [vmem:[#allocation39_spill] sm:$0xff] %v9311_v17  ;;  %v3114_v48 = vmul.f32 %v9292_v11, %v9292_v11 }
 0x4c8   :  { %13127 = vst [vmem:[#allocation42_spill] sm:$0xff] %v9336_v22 }
 0x4cc   :  { %3454 = vadd.xlane.f32.xlu0 %v3453_v4  ;;  %2688 = vadd.xlane.f32.xlu1 %v2687_v2  ;;  %v9315_v46 = vpop.f32.mrf.mxu1 }
 0x4cd   :  { %2828 = vadd.xlane.f32.xlu2 %v2827_v36  ;;  %v3456_v36 = vsel %vm1185_vm8, %v3183_v18, 0.0  ;;  %13125 = vst [vmem:[#allocation40_spill] sm:$0xff] %v9315_v46  ;;  %v2830_v18 = vsel %vm1185_vm8, %v9306_v42, 0.0  ;;  %v2694_v33 = vsel %vm1185_vm8, %v9315_v46, 0.0  ;;  %v3117_v11 = vmul.f32 %v9315_v46, %v9315_v46 }
 0x4ce   :  { %v3457_v1 = vadd.f32 %v3456_v36, %v3182_v38  ;;  %v3320_v38 = vsel %vm1185_vm8, %v3115_v26, 0.0  ;;  %v3185_v26 = vmul.f32 %v9306_v42, %v9306_v42 }
 0x4cf   :  { %v9301_v43 = vpop.xlane.xlu0 %3274  ;;  %v2785_v2 = vpop.xlane.xlu1 %2784  ;;  %v3321_v19 = vadd.f32 %v3320_v38, %v3114_v48  ;;  %v2834_v48 = vsel %vm1185_vm8, %v9336_v22, 0.0 }
 0x4d0   :  { %v9303_v4 = vpop.xlane.xlu2 %2648  ;;  %v9313_v34 = vmul.f32 0.0051020407, %v2785_v2  ;;  %v9328_v2 = vpop.f32.mrf.mxu0 }
 0x4d1   :  { %13126 = vst [vmem:[#allocation41_spill] sm:$0xff] %v9328_v2  ;;  %v2695_v53 = vadd.f32 %v2694_v33, %v9328_v2  ;;  %v3184_v33 = vmul.f32 %v9311_v17, %v9311_v17  ;;  %v3116_v38 = vmul.f32 %v9328_v2, %v9328_v2  ;;  %v9366_v2 = vpop.f32.mrf.mxu3  ;;  %v9498_v30 = vmul.f32 0.0051020407, %v9303_v4 }
 0x4d2   :  { %v3754_v36 = vmul.f32 %v9313_v34, %v9313_v34  ;;  %13130 = vst [vmem:[#allocation45_spill] sm:$0xff] %v9366_v2 }
 0x4d4   :  { %3318 = vadd.xlane.f32.xlu1 %v3317_v35  ;;  %2692 = vadd.xlane.f32.xlu0 %v2691_v24  ;;  %v9360_v42 = vpop.f32.mrf.mxu1 }
 0x4d5   :  { %3458 = vadd.xlane.f32.xlu2 %v3457_v1  ;;  %v2831_v1 = vadd.f32 %v2830_v18, %v9311_v17  ;;  %v9342_v18 = vpop.f32.mrf.mxu2  ;;  %13129 = vst [vmem:[#allocation44_spill] sm:$0xff] %v9360_v42  ;;  %v3119_v20 = vmul.f32 %v9360_v42, %v9360_v42 }
 0x4d6   :  { %13128 = vst [vmem:[#allocation43_spill] sm:$0xff] %v9342_v18 }
 0x4d7   :  { %v9324_v35 = vpop.xlane.xlu0 %2788  ;;  %v3415_v24 = vpop.xlane.xlu1 %3414  ;;  %v3328_v50 = vsel %vm1185_vm8, %v3119_v20, 0.0 }
 0x4d8   :  { %v9326_v51 = vpop.xlane.xlu2 %3278  ;;  %v3664_v44 = vmul.f32 0.0051020407, %v3415_v24  ;;  %v9368_v39 = vpop.f32.mrf.mxu0 }
 0x4d9   :  { %13131 = vst [vmem:[#allocation46_spill] sm:$0xff] %v9368_v39 }
 0x4da   :  { %v3844_v16 = vsub.f32 %v3664_v44, %v3754_v36  ;;  %v3460_v44 = vsel %vm1185_vm8, %v3185_v26, 0.0  ;;  %v2835_v36 = vadd.f32 %v2834_v48, %v9342_v18  ;;  %v3187_v26 = vmul.f32 %v9336_v22, %v9336_v22 }
 0x4dc   :  { %2832 = vadd.xlane.f32.xlu1 %v2831_v1  ;;  %3322 = vadd.xlane.f32.xlu0 %v3321_v19  ;;  %v9340_v41 = vadd.f32 1e-05, %v3844_v16  ;;  %v3324_v16 = vsel %vm1185_vm8, %v3117_v11, 0.0  ;;  %v3461_v1 = vadd.f32 %v3460_v44, %v3184_v33  ;;  %v3186_v11 = vmul.f32 %v9342_v18, %v9342_v18  ;;  %v9394_v63 = vpop.f32.mrf.mxu1 }
 0x4dd   :  { %2696 = vadd.xlane.f32.xlu2 %v2695_v53  ;;  %v3325_v46 = vadd.f32 %v3324_v16, %v3116_v38  ;;  %v2838_v33 = vsel %vm1185_vm8, %v9366_v2, 0.0  ;;  %v3464_v48 = vsel %vm1185_vm8, %v3187_v26, 0.0  ;;  %v2698_v38 = vsel %vm1185_vm8, %v9360_v42, 0.0  ;;  %13133 = vst [vmem:[#allocation48_spill] sm:$0xff] %v9394_v63 }
 0x4de   :  { %7183 = vrsqrt.f32 %v9340_v41  ;;  %v3628_v18 = vmul.f32 0.0051020407, %v9278_v28  ;;  %v3465_v32 = vadd.f32 %v3464_v48, %v3186_v11  ;;  %v2699_v23 = vadd.f32 %v2698_v38, %v9368_v39 }
 0x4df   :  { %v9352_v24 = vpop.xlane.xlu0 %3418  ;;  %v9354_v19 = vpop.xlane.xlu1 %2652  ;;  %v2702_v28 = vsel %vm1185_vm8, %v9394_v63, 0.0  ;;  %v3118_v48 = vmul.f32 %v9368_v39, %v9368_v39  ;;  %vm4354_vm11 = vweird.f32 %v9340_v41 }
 0x4e0   :  { %v9357_v53 = vpop.xlane.xlu2 %2792  ;;  %v9421_v39 = vpop.f32.mrf.mxu3 }
 0x4e1   :  { %13135 = vst [vmem:[#allocation50_spill] sm:$0xff] %v9421_v39 }
 0x4e4   :  { %v9364_v17 = vpop.eup %7183  ;;  %3462 = vadd.xlane.f32.xlu1 %v3461_v1  ;;  %2836 = vadd.xlane.f32.xlu0 %v2835_v36  ;;  %v9384_v1 = vmul.f32 0.0051020407, %v9259_v62  ;;  %v9386_v36 = vpop.f32.mrf.mxu2 }
 0x4e5   :  { %3326 = vadd.xlane.f32.xlu2 %v3325_v46  ;;  %v4349_v44 = vmul.f32 %v9364_v17, %v9340_v41  ;;  %13132 = vst [vmem:[#allocation47_spill] sm:$0xff] %v9386_v36  ;;  %v2839_v22 = vadd.f32 %v2838_v33, %v9386_v36  ;;  %v3189_v33 = vmul.f32 %v9366_v2, %v9366_v2  ;;  %vm4355_vm10 = vweird.f32 %v9364_v17  ;;  %v9424_v20 = vpop.f32.mrf.mxu1 }
 0x4e6   :  { %v3718_v62 = vmul.f32 %v9384_v1, %v9384_v1  ;;  %v3188_v42 = vmul.f32 %v9386_v36, %v9386_v36  ;;  %v3121_v2 = vmul.f32 %v9394_v63, %v9394_v63  ;;  %13136 = vst [vmem:[#allocation51_spill] sm:$0xff] %v9424_v20  ;;  %vm4356_vm12 = vmor %vm4354_vm11, %vm4355_vm10 }
 0x4e7   :  { %v9379_v16 = vpop.xlane.xlu0 %2656  ;;  %v9381_v46 = vpop.xlane.xlu1 %3282  ;;  %v4350_v26 = vmul.f32 %v9364_v17, %v4349_v44 }
 0x4e8   :  { %v9398_v9 = vpop.xlane.xlu2 %3422  ;;  %v3808_v11 = vsub.f32 %v3628_v18, %v3718_v62  ;;  %v9404_v44 = vpop.f32.mrf.mxu0  ;;  %v3329_v62 = vadd.f32 %v3328_v50, %v3118_v48  ;;  %v2842_v48 = vsel %vm1185_vm8, %v9421_v39, 0.0 }
 0x4e9   :  { %13134 = vst [vmem:[#allocation49_spill] sm:$0xff] %v9404_v44  ;;  %v4351_v38 = vmul.f32 0.5, %v4350_v26  ;;  %v9454_v61 = vpop.f32.mrf.mxu3 }
 0x4ea   :  { %v9417_v18 = vadd.f32 1e-05, %v3808_v11  ;;  %v4924_v11 = vld [vmem:[%s12931_s7 + $0x120] sm:$0xff]  ;;  %13139 = vst [vmem:[#allocation54_spill] sm:$0xff] %v9454_v61 }
 0x4eb   :  { %v4352_v36 = vsub.f32 1.5, %v4351_v38 }
 0x4ec   :  { %3466 = vadd.xlane.f32.xlu0 %v3465_v32  ;;  %2700 = vadd.xlane.f32.xlu1 %v2699_v23  ;;  %v3468_v23 = vsel %vm1185_vm8, %v3189_v33, 0.0  ;;  %7185 = vrsqrt.f32 %v9417_v18  ;;  %vm3994_vm14 = vweird.f32 %v9417_v18 }
 0x4ed   :  { %2840 = vadd.xlane.f32.xlu2 %v2839_v22  ;;  %v2703_v22 = vadd.f32 %v2702_v28, %v9404_v44  ;;  %v3469_v26 = vadd.f32 %v3468_v23, %v3188_v42  ;;  %v4353_v33 = vmul.f32 %v9364_v17, %v4352_v36  ;;  %v9431_v28 = vpop.f32.mrf.mxu2  ;;  %v3120_v42 = vmul.f32 %v9404_v44, %v9404_v44  ;;  %v9490_v31 = vpop.f32.mrf.mxu1 }
 0x4ee   :  { %13137 = vst [vmem:[#allocation52_spill] sm:$0xff] %v9431_v28  ;;  %v3332_v36 = vsel %vm1185_vm8, %v3121_v2, 0.0  ;;  %v2843_v63 = vadd.f32 %v2842_v48, %v9431_v28  ;;  %v3191_v2 = vmul.f32 %v9421_v39, %v9421_v39  ;;  %v2846_v48 = vsel %vm1185_vm8, %v9454_v61, 0.0 }
 0x4ef   :  { %v9411_v49 = vpop.xlane.xlu0 %3286  ;;  %v9413_v32 = vpop.xlane.xlu1 %2796  ;;  %v4357_v23 = vsel %vm4356_vm12, %v9364_v17, %v4353_v33  ;;  %v3333_v44 = vadd.f32 %v3332_v36, %v3120_v42  ;;  %v7096_v42 = vld [vmem:[%s12930_s6 + $0xe0] sm:$0xff]  ;;  %13141 = vst [vmem:[#allocation56_spill] sm:$0xff] %v9490_v31 }
 0x4f0   :  { %v9429_v50 = vpop.xlane.xlu2 %2660  ;;  %7051 = vmatmul.msk.bf16.gmra.mxu3 %vm2027_vm9, %v7096_v42  ;;  %7006 = vmatmul.msk.bf16.gmra.mxu2 %vm2027_vm9, %v7096_v42 }
 0x4f2   :  { %v9462_v33 = vpop.eup %7185 }
 0x4f3   :  { %vm3995_vm13 = vweird.f32 %v9462_v33 }
 0x4f4   :  { %3330 = vadd.xlane.f32.xlu1 %v3329_v62  ;;  %2704 = vadd.xlane.f32.xlu0 %v2703_v22  ;;  %v9446_v22 = vpop.f32.mrf.mxu0  ;;  %v2706_v62 = vsel %vm1185_vm8, %v9424_v20, 0.0  ;;  %vm3996_vm15 = vmor %vm3994_vm14, %vm3995_vm13 }
 0x4f5   :  { %3470 = vadd.xlane.f32.xlu2 %v3469_v26  ;;  %13138 = vst [vmem:[#allocation53_spill] sm:$0xff] %v9446_v22  ;;  %v9450_v26 = vmul.f32 %v4924_v11, %v4357_v23  ;;  %v2707_v3 = vadd.f32 %v2706_v62, %v9446_v22  ;;  %v3123_v11 = vmul.f32 %v9424_v20, %v9424_v20  ;;  %v9471_v36 = vpop.f32.mrf.mxu2  ;;  %v9522_v37 = vpop.f32.mrf.mxu1 }
 0x4f6   :  { %13140 = vst [vmem:[#allocation55_spill] sm:$0xff] %v9471_v36  ;;  %v2847_v39 = vadd.f32 %v2846_v48, %v9471_v36  ;;  %v9500_v48 = vpop.f32.mrf.mxu3 }
 0x4f7   :  { %v9441_v41 = vpop.xlane.xlu0 %2800  ;;  %v9443_v38 = vpop.xlane.xlu1 %3426  ;;  %v9460_v17 = vmul.f32 %v9450_v26, %v9313_v34  ;;  %v3190_v34 = vmul.f32 %v9431_v28, %v9431_v28  ;;  %v3336_v28 = vsel %vm1185_vm8, %v3123_v11, 0.0  ;;  %13143 = vst [vmem:[#allocation58_spill] sm:$0xff] %v9500_v48  ;;  %v2710_v11 = vsel %vm1185_vm8, %v9490_v31, 0.0 }
 0x4f8   :  { %v9486_v20 = vpop.xlane.xlu2 %3290  ;;  %13146 = vst [vmem:[#allocation61_spill] sm:$0xff] %v9522_v37  ;;  %v3195_v5 = vmul.f32 %v9500_v48, %v9500_v48 }
 0x4fc   :  { %2844 = vadd.xlane.f32.xlu1 %v2843_v63  ;;  %3334 = vadd.xlane.f32.xlu0 %v3333_v44  ;;  %v3989_v63 = vmul.f32 %v9462_v33, %v9417_v18  ;;  %v3472_v44 = vsel %vm1185_vm8, %v3191_v2, 0.0  ;;  %v3193_v2 = vmul.f32 %v9454_v61, %v9454_v61  ;;  %v3720_v61 = vmul.f32 %v9498_v30, %v9498_v30 }
 0x4fd   :  { %2708 = vadd.xlane.f32.xlu2 %v2707_v3  ;;  %v3122_v3 = vmul.f32 %v9446_v22, %v9446_v22  ;;  %v3473_v42 = vadd.f32 %v3472_v44, %v3190_v34  ;;  %v9495_v22 = vpop.f32.mrf.mxu0  ;;  %v3192_v34 = vmul.f32 %v9471_v36, %v9471_v36  ;;  %v3630_v44 = vmul.f32 0.0051020407, %v9326_v51  ;;  %v9512_v4 = vpop.f32.mrf.mxu2 }
 0x4fe   :  { %v3990_v15 = vmul.f32 %v9462_v33, %v3989_v63  ;;  %13142 = vst [vmem:[#allocation57_spill] sm:$0xff] %v9495_v22 }
 0x4ff   :  { %v9482_v23 = vpop.xlane.xlu0 %3430  ;;  %v9484_v62 = vpop.xlane.xlu1 %2664  ;;  %v3337_v56 = vadd.f32 %v3336_v28, %v3122_v3  ;;  %v3476_v28 = vsel %vm1185_vm8, %v3193_v2, 0.0  ;;  %13144 = vst [vmem:[#allocation59_spill] sm:$0xff] %v9512_v4  ;;  %v3810_v10 = vsub.f32 %v3630_v44, %v3720_v61 }
 0x500   :  { %v3991_v63 = vmul.f32 0.5, %v3990_v15  ;;  %v9519_v36 = vpop.xlane.xlu2 %2804  ;;  %v3477_v15 = vadd.f32 %v3476_v28, %v3192_v34  ;;  %v3194_v34 = vmul.f32 %v9512_v4, %v9512_v4  ;;  %v3480_v28 = vsel %vm1185_vm8, %v3195_v5, 0.0 }
 0x501   :  { %13145 = vst [vmem:[#allocation60_spill] sm:$0xff] %v9519_v36 }
 0x502   :  { %v3992_v51 = vsub.f32 1.5, %v3991_v63 }
 0x504   :  { %3474 = vadd.xlane.f32.xlu1 %v3473_v42  ;;  %2848 = vadd.xlane.f32.xlu0 %v2847_v39  ;;  %v2711_v42 = vadd.f32 %v2710_v11, %v9495_v22  ;;  %v3900_v11 = vadd.f32 1e-05, %v3810_v10  ;;  %v3993_v44 = vmul.f32 %v9462_v33, %v3992_v51  ;;  %v4888_v10 = vld [vmem:[%s12931_s7] sm:$0xff] }
 0x505   :  { %3338 = vadd.xlane.f32.xlu2 %v3337_v56  ;;  %v2850_v56 = vsel %vm1185_vm8, %v9500_v48, 0.0  ;;  %v9526_v7 = vpop.f32.mrf.mxu0 }
 0x506   :  { %v2851_v2 = vadd.f32 %v2850_v56, %v9512_v4  ;;  %13147 = vst [vmem:[#allocation62_spill] sm:$0xff] %v9526_v7  ;;  %7187 = vrsqrt.f32 %v3900_v11  ;;  %v3481_v56 = vadd.f32 %v3480_v28, %v3194_v34  ;;  %vm4014_vm2 = vweird.f32 %v3900_v11 }
 0x507   :  { %v9508_v39 = vpop.xlane.xlu0 %2668  ;;  %v9510_v3 = vpop.xlane.xlu1 %3294 }
 0x50c   :  { %3478 = vadd.xlane.f32.xlu0 %v3477_v15  ;;  %2712 = vadd.xlane.f32.xlu1 %v2711_v42  ;;  %v3997_v42 = vsel %vm3996_vm15, %v9462_v33, %v3993_v44  ;;  %v9542_v15 = vpop.xlane.xlu2 %3434  ;;  %v7188_v33 = vpop.eup %7187 }
 0x50d   :  { %2852 = vadd.xlane.f32.xlu2 %v2851_v2  ;;  %13148 = vst [vmem:[#allocation63_spill] sm:$0xff] %v9542_v15  ;;  %v9544_v2 = vpop.f32.mrf.mxu1  ;;  %v4978_v5 = vmul.f32 %v4888_v10, %v3997_v42  ;;  %v9552_v34 = vpop.f32.mrf.mxu0  ;;  %v4009_v4 = vmul.f32 %v7188_v33, %v3900_v11  ;;  %vm4015_vm1 = vweird.f32 %v7188_v33 }
 0x50e   :  { %13149 = vst [vmem:[#allocation64_spill] sm:$0xff] %v9544_v2  ;;  %v2718_v51 = vsel %vm1185_vm8, %v9544_v2, 0.0  ;;  %vm4016_vm3 = vmor %vm4014_vm2, %vm4015_vm1 }
 0x50f   :  { %v9531_v63 = vpop.xlane.xlu0 %3298  ;;  %v9533_v61 = vpop.xlane.xlu1 %2808  ;;  %13151 = vst [vmem:[#allocation66_spill] sm:$0xff] %v9552_v34  ;;  %v2719_v44 = vadd.f32 %v2718_v51, %v9552_v34  ;;  %v5788_v28 = vmul.f32 %v4978_v5, %v9384_v1  ;;  %v4010_v36 = vmul.f32 %v7188_v33, %v4009_v4 }
 0x511   :  { %v4011_v8 = vmul.f32 0.5, %v4010_v36  ;;  %v4890_v36 = vld [vmem:[%s12931_s7 + $0x10] sm:$0xff] }
 0x514   :  { %v9559_v6 = vpop.xlane.xlu2 %2672 }
 0x515   :  { %3482 = vadd.xlane.f32.xlu2 %v3481_v56  ;;  %v5698_v56 = vld [vmem:[%s12932_s8] sm:$0xff]  ;;  %13152 = vst [vmem:[#allocation67_spill] sm:$0xff] %v9559_v6 }
 0x516   :  { %v5878_v42 = vsub.f32 %v5698_v56, %v5788_v28 }
 0x517   :  { %v9548_v48 = vpop.xlane.xlu0 %2812  ;;  %v9550_v18 = vpop.xlane.xlu1 %3438 }
 0x518   :  { %13150 = vst [vmem:[#allocation65_spill] sm:$0xff] %v9550_v18 }
 0x51c   :  { %v9569_v60 = vpop.xlane.xlu2 %3302 }
 0x51d   :  { %2720 = vadd.xlane.f32.xlu2 %v2719_v44  ;;  %13156 = vst [vmem:[#allocation71_spill] sm:$0xff] %v9569_v60  ;;  %v4012_v44 = vsub.f32 1.5, %v4011_v8  ;;  %v9585_v8 = vmul.f32 0.0051020407, %v9276_v13  ;;  %v3125_v13 = vmul.f32 %v9490_v31, %v9490_v31  ;;  %v9616_v31 = vmul.f32 0.0051020407, %v9324_v35 }
 0x51f   :  { %v9561_v10 = vpop.xlane.xlu0 %3442  ;;  %v9563_v15 = vpop.xlane.xlu1 %2676  ;;  %v4013_v18 = vmul.f32 %v7188_v33, %v4012_v44  ;;  %v3629_v44 = vmul.f32 0.0051020407, %v9301_v43  ;;  %v3124_v43 = vmul.f32 %v9495_v22, %v9495_v22  ;;  %v3755_v35 = vmul.f32 %v9616_v31, %v9616_v31 }
 0x520   :  { %13153 = vst [vmem:[#allocation68_spill] sm:$0xff] %v9563_v15  ;;  %5970 = vperm.xlu0 %7130, %v5878_v42  }
 0x521   :  { %v4017_v4 = vsel %vm4016_vm3, %v7188_v33, %v4013_v18  ;;  %v3719_v18 = vmul.f32 %v9585_v8, %v9585_v8 }
 0x522   :  { %v9581_v42 = vmul.f32 %v4890_v36, %v4017_v4 }
 0x523   :  { %v3809_v33 = vsub.f32 %v3629_v44, %v3719_v18  ;;  %v3340_v44 = vsel %vm1185_vm8, %v3125_v13, 0.0 }
 0x525   :  { %5070 = vperm.xlu1 %7131, %v4978_v5   ;;  %v9579_v5 = vpop.xlane.xlu2 %2816  ;;  %v3899_v4 = vadd.f32 1e-05, %v3809_v33  ;;  %v3341_v33 = vadd.f32 %v3340_v44, %v3124_v43  ;;  %v3665_v43 = vmul.f32 0.0051020407, %v9352_v24 }
 0x526   :  { %13159 = vst [vmem:[#allocation74_spill] sm:$0xff] %v9579_v5 }
 0x527   :  { %v9565_v51 = vpop.xlane.xlu0 %2680  ;;  %v9567_v1 = vpop.xlane.xlu1 %3306  ;;  %7189 = vrsqrt.f32 %v3899_v4  ;;  %vm4004_vm5 = vweird.f32 %v3899_v4 }
 0x528   :  { %13154 = vst [vmem:[#allocation69_spill] sm:$0xff] %v9565_v51  ;;  %5250 = vperm.xlu0 %7130, %v9450_v26  }
 0x529   :  { %13155 = vst [vmem:[#allocation70_spill] sm:$0xff] %v9567_v1  ;;  %v9613_v1 = vpop.f32.mrf.mxu3 }
 0x52a   :  { %13168 = vst [vmem:[#allocation83_spill] sm:$0xff] %v9613_v1  ;;  %v2854_v13 = vsel %vm1185_vm8, %v9613_v1, 0.0 }
 0x52d   :  { %v9594_v60 = vpop.xlane.xlu2 %3446 }
 0x52e   :  { %13162 = vst [vmem:[#allocation77_spill] sm:$0xff] %v9594_v60 }
 0x52f   :  { %v9572_v28 = vpop.xlane.xlu0 %3310  ;;  %v9574_v56 = vpop.xlane.xlu1 %2820 }
 0x530   :  { %13157 = vst [vmem:[#allocation72_spill] sm:$0xff] %v9572_v28 }
 0x531   :  { %13158 = vst [vmem:[#allocation73_spill] sm:$0xff] %v9574_v56  ;;  %v7190_v56 = vpop.eup %7189 }
 0x532   :  { %v3999_v60 = vmul.f32 %v7190_v56, %v3899_v4  ;;  %vm4005_vm4 = vweird.f32 %v7190_v56 }
 0x533   :  { %vm4006_vm6 = vmor %vm4004_vm5, %vm4005_vm4 }
 0x535   :  { %5080 = vperm.xlu2 %7132, %v9581_v42   ;;  %v9602_v6 = vpop.xlane.xlu2 %2684 }
 0x536   :  { %13165 = vst [vmem:[#allocation80_spill] sm:$0xff] %v9602_v6 }
 0x537   :  { %v9587_v26 = vpop.xlane.xlu0 %2824  ;;  %v9589_v11 = vpop.xlane.xlu1 %3450 }
 0x538   :  { %13160 = vst [vmem:[#allocation75_spill] sm:$0xff] %v9587_v26 }
 0x539   :  { %13161 = vst [vmem:[#allocation76_spill] sm:$0xff] %v9589_v11 }
 0x53d   :  { %v9618_v6 = vpop.xlane.xlu2 %3314 }
 0x53e   :  { %13169 = vst [vmem:[#allocation84_spill] sm:$0xff] %v9618_v6  ;;  %v3129_v6 = vmul.f32 %v9544_v2, %v9544_v2 }
 0x53f   :  { %v9596_v5 = vpop.xlane.xlu1 %2688  ;;  %v9598_v36 = vpop.xlane.xlu0 %3454 }
 0x540   :  { %13163 = vst [vmem:[#allocation78_spill] sm:$0xff] %v9596_v5  ;;  %v2714_v5 = vsel %vm1185_vm8, %v9522_v37, 0.0 }
 0x541   :  { %13164 = vst [vmem:[#allocation79_spill] sm:$0xff] %v9598_v36  ;;  %v2715_v22 = vadd.f32 %v2714_v5, %v9526_v7 }
 0x547   :  { %v9606_v11 = vpop.xlane.xlu1 %3318  ;;  %v9609_v18 = vpop.xlane.xlu0 %2692 }
 0x548   :  { %13166 = vst [vmem:[#allocation81_spill] sm:$0xff] %v9606_v11  ;;  %v9621_v11 = vpop.f32.mrf.mxu2 }
 0x549   :  { %13167 = vst [vmem:[#allocation82_spill] sm:$0xff] %v9609_v18  ;;  %v4000_v18 = vmul.f32 %v7190_v56, %v3999_v60  ;;  %v2855_v44 = vadd.f32 %v2854_v13, %v9621_v11  ;;  %v3845_v60 = vsub.f32 %v3665_v43, %v3755_v35  ;;  %v3196_v24 = vmul.f32 %v9621_v11, %v9621_v11 }
 0x54a   :  { %13170 = vst [vmem:[#allocation85_spill] sm:$0xff] %v9621_v11 }
 0x54b   :  { %v4001_v5 = vmul.f32 0.5, %v4000_v18  ;;  %v9643_v18 = vpop.xlane.xlu2 %2828 }
 0x54c   :  { %13172 = vst [vmem:[#allocation87_spill] sm:$0xff] %v9643_v18 }
 0x54d   :  { %v4002_v26 = vsub.f32 1.5, %v4001_v5 }
 0x54f   :  { %3342 = vadd.xlane.f32.xlu1 %v3341_v33  ;;  %v9627_v15 = vpop.xlane.xlu1 %2832  ;;  %v3197_v33 = vmul.f32 %v9613_v1, %v9613_v1  ;;  %v9635_v36 = vpop.xlane.xlu0 %3322  ;;  %v3935_v1 = vadd.f32 1e-05, %v3845_v60  ;;  %v4003_v51 = vmul.f32 %v7190_v56, %v4002_v26 }
 0x550   :  { %13171 = vst [vmem:[#allocation86_spill] sm:$0xff] %v9627_v15  ;;  %v3348_v15 = vsel %vm1185_vm8, %v3129_v6, 0.0  ;;  %v4889_v6 = vld [vmem:[%s12931_s7 + $0x8] sm:$0xff] }
 0x551   :  { %v3484_v13 = vsel %vm1185_vm8, %v3197_v33, 0.0  ;;  %7191 = vrsqrt.f32 %v3935_v1  ;;  %v4007_v35 = vsel %vm4006_vm6, %v7190_v56, %v4003_v51  ;;  %v5790_v51 = vmul.f32 %v9581_v42, %v9498_v30  ;;  %v5700_v56 = vld [vmem:[%s12932_s8 + $0x10] sm:$0xff] }
 0x552   :  { %2716 = vadd.xlane.f32.xlu0 %v2715_v22  ;;  %v3128_v22 = vmul.f32 %v9552_v34, %v9552_v34  ;;  %v3485_v28 = vadd.f32 %v3484_v13, %v3196_v24  ;;  %vm4364_vm0 = vweird.f32 %v3935_v1 }
 0x553   :  { %v9652_v5 = vpop.xlane.xlu2 %3458  ;;  %v5880_v34 = vsub.f32 %v5700_v56, %v5790_v51  ;;  %v7097_v51 = vld [vmem:[%s12930_s6 + $0xe8] sm:$0xff] }
 0x554   :  { %v3349_v2 = vadd.f32 %v3348_v15, %v3128_v22  ;;  %13173 = vst [vmem:[#allocation88_spill] sm:$0xff] %v9652_v5  ;;  %v4979_v15 = vmul.f32 %v4889_v6, %v4007_v35  ;;  %v5699_v6 = vld [vmem:[%s12932_s8 + $0x8] sm:$0xff]  ;;  %7052 = vmatmul.msk.bf16.gmra.mxu3 %vm2027_vm9, %v7097_v51  ;;  %7007 = vmatmul.msk.bf16.gmra.mxu2 %vm2027_vm9, %v7097_v51 }
 0x556   :  { %v5789_v13 = vmul.f32 %v4979_v15, %v9585_v8 }
 0x557   :  { %2856 = vadd.xlane.f32.xlu1 %v2855_v44  ;;  %v9645_v43 = vpop.xlane.xlu1 %3462  ;;  %v9647_v44 = vpop.xlane.xlu0 %2836 }
 0x558   :  { %v7192_v33 = vpop.eup %7191 }
 0x559   :  { %v4359_v26 = vmul.f32 %v7192_v33, %v3935_v1  ;;  %vm4365_vm7 = vweird.f32 %v7192_v33 }
 0x55a   :  { %vm4366_vm10 = vmor %vm4364_vm0, %vm4365_vm7 }
 0x55e   :  { %3350 = vadd.xlane.f32.xlu2 %v3349_v2  ;;  %v4360_v2 = vmul.f32 %v7192_v33, %v4359_v26 }
 0x55f   :  { %3486 = vadd.xlane.f32.xlu1 %v3485_v28  ;;  %v9654_v60 = vpop.xlane.xlu1 %2700  ;;  %v9656_v24 = vpop.xlane.xlu0 %3466 }
 0x560   :  { %v9658_v28 = vpop.xlane.xlu2 %2696  ;;  %v4361_v4 = vmul.f32 0.5, %v4360_v2  ;;  %v5879_v2 = vsub.f32 %v5699_v6, %v5789_v13 }
 0x561   :  { %13174 = vst [vmem:[#allocation89_spill] sm:$0xff] %v9658_v28 }
 0x562   :  { %v4362_v26 = vsub.f32 1.5, %v4361_v4  ;;  %v7079_v4 = vld [vmem:[%s12930_s6 + $0x58] sm:$0xff] }
 0x563   :  { %7034 = vmatmul.msk.bf16.gmra.mxu1 %vm2027_vm9, %v7079_v4  ;;  %6989 = vmatmul.msk.bf16.gmra.mxu0 %vm2027_vm9, %v7079_v4  ;;  %v7080_v4 = vld [vmem:[%s12930_s6 + $0x60] sm:$0xff] }
 0x564   :  { %v4363_v11 = vmul.f32 %v7192_v33, %v4362_v26  ;;  %v9701_v26 = vmul.f32 0.0051020407, %v9357_v53 }
 0x566   :  { %5075 = vperm.xlu0 %7130, %v4979_v15   ;;  %v4367_v8 = vsel %vm4366_vm10, %v7192_v33, %v4363_v11  ;;  %v4925_v15 = vld [vmem:[%s12931_s7 + $0x128] sm:$0xff]  ;;  %v3756_v51 = vmul.f32 %v9701_v26, %v9701_v26 }
 0x567   :  { %v9665_v22 = vpop.xlane.xlu1 %3330  ;;  %v9668_v35 = vpop.xlane.xlu0 %2704  ;;  %v5015_v56 = vmul.f32 %v4925_v15, %v4367_v8  ;;  %v5735_v33 = vld [vmem:[%s12932_s8 + $0x128] sm:$0xff]  ;;  %v3666_v15 = vmul.f32 0.0051020407, %v9398_v9 }
 0x568   :  { %v9673_v30 = vpop.xlane.xlu2 %3326  ;;  %v9721_v9 = vpop.f32.mrf.mxu3 }
 0x569   :  { %13175 = vst [vmem:[#allocation90_spill] sm:$0xff] %v9673_v30  ;;  %v5825_v11 = vmul.f32 %v5015_v56, %v9616_v31  ;;  %v3126_v31 = vmul.f32 %v9526_v7, %v9526_v7 }
 0x56a   :  { %13180 = vst [vmem:[#allocation95_spill] sm:$0xff] %v9721_v9 }
 0x56b   :  { %v5915_v6 = vsub.f32 %v5735_v33, %v5825_v11  ;;  %v3846_v33 = vsub.f32 %v3666_v15, %v3756_v51 }
 0x56d   :  { %v3936_v30 = vadd.f32 1e-05, %v3846_v33 }
 0x56f   :  { %v9675_v42 = vpop.xlane.xlu1 %2844  ;;  %7193 = vrsqrt.f32 %v3936_v30  ;;  %vm4374_vm12 = vweird.f32 %v3936_v30 }
 0x570   :  { %13176 = vst [vmem:[#allocation91_spill] sm:$0xff] %v9675_v42  ;;  %v9692_v1 = vpop.xlane.xlu2 %2840 }
 0x571   :  { %13177 = vst [vmem:[#allocation92_spill] sm:$0xff] %v9692_v1 }
 0x573   :  { %7035 = vmatmul.msk.bf16.gmra.mxu1 %vm2027_vm9, %v7080_v4  ;;  %6990 = vmatmul.msk.bf16.gmra.mxu0 %vm2027_vm9, %v7080_v4  ;;  %v9735_v51 = vpop.f32.mrf.mxu3 }
 0x574   :  { %13183 = vst [vmem:[#allocation98_spill] sm:$0xff] %v9735_v51 }
 0x575   :  { %v7194_v33 = vpop.eup %7193 }
 0x576   :  { %5980 = vperm.xlu2 %7132, %v5880_v34   ;;  %v9683_v34 = vpop.xlane.xlu0 %3334  ;;  %vm4375_vm11 = vweird.f32 %v7194_v33 }
 0x577   :  { %v9698_v13 = vpop.xlane.xlu1 %3474  ;;  %vm4376_vm13 = vmor %vm4374_vm12, %vm4375_vm11 }
 0x578   :  { %5975 = vperm.xlu1 %7131, %v5879_v2   ;;  %13178 = vst [vmem:[#allocation93_spill] sm:$0xff] %v9698_v13  ;;  %v3127_v2 = vmul.f32 %v9522_v37, %v9522_v37  ;;  %v9719_v11 = vpop.xlane.xlu2 %3470  ;;  %v9761_v37 = vpop.f32.mrf.mxu0 }
 0x579   :  { %13179 = vst [vmem:[#allocation94_spill] sm:$0xff] %v9719_v11  ;;  %v2862_v11 = vsel %vm1185_vm8, %v9735_v51, 0.0 }
 0x57a   :  { %v3344_v53 = vsel %vm1185_vm8, %v3127_v2, 0.0  ;;  %v9729_v2 = vpop.f32.mrf.mxu2  ;;  %13188 = vst [vmem:[#allocation103_spill] sm:$0xff] %v9761_v37 }
 0x57e   :  { %v9705_v8 = vpop.xlane.xlu0 %2848 }
 0x57f   :  { %v9725_v1 = vpop.xlane.xlu1 %2712 }
 0x580   :  { %5255 = vperm.xlu1 %7131, %v5015_v56   ;;  %v7098_v56 = vld [vmem:[%s12930_s6 + $0xf0] sm:$0xff]  ;;  %13181 = vst [vmem:[#allocation96_spill] sm:$0xff] %v9725_v1  ;;  %v9733_v15 = vpop.xlane.xlu2 %2708 }
 0x581   :  { %7053 = vmatmul.msk.bf16.gmra.mxu3 %vm2027_vm9, %v7098_v56  ;;  %7008 = vmatmul.msk.bf16.gmra.mxu2 %vm2027_vm9, %v7098_v56  ;;  %13182 = vst [vmem:[#allocation97_spill] sm:$0xff] %v9733_v15 }
 0x582   :  { %v9741_v5 = vpop.f32.mrf.mxu2 }
 0x583   :  { %13184 = vst [vmem:[#allocation99_spill] sm:$0xff] %v9741_v5  ;;  %v2863_v18 = vadd.f32 %v2862_v11, %v9741_v5 }
 0x586   :  { %v9731_v28 = vpop.xlane.xlu0 %3478 }
 0x588   :  { %6155 = vperm.xlu1 %7131, %v5915_v6   ;;  %v3345_v6 = vadd.f32 %v3344_v53, %v3126_v31 }
 0x590   :  { %3346 = vadd.xlane.f32.xlu0 %v3345_v6 }
 0x592   :  { %v5971_v56 = vpop.permute.xlu0 %5970 }
 0x597   :  { %v5071_v31 = vpop.permute.xlu1 %5070 }
 0x598   :  { %v5518_v4 = vmul.f32 %v5071_v31, %v8963_v55  ;;  %v5519_v53 = vmul.f32 %v5071_v31, %v8967_v45  ;;  %v4369_v55 = vmul.f32 %v7194_v33, %v3936_v30  ;;  %v5734_v45 = vld [vmem:[%s12932_s8 + $0x120] sm:$0xff]  ;;  %v9754_v31 = vpop.xlane.xlu2 %3338 }
 0x599   :  { %13185 = vst [vmem:[#allocation100_spill] sm:$0xff] %v9754_v31  ;;  %v5914_v11 = vsub.f32 %v5734_v45, %v9460_v17 }
 0x59a   :  { %v6418_v6 = vadd.f32 %v5971_v56, %v5518_v4  ;;  %v6419_v1 = vadd.f32 %v5971_v56, %v5519_v53  ;;  %v4370_v4 = vmul.f32 %v7194_v33, %v4369_v55  ;;  %v9757_v56 = vpop.f32.mrf.mxu1  ;;  %v9769_v55 = vmul.f32 0.0051020407, %v9379_v16 }
 0x59b   :  { %13186 = vst [vmem:[#allocation101_spill] sm:$0xff] %v9757_v56  ;;  %v3131_v17 = vmul.f32 %v9757_v56, %v9757_v56 }
 0x59c   :  { %6598 = vst [vmem:[%s12933_s9] sm:$0xff] %v6418_v6  ;;  %v4371_v53 = vmul.f32 0.5, %v4370_v4  ;;  %v4926_v4 = vld [vmem:[%s12931_s7 + $0x130] sm:$0xff]  ;;  %v3722_v16 = vmul.f32 %v9769_v55, %v9769_v55 }
 0x59d   :  { %6599 = vst.msk [vmem:[%s12933_s9 + $0x8] sm:$0xff] %vm1185_vm8, %v6419_v1 }
 0x59e   :  { %v4372_v6 = vsub.f32 1.5, %v4371_v53  ;;  %v3130_v53 = vmul.f32 %v9761_v37, %v9761_v37 }
 0x59f   :  { %2864 = vadd.xlane.f32.xlu2 %v2863_v18  ;;  %v2722_v18 = vsel %vm1185_vm8, %v9757_v56, 0.0 }
 0x5a0   :  { %v9759_v15 = vpop.xlane.xlu2 %2852  ;;  %v4373_v1 = vmul.f32 %v7194_v33, %v4372_v6  ;;  %v2723_v7 = vadd.f32 %v2722_v18, %v9761_v37  ;;  %v3352_v18 = vsel %vm1185_vm8, %v3131_v17, 0.0 }
 0x5a1   :  { %13187 = vst [vmem:[#allocation102_spill] sm:$0xff] %v9759_v15  ;;  %v3631_v15 = vmul.f32 0.0051020407, %v9381_v46 }
 0x5a2   :  { %v4377_v45 = vsel %vm4376_vm13, %v7194_v33, %v4373_v1  ;;  %v3353_v33 = vadd.f32 %v3352_v18, %v3130_v53  ;;  %v9786_v1 = vmul.f32 0.0051020407, %v9354_v19  ;;  %v9806_v18 = vmul.f32 0.0051020407, %v9441_v41 }
 0x5a3   :  { %v9779_v30 = vmul.f32 %v4926_v4, %v4377_v45  ;;  %v9793_v45 = vpop.f32.mrf.mxu2 }
 0x5a4   :  { %6150 = vperm.xlu0 %7130, %v5914_v11   ;;  %v3632_v11 = vmul.f32 0.0051020407, %v9411_v49  ;;  %v9788_v49 = vpop.f32.mrf.mxu3  ;;  %13191 = vst [vmem:[#allocation106_spill] sm:$0xff] %v9793_v45  ;;  %v3721_v4 = vmul.f32 %v9786_v1, %v9786_v1 }
 0x5a5   :  { %13190 = vst [vmem:[#allocation105_spill] sm:$0xff] %v9788_v49  ;;  %v2866_v17 = vsel %vm1185_vm8, %v9788_v49, 0.0  ;;  %v3203_v46 = vmul.f32 %v9788_v49, %v9788_v49  ;;  %v9821_v49 = vmul.f32 0.0051020407, %v9413_v32 }
 0x5a6   :  { %v3811_v53 = vsub.f32 %v3631_v15, %v3721_v4  ;;  %v2867_v19 = vadd.f32 %v2866_v17, %v9793_v45  ;;  %v3758_v17 = vmul.f32 %v9806_v18, %v9806_v18 }
 0x5a7   :  { %v3496_v15 = vsel %vm1185_vm8, %v3203_v46, 0.0 }
 0x5a8   :  { %v9777_v6 = vpop.xlane.xlu2 %3482 }
 0x5a9   :  { %13189 = vst [vmem:[#allocation104_spill] sm:$0xff] %v9777_v6 }
 0x5b2   :  { %2724 = vadd.xlane.f32.xlu1 %v2723_v7  ;;  %v3812_v7 = vsub.f32 %v3632_v11, %v3722_v16  ;;  %v9799_v11 = vpop.xlane.xlu2 %2720  ;;  %v9808_v16 = vadd.f32 1e-05, %v3811_v53  ;;  %v2858_v53 = vsel %vm1185_vm8, %v9721_v9, 0.0 }
 0x5b3   :  { %13192 = vst [vmem:[#allocation107_spill] sm:$0xff] %v9799_v11  ;;  %v2859_v46 = vadd.f32 %v2858_v53, %v9729_v2 }
 0x5b4   :  { %v9791_v6 = vadd.f32 1e-05, %v3812_v7  ;;  %v3202_v7 = vmul.f32 %v9793_v45, %v9793_v45  ;;  %vm4024_vm3 = vweird.f32 %v9808_v16 }
 0x5b6   :  { %7195 = vrsqrt.f32 %v9791_v6  ;;  %v3497_v11 = vadd.f32 %v3496_v15, %v3202_v7  ;;  %v3199_v7 = vmul.f32 %v9721_v9, %v9721_v9  ;;  %vm4034_vm15 = vweird.f32 %v9791_v6 }
 0x5b7   :  { %5260 = vperm.xlu2 %7132, %v9779_v30   ;;  %7197 = vrsqrt.f32 %v9808_v16 }
 0x5ba   :  { %3354 = vadd.xlane.f32.xlu1 %v3353_v33  ;;  %v3668_v33 = vmul.f32 0.0051020407, %v9482_v23  ;;  %v5081_v31 = vpop.permute.xlu2 %5080  ;;  %v3667_v23 = vmul.f32 0.0051020407, %v9443_v38 }
 0x5bc   :  { %v7196_v4 = vpop.eup %7195  ;;  %v3848_v41 = vsub.f32 %v3668_v33, %v3758_v17  ;;  %v3757_v33 = vmul.f32 %v9821_v49, %v9821_v49 }
 0x5bd   :  { %v7198_v15 = vpop.eup %7197  ;;  %vm4035_vm14 = vweird.f32 %v7196_v4 }
 0x5be   :  { %v9825_v56 = vadd.f32 1e-05, %v3848_v41  ;;  %v3847_v32 = vsub.f32 %v3667_v23, %v3757_v33  ;;  %v4019_v38 = vmul.f32 %v7198_v15, %v9808_v16  ;;  %v3488_v41 = vsel %vm1185_vm8, %v3199_v7, 0.0  ;;  %vm4036_vm1 = vmor %vm4034_vm15, %vm4035_vm14 }
 0x5bf   :  { %v5522_v33 = vmul.f32 %v5081_v31, %v8999_v54  ;;  %v5523_v7 = vmul.f32 %v5081_v31, %v9002_v47  ;;  %vm4025_vm2 = vweird.f32 %v7198_v15 }
 0x5c0   :  { %7199 = vrsqrt.f32 %v9825_v56  ;;  %v9840_v37 = vadd.f32 1e-05, %v3847_v32  ;;  %v4020_v13 = vmul.f32 %v7198_v15, %v4019_v38  ;;  %vm4026_vm4 = vmor %vm4024_vm3, %vm4025_vm2  ;;  %vm4394_vm6 = vweird.f32 %v9825_v56 }
 0x5c2   :  { %2868 = vadd.xlane.f32.xlu1 %v2867_v19  ;;  %v4029_v19 = vmul.f32 %v7196_v4, %v9791_v6  ;;  %v9831_v17 = vpop.xlane.xlu1 %3342  ;;  %7201 = vrsqrt.f32 %v9840_v37  ;;  %v4021_v32 = vmul.f32 0.5, %v4020_v13  ;;  %v4892_v6 = vld [vmem:[%s12931_s7 + $0x20] sm:$0xff]  ;;  %vm4384_vm10 = vweird.f32 %v9840_v37 }
 0x5c3   :  { %13193 = vst [vmem:[#allocation108_spill] sm:$0xff] %v9831_v17  ;;  %v9842_v17 = vpop.permute.xlu0 %5250 }
 0x5c4   :  { %v4030_v45 = vmul.f32 %v7196_v4, %v4029_v19  ;;  %v4022_v54 = vsub.f32 1.5, %v4021_v32 }
 0x5c6   :  { %v4031_v53 = vmul.f32 0.5, %v4030_v45  ;;  %v3201_v45 = vmul.f32 %v9735_v51, %v9735_v51  ;;  %v4023_v32 = vmul.f32 %v7198_v15, %v4022_v54  ;;  %v5702_v54 = vld [vmem:[%s12932_s8 + $0x20] sm:$0xff] }
 0x5c8   :  { %v4032_v42 = vsub.f32 1.5, %v4031_v53  ;;  %v3200_v53 = vmul.f32 %v9741_v5, %v9741_v5  ;;  %v3492_v51 = vsel %vm1185_vm8, %v3201_v45, 0.0 }
 0x5ca   :  { %3498 = vadd.xlane.f32.xlu1 %v3497_v11  ;;  %v3198_v11 = vmul.f32 %v9729_v2, %v9729_v2  ;;  %v9844_v23 = vpop.xlane.xlu1 %2856  ;;  %v4033_v38 = vmul.f32 %v7196_v4, %v4032_v42  ;;  %v3493_v31 = vadd.f32 %v3492_v51, %v3200_v53 }
 0x5cb   :  { %v9869_v13 = vpop.xlane.xlu0 %2716 }
 0x5cc   :  { %v3489_v9 = vadd.f32 %v3488_v41, %v3198_v11  ;;  %v4037_v45 = vsel %vm4036_vm1, %v7196_v4, %v4033_v38  ;;  %v4027_v4 = vsel %vm4026_vm4, %v7198_v15, %v4023_v32  ;;  %v4891_v38 = vld [vmem:[%s12931_s7 + $0x18] sm:$0xff] }
 0x5ce   :  { %2860 = vadd.xlane.f32.xlu0 %v2859_v46  ;;  %v9846_v46 = vpop.eup %7199 }
 0x5cf   :  { %v9866_v47 = vpop.eup %7201  ;;  %vm4395_vm5 = vweird.f32 %v9846_v46 }
 0x5d0   :  { %vm4396_vm7 = vmor %vm4394_vm6, %vm4395_vm5  ;;  %vm4385_vm0 = vweird.f32 %v9866_v47 }
 0x5d1   :  { %v9837_v19 = vpop.xlane.xlu2 %3350  ;;  %vm4386_vm11 = vmor %vm4384_vm10, %vm4385_vm0 }
 0x5d2   :  { %13194 = vst [vmem:[#allocation109_spill] sm:$0xff] %v9837_v19 }
 0x5d6   :  { %3490 = vadd.xlane.f32.xlu0 %v3489_v9  ;;  %v4389_v9 = vmul.f32 %v9846_v46, %v9825_v56  ;;  %v4928_v56 = vld [vmem:[%s12931_s7 + $0x140] sm:$0xff] }
 0x5d8   :  { %v4390_v42 = vmul.f32 %v9846_v46, %v4389_v9 }
 0x5d9   :  { %v5981_v11 = vpop.permute.xlu2 %5980 }
 0x5da   :  { %v6422_v41 = vadd.f32 %v5981_v11, %v5522_v33  ;;  %v6423_v19 = vadd.f32 %v5981_v11, %v5523_v7  ;;  %v9874_v33 = vpop.xlane.xlu1 %3486  ;;  %v4379_v7 = vmul.f32 %v9866_v47, %v9840_v37  ;;  %v4391_v11 = vmul.f32 0.5, %v4390_v42  ;;  %v7081_v37 = vld [vmem:[%s12930_s6 + $0x68] sm:$0xff] }
 0x5db   :  { %v4981_v42 = vmul.f32 %v4891_v38, %v4027_v4  ;;  %v5826_v38 = vmul.f32 %v9779_v30, %v9701_v26  ;;  %v5738_v26 = vld [vmem:[%s12932_s8 + $0x140] sm:$0xff]  ;;  %7036 = vmatmul.msk.bf16.gmra.mxu1 %vm2027_vm9, %v7081_v37  ;;  %6991 = vmatmul.msk.bf16.gmra.mxu0 %vm2027_vm9, %v7081_v37 }
 0x5dc   :  { %6602 = vst [vmem:[%s12933_s9 + $0x20] sm:$0xff] %v6422_v41  ;;  %v4380_v51 = vmul.f32 %v9866_v47, %v4379_v7  ;;  %v4392_v53 = vsub.f32 1.5, %v4391_v11  ;;  %v5076_v41 = vpop.permute.xlu0 %5075 }
 0x5dd   :  { %6603 = vst.msk [vmem:[%s12933_s9 + $0x28] sm:$0xff] %vm1185_vm8, %v6423_v19  ;;  %v4982_v19 = vmul.f32 %v4892_v6, %v4037_v45  ;;  %v5520_v16 = vmul.f32 %v5076_v41, %v8979_v14  ;;  %v5521_v45 = vmul.f32 %v5076_v41, %v8984_v21  ;;  %v5791_v32 = vmul.f32 %v4981_v42, %v9786_v1  ;;  %v5701_v14 = vld [vmem:[%s12932_s8 + $0x18] sm:$0xff] }
 0x5de   :  { %v4393_v7 = vmul.f32 %v9846_v46, %v4392_v53  ;;  %v4927_v41 = vld [vmem:[%s12931_s7 + $0x138] sm:$0xff] }
 0x5df   :  { %v5792_v9 = vmul.f32 %v4982_v19, %v9769_v55  ;;  %v5881_v1 = vsub.f32 %v5701_v14, %v5791_v32 }
 0x5e0   :  { %3494 = vadd.xlane.f32.xlu2 %v3493_v31  ;;  %v4381_v31 = vmul.f32 0.5, %v4380_v51  ;;  %v4397_v21 = vsel %vm4396_vm7, %v9846_v46, %v4393_v7  ;;  %v5736_v46 = vld [vmem:[%s12932_s8 + $0x130] sm:$0xff]  ;;  %v3633_v7 = vmul.f32 0.0051020407, %v9486_v20 }
 0x5e1   :  { %v5882_v6 = vsub.f32 %v5702_v54, %v5792_v9  ;;  %v5018_v51 = vmul.f32 %v4928_v56, %v4397_v21  ;;  %v5590_v56 = vmul.f32 %v9842_v17, %v8993_v29  ;;  %v9974_v29 = vpop.f32.mrf.mxu2 }
 0x5e2   :  { %v4382_v11 = vsub.f32 1.5, %v4381_v31 }
 0x5e3   :  { %5090 = vperm.xlu1 %7131, %v4982_v19   ;;  %v5828_v54 = vmul.f32 %v5018_v51, %v9806_v18 }
 0x5e4   :  { %v4383_v4 = vmul.f32 %v9866_v47, %v4382_v11 }
 0x5e6   :  { %v4387_v53 = vsel %vm4386_vm11, %v9866_v47, %v4383_v4 }
 0x5e7   :  { %v9926_v30 = vmul.f32 %v4927_v41, %v4387_v53 }
 0x5ea   :  { %v5976_v15 = vpop.permute.xlu1 %5975  ;;  %5085 = vperm.xlu0 %7130, %v4981_v42   ;;  %v5916_v42 = vsub.f32 %v5736_v46, %v5826_v38  ;;  %v9965_v38 = vpop.f32.mrf.mxu3 }
 0x5eb   :  { %v6420_v55 = vadd.f32 %v5976_v15, %v5520_v16  ;;  %v6421_v19 = vadd.f32 %v5976_v15, %v5521_v45  ;;  %5990 = vperm.xlu1 %7131, %v5882_v6   ;;  %v5918_v16 = vsub.f32 %v5738_v26, %v5828_v54  ;;  %v7099_v45 = vld [vmem:[%s12930_s6 + $0xf8] sm:$0xff] }
 0x5ec   :  { %7054 = vmatmul.msk.bf16.gmra.mxu3 %vm2027_vm9, %v7099_v45  ;;  %7009 = vmatmul.msk.bf16.gmra.mxu2 %vm2027_vm9, %v7099_v45  ;;  %v9995_v45 = vpop.f32.mrf.mxu2 }
 0x5ed   :  { %6600 = vst [vmem:[%s12933_s9 + $0x10] sm:$0xff] %v6420_v55  ;;  %v9951_v55 = vpop.f32.mrf.mxu0 }
 0x5ee   :  { %6601 = vst.msk [vmem:[%s12933_s9 + $0x18] sm:$0xff] %vm1185_vm8, %v6421_v19 }
 0x5ef   :  { %13200 = vst [vmem:[#allocation115_spill] sm:$0xff] %v9995_v45 }
 0x5f2   :  { %v5256_v9 = vpop.permute.xlu1 %5255  ;;  %5985 = vperm.xlu0 %7130, %v5881_v1   ;;  %v9988_v37 = vpop.f32.mrf.mxu3 }
 0x5f3   :  { %5270 = vperm.xlu1 %7131, %v5018_v51   ;;  %v5592_v47 = vmul.f32 %v5256_v9, %v9017_v52  ;;  %v5593_v31 = vmul.f32 %v5256_v9, %v9010_v57  ;;  %v9946_v57 = vmul.f32 0.0051020407, %v9429_v50  ;;  %v9948_v52 = vpop.f32.mrf.mxu1  ;;  %v5591_v50 = vmul.f32 %v9842_v17, %v8988_v12  ;;  %13199 = vst [vmem:[#allocation114_spill] sm:$0xff] %v9988_v37 }
 0x5f4   :  { %v2726_v41 = vsel %vm1185_vm8, %v9948_v52, 0.0 }
 0x5f5   :  { %v3723_v19 = vmul.f32 %v9946_v57, %v9946_v57  ;;  %v9963_v51 = vpop.f32.mrf.mxu0 }
 0x5f6   :  { %13196 = vst [vmem:[#allocation111_spill] sm:$0xff] %v9963_v51 }
 0x5f7   :  { %v3813_v11 = vsub.f32 %v3633_v7, %v3723_v19  ;;  %v3132_v7 = vmul.f32 %v9951_v55, %v9951_v55 }
 0x5f8   :  { %6160 = vperm.xlu2 %7132, %v5916_v42  }
 0x5f9   :  { %v3903_v14 = vadd.f32 1e-05, %v3813_v11  ;;  %v3635_v11 = vmul.f32 0.0051020407, %v9531_v63 }
 0x5fa   :  { %v6156_v18 = vpop.permute.xlu1 %6155  ;;  %5265 = vperm.xlu0 %7130, %v9926_v30  }
 0x5fb   :  { %v6492_v6 = vadd.f32 %v6156_v18, %v5592_v47  ;;  %v6493_v15 = vadd.f32 %v6156_v18, %v5593_v31  ;;  %6170 = vperm.xlu1 %7131, %v5918_v16   ;;  %v9957_v21 = vpop.f32.mrf.mxu1  ;;  %7203 = vrsqrt.f32 %v3903_v14  ;;  %v2727_v47 = vadd.f32 %v2726_v41, %v9951_v55 }
 0x5fc   :  { %13195 = vst [vmem:[#allocation110_spill] sm:$0xff] %v9957_v21  ;;  %v2730_v17 = vsel %vm1185_vm8, %v9957_v21, 0.0  ;;  %v3133_v16 = vmul.f32 %v9948_v52, %v9948_v52  ;;  %vm4044_vm13 = vweird.f32 %v3903_v14 }
 0x5fd   :  { %6672 = vst [vmem:[%s12933_s9 + $0x250] sm:$0xff] %v6492_v6  ;;  %v9982_v53 = vpop.f32.mrf.mxu0  ;;  %v2731_v54 = vadd.f32 %v2730_v17, %v9963_v51  ;;  %v9998_v6 = vmul.f32 0.0051020407, %v9508_v39 }
 0x5fe   :  { %6673 = vst.msk [vmem:[%s12933_s9 + $0x258] sm:$0xff] %vm1185_vm8, %v6493_v15  ;;  %v3136_v15 = vmul.f32 %v9982_v53, %v9982_v53 }
 0x5ff   :  { %13198 = vst [vmem:[#allocation113_spill] sm:$0xff] %v9982_v53 }
 0x601   :  { %v7204_v9 = vpop.eup %7203 }
 0x602   :  { %v4039_v42 = vmul.f32 %v7204_v9, %v3903_v14  ;;  %vm4045_vm12 = vweird.f32 %v7204_v9 }
 0x603   :  { %v9955_v32 = vpop.xlane.xlu0 %3346  ;;  %v9976_v12 = vpop.f32.mrf.mxu1  ;;  %vm4046_vm14 = vmor %vm4044_vm13, %vm4045_vm12 }
 0x604   :  { %13197 = vst [vmem:[#allocation112_spill] sm:$0xff] %v9976_v12  ;;  %v2734_v46 = vsel %vm1185_vm8, %v9976_v12, 0.0  ;;  %v3137_v31 = vmul.f32 %v9976_v12, %v9976_v12  ;;  %v4040_v18 = vmul.f32 %v7204_v9, %v4039_v42  ;;  %v10009_v17 = vpop.f32.mrf.mxu3 }
 0x605   :  { %v2735_v26 = vadd.f32 %v2734_v46, %v9982_v53  ;;  %13201 = vst [vmem:[#allocation116_spill] sm:$0xff] %v10009_v17  ;;  %v2878_v41 = vsel %vm1185_vm8, %v10009_v17, 0.0  ;;  %v13231_v53 = vld [vmem:[#allocation4_spill] sm:$0xff] }
 0x606   :  { %v3364_v19 = vsel %vm1185_vm8, %v3137_v31, 0.0  ;;  %v3209_v31 = vmul.f32 %v10009_v17, %v10009_v17 }
 0x616   :  { %v6151_v1 = vpop.permute.xlu0 %6150 }
 0x617   :  { %v6490_v20 = vadd.f32 %v6151_v1, %v5590_v56  ;;  %v6491_v4 = vadd.f32 %v6151_v1, %v5591_v50  ;;  %v3356_v56 = vsel %vm1185_vm8, %v3133_v16, 0.0  ;;  %v4041_v50 = vmul.f32 0.5, %v4040_v18  ;;  %v4893_v18 = vld [vmem:[%s12931_s7 + $0x28] sm:$0xff] }
 0x618   :  { %v3725_v1 = vmul.f32 %v9998_v6, %v9998_v6  ;;  %v3357_v39 = vadd.f32 %v3356_v56, %v3132_v7  ;;  %v10026_v7 = vmul.f32 0.0051020407, %v9548_v48  ;;  %v5737_v48 = vld [vmem:[%s12932_s8 + $0x138] sm:$0xff] }
 0x619   :  { %6670 = vst [vmem:[%s12933_s9 + $0x240] sm:$0xff] %v6490_v20  ;;  %v3365_v20 = vadd.f32 %v3364_v19, %v3136_v15  ;;  %v4042_v46 = vsub.f32 1.5, %v4041_v50  ;;  %v3508_v19 = vsel %vm1185_vm8, %v3209_v31, 0.0 }
 0x61a   :  { %6671 = vst.msk [vmem:[%s12933_s9 + $0x248] sm:$0xff] %vm1185_vm8, %v6491_v4  ;;  %v3815_v4 = vsub.f32 %v3635_v11, %v3725_v1  ;;  %v3671_v11 = vmul.f32 0.0051020407, %v9561_v10  ;;  %v3761_v1 = vmul.f32 %v10026_v7, %v10026_v7 }
 0x61c   :  { %v3905_v63 = vadd.f32 1e-05, %v3815_v4  ;;  %v3851_v4 = vsub.f32 %v3671_v11, %v3761_v1  ;;  %v4895_v1 = vld [vmem:[%s12931_s7 + $0x38] sm:$0xff] }
 0x61e   :  { %7205 = vrsqrt.f32 %v3905_v63  ;;  %vm4064_vm1 = vweird.f32 %v3905_v63 }
 0x621   :  { %2732 = vadd.xlane.f32.xlu2 %v2731_v54  ;;  %v10013_v54 = vpop.f32.mrf.mxu2 }
 0x622   :  { %13202 = vst [vmem:[#allocation117_spill] sm:$0xff] %v10013_v54  ;;  %v3208_v15 = vmul.f32 %v10013_v54, %v10013_v54 }
 0x624   :  { %2728 = vadd.xlane.f32.xlu0 %v2727_v47  ;;  %v2879_v47 = vadd.f32 %v2878_v41, %v10013_v54  ;;  %v7206_v56 = vpop.eup %7205  ;;  %v3941_v41 = vadd.f32 1e-05, %v3851_v4 }
 0x625   :  { %2736 = vadd.xlane.f32.xlu1 %v2735_v26  ;;  %v10015_v42 = vpop.xlane.xlu1 %2724  ;;  %v4043_v26 = vmul.f32 %v7204_v9, %v4042_v46  ;;  %vm4065_vm15 = vweird.f32 %v7206_v56 }
 0x626   :  { %7207 = vrsqrt.f32 %v3941_v41  ;;  %vm4066_vm2 = vmor %vm4064_vm1, %vm4065_vm15  ;;  %vm4424_vm4 = vweird.f32 %v3941_v41 }
 0x627   :  { %v4047_v16 = vsel %vm4046_vm14, %v7204_v9, %v4043_v26  ;;  %v3509_v9 = vadd.f32 %v3508_v19, %v3208_v15  ;;  %v10042_v26 = vpop.xlane.xlu2 %2864 }
 0x628   :  { %v10029_v14 = vmul.f32 %v4893_v18, %v4047_v16  ;;  %13203 = vst [vmem:[#allocation118_spill] sm:$0xff] %v10042_v26 }
 0x62c   :  { %3358 = vadd.xlane.f32.xlu0 %v3357_v39  ;;  %v4059_v39 = vmul.f32 %v7206_v56, %v3905_v63  ;;  %v10046_v18 = vpop.eup %7207  ;;  %v3634_v63 = vmul.f32 0.0051020407, %v9510_v3  ;;  %v7082_v3 = vld [vmem:[%s12930_s6 + $0x70] sm:$0xff] }
 0x62d   :  { %3366 = vadd.xlane.f32.xlu1 %v3365_v20  ;;  %v10032_v50 = vpop.xlane.xlu1 %3354  ;;  %v5827_v20 = vmul.f32 %v9926_v30, %v9821_v49  ;;  %v4419_v19 = vmul.f32 %v10046_v18, %v3941_v41  ;;  %7037 = vmatmul.msk.bf16.gmra.mxu1 %vm2027_vm9, %v7082_v3  ;;  %vm4425_vm3 = vweird.f32 %v10046_v18  ;;  %v4931_v41 = vld [vmem:[%s12931_s7 + $0x158] sm:$0xff] }
 0x62e   :  { %v4060_v46 = vmul.f32 %v7206_v56, %v4059_v39  ;;  %6992 = vmatmul.msk.bf16.gmra.mxu0 %vm2027_vm9, %v7082_v3  ;;  %vm4426_vm5 = vmor %vm4424_vm4, %vm4425_vm3 }
 0x62f   :  { %v5917_v10 = vsub.f32 %v5737_v48, %v5827_v20  ;;  %v5261_v30 = vpop.permute.xlu2 %5260  ;;  %v4420_v20 = vmul.f32 %v10046_v18, %v4419_v19 }
 0x630   :  { %v4061_v31 = vmul.f32 0.5, %v4060_v46 }
 0x631   :  { %v4421_v46 = vmul.f32 0.5, %v4420_v20 }
 0x632   :  { %v4062_v16 = vsub.f32 1.5, %v4061_v31 }
 0x633   :  { %v4422_v19 = vsub.f32 1.5, %v4421_v46 }
 0x634   :  { %v4063_v15 = vmul.f32 %v7206_v56, %v4062_v16  ;;  %v5705_v16 = vld [vmem:[%s12932_s8 + $0x38] sm:$0xff] }
 0x635   :  { %2880 = vadd.xlane.f32.xlu1 %v2879_v47  ;;  %v10044_v47 = vpop.xlane.xlu1 %2868 }
 0x636   :  { %13204 = vst [vmem:[#allocation119_spill] sm:$0xff] %v10044_v47 }
 0x639   :  { %5095 = vperm.xlu2 %7132, %v10029_v14  }
 0x63d   :  { %3510 = vadd.xlane.f32.xlu1 %v3509_v9  ;;  %v10051_v11 = vpop.xlane.xlu1 %3498  ;;  %v4067_v9 = vsel %vm4066_vm2, %v7206_v56, %v4063_v15 }
 0x63e   :  { %13205 = vst [vmem:[#allocation120_spill] sm:$0xff] %v10051_v11  ;;  %v4985_v39 = vmul.f32 %v4895_v1, %v4067_v9  ;;  %v3135_v9 = vmul.f32 %v9957_v21, %v9957_v21  ;;  %v5595_v1 = vmul.f32 %v5261_v30, %v9036_v27 }
 0x640   :  { %6165 = vperm.xlu0 %7130, %v5917_v10   ;;  %v10062_v10 = vmul.f32 0.0051020407, %v9484_v62  ;;  %v5795_v56 = vmul.f32 %v4985_v39, %v9998_v6  ;;  %v5594_v62 = vmul.f32 %v5261_v30, %v9050_v58  ;;  %v7100_v6 = vld [vmem:[%s12930_s6 + $0x100] sm:$0xff] }
 0x641   :  { %v10048_v49 = vpop.xlane.xlu0 %2860  ;;  %7055 = vmatmul.msk.bf16.gmra.mxu3 %vm2027_vm9, %v7100_v6  ;;  %7010 = vmatmul.msk.bf16.gmra.mxu2 %vm2027_vm9, %v7100_v6  ;;  %v13207_v6 = vld [vmem:[#allocation65_spill] sm:$0xff] }
 0x642   :  { %v3724_v15 = vmul.f32 %v10062_v10, %v10062_v10  ;;  %v5885_v21 = vsub.f32 %v5705_v16, %v5795_v56 }
 0x644   :  { %v3814_v20 = vsub.f32 %v3634_v63, %v3724_v15  ;;  %v3360_v63 = vsel %vm1185_vm8, %v3135_v9, 0.0  ;;  %v4423_v15 = vmul.f32 %v10046_v18, %v4422_v19  ;;  %v10118_v9 = vmul.f32 0.0051020407, %v9533_v61  ;;  %v7083_v61 = vld [vmem:[%s12930_s6 + $0x78] sm:$0xff] }
 0x645   :  { %7038 = vmatmul.msk.bf16.gmra.mxu1 %vm2027_vm9, %v7083_v61  ;;  %6993 = vmatmul.msk.bf16.gmra.mxu0 %vm2027_vm9, %v7083_v61 }
 0x649   :  { %v10059_v4 = vpop.xlane.xlu0 %3490 }
 0x653   :  { %v10057_v48 = vpop.xlane.xlu2 %3494 }
 0x654   :  { %13206 = vst [vmem:[#allocation121_spill] sm:$0xff] %v10057_v48 }
 0x655   :  { %v5091_v31 = vpop.permute.xlu1 %5090 }
 0x656   :  { %5105 = vperm.xlu1 %7131, %v4985_v39   ;;  %v3134_v39 = vmul.f32 %v9963_v51, %v9963_v51  ;;  %v5526_v46 = vmul.f32 %v5091_v31, %v9062_v0  ;;  %v5527_v58 = vmul.f32 %v5091_v31, %v9054_v59 }
 0x658   :  { %v3361_v31 = vadd.f32 %v3360_v63, %v3134_v39  ;;  %v3760_v39 = vmul.f32 %v10118_v9, %v10118_v9 }
 0x65b   :  { %v6161_v5 = vpop.permute.xlu2 %6160 }
 0x65c   :  { %v6494_v48 = vadd.f32 %v6161_v5, %v5594_v62  ;;  %v6495_v27 = vadd.f32 %v6161_v5, %v5595_v1  ;;  %v5086_v30 = vpop.permute.xlu0 %5085  ;;  %v10099_v5 = vadd.f32 1e-05, %v3814_v20  ;;  %v3670_v20 = vmul.f32 0.0051020407, %v13207_v6 }
 0x65d   :  { %v5991_v26 = vpop.permute.xlu1 %5990  ;;  %v5525_v56 = vmul.f32 %v5086_v30, %v9029_v40 }
 0x65e   :  { %6674 = vst [vmem:[%s12933_s9 + $0x260] sm:$0xff] %v6494_v48  ;;  %v6426_v59 = vadd.f32 %v5991_v26, %v5526_v46  ;;  %v6427_v0 = vadd.f32 %v5991_v26, %v5527_v58  ;;  %6005 = vperm.xlu1 %7131, %v5885_v21   ;;  %v4427_v21 = vsel %vm4426_vm5, %v10046_v18, %v4423_v15  ;;  %v2870_v26 = vsel %vm1185_vm8, %v9965_v38, 0.0  ;;  %v5741_v46 = vld [vmem:[%s12932_s8 + $0x158] sm:$0xff] }
 0x65f   :  { %6675 = vst.msk [vmem:[%s12933_s9 + $0x268] sm:$0xff] %vm1185_vm8, %v6495_v27  ;;  %v5524_v48 = vmul.f32 %v5086_v30, %v9034_v25  ;;  %7209 = vrsqrt.f32 %v10099_v5  ;;  %v5021_v19 = vmul.f32 %v4931_v41, %v4427_v21  ;;  %v2871_v3 = vadd.f32 %v2870_v26, %v9974_v29 }
 0x660   :  { %6606 = vst [vmem:[%s12933_s9 + $0x40] sm:$0xff] %v6426_v59  ;;  %v3205_v25 = vmul.f32 %v9965_v38, %v9965_v38  ;;  %v3204_v27 = vmul.f32 %v9974_v29, %v9974_v29  ;;  %v3850_v30 = vsub.f32 %v3670_v20, %v3760_v39  ;;  %v13209_v59 = vld [vmem:[#allocation6_spill] sm:$0xff]  ;;  %vm4054_vm7 = vweird.f32 %v10099_v5 }
 0x661   :  { %6607 = vst.msk [vmem:[%s12933_s9 + $0x48] sm:$0xff] %vm1185_vm8, %v6427_v0  ;;  %v5831_v40 = vmul.f32 %v5021_v19, %v10026_v7  ;;  %v13208_v7 = vld [vmem:[#allocation7_spill] sm:$0xff] }
 0x662   :  { %3362 = vadd.xlane.f32.xlu2 %v3361_v31  ;;  %v3500_v63 = vsel %vm1185_vm8, %v3205_v25, 0.0 }
 0x663   :  { %v5921_v31 = vsub.f32 %v5741_v46, %v5831_v40  ;;  %v10165_v40 = vpop.f32.mrf.mxu1 }
 0x664   :  { %v5986_v16 = vpop.permute.xlu0 %5985  ;;  %13210 = vst [vmem:[#allocation65_spill] sm:$0xff] %v10165_v40 }
 0x665   :  { %v6424_v18 = vadd.f32 %v5986_v16, %v5524_v48  ;;  %v6425_v62 = vadd.f32 %v5986_v16, %v5525_v56  ;;  %v5271_v1 = vpop.permute.xlu1 %5270  ;;  %v7210_v58 = vpop.eup %7209  ;;  %v3501_v56 = vadd.f32 %v3500_v63, %v3204_v27  ;;  %v3940_v16 = vadd.f32 1e-05, %v3850_v30  ;;  %v4894_v27 = vld [vmem:[%s12931_s7 + $0x30] sm:$0xff] }
 0x666   :  { %5285 = vperm.xlu1 %7131, %v5021_v19   ;;  %v5598_v15 = vmul.f32 %v5271_v1, %v13208_v7  ;;  %v5599_v0 = vmul.f32 %v5271_v1, %v13209_v59  ;;  %v4049_v21 = vmul.f32 %v7210_v58, %v10099_v5  ;;  %v5703_v1 = vld [vmem:[%s12932_s8 + $0x28] sm:$0xff]  ;;  %vm4055_vm6 = vweird.f32 %v7210_v58  ;;  %v5704_v5 = vld [vmem:[%s12932_s8 + $0x30] sm:$0xff] }
 0x667   :  { %6604 = vst [vmem:[%s12933_s9 + $0x30] sm:$0xff] %v6424_v18  ;;  %7211 = vrsqrt.f32 %v3940_v16  ;;  %v5793_v18 = vmul.f32 %v10029_v14, %v9946_v57  ;;  %v10167_v14 = vpop.f32.mrf.mxu0  ;;  %vm4056_vm0 = vmor %vm4054_vm7, %vm4055_vm6  ;;  %vm4414_vm11 = vweird.f32 %v3940_v16 }
 0x668   :  { %6605 = vst.msk [vmem:[%s12933_s9 + $0x38] sm:$0xff] %vm1185_vm8, %v6425_v62  ;;  %v4050_v19 = vmul.f32 %v7210_v58, %v4049_v21 }
 0x669   :  { %v5883_v6 = vsub.f32 %v5703_v1, %v5793_v18  ;;  %13211 = vst [vmem:[#allocation7_spill] sm:$0xff] %v10167_v14 }
 0x66a   :  { %2872 = vadd.xlane.f32.xlu0 %v2871_v3  ;;  %v4051_v62 = vmul.f32 0.5, %v4050_v19  ;;  %v7101_v3 = vld [vmem:[%s12930_s6 + $0x108] sm:$0xff] }
 0x66b   :  { %7056 = vmatmul.msk.bf16.gmra.mxu3 %vm2027_vm9, %v7101_v3  ;;  %7011 = vmatmul.msk.bf16.gmra.mxu2 %vm2027_vm9, %v7101_v3  ;;  %v10173_v63 = vpop.f32.mrf.mxu1 }
 0x66c   :  { %v4052_v20 = vsub.f32 1.5, %v4051_v62  ;;  %13212 = vst [vmem:[#allocation6_spill] sm:$0xff] %v10173_v63 }
 0x66d   :  { %v6171_v41 = vpop.permute.xlu1 %6170  ;;  %v7212_v25 = vpop.eup %7211 }
 0x66e   :  { %v6498_v26 = vadd.f32 %v6171_v41, %v5598_v15  ;;  %v6499_v48 = vadd.f32 %v6171_v41, %v5599_v0  ;;  %6185 = vperm.xlu1 %7131, %v5921_v31   ;;  %v4409_v57 = vmul.f32 %v7212_v25, %v3940_v16  ;;  %v4053_v61 = vmul.f32 %v7210_v58, %v4052_v20  ;;  %v10181_v31 = vpop.f32.mrf.mxu3  ;;  %v4930_v20 = vld [vmem:[%s12931_s7 + $0x150] sm:$0xff] }
 0x66f   :  { %v10175_v15 = vpop.f32.mrf.mxu0  ;;  %13214 = vst [vmem:[#allocation123_spill] sm:$0xff] %v10181_v31  ;;  %vm4415_vm10 = vweird.f32 %v7212_v25 }
 0x670   :  { %6678 = vst [vmem:[%s12933_s9 + $0x280] sm:$0xff] %v6498_v26  ;;  %v4410_v39 = vmul.f32 %v7212_v25, %v4409_v57  ;;  %v4057_v46 = vsel %vm4056_vm0, %v7210_v58, %v4053_v61  ;;  %v13215_v58 = vld [vmem:[#allocation60_spill] sm:$0xff]  ;;  %v13216_v26 = vld [vmem:[#allocation63_spill] sm:$0xff]  ;;  %vm4416_vm12 = vmor %vm4414_vm11, %vm4415_vm10 }
 0x671   :  { %6679 = vst.msk [vmem:[%s12933_s9 + $0x288] sm:$0xff] %vm1185_vm8, %v6499_v48  ;;  %v4984_v30 = vmul.f32 %v4894_v27, %v4057_v46  ;;  %v10184_v21 = vmul.f32 0.0051020407, %v13215_v58  ;;  %v3669_v48 = vmul.f32 0.0051020407, %v13216_v26 }
 0x672   :  { %3502 = vadd.xlane.f32.xlu0 %v3501_v56  ;;  %v4411_v7 = vmul.f32 0.5, %v4410_v39  ;;  %13213 = vst [vmem:[#allocation122_spill] sm:$0xff] %v10175_v15  ;;  %v10187_v56 = vpop.f32.mrf.mxu2 }
 0x673   :  { %v5794_v59 = vmul.f32 %v4984_v30, %v10062_v10  ;;  %13217 = vst [vmem:[#allocation60_spill] sm:$0xff] %v10187_v56  ;;  %v10189_v18 = vpop.f32.mrf.mxu1  ;;  %v3759_v10 = vmul.f32 %v10184_v21, %v10184_v21 }
 0x674   :  { %v4412_v0 = vsub.f32 1.5, %v4411_v7  ;;  %13218 = vst [vmem:[#allocation63_spill] sm:$0xff] %v10189_v18  ;;  %v2746_v1 = vsel %vm1185_vm8, %v10189_v18, 0.0  ;;  %v3143_v16 = vmul.f32 %v10189_v18, %v10189_v18  ;;  %v13222_v7 = vld [vmem:[#allocation69_spill] sm:$0xff] }
 0x675   :  { %v5884_v41 = vsub.f32 %v5704_v5, %v5794_v59  ;;  %v3849_v62 = vsub.f32 %v3669_v48, %v3759_v10  ;;  %v10213_v59 = vmul.f32 0.0051020407, %v13222_v7  ;;  %v13223_v5 = vld [vmem:[#allocation72_spill] sm:$0xff]  ;;  %v2874_v48 = vsel %vm1185_vm8, %v9988_v37, 0.0 }
 0x676   :  { %v4413_v19 = vmul.f32 %v7212_v25, %v4412_v0  ;;  %v10203_v39 = vpop.f32.mrf.mxu3  ;;  %v3376_v0 = vsel %vm1185_vm8, %v3143_v16, 0.0  ;;  %v3638_v58 = vmul.f32 0.0051020407, %v13223_v5 }
 0x677   :  { %v10195_v3 = vpop.f32.mrf.mxu0  ;;  %13220 = vst [vmem:[#allocation125_spill] sm:$0xff] %v10203_v39  ;;  %v3939_v46 = vadd.f32 1e-05, %v3849_v62  ;;  %v3728_v26 = vmul.f32 %v10213_v59, %v10213_v59 }
 0x678   :  { %13219 = vst [vmem:[#allocation124_spill] sm:$0xff] %v10195_v3  ;;  %v2747_v57 = vadd.f32 %v2746_v1, %v10195_v3 }
 0x679   :  { %7213 = vrsqrt.f32 %v3939_v46  ;;  %v3818_v62 = vsub.f32 %v3638_v58, %v3728_v26  ;;  %v13227_v26 = vld [vmem:[#allocation75_spill] sm:$0xff]  ;;  %vm4404_vm14 = vweird.f32 %v3939_v46 }
 0x67a   :  { %5995 = vperm.xlu2 %7132, %v5883_v6   ;;  %v4417_v6 = vsel %vm4416_vm12, %v7212_v25, %v4413_v19  ;;  %v10208_v27 = vpop.f32.mrf.mxu2  ;;  %v3142_v25 = vmul.f32 %v10195_v3, %v10195_v3 }
 0x67b   :  { %v10201_v61 = vmul.f32 %v4930_v20, %v4417_v6  ;;  %13221 = vst [vmem:[#allocation126_spill] sm:$0xff] %v10208_v27  ;;  %v2875_v20 = vadd.f32 %v2874_v48, %v9995_v45  ;;  %v3908_v7 = vadd.f32 1e-05, %v3818_v62  ;;  %v10238_v48 = vmul.f32 0.0051020407, %v13227_v26  ;;  %v13230_v26 = vld [vmem:[#allocation3_spill] sm:$0xff] }
 0x67d   :  { %7215 = vrsqrt.f32 %v3908_v7  ;;  %vm4094_vm2 = vweird.f32 %v3908_v7 }
 0x67e   :  { %v10221_v19 = vpop.f32.mrf.mxu3 }
 0x67f   :  { %13224 = vst [vmem:[#allocation69_spill] sm:$0xff] %v10221_v19  ;;  %v7214_v10 = vpop.eup %7213  ;;  %v2890_v16 = vsel %vm1185_vm8, %v10221_v19, 0.0  ;;  %v3215_v5 = vmul.f32 %v10221_v19, %v10221_v19 }
 0x680   :  { %vm4405_vm13 = vweird.f32 %v7214_v10 }
 0x681   :  { %v3520_v51 = vsel %vm1185_vm8, %v3215_v5, 0.0  ;;  %vm4406_vm15 = vmor %vm4404_vm14, %vm4405_vm13 }
 0x683   :  { %v7216_v19 = vpop.eup %7215 }
 0x684   :  { %vm4095_vm1 = vweird.f32 %v7216_v19 }
 0x685   :  { %vm4096_vm3 = vmor %vm4094_vm2, %vm4095_vm1 }
 0x686   :  { %5100 = vperm.xlu0 %7130, %v4984_v30   ;;  %v5266_v30 = vpop.permute.xlu0 %5265 }
 0x687   :  { %v5596_v12 = vmul.f32 %v5266_v30, %v13230_v26  ;;  %v5597_v5 = vmul.f32 %v5266_v30, %v13231_v53 }
 0x68e   :  { %6000 = vperm.xlu0 %7130, %v5884_v41   ;;  %v3377_v41 = vadd.f32 %v3376_v0, %v3142_v25  ;;  %v4399_v25 = vmul.f32 %v7214_v10, %v3939_v46 }
 0x690   :  { %v4400_v58 = vmul.f32 %v7214_v10, %v4399_v25  ;;  %v3764_v25 = vmul.f32 %v10238_v48, %v10238_v48 }
 0x692   :  { %v4401_v18 = vmul.f32 0.5, %v4400_v58 }
 0x694   :  { %v4402_v54 = vsub.f32 1.5, %v4401_v18 }
 0x696   :  { %5280 = vperm.xlu0 %7130, %v10201_v61  }
 0x697   :  { %v10223_v1 = vpop.xlane.xlu0 %2728 }
 0x698   :  { %2748 = vadd.xlane.f32.xlu1 %v2747_v57  ;;  %v10225_v6 = vpop.xlane.xlu1 %2736  ;;  %v10228_v57 = vpop.f32.mrf.mxu2 }
 0x699   :  { %13225 = vst [vmem:[#allocation72_spill] sm:$0xff] %v10225_v6  ;;  %v2891_v0 = vadd.f32 %v2890_v16, %v10228_v57  ;;  %v4403_v6 = vmul.f32 %v7214_v10, %v4402_v54  ;;  %v2738_v54 = vsel %vm1185_vm8, %v10165_v40, 0.0 }
 0x69a   :  { %13226 = vst [vmem:[#allocation127_spill] sm:$0xff] %v10228_v57  ;;  %v2739_v30 = vadd.f32 %v2738_v54, %v10167_v14 }
 0x69b   :  { %v4407_v53 = vsel %vm4406_vm15, %v7214_v10, %v4403_v6 }
 0x69f   :  { %v10241_v3 = vpop.xlane.xlu0 %3358 }
 0x6a0   :  { %3378 = vadd.xlane.f32.xlu1 %v3377_v41  ;;  %v3214_v41 = vmul.f32 %v10228_v57, %v10228_v57  ;;  %v10243_v62 = vpop.xlane.xlu1 %3366 }
 0x6a1   :  { %13228 = vst [vmem:[#allocation75_spill] sm:$0xff] %v10243_v62 }
 0x6a2   :  { %v3521_v17 = vadd.f32 %v3520_v51, %v3214_v41 }
 0x6a3   :  { %2876 = vadd.xlane.f32.xlu2 %v2875_v20  ;;  %v13229_v20 = vld [vmem:[#allocation79_spill] sm:$0xff] }
 0x6a4   :  { %v3674_v16 = vmul.f32 0.0051020407, %v13229_v20 }
 0x6a6   :  { %v3854_v57 = vsub.f32 %v3674_v16, %v3764_v25  ;;  %v10275_v25 = vpop.xlane.xlu2 %2732 }
 0x6a7   :  { %13234 = vst [vmem:[#allocation4_spill] sm:$0xff] %v10275_v25 }
 0x6a8   :  { %2892 = vadd.xlane.f32.xlu1 %v2891_v0  ;;  %v4089_v0 = vmul.f32 %v7216_v19, %v3908_v7  ;;  %v3944_v11 = vadd.f32 1e-05, %v3854_v57  ;;  %v10250_v41 = vpop.xlane.xlu1 %2880  ;;  %v5708_v7 = vld [vmem:[%s12932_s8 + $0x50] sm:$0xff] }
 0x6a9   :  { %13232 = vst [vmem:[#allocation79_spill] sm:$0xff] %v10250_v41  ;;  %v3641_v41 = vmul.f32 0.0051020407, %v9635_v36 }
 0x6aa   :  { %v4090_v51 = vmul.f32 %v7216_v19, %v4089_v0  ;;  %7217 = vrsqrt.f32 %v3944_v11  ;;  %vm4454_vm5 = vweird.f32 %v3944_v11 }
 0x6b0   :  { %3522 = vadd.xlane.f32.xlu1 %v3521_v17  ;;  %v4091_v17 = vmul.f32 0.5, %v4090_v51  ;;  %v7218_v57 = vpop.eup %7217  ;;  %v10270_v10 = vpop.xlane.xlu1 %3510 }
 0x6b1   :  { %13233 = vst [vmem:[#allocation3_spill] sm:$0xff] %v10270_v10  ;;  %v4449_v6 = vmul.f32 %v7218_v57, %v3944_v11  ;;  %vm4455_vm4 = vweird.f32 %v7218_v57  ;;  %v5830_v11 = vmul.f32 %v10201_v61, %v10118_v9  ;;  %v13238_v9 = vld [vmem:[#allocation5_spill] sm:$0xff] }
 0x6b2   :  { %v6166_v58 = vpop.permute.xlu0 %6165  ;;  %v4092_v46 = vsub.f32 1.5, %v4091_v17  ;;  %vm4456_vm6 = vmor %vm4454_vm5, %vm4455_vm4 }
 0x6b3   :  { %v6496_v62 = vadd.f32 %v6166_v58, %v5596_v12  ;;  %v6497_v47 = vadd.f32 %v6166_v58, %v5597_v5  ;;  %v4929_v12 = vld [vmem:[%s12931_s7 + $0x148] sm:$0xff]  ;;  %v4450_v0 = vmul.f32 %v7218_v57, %v4449_v6  ;;  %v4898_v58 = vld [vmem:[%s12931_s7 + $0x50] sm:$0xff] }
 0x6b4   :  { %v10264_v18 = vmul.f32 %v4929_v12, %v4407_v53  ;;  %v4093_v20 = vmul.f32 %v7216_v19, %v4092_v46  ;;  %v5096_v46 = vpop.permute.xlu2 %5095 }
 0x6b5   :  { %6676 = vst [vmem:[%s12933_s9 + $0x270] sm:$0xff] %v6496_v62  ;;  %v3138_v62 = vmul.f32 %v10167_v14, %v10167_v14  ;;  %v4451_v53 = vmul.f32 0.5, %v4450_v0  ;;  %v5528_v61 = vmul.f32 %v5096_v46, %v13238_v9  ;;  %v10346_v9 = vpop.f32.mrf.mxu0 }
 0x6b6   :  { %6677 = vst.msk [vmem:[%s12933_s9 + $0x278] sm:$0xff] %vm1185_vm8, %v6497_v47  ;;  %v3139_v47 = vmul.f32 %v10165_v40, %v10165_v40  ;;  %v4097_v5 = vsel %vm4096_vm3, %v7216_v19, %v4093_v20  ;;  %v13236_v19 = vld [vmem:[#allocation12_spill] sm:$0xff] }
 0x6b7   :  { %v4988_v51 = vmul.f32 %v4898_v58, %v4097_v5  ;;  %v4452_v54 = vsub.f32 1.5, %v4451_v53  ;;  %v5740_v53 = vld [vmem:[%s12932_s8 + $0x150] sm:$0xff]  ;;  %13243 = vst [vmem:[#allocation5_spill] sm:$0xff] %v10346_v9 }
 0x6b8   :  { %v3368_v16 = vsel %vm1185_vm8, %v3139_v47, 0.0 }
 0x6b9   :  { %v3369_v26 = vadd.f32 %v3368_v16, %v3138_v62  ;;  %v5798_v17 = vmul.f32 %v4988_v51, %v10213_v59  ;;  %v4453_v16 = vmul.f32 %v7218_v57, %v4452_v54  ;;  %v3207_v54 = vmul.f32 %v9988_v37, %v9988_v37 }
 0x6bb   :  { %5275 = vperm.xlu2 %7132, %v10264_v18   ;;  %v5888_v62 = vsub.f32 %v5708_v7, %v5798_v17  ;;  %v4457_v59 = vsel %vm4456_vm6, %v7218_v57, %v4453_v16  ;;  %v7084_v57 = vld [vmem:[%s12930_s6 + $0x80] sm:$0xff]  ;;  %v5920_v17 = vsub.f32 %v5740_v53, %v5830_v11  ;;  %v3504_v11 = vsel %vm1185_vm8, %v3207_v54, 0.0  ;;  %v10342_v54 = vpop.f32.mrf.mxu1 }
 0x6bc   :  { %7039 = vmatmul.msk.bf16.gmra.mxu1 %vm2027_vm9, %v7084_v57  ;;  %6994 = vmatmul.msk.bf16.gmra.mxu0 %vm2027_vm9, %v7084_v57  ;;  %13242 = vst [vmem:[#allocation12_spill] sm:$0xff] %v10342_v54 }
 0x6c0   :  { %2740 = vadd.xlane.f32.xlu0 %v2739_v30  ;;  %v13235_v30 = vld [vmem:[#allocation13_spill] sm:$0xff] }
 0x6c8   :  { %v5106_v12 = vpop.permute.xlu1 %5105  ;;  %3370 = vadd.xlane.f32.xlu0 %v3369_v26  ;;  %v4934_v26 = vld [vmem:[%s12931_s7 + $0x170] sm:$0xff] }
 0x6c9   :  { %5120 = vperm.xlu1 %7131, %v4988_v51   ;;  %v5532_v47 = vmul.f32 %v5106_v12, %v13235_v30  ;;  %v5533_v6 = vmul.f32 %v5106_v12, %v13236_v19  ;;  %v5024_v51 = vmul.f32 %v4934_v26, %v4457_v59  ;;  %v13239_v30 = vld [vmem:[#allocation2_spill] sm:$0xff]  ;;  %v5744_v19 = vld [vmem:[%s12932_s8 + $0x170] sm:$0xff] }
 0x6cb   :  { %v5834_v7 = vmul.f32 %v5024_v51, %v10238_v48  ;;  %v3206_v48 = vmul.f32 %v9995_v45, %v9995_v45 }
 0x6cd   :  { %v5924_v26 = vsub.f32 %v5744_v19, %v5834_v7 }
 0x6d0   :  { %v6006_v20 = vpop.permute.xlu1 %6005 }
 0x6d1   :  { %v6432_v0 = vadd.f32 %v6006_v20, %v5532_v47  ;;  %v6433_v5 = vadd.f32 %v6006_v20, %v5533_v6  ;;  %6020 = vperm.xlu1 %7131, %v5888_v62   ;;  %v5529_v47 = vmul.f32 %v5096_v46, %v13239_v30  ;;  %v7102_v6 = vld [vmem:[%s12930_s6 + $0x110] sm:$0xff]  ;;  %v13240_v46 = vld [vmem:[#allocation19_spill] sm:$0xff] }
 0x6d2   :  { %7057 = vmatmul.msk.bf16.gmra.mxu3 %vm2027_vm9, %v7102_v6  ;;  %7012 = vmatmul.msk.bf16.gmra.mxu2 %vm2027_vm9, %v7102_v6 }
 0x6d3   :  { %6612 = vst [vmem:[%s12933_s9 + $0x70] sm:$0xff] %v6432_v0 }
 0x6d4   :  { %6613 = vst.msk [vmem:[%s12933_s9 + $0x78] sm:$0xff] %vm1185_vm8, %v6433_v5  ;;  %v13241_v5 = vld [vmem:[#allocation18_spill] sm:$0xff] }
 0x6d5   :  { %v10296_v58 = vpop.xlane.xlu2 %3362 }
 0x6d6   :  { %13237 = vst [vmem:[#allocation13_spill] sm:$0xff] %v10296_v58 }
 0x6d8   :  { %v5286_v12 = vpop.permute.xlu1 %5285 }
 0x6d9   :  { %5300 = vperm.xlu1 %7131, %v5024_v51   ;;  %v5604_v0 = vmul.f32 %v5286_v12, %v13240_v46  ;;  %v5605_v59 = vmul.f32 %v5286_v12, %v13241_v5  ;;  %v10361_v5 = vpop.f32.mrf.mxu0 }
 0x6da   :  { %13247 = vst [vmem:[#allocation19_spill] sm:$0xff] %v10361_v5 }
 0x6dc   :  { %6180 = vperm.xlu0 %7130, %v5920_v17   ;;  %v3505_v17 = vadd.f32 %v3504_v11, %v3206_v48  ;;  %v5739_v48 = vld [vmem:[%s12932_s8 + $0x148] sm:$0xff]  ;;  %v13249_v11 = vld [vmem:[#allocation9_spill] sm:$0xff] }
 0x6dd   :  { %v5996_v62 = vpop.permute.xlu2 %5995  ;;  %v10340_v12 = vpop.xlane.xlu0 %2872 }
 0x6de   :  { %v6428_v20 = vadd.f32 %v5996_v62, %v5528_v61  ;;  %v6429_v16 = vadd.f32 %v5996_v62, %v5529_v47  ;;  %v13244_v61 = vld [vmem:[#allocation68_spill] sm:$0xff]  ;;  %v13245_v47 = vld [vmem:[#allocation70_spill] sm:$0xff]  ;;  %v5829_v62 = vmul.f32 %v10264_v18, %v10184_v21  ;;  %v2882_v18 = vsel %vm1185_vm8, %v10181_v31, 0.0 }
 0x6df   :  { %v10349_v30 = vmul.f32 0.0051020407, %v13244_v61  ;;  %v3637_v19 = vmul.f32 0.0051020407, %v13245_v47 }
 0x6e0   :  { %6608 = vst [vmem:[%s12933_s9 + $0x50] sm:$0xff] %v6428_v20  ;;  %v6186_v51 = vpop.permute.xlu1 %6185  ;;  %v10359_v20 = vpop.f32.mrf.mxu1 }
 0x6e1   :  { %6609 = vst.msk [vmem:[%s12933_s9 + $0x58] sm:$0xff] %vm1185_vm8, %v6429_v16  ;;  %v6504_v53 = vadd.f32 %v6186_v51, %v5604_v0  ;;  %v6505_v57 = vadd.f32 %v6186_v51, %v5605_v59  ;;  %6200 = vperm.xlu1 %7131, %v5924_v26   ;;  %v3727_v6 = vmul.f32 %v10349_v30, %v10349_v30  ;;  %v10365_v26 = vpop.f32.mrf.mxu3 }
 0x6e2   :  { %13246 = vst [vmem:[#allocation2_spill] sm:$0xff] %v10359_v20  ;;  %v5919_v0 = vsub.f32 %v5739_v48, %v5829_v62  ;;  %v2883_v48 = vadd.f32 %v2882_v18, %v10187_v56  ;;  %v3210_v18 = vmul.f32 %v10187_v56, %v10187_v56 }
 0x6e3   :  { %6684 = vst [vmem:[%s12933_s9 + $0x2b0] sm:$0xff] %v6504_v53  ;;  %v3817_v16 = vsub.f32 %v3637_v19, %v3727_v6  ;;  %v13250_v53 = vld [vmem:[#allocation8_spill] sm:$0xff]  ;;  %v13253_v6 = vld [vmem:[#allocation73_spill] sm:$0xff] }
 0x6e4   :  { %6685 = vst.msk [vmem:[%s12933_s9 + $0x2b8] sm:$0xff] %vm1185_vm8, %v6505_v57  ;;  %3506 = vadd.xlane.f32.xlu2 %v3505_v17  ;;  %v10372_v17 = vpop.f32.mrf.mxu2  ;;  %v10377_v62 = vmul.f32 0.0051020407, %v13253_v6 }
 0x6e5   :  { %v10344_v7 = vpop.xlane.xlu0 %3502  ;;  %v10363_v59 = vadd.f32 1e-05, %v3817_v16  ;;  %13248 = vst [vmem:[#allocation18_spill] sm:$0xff] %v10365_v26  ;;  %v3211_v16 = vmul.f32 %v10181_v31, %v10181_v31 }
 0x6e6   :  { %13251 = vst [vmem:[#allocation68_spill] sm:$0xff] %v10372_v17 }
 0x6e7   :  { %7219 = vrsqrt.f32 %v10363_v59  ;;  %vm4084_vm0 = vweird.f32 %v10363_v59 }
 0x6e8   :  { %v10374_v19 = vpop.f32.mrf.mxu1 }
 0x6e9   :  { %13252 = vst [vmem:[#allocation70_spill] sm:$0xff] %v10374_v19  ;;  %v10400_v6 = vpop.f32.mrf.mxu3 }
 0x6ea   :  { %13256 = vst [vmem:[#allocation8_spill] sm:$0xff] %v10400_v6 }
 0x6ec   :  { %v10405_v58 = vpop.f32.mrf.mxu2 }
 0x6ed   :  { %13257 = vst [vmem:[#allocation73_spill] sm:$0xff] %v10405_v58 }
 0x6f8   :  { %v5101_v46 = vpop.permute.xlu0 %5100 }
 0x6f9   :  { %v5530_v51 = vmul.f32 %v5101_v46, %v13249_v11  ;;  %v5531_v21 = vmul.f32 %v5101_v46, %v13250_v53  ;;  %v13254_v46 = vld [vmem:[#allocation76_spill] sm:$0xff]  ;;  %v2758_v11 = vsel %vm1185_vm8, %v10374_v19, 0.0  ;;  %v7220_v53 = vpop.eup %7219 }
 0x6fa   :  { %v4079_v37 = vmul.f32 %v7220_v53, %v10363_v59  ;;  %vm4085_vm7 = vweird.f32 %v7220_v53  ;;  %v3677_v59 = vmul.f32 0.0051020407, %v9656_v24 }
 0x6fb   :  { %vm4086_vm10 = vmor %vm4084_vm0, %vm4085_vm7 }
 0x6fc   :  { %6175 = vperm.xlu2 %7132, %v5919_v0   ;;  %v3673_v0 = vmul.f32 0.0051020407, %v13254_v46  ;;  %v3149_v46 = vmul.f32 %v10374_v19, %v10374_v19  ;;  %v4080_v19 = vmul.f32 %v7220_v53, %v4079_v37 }
 0x700   :  { %v6001_v57 = vpop.permute.xlu0 %6000 }
 0x701   :  { %v6430_v61 = vadd.f32 %v6001_v57, %v5530_v51  ;;  %v6431_v47 = vadd.f32 %v6001_v57, %v5531_v21  ;;  %v10392_v51 = vpop.f32.mrf.mxu0  ;;  %v3763_v21 = vmul.f32 %v10377_v62, %v10377_v62 }
 0x702   :  { %13255 = vst [vmem:[#allocation9_spill] sm:$0xff] %v10392_v51  ;;  %v2759_v57 = vadd.f32 %v2758_v11, %v10392_v51  ;;  %v3148_v25 = vmul.f32 %v10392_v51, %v10392_v51  ;;  %v13258_v11 = vld [vmem:[#allocation82_spill] sm:$0xff] }
 0x703   :  { %6610 = vst [vmem:[%s12933_s9 + $0x60] sm:$0xff] %v6430_v61  ;;  %v3512_v61 = vsel %vm1185_vm8, %v3211_v16, 0.0  ;;  %v10412_v10 = vmul.f32 0.0051020407, %v13258_v11  ;;  %v3388_v16 = vsel %vm1185_vm8, %v3149_v46, 0.0  ;;  %v4081_v11 = vmul.f32 0.5, %v4080_v19  ;;  %v10425_v46 = vpop.f32.mrf.mxu3 }
 0x704   :  { %6611 = vst.msk [vmem:[%s12933_s9 + $0x68] sm:$0xff] %vm1185_vm8, %v6431_v47  ;;  %v3853_v47 = vsub.f32 %v3673_v0, %v3763_v21  ;;  %v3513_v45 = vadd.f32 %v3512_v61, %v3210_v18  ;;  %v13259_v0 = vld [vmem:[#allocation67_spill] sm:$0xff]  ;;  %v3389_v31 = vadd.f32 %v3388_v16, %v3148_v25  ;;  %v2902_v36 = vsel %vm1185_vm8, %v10425_v46, 0.0 }
 0x705   :  { %v10416_v21 = vmul.f32 0.0051020407, %v13259_v0  ;;  %v13260_v18 = vld [vmem:[#allocation71_spill] sm:$0xff]  ;;  %13261 = vst [vmem:[#allocation76_spill] sm:$0xff] %v10425_v46  ;;  %v4082_v25 = vsub.f32 1.5, %v4081_v11 }
 0x706   :  { %2884 = vadd.xlane.f32.xlu0 %v2883_v48  ;;  %v10409_v48 = vadd.f32 1e-05, %v3853_v47  ;;  %v3636_v61 = vmul.f32 0.0051020407, %v13260_v18 }
 0x707   :  { %v3726_v47 = vmul.f32 %v10416_v21, %v10416_v21 }
 0x708   :  { %7221 = vrsqrt.f32 %v10409_v48  ;;  %vm4444_vm12 = vweird.f32 %v10409_v48 }
 0x709   :  { %v3816_v51 = vsub.f32 %v3636_v61, %v3726_v47  ;;  %v4083_v61 = vmul.f32 %v7220_v53, %v4082_v25 }
 0x70b   :  { %2760 = vadd.xlane.f32.xlu1 %v2759_v57  ;;  %v3731_v57 = vmul.f32 %v10412_v10, %v10412_v10  ;;  %v10427_v37 = vpop.xlane.xlu1 %2748  ;;  %v10435_v56 = vadd.f32 1e-05, %v3816_v51  ;;  %v10447_v51 = vmul.f32 0.0051020407, %v9647_v44 }
 0x70c   :  { %13262 = vst [vmem:[#allocation82_spill] sm:$0xff] %v10427_v37 }
 0x70d   :  { %v3821_v0 = vsub.f32 %v3641_v41, %v3731_v57  ;;  %v3221_v41 = vmul.f32 %v10425_v46, %v10425_v46  ;;  %v2742_v46 = vsel %vm1185_vm8, %v10173_v63, 0.0  ;;  %v3767_v44 = vmul.f32 %v10447_v51, %v10447_v51 }
 0x70e   :  { %3514 = vadd.xlane.f32.xlu0 %v3513_v45  ;;  %v10431_v45 = vpop.f32.mrf.mxu2  ;;  %v7222_v16 = vpop.eup %7221  ;;  %vm4074_vm2 = vweird.f32 %v10435_v56 }
 0x70f   :  { %13263 = vst [vmem:[#allocation67_spill] sm:$0xff] %v10431_v45  ;;  %v10433_v18 = vadd.f32 1e-05, %v3821_v0  ;;  %v2903_v19 = vadd.f32 %v2902_v36, %v10431_v45  ;;  %v3220_v57 = vmul.f32 %v10431_v45, %v10431_v45  ;;  %v3532_v47 = vsel %vm1185_vm8, %v3221_v41, 0.0  ;;  %v4897_v36 = vld [vmem:[%s12931_s7 + $0x48] sm:$0xff] }
 0x710   :  { %v4087_v0 = vsel %vm4086_vm10, %v7220_v53, %v4083_v61  ;;  %v2743_v53 = vadd.f32 %v2742_v46, %v10175_v15  ;;  %v3857_v61 = vsub.f32 %v3677_v59, %v3767_v44  ;;  %vm4445_vm11 = vweird.f32 %v7222_v16  ;;  %v4933_v44 = vld [vmem:[%s12931_s7 + $0x168] sm:$0xff] }
 0x711   :  { %7223 = vrsqrt.f32 %v10433_v18  ;;  %v4987_v37 = vmul.f32 %v4897_v36, %v4087_v0  ;;  %vm4446_vm13 = vmor %vm4444_vm12, %vm4445_vm11  ;;  %vm4124_vm1 = vweird.f32 %v10433_v18 }
 0x712   :  { %7225 = vrsqrt.f32 %v10435_v56 }
 0x713   :  { %3390 = vadd.xlane.f32.xlu1 %v3389_v31  ;;  %v4439_v31 = vmul.f32 %v7222_v16, %v10409_v48  ;;  %v10453_v25 = vpop.xlane.xlu1 %3378 }
 0x714   :  { %13264 = vst [vmem:[#allocation71_spill] sm:$0xff] %v10453_v25  ;;  %v5797_v25 = vmul.f32 %v4987_v37, %v10349_v30 }
 0x715   :  { %v4440_v11 = vmul.f32 %v7222_v16, %v4439_v31 }
 0x717   :  { %v7224_v45 = vpop.eup %7223  ;;  %v4441_v31 = vmul.f32 0.5, %v4440_v11 }
 0x718   :  { %v7226_v41 = vpop.eup %7225  ;;  %v4119_v40 = vmul.f32 %v7224_v45, %v10433_v18  ;;  %vm4125_vm14 = vweird.f32 %v7224_v45 }
 0x719   :  { %v4069_v24 = vmul.f32 %v7226_v41, %v10435_v56  ;;  %v4442_v14 = vsub.f32 1.5, %v4441_v31  ;;  %vm4075_vm15 = vweird.f32 %v7226_v41  ;;  %vm4126_vm3 = vmor %vm4124_vm1, %vm4125_vm14 }
 0x71a   :  { %v4120_v0 = vmul.f32 %v7224_v45, %v4119_v40  ;;  %vm4076_vm4 = vmor %vm4074_vm2, %vm4075_vm15 }
 0x71b   :  { %2904 = vadd.xlane.f32.xlu1 %v2903_v19  ;;  %v3533_v19 = vadd.f32 %v3532_v47, %v3220_v57  ;;  %v5707_v57 = vld [vmem:[%s12932_s8 + $0x48] sm:$0xff]  ;;  %v3947_v47 = vadd.f32 1e-05, %v3857_v61  ;;  %v10467_v11 = vpop.xlane.xlu1 %2892  ;;  %v4070_v46 = vmul.f32 %v7226_v41, %v4069_v24  ;;  %v4443_v59 = vmul.f32 %v7222_v16, %v4442_v14  ;;  %v5281_v14 = vpop.permute.xlu0 %5280 }
 0x71c   :  { %13265 = vst [vmem:[#allocation128_spill] sm:$0xff] %v10467_v11  ;;  %v5887_v36 = vsub.f32 %v5707_v57, %v5797_v25 }
 0x71d   :  { %7227 = vrsqrt.f32 %v3947_v47  ;;  %v4071_v30 = vmul.f32 0.5, %v4070_v46  ;;  %v4901_v46 = vld [vmem:[%s12931_s7 + $0x68] sm:$0xff]  ;;  %vm4484_vm6 = vweird.f32 %v3947_v47 }
 0x722   :  { %5115 = vperm.xlu0 %7130, %v4987_v37   ;;  %v4447_v37 = vsel %vm4446_vm13, %v7222_v16, %v4443_v59  ;;  %v4896_v59 = vld [vmem:[%s12931_s7 + $0x40] sm:$0xff] }
 0x723   :  { %3534 = vadd.xlane.f32.xlu1 %v3533_v19  ;;  %v4121_v19 = vmul.f32 0.5, %v4120_v0  ;;  %v7228_v40 = vpop.eup %7227  ;;  %v10473_v61 = vmul.f32 %v4933_v44, %v4447_v37  ;;  %v10475_v25 = vpop.xlane.xlu1 %3522 }
 0x724   :  { %13266 = vst [vmem:[#allocation129_spill] sm:$0xff] %v10475_v25  ;;  %v4479_v48 = vmul.f32 %v7228_v40, %v3947_v47  ;;  %vm4485_vm5 = vweird.f32 %v7228_v40  ;;  %v7103_v47 = vld [vmem:[%s12930_s6 + $0x118] sm:$0xff] }
 0x725   :  { %2744 = vadd.xlane.f32.xlu2 %v2743_v53  ;;  %v4122_v31 = vsub.f32 1.5, %v4121_v19  ;;  %v4072_v53 = vsub.f32 1.5, %v4071_v30  ;;  %vm4486_vm7 = vmor %vm4484_vm6, %vm4485_vm5  ;;  %7058 = vmatmul.msk.bf16.gmra.mxu3 %vm2027_vm9, %v7103_v47 }
 0x726   :  { %v4480_v16 = vmul.f32 %v7228_v40, %v4479_v48  ;;  %v13268_v48 = vld [vmem:[#allocation24_spill] sm:$0xff]  ;;  %7013 = vmatmul.msk.bf16.gmra.mxu2 %vm2027_vm9, %v7103_v47 }
 0x727   :  { %v4123_v24 = vmul.f32 %v7224_v45, %v4122_v31  ;;  %v4073_v57 = vmul.f32 %v7226_v41, %v4072_v53  ;;  %v13267_v31 = vld [vmem:[#allocation25_spill] sm:$0xff] }
 0x728   :  { %v4481_v37 = vmul.f32 0.5, %v4480_v16 }
 0x729   :  { %v4127_v0 = vsel %vm4126_vm3, %v7224_v45, %v4123_v24 }
 0x72a   :  { %6015 = vperm.xlu0 %7130, %v5887_v36   ;;  %v4077_v36 = vsel %vm4076_vm4, %v7226_v41, %v4073_v57  ;;  %v4991_v19 = vmul.f32 %v4901_v46, %v4127_v0  ;;  %v4482_v45 = vsub.f32 1.5, %v4481_v37  ;;  %v5711_v41 = vld [vmem:[%s12932_s8 + $0x68] sm:$0xff] }
 0x72b   :  { %v10488_v44 = vmul.f32 %v4896_v59, %v4077_v36  ;;  %v4937_v37 = vld [vmem:[%s12931_s7 + $0x188] sm:$0xff] }
 0x72c   :  { %v5801_v56 = vmul.f32 %v4991_v19, %v10412_v10  ;;  %v4483_v0 = vmul.f32 %v7228_v40, %v4482_v45  ;;  %v10499_v10 = vpop.xlane.xlu2 %2876  ;;  %v13270_v45 = vld [vmem:[#allocation15_spill] sm:$0xff] }
 0x72d   :  { %13269 = vst [vmem:[#allocation25_spill] sm:$0xff] %v10499_v10 }
 0x72e   :  { %v5891_v57 = vsub.f32 %v5711_v41, %v5801_v56  ;;  %v5602_v41 = vmul.f32 %v5281_v14, %v13270_v45  ;;  %v2750_v45 = vsel %vm1185_vm8, %v10342_v54, 0.0 }
 0x732   :  { %5295 = vperm.xlu0 %7130, %v10473_v61  }
 0x733   :  { %v10486_v30 = vpop.xlane.xlu0 %2740 }
 0x73b   :  { %v5121_v18 = vpop.permute.xlu1 %5120  ;;  %v10497_v59 = vpop.xlane.xlu0 %3370 }
 0x73c   :  { %5135 = vperm.xlu1 %7131, %v4991_v19   ;;  %v5538_v53 = vmul.f32 %v5121_v18, %v13267_v31  ;;  %v5539_v24 = vmul.f32 %v5121_v18, %v13268_v48  ;;  %v4487_v19 = vsel %vm4486_vm7, %v7228_v40, %v4483_v0  ;;  %v13271_v31 = vld [vmem:[#allocation14_spill] sm:$0xff]  ;;  %v5747_v0 = vld [vmem:[%s12932_s8 + $0x188] sm:$0xff] }
 0x73d   :  { %5110 = vperm.xlu2 %7132, %v10488_v44   ;;  %v5027_v18 = vmul.f32 %v4937_v37, %v4487_v19 }
 0x73f   :  { %v5837_v48 = vmul.f32 %v5027_v18, %v10447_v51 }
 0x741   :  { %v5927_v51 = vsub.f32 %v5747_v0, %v5837_v48  ;;  %v3141_v48 = vmul.f32 %v10173_v63, %v10173_v63 }
 0x743   :  { %v6021_v16 = vpop.permute.xlu1 %6020 }
 0x744   :  { %v6438_v46 = vadd.f32 %v6021_v16, %v5538_v53  ;;  %v6439_v36 = vadd.f32 %v6021_v16, %v5539_v24  ;;  %6035 = vperm.xlu1 %7131, %v5891_v57   ;;  %v5603_v53 = vmul.f32 %v5281_v14, %v13271_v31  ;;  %v5276_v24 = vpop.permute.xlu2 %5275  ;;  %v3145_v31 = vmul.f32 %v10342_v54, %v10342_v54 }
 0x746   :  { %6618 = vst [vmem:[%s12933_s9 + $0xa0] sm:$0xff] %v6438_v46  ;;  %v13272_v46 = vld [vmem:[#allocation31_spill] sm:$0xff] }
 0x747   :  { %6619 = vst.msk [vmem:[%s12933_s9 + $0xa8] sm:$0xff] %vm1185_vm8, %v6439_v36  ;;  %v13273_v36 = vld [vmem:[#allocation30_spill] sm:$0xff] }
 0x74b   :  { %v5301_v56 = vpop.permute.xlu1 %5300 }
 0x74c   :  { %5315 = vperm.xlu1 %7131, %v5027_v18   ;;  %v5610_v14 = vmul.f32 %v5301_v56, %v13272_v46  ;;  %v5611_v19 = vmul.f32 %v5301_v56, %v13273_v36  ;;  %v13276_v46 = vld [vmem:[#allocation10_spill] sm:$0xff] }
 0x74e   :  { %v6181_v40 = vpop.permute.xlu0 %6180 }
 0x74f   :  { %v6502_v57 = vadd.f32 %v6181_v40, %v5602_v41  ;;  %v6503_v16 = vadd.f32 %v6181_v40, %v5603_v53  ;;  %v2751_v41 = vadd.f32 %v2750_v45, %v10346_v9  ;;  %v7104_v53 = vld [vmem:[%s12930_s6 + $0x120] sm:$0xff]  ;;  %v3144_v40 = vmul.f32 %v10346_v9, %v10346_v9 }
 0x750   :  { %7059 = vmatmul.msk.bf16.gmra.mxu3 %vm2027_vm9, %v7104_v53  ;;  %7014 = vmatmul.msk.bf16.gmra.mxu2 %vm2027_vm9, %v7104_v53  ;;  %v3372_v45 = vsel %vm1185_vm8, %v3141_v48, 0.0  ;;  %v5833_v48 = vmul.f32 %v10473_v61, %v10377_v62  ;;  %v5706_v62 = vld [vmem:[%s12932_s8 + $0x40] sm:$0xff]  ;;  %v3217_v9 = vmul.f32 %v10365_v26, %v10365_v26 }
 0x751   :  { %6682 = vst [vmem:[%s12933_s9 + $0x2a0] sm:$0xff] %v6502_v57  ;;  %v3380_v57 = vsel %vm1185_vm8, %v3145_v31, 0.0 }
 0x752   :  { %6683 = vst.msk [vmem:[%s12933_s9 + $0x2a8] sm:$0xff] %vm1185_vm8, %v6503_v16  ;;  %v13275_v16 = vld [vmem:[#allocation11_spill] sm:$0xff] }
 0x753   :  { %v6201_v37 = vpop.permute.xlu1 %6200  ;;  %v5600_v0 = vmul.f32 %v5276_v24, %v13275_v16  ;;  %v10582_v16 = vpop.f32.mrf.mxu2 }
 0x754   :  { %v6510_v18 = vadd.f32 %v6201_v37, %v5610_v14  ;;  %v6511_v47 = vadd.f32 %v6201_v37, %v5611_v19  ;;  %6215 = vperm.xlu1 %7131, %v5927_v51   ;;  %v5601_v14 = vmul.f32 %v5276_v24, %v13276_v46  ;;  %v3140_v19 = vmul.f32 %v10175_v15, %v10175_v15  ;;  %v10569_v24 = vpop.f32.mrf.mxu0 }
 0x756   :  { %6690 = vst [vmem:[%s12933_s9 + $0x2e0] sm:$0xff] %v6510_v18  ;;  %v3381_v18 = vadd.f32 %v3380_v57, %v3144_v40  ;;  %v10575_v40 = vpop.f32.mrf.mxu3  ;;  %v5743_v57 = vld [vmem:[%s12932_s8 + $0x168] sm:$0xff] }
 0x757   :  { %6691 = vst.msk [vmem:[%s12933_s9 + $0x2e8] sm:$0xff] %vm1185_vm8, %v6511_v47  ;;  %v10540_v56 = vpop.xlane.xlu2 %3506  ;;  %v10559_v47 = vpop.f32.mrf.mxu1  ;;  %v5923_v46 = vsub.f32 %v5743_v57, %v5833_v48  ;;  %v3644_v57 = vmul.f32 0.0051020407, %v9683_v34 }
 0x758   :  { %13274 = vst [vmem:[#allocation24_spill] sm:$0xff] %v10540_v56 }
 0x75c   :  { %2752 = vadd.xlane.f32.xlu0 %v2751_v41  ;;  %v3373_v41 = vadd.f32 %v3372_v45, %v3140_v19  ;;  %v10573_v53 = vpop.f32.mrf.mxu0  ;;  %v5796_v19 = vmul.f32 %v10488_v44, %v10416_v21  ;;  %v10600_v45 = vpop.f32.mrf.mxu2  ;;  %v10605_v21 = vmul.f32 0.0051020407, %v9668_v35 }
 0x75d   :  { %13278 = vst [vmem:[#allocation14_spill] sm:$0xff] %v10573_v53 }
 0x75e   :  { %13282 = vst [vmem:[#allocation10_spill] sm:$0xff] %v10600_v45 }
 0x75f   :  { %v6176_v36 = vpop.permute.xlu2 %6175  ;;  %v10571_v31 = vpop.f32.mrf.mxu1 }
 0x760   :  { %v6500_v51 = vadd.f32 %v6176_v36, %v5600_v0  ;;  %v6501_v37 = vadd.f32 %v6176_v36, %v5601_v14  ;;  %13277 = vst [vmem:[#allocation15_spill] sm:$0xff] %v10571_v31 }
 0x762   :  { %6680 = vst [vmem:[%s12933_s9 + $0x290] sm:$0xff] %v6500_v51  ;;  %v10596_v51 = vpop.f32.mrf.mxu3 }
 0x763   :  { %6681 = vst.msk [vmem:[%s12933_s9 + $0x298] sm:$0xff] %vm1185_vm8, %v6501_v37 }
 0x764   :  { %3382 = vadd.xlane.f32.xlu0 %v3381_v18  ;;  %v10588_v36 = vpop.f32.mrf.mxu0  ;;  %13281 = vst [vmem:[#allocation11_spill] sm:$0xff] %v10596_v51  ;;  %v5886_v18 = vsub.f32 %v5706_v62, %v5796_v19 }
 0x765   :  { %13280 = vst [vmem:[#allocation30_spill] sm:$0xff] %v10588_v36 }
 0x766   :  { %3374 = vadd.xlane.f32.xlu2 %v3373_v41  ;;  %v3154_v41 = vmul.f32 %v10588_v36, %v10588_v36 }
 0x767   :  { %v10584_v0 = vpop.f32.mrf.mxu1 }
 0x768   :  { %13279 = vst [vmem:[#allocation31_spill] sm:$0xff] %v10584_v0  ;;  %v2770_v14 = vsel %vm1185_vm8, %v10584_v0, 0.0  ;;  %v3155_v37 = vmul.f32 %v10584_v0, %v10584_v0 }
 0x769   :  { %v2771_v61 = vadd.f32 %v2770_v14, %v10588_v36  ;;  %v3734_v14 = vmul.f32 %v10605_v21, %v10605_v21 }
 0x76a   :  { %v3400_v44 = vsel %vm1185_vm8, %v3155_v37, 0.0  ;;  %v10613_v19 = vpop.f32.mrf.mxu3 }
 0x76b   :  { %13283 = vst [vmem:[#allocation130_spill] sm:$0xff] %v10613_v19  ;;  %v3824_v62 = vsub.f32 %v3644_v57, %v3734_v14  ;;  %v2914_v35 = vsel %vm1185_vm8, %v10613_v19, 0.0  ;;  %v13287_v57 = vld [vmem:[#allocation74_spill] sm:$0xff] }
 0x76d   :  { %v10621_v37 = vadd.f32 1e-05, %v3824_v62  ;;  %v13288_v62 = vld [vmem:[#allocation81_spill] sm:$0xff] }
 0x76e   :  { %v3640_v56 = vmul.f32 0.0051020407, %v13288_v62 }
 0x76f   :  { %7229 = vrsqrt.f32 %v10621_v37  ;;  %vm4154_vm10 = vweird.f32 %v10621_v37 }
 0x778   :  { %6195 = vperm.xlu0 %7130, %v5923_v46   ;;  %v3401_v46 = vadd.f32 %v3400_v44, %v3154_v41  ;;  %v3227_v41 = vmul.f32 %v10613_v19, %v10613_v19  ;;  %v13286_v44 = vld [vmem:[#allocation78_spill] sm:$0xff]  ;;  %v13289_v19 = vld [vmem:[#allocation77_spill] sm:$0xff] }
 0x779   :  { %v10608_v48 = vpop.xlane.xlu0 %2884  ;;  %v10629_v15 = vmul.f32 0.0051020407, %v13286_v44  ;;  %v3672_v0 = vmul.f32 0.0051020407, %v13289_v19 }
 0x77a   :  { %v3544_v10 = vsel %vm1185_vm8, %v3227_v41, 0.0 }
 0x77b   :  { %v3730_v36 = vmul.f32 %v10629_v15, %v10629_v15 }
 0x77d   :  { %v3820_v62 = vsub.f32 %v3640_v56, %v3730_v36  ;;  %v2894_v56 = vsel %vm1185_vm8, %v10365_v26, 0.0 }
 0x77e   :  { %6010 = vperm.xlu2 %7132, %v5886_v18   ;;  %2772 = vadd.xlane.f32.xlu1 %v2771_v61  ;;  %v10615_v63 = vpop.xlane.xlu1 %2760  ;;  %v10619_v61 = vpop.f32.mrf.mxu2 }
 0x77f   :  { %13284 = vst [vmem:[#allocation131_spill] sm:$0xff] %v10615_v63  ;;  %v2915_v18 = vadd.f32 %v2914_v35, %v10619_v61  ;;  %v3226_v14 = vmul.f32 %v10619_v61, %v10619_v61  ;;  %v10639_v35 = vmul.f32 0.0051020407, %v9705_v8  ;;  %v10650_v63 = vpop.eup %7229  ;;  %v10656_v11 = vadd.f32 1e-05, %v3820_v62 }
 0x780   :  { %13285 = vst [vmem:[#allocation132_spill] sm:$0xff] %v10619_v61  ;;  %vm4155_vm0 = vweird.f32 %v10650_v63 }
 0x781   :  { %v10624_v34 = vpop.xlane.xlu0 %3514  ;;  %v3770_v8 = vmul.f32 %v10639_v35, %v10639_v35  ;;  %7231 = vrsqrt.f32 %v10656_v11  ;;  %vm4156_vm11 = vmor %vm4154_vm10, %vm4155_vm0  ;;  %vm4114_vm2 = vweird.f32 %v10656_v11 }
 0x786   :  { %3402 = vadd.xlane.f32.xlu1 %v3401_v46  ;;  %v10633_v46 = vmul.f32 0.0051020407, %v13287_v57  ;;  %v10643_v44 = vpop.xlane.xlu1 %3390  ;;  %v3680_v57 = vmul.f32 0.0051020407, %v9731_v28 }
 0x787   :  { %13290 = vst [vmem:[#allocation78_spill] sm:$0xff] %v10643_v44  ;;  %v4149_v44 = vmul.f32 %v10650_v63, %v10621_v37 }
 0x788   :  { %v3762_v61 = vmul.f32 %v10633_v46, %v10633_v46  ;;  %v3860_v19 = vsub.f32 %v3680_v57, %v3770_v8 }
 0x78a   :  { %v3852_v41 = vsub.f32 %v3672_v0, %v3762_v61  ;;  %v10660_v54 = vadd.f32 1e-05, %v3860_v19  ;;  %v13292_v0 = vld [vmem:[#allocation22_spill] sm:$0xff]  ;;  %v13293_v61 = vld [vmem:[#allocation20_spill] sm:$0xff] }
 0x78c   :  { %v10658_v28 = vadd.f32 1e-05, %v3852_v41  ;;  %v13294_v41 = vld [vmem:[#allocation86_spill] sm:$0xff]  ;;  %vm4514_vm4 = vweird.f32 %v10660_v54 }
 0x78e   :  { %2916 = vadd.xlane.f32.xlu1 %v2915_v18  ;;  %v3545_v18 = vadd.f32 %v3544_v10, %v3226_v14  ;;  %v4150_v10 = vmul.f32 %v10650_v63, %v4149_v44  ;;  %v10663_v14 = vpop.xlane.xlu1 %2904  ;;  %7233 = vrsqrt.f32 %v10658_v28  ;;  %v10673_v44 = vmul.f32 0.0051020407, %v13294_v41 }
 0x78f   :  { %13291 = vst [vmem:[#allocation74_spill] sm:$0xff] %v10663_v14  ;;  %7235 = vrsqrt.f32 %v10660_v54  ;;  %v2895_v14 = vadd.f32 %v2894_v56, %v10372_v17  ;;  %vm4434_vm14 = vweird.f32 %v10658_v28 }
 0x790   :  { %v4151_v19 = vmul.f32 0.5, %v4150_v10  ;;  %v10691_v10 = vpop.eup %7231 }
 0x791   :  { %v4109_v41 = vmul.f32 %v10691_v10, %v10656_v11  ;;  %vm4115_vm13 = vweird.f32 %v10691_v10  ;;  %v4900_v11 = vld [vmem:[%s12931_s7 + $0x60] sm:$0xff] }
 0x792   :  { %vm4116_vm3 = vmor %vm4114_vm2, %vm4115_vm13 }
 0x794   :  { %v5116_v25 = vpop.permute.xlu0 %5115  ;;  %v10695_v56 = vpop.eup %7233 }
 0x795   :  { %v5536_v36 = vmul.f32 %v5116_v25, %v13292_v0  ;;  %v5537_v57 = vmul.f32 %v5116_v25, %v13293_v61  ;;  %v7105_v25 = vld [vmem:[%s12930_s6 + $0x128] sm:$0xff]  ;;  %v3676_v0 = vmul.f32 0.0051020407, %v9645_v43  ;;  %v3766_v61 = vmul.f32 %v10673_v44, %v10673_v44 }
 0x796   :  { %3546 = vadd.xlane.f32.xlu1 %v3545_v18  ;;  %7060 = vmatmul.msk.bf16.gmra.mxu3 %vm2027_vm9, %v7105_v25  ;;  %v4152_v43 = vsub.f32 1.5, %v4151_v19  ;;  %v10707_v26 = vpop.xlane.xlu1 %3534  ;;  %v4429_v45 = vmul.f32 %v10695_v56, %v10658_v28  ;;  %vm4435_vm12 = vweird.f32 %v10695_v56 }
 0x797   :  { %7015 = vmatmul.msk.bf16.gmra.mxu2 %vm2027_vm9, %v7105_v25  ;;  %v3856_v25 = vsub.f32 %v3676_v0, %v3766_v61  ;;  %13295 = vst [vmem:[#allocation81_spill] sm:$0xff] %v10707_v26  ;;  %vm10743_vm1 = vmor %vm4434_vm14, %vm4435_vm12 }
 0x798   :  { %v4430_v0 = vmul.f32 %v10695_v56, %v4429_v45 }
 0x79c   :  { %v6016_v18 = vpop.permute.xlu0 %6015 }
 0x79d   :  { %v6436_v62 = vadd.f32 %v6016_v18, %v5536_v36  ;;  %v6437_v8 = vadd.f32 %v6016_v18, %v5537_v57  ;;  %v2886_v36 = vsel %vm1185_vm8, %v10203_v39, 0.0  ;;  %v3216_v57 = vmul.f32 %v10372_v17, %v10372_v17  ;;  %v10701_v18 = vpop.eup %7235 }
 0x79e   :  { %v4153_v17 = vmul.f32 %v10650_v63, %v4152_v43  ;;  %vm4515_vm15 = vweird.f32 %v10701_v18 }
 0x79f   :  { %6616 = vst [vmem:[%s12933_s9 + $0x90] sm:$0xff] %v6436_v62  ;;  %v2887_v62 = vadd.f32 %v2886_v36, %v10208_v27  ;;  %v10716_v36 = vadd.f32 1e-05, %v3856_v25  ;;  %vm4516_vm5 = vmor %vm4514_vm4, %vm4515_vm15 }
 0x7a0   :  { %6617 = vst.msk [vmem:[%s12933_s9 + $0x98] sm:$0xff] %vm1185_vm8, %v6437_v8  ;;  %v3524_v8 = vsel %vm1185_vm8, %v3217_v9, 0.0  ;;  %v4110_v9 = vmul.f32 %v10691_v10, %v4109_v41  ;;  %v4157_v26 = vsel %vm4156_vm11, %v10650_v63, %v4153_v17  ;;  %v5714_v63 = vld [vmem:[%s12932_s8 + $0x80] sm:$0xff] }
 0x7a1   :  { %v3525_v19 = vadd.f32 %v3524_v8, %v3216_v57  ;;  %v4904_v57 = vld [vmem:[%s12931_s7 + $0x80] sm:$0xff]  ;;  %7237 = vrsqrt.f32 %v10716_v36  ;;  %v4431_v8 = vmul.f32 0.5, %v4430_v0  ;;  %vm4474_vm7 = vweird.f32 %v10716_v36 }
 0x7a2   :  { %2896 = vadd.xlane.f32.xlu0 %v2895_v14  ;;  %v4509_v14 = vmul.f32 %v10701_v18, %v10660_v54  ;;  %v4111_v43 = vmul.f32 0.5, %v4110_v9  ;;  %v13296_v9 = vld [vmem:[#allocation37_spill] sm:$0xff] }
 0x7a4   :  { %v4510_v61 = vmul.f32 %v10701_v18, %v4509_v14  ;;  %v4112_v37 = vsub.f32 1.5, %v4111_v43  ;;  %v4432_v14 = vsub.f32 1.5, %v4431_v8 }
 0x7a6   :  { %v4511_v41 = vmul.f32 0.5, %v4510_v61 }
 0x7a7   :  { %2888 = vadd.xlane.f32.xlu2 %v2887_v62  ;;  %v4994_v62 = vmul.f32 %v4904_v57, %v4157_v26  ;;  %v10727_v51 = vpop.eup %7237  ;;  %v4113_v26 = vmul.f32 %v10691_v10, %v4112_v37 }
 0x7a8   :  { %v4469_v17 = vmul.f32 %v10727_v51, %v10716_v36  ;;  %vm4475_vm6 = vweird.f32 %v10727_v51 }
 0x7a9   :  { %v5804_v45 = vmul.f32 %v4994_v62, %v10605_v21  ;;  %v13297_v21 = vld [vmem:[#allocation36_spill] sm:$0xff]  ;;  %vm4476_vm0 = vmor %vm4474_vm7, %vm4475_vm6 }
 0x7aa   :  { %3526 = vadd.xlane.f32.xlu0 %v3525_v19  ;;  %v4512_v19 = vsub.f32 1.5, %v4511_v41  ;;  %v4470_v28 = vmul.f32 %v10727_v51, %v4469_v17  ;;  %v13301_v41 = vld [vmem:[#allocation42_spill] sm:$0xff] }
 0x7ab   :  { %v5894_v57 = vsub.f32 %v5714_v63, %v5804_v45  ;;  %v4932_v45 = vld [vmem:[%s12931_s7 + $0x160] sm:$0xff] }
 0x7ac   :  { %v4513_v8 = vmul.f32 %v10701_v18, %v4512_v19  ;;  %v4471_v63 = vmul.f32 0.5, %v4470_v28 }
 0x7ae   :  { %v5136_v25 = vpop.permute.xlu1 %5135 }
 0x7af   :  { %5150 = vperm.xlu1 %7131, %v4994_v62   ;;  %v5544_v0 = vmul.f32 %v5136_v25, %v13296_v9  ;;  %v5545_v61 = vmul.f32 %v5136_v25, %v13297_v21  ;;  %v4433_v62 = vmul.f32 %v10695_v56, %v4432_v14  ;;  %v4117_v25 = vsel %vm4116_vm3, %v10691_v10, %v4113_v26  ;;  %v4940_v10 = vld [vmem:[%s12931_s7 + $0x1a0] sm:$0xff] }
 0x7b0   :  { %v4517_v14 = vsel %vm4516_vm5, %v10701_v18, %v4513_v8  ;;  %v4990_v19 = vmul.f32 %v4900_v11, %v4117_v25  ;;  %v4472_v21 = vsub.f32 1.5, %v4471_v63  ;;  %v5710_v18 = vld [vmem:[%s12932_s8 + $0x60] sm:$0xff]  ;;  %v10789_v25 = vpop.xlane.xlu2 %2744 }
 0x7b1   :  { %v4437_v54 = vsel %vm10743_vm1, %v10695_v56, %v4433_v62  ;;  %v5030_v17 = vmul.f32 %v4940_v10, %v4517_v14  ;;  %v13300_v62 = vld [vmem:[#allocation43_spill] sm:$0xff]  ;;  %13302 = vst [vmem:[#allocation77_spill] sm:$0xff] %v10789_v25  ;;  %v5296_v14 = vpop.permute.xlu0 %5295 }
 0x7b2   :  { %v10773_v26 = vmul.f32 %v4932_v45, %v4437_v54  ;;  %v5800_v56 = vmul.f32 %v4990_v19, %v10629_v15  ;;  %v4473_v15 = vmul.f32 %v10727_v51, %v4472_v21  ;;  %v4936_v45 = vld [vmem:[%s12931_s7 + $0x180] sm:$0xff]  ;;  %v13304_v21 = vld [vmem:[#allocation17_spill] sm:$0xff] }
 0x7b4   :  { %v4477_v54 = vsel %vm4476_vm0, %v10727_v51, %v4473_v15  ;;  %v10809_v51 = vpop.f32.mrf.mxu2 }
 0x7b5   :  { %v10802_v36 = vmul.f32 %v4936_v45, %v4477_v54 }
 0x7b6   :  { %v6036_v43 = vpop.permute.xlu1 %6035 }
 0x7b7   :  { %v6444_v37 = vadd.f32 %v6036_v43, %v5544_v0  ;;  %v6445_v9 = vadd.f32 %v6036_v43, %v5545_v61  ;;  %6050 = vperm.xlu1 %7131, %v5894_v57   ;;  %v5840_v61 = vmul.f32 %v5030_v17, %v10639_v35  ;;  %v5750_v57 = vld [vmem:[%s12932_s8 + $0x1a0] sm:$0xff]  ;;  %v5890_v43 = vsub.f32 %v5710_v18, %v5800_v56 }
 0x7b8   :  { %v5111_v10 = vpop.permute.xlu2 %5110  ;;  %v3213_v56 = vmul.f32 %v10203_v39, %v10203_v39  ;;  %v10937_v39 = vmul.f32 0.0051020407, %v9654_v60 }
 0x7b9   :  { %6624 = vst [vmem:[%s12933_s9 + $0xd0] sm:$0xff] %v6444_v37  ;;  %v5534_v18 = vmul.f32 %v5111_v10, %v13304_v21 }
 0x7ba   :  { %6625 = vst.msk [vmem:[%s12933_s9 + $0xd8] sm:$0xff] %vm1185_vm8, %v6445_v9  ;;  %v5930_v9 = vsub.f32 %v5750_v57, %v5840_v61  ;;  %v13305_v61 = vld [vmem:[#allocation16_spill] sm:$0xff] }
 0x7bb   :  { %v5535_v57 = vmul.f32 %v5111_v10, %v13305_v61  ;;  %v13308_v10 = vld [vmem:[#allocation28_spill] sm:$0xff] }
 0x7be   :  { %5130 = vperm.xlu0 %7130, %v4990_v19   ;;  %v5316_v0 = vpop.permute.xlu1 %5315  ;;  %v10805_v19 = vpop.f32.mrf.mxu3 }
 0x7bf   :  { %5290 = vperm.xlu2 %7132, %v10773_v26   ;;  %5330 = vperm.xlu1 %7131, %v5030_v17   ;;  %v5616_v8 = vmul.f32 %v5316_v0, %v13300_v62  ;;  %v5617_v37 = vmul.f32 %v5316_v0, %v13301_v41  ;;  %v10821_v62 = vpop.f32.mrf.mxu2  ;;  %v10824_v41 = vmul.f32 0.0051020407, %v9869_v13 }
 0x7c0   :  { %13306 = vst [vmem:[#allocation20_spill] sm:$0xff] %v10821_v62 }
 0x7c1   :  { %v3737_v13 = vmul.f32 %v10824_v41, %v10824_v41 }
 0x7c6   :  { %6030 = vperm.xlu0 %7130, %v5890_v43   ;;  %v6216_v28 = vpop.permute.xlu1 %6215  ;;  %v10813_v0 = vpop.f32.mrf.mxu3 }
 0x7c7   :  { %v6516_v35 = vadd.f32 %v6216_v28, %v5616_v8  ;;  %v6517_v11 = vadd.f32 %v6216_v28, %v5617_v37  ;;  %6230 = vperm.xlu1 %7131, %v5930_v9   ;;  %v3212_v37 = vmul.f32 %v10208_v27, %v10208_v27  ;;  %v3516_v28 = vsel %vm1185_vm8, %v3213_v56, 0.0 }
 0x7c8   :  { %v5608_v56 = vmul.f32 %v5296_v14, %v13308_v10  ;;  %v3683_v10 = vmul.f32 0.0051020407, %v10059_v4 }
 0x7c9   :  { %6696 = vst [vmem:[%s12933_s9 + $0x310] sm:$0xff] %v6516_v35  ;;  %v3647_v35 = vmul.f32 0.0051020407, %v9955_v32  ;;  %v13309_v32 = vld [vmem:[#allocation26_spill] sm:$0xff] }
 0x7ca   :  { %6697 = vst.msk [vmem:[%s12933_s9 + $0x318] sm:$0xff] %vm1185_vm8, %v6517_v11  ;;  %v3517_v11 = vadd.f32 %v3516_v28, %v3212_v37  ;;  %v5609_v21 = vmul.f32 %v5296_v14, %v13309_v32  ;;  %v2762_v28 = vsel %vm1185_vm8, %v10559_v47, 0.0  ;;  %v3151_v32 = vmul.f32 %v10559_v47, %v10559_v47 }
 0x7cb   :  { %v3827_v45 = vsub.f32 %v3647_v35, %v3737_v13  ;;  %v10862_v13 = vmul.f32 0.0051020407, %v10048_v49 }
 0x7ce   :  { %5310 = vperm.xlu0 %7130, %v10802_v36  }
 0x7cf   :  { %v10807_v63 = vpop.xlane.xlu0 %2752 }
 0x7d3   :  { %v10839_v54 = vpop.f32.mrf.mxu3 }
 0x7d4   :  { %13307 = vst [vmem:[#allocation86_spill] sm:$0xff] %v10839_v54  ;;  %v2926_v61 = vsel %vm1185_vm8, %v10839_v54, 0.0  ;;  %v3233_v14 = vmul.f32 %v10839_v54, %v10839_v54 }
 0x7d7   :  { %v10819_v43 = vpop.xlane.xlu0 %3382 }
 0x7d9   :  { %v10811_v17 = vpop.xlane.xlu2 %3374 }
 0x7da   :  { %13303 = vst [vmem:[#allocation22_spill] sm:$0xff] %v10811_v17  ;;  %v3643_v17 = vmul.f32 0.0051020407, %v9665_v22 }
 0x7db   :  { %v10951_v22 = vpop.f32.mrf.mxu3 }
 0x7e1   :  { %v6011_v8 = vpop.permute.xlu2 %6010 }
 0x7e2   :  { %v6434_v9 = vadd.f32 %v6011_v8, %v5534_v18  ;;  %v6435_v15 = vadd.f32 %v6011_v8, %v5535_v57  ;;  %v10845_v57 = vpop.f32.mrf.mxu2 }
 0x7e3   :  { %13310 = vst [vmem:[#allocation37_spill] sm:$0xff] %v10845_v57  ;;  %v2927_v37 = vadd.f32 %v2926_v61, %v10845_v57  ;;  %v3232_v35 = vmul.f32 %v10845_v57, %v10845_v57  ;;  %v13320_v57 = vld [vmem:[#allocation91_spill] sm:$0xff] }
 0x7e4   :  { %6614 = vst [vmem:[%s12933_s9 + $0x80] sm:$0xff] %v6434_v9  ;;  %v10963_v62 = vmul.f32 0.0051020407, %v13320_v57 }
 0x7e5   :  { %6615 = vst.msk [vmem:[%s12933_s9 + $0x88] sm:$0xff] %vm1185_vm8, %v6435_v15  ;;  %v3917_v15 = vadd.f32 1e-05, %v3827_v45  ;;  %v7085_v45 = vld [vmem:[%s12930_s6 + $0x88] sm:$0xff] }
 0x7e6   :  { %7040 = vmatmul.msk.bf16.gmra.mxu1 %vm2027_vm9, %v7085_v45  ;;  %6995 = vmatmul.msk.bf16.gmra.mxu0 %vm2027_vm9, %v7085_v45 }
 0x7e7   :  { %7239 = vrsqrt.f32 %v3917_v15  ;;  %vm4184_vm11 = vweird.f32 %v3917_v15 }
 0x7e8   :  { %3518 = vadd.xlane.f32.xlu2 %v3517_v11  ;;  %v3556_v11 = vsel %vm1185_vm8, %v3233_v14, 0.0  ;;  %v5832_v14 = vmul.f32 %v10773_v26, %v10633_v46 }
 0x7ea   :  { %v6196_v18 = vpop.permute.xlu0 %6195  ;;  %v10960_v54 = vpop.f32.mrf.mxu2 }
 0x7eb   :  { %v6508_v8 = vadd.f32 %v6196_v18, %v5608_v56  ;;  %v6509_v9 = vadd.f32 %v6196_v18, %v5609_v21  ;;  %v2763_v56 = vadd.f32 %v2762_v28, %v10569_v24  ;;  %v3557_v21 = vadd.f32 %v3556_v11, %v3232_v35  ;;  %v5742_v28 = vld [vmem:[%s12932_s8 + $0x160] sm:$0xff] }
 0x7ec   :  { %v3773_v18 = vmul.f32 %v10862_v13, %v10862_v13 }
 0x7ed   :  { %6688 = vst [vmem:[%s12933_s9 + $0x2d0] sm:$0xff] %v6508_v8  ;;  %v7240_v49 = vpop.eup %7239  ;;  %v3150_v8 = vmul.f32 %v10569_v24, %v10569_v24 }
 0x7ee   :  { %6689 = vst.msk [vmem:[%s12933_s9 + $0x2d8] sm:$0xff] %vm1185_vm8, %v6509_v9  ;;  %v3863_v61 = vsub.f32 %v3683_v10, %v3773_v18  ;;  %v4179_v4 = vmul.f32 %v7240_v49, %v3917_v15  ;;  %v3392_v9 = vsel %vm1185_vm8, %v3151_v32, 0.0  ;;  %v7106_v10 = vld [vmem:[%s12930_s6 + $0x130] sm:$0xff]  ;;  %vm4185_vm10 = vweird.f32 %v7240_v49 }
 0x7ef   :  { %v3393_v11 = vadd.f32 %v3392_v9, %v3150_v8  ;;  %7061 = vmatmul.msk.bf16.gmra.mxu3 %vm2027_vm9, %v7106_v10  ;;  %7016 = vmatmul.msk.bf16.gmra.mxu2 %vm2027_vm9, %v7106_v10  ;;  %vm4186_vm12 = vmor %vm4184_vm11, %vm4185_vm10  ;;  %v13311_v10 = vld [vmem:[#allocation80_spill] sm:$0xff] }
 0x7f0   :  { %v3953_v35 = vadd.f32 1e-05, %v3863_v61  ;;  %v4180_v45 = vmul.f32 %v7240_v49, %v4179_v4 }
 0x7f1   :  { %2928 = vadd.xlane.f32.xlu1 %v2927_v37  ;;  %v10879_v37 = vpop.xlane.xlu1 %2772 }
 0x7f2   :  { %7241 = vrsqrt.f32 %v3953_v35  ;;  %v4181_v46 = vmul.f32 0.5, %v4180_v45  ;;  %vm4544_vm14 = vweird.f32 %v3953_v35 }
 0x7f4   :  { %v4182_v32 = vsub.f32 1.5, %v4181_v46 }
 0x7f6   :  { %v4183_v61 = vmul.f32 %v7240_v49, %v4182_v32  ;;  %v13312_v32 = vld [vmem:[#allocation84_spill] sm:$0xff] }
 0x7f8   :  { %2764 = vadd.xlane.f32.xlu0 %v2763_v56  ;;  %v5922_v56 = vsub.f32 %v5742_v28, %v5832_v14  ;;  %v4187_v9 = vsel %vm4186_vm12, %v7240_v49, %v4183_v61  ;;  %v4907_v14 = vld [vmem:[%s12931_s7 + $0x98] sm:$0xff]  ;;  %v5836_v28 = vmul.f32 %v10802_v36, %v10673_v44 }
 0x7f9   :  { %3558 = vadd.xlane.f32.xlu1 %v3557_v21  ;;  %v10891_v26 = vpop.xlane.xlu1 %3402  ;;  %v7242_v21 = vpop.eup %7241  ;;  %v4997_v45 = vmul.f32 %v4907_v14, %v4187_v9  ;;  %v7107_v49 = vld [vmem:[%s12930_s6 + $0x138] sm:$0xff] }
 0x7fa   :  { %v4539_v18 = vmul.f32 %v7242_v21, %v3953_v35  ;;  %vm4545_vm13 = vweird.f32 %v7242_v21  ;;  %v5753_v35 = vld [vmem:[%s12932_s8 + $0x1b8] sm:$0xff] }
 0x7fb   :  { %v5807_v44 = vmul.f32 %v4997_v45, %v10824_v41  ;;  %vm4546_vm15 = vmor %vm4544_vm14, %vm4545_vm13 }
 0x7fc   :  { %v4540_v8 = vmul.f32 %v7242_v21, %v4539_v18  ;;  %v3639_v18 = vmul.f32 0.0051020407, %v13312_v32  ;;  %v2754_v32 = vsel %vm1185_vm8, %v10359_v20, 0.0 }
 0x7fe   :  { %v4541_v15 = vmul.f32 0.5, %v4540_v8  ;;  %v5717_v8 = vld [vmem:[%s12932_s8 + $0x98] sm:$0xff] }
 0x7ff   :  { %7062 = vmatmul.msk.bf16.gmra.mxu3 %vm2027_vm9, %v7107_v49  ;;  %7017 = vmatmul.msk.bf16.gmra.mxu2 %vm2027_vm9, %v7107_v49 }
 0x800   :  { %6190 = vperm.xlu2 %7132, %v5922_v56   ;;  %3394 = vadd.xlane.f32.xlu0 %v3393_v11  ;;  %v5746_v11 = vld [vmem:[%s12932_s8 + $0x180] sm:$0xff]  ;;  %v10904_v56 = vmul.f32 0.0051020407, %v13311_v10  ;;  %v4542_v61 = vsub.f32 1.5, %v4541_v15 }
 0x801   :  { %v10893_v4 = vpop.xlane.xlu1 %2916  ;;  %v5926_v46 = vsub.f32 %v5746_v11, %v5836_v28  ;;  %v5897_v28 = vsub.f32 %v5717_v8, %v5807_v44  ;;  %v13314_v8 = vld [vmem:[#allocation49_spill] sm:$0xff] }
 0x802   :  { %v3729_v36 = vmul.f32 %v10904_v56, %v10904_v56  ;;  %v4543_v11 = vmul.f32 %v7242_v21, %v4542_v61 }
 0x804   :  { %v3819_v9 = vsub.f32 %v3639_v18, %v3729_v36  ;;  %v4547_v41 = vsel %vm4546_vm15, %v7242_v21, %v4543_v11  ;;  %v2755_v21 = vadd.f32 %v2754_v32, %v10361_v5 }
 0x806   :  { %v3909_v10 = vadd.f32 1e-05, %v3819_v9 }
 0x808   :  { %7243 = vrsqrt.f32 %v3909_v10  ;;  %vm4104_vm2 = vweird.f32 %v3909_v10 }
 0x809   :  { %v10918_v14 = vpop.xlane.xlu1 %3546 }
 0x80a   :  { %13313 = vst [vmem:[#allocation36_spill] sm:$0xff] %v10918_v14 }
 0x80e   :  { %v7244_v44 = vpop.eup %7243 }
 0x80f   :  { %v4099_v61 = vmul.f32 %v7244_v44, %v3909_v10  ;;  %vm4105_vm1 = vweird.f32 %v7244_v44  ;;  %v13321_v10 = vld [vmem:[#allocation93_spill] sm:$0xff] }
 0x810   :  { %vm4106_vm3 = vmor %vm4104_vm2, %vm4105_vm1 }
 0x811   :  { %v4100_v27 = vmul.f32 %v7244_v44, %v4099_v61 }
 0x812   :  { %5165 = vperm.xlu1 %7131, %v4997_v45   ;;  %v4943_v45 = vld [vmem:[%s12931_s7 + $0x1b8] sm:$0xff] }
 0x813   :  { %v5033_v15 = vmul.f32 %v4943_v45, %v4547_v41  ;;  %v4101_v60 = vmul.f32 0.5, %v4100_v27 }
 0x814   :  { %6210 = vperm.xlu0 %7130, %v5926_v46  }
 0x815   :  { %v10920_v49 = vpop.xlane.xlu0 %2896  ;;  %v5843_v18 = vmul.f32 %v5033_v15, %v10862_v13 }
 0x817   :  { %v5933_v41 = vsub.f32 %v5753_v35, %v5843_v18 }
 0x81a   :  { %6065 = vperm.xlu1 %7131, %v5897_v28   ;;  %v13315_v28 = vld [vmem:[#allocation48_spill] sm:$0xff] }
 0x81d   :  { %v10931_v36 = vpop.xlane.xlu0 %3526 }
 0x821   :  { %v5151_v46 = vpop.permute.xlu1 %5150 }
 0x822   :  { %5345 = vperm.xlu1 %7131, %v5033_v15   ;;  %v5550_v9 = vmul.f32 %v5151_v46, %v13314_v8  ;;  %v5551_v11 = vmul.f32 %v5151_v46, %v13315_v28  ;;  %v3733_v46 = vmul.f32 %v10937_v39, %v10937_v39  ;;  %v2906_v8 = vsel %vm1185_vm8, %v10575_v40, 0.0 }
 0x824   :  { %v3823_v32 = vsub.f32 %v3643_v17, %v3733_v46  ;;  %v13319_v17 = vld [vmem:[#allocation54_spill] sm:$0xff] }
 0x826   :  { %v10949_v61 = vadd.f32 1e-05, %v3823_v32 }
 0x828   :  { %7245 = vrsqrt.f32 %v10949_v61  ;;  %vm4144_vm5 = vweird.f32 %v10949_v61 }
 0x829   :  { %2756 = vadd.xlane.f32.xlu2 %v2755_v21  ;;  %v6051_v45 = vpop.permute.xlu1 %6050  ;;  %v4102_v21 = vsub.f32 1.5, %v4101_v60 }
 0x82a   :  { %v6450_v13 = vadd.f32 %v6051_v45, %v5550_v9  ;;  %v6451_v15 = vadd.f32 %v6051_v45, %v5551_v11  ;;  %6245 = vperm.xlu1 %7131, %v5933_v41   ;;  %v13316_v9 = vld [vmem:[#allocation33_spill] sm:$0xff]  ;;  %v13317_v11 = vld [vmem:[#allocation32_spill] sm:$0xff]  ;;  %v13318_v45 = vld [vmem:[#allocation55_spill] sm:$0xff] }
 0x82b   :  { %v4103_v46 = vmul.f32 %v7244_v44, %v4102_v21  ;;  %v3679_v21 = vmul.f32 0.0051020407, %v13321_v10  ;;  %v11006_v10 = vpop.xlane.xlu2 %2888 }
 0x82c   :  { %6630 = vst [vmem:[%s12933_s9 + $0x100] sm:$0xff] %v6450_v13 }
 0x82d   :  { %6631 = vst.msk [vmem:[%s12933_s9 + $0x108] sm:$0xff] %vm1185_vm8, %v6451_v15  ;;  %v4107_v57 = vsel %vm4106_vm3, %v7244_v44, %v4103_v46  ;;  %v10998_v46 = vpop.f32.mrf.mxu2 }
 0x82e   :  { %13323 = vst [vmem:[#allocation42_spill] sm:$0xff] %v10998_v46 }
 0x82f   :  { %13324 = vst [vmem:[#allocation17_spill] sm:$0xff] %v11006_v10 }
 0x830   :  { %v5131_v18 = vpop.permute.xlu0 %5130 }
 0x831   :  { %v5331_v35 = vpop.permute.xlu1 %5330  ;;  %v5542_v28 = vmul.f32 %v5131_v18, %v13316_v9  ;;  %v5543_v41 = vmul.f32 %v5131_v18, %v13317_v11  ;;  %v2907_v9 = vadd.f32 %v2906_v8, %v10582_v16  ;;  %v7246_v8 = vpop.eup %7245 }
 0x832   :  { %v5622_v27 = vmul.f32 %v5331_v35, %v13318_v45  ;;  %v5623_v13 = vmul.f32 %v5331_v35, %v13319_v17  ;;  %v3223_v35 = vmul.f32 %v10575_v40, %v10575_v40  ;;  %v10994_v17 = vpop.f32.mrf.mxu3  ;;  %vm4145_vm4 = vweird.f32 %v7246_v8 }
 0x833   :  { %13322 = vst [vmem:[#allocation43_spill] sm:$0xff] %v10994_v17  ;;  %vm4146_vm6 = vmor %vm4144_vm5, %vm4145_vm4 }
 0x834   :  { %v3536_v45 = vsel %vm1185_vm8, %v3223_v35, 0.0 }
 0x838   :  { %v6031_v15 = vpop.permute.xlu0 %6030 }
 0x839   :  { %v6442_v60 = vadd.f32 %v6031_v15, %v5542_v28  ;;  %v6443_v32 = vadd.f32 %v6031_v15, %v5543_v41  ;;  %v6231_v25 = vpop.permute.xlu1 %6230  ;;  %v3769_v28 = vmul.f32 %v10963_v62, %v10963_v62  ;;  %v3222_v41 = vmul.f32 %v10582_v16, %v10582_v16 }
 0x83a   :  { %v6522_v18 = vadd.f32 %v6231_v25, %v5622_v27  ;;  %v6523_v11 = vadd.f32 %v6231_v25, %v5623_v13  ;;  %v4899_v25 = vld [vmem:[%s12931_s7 + $0x58] sm:$0xff]  ;;  %v4139_v13 = vmul.f32 %v7246_v8, %v10949_v61 }
 0x83b   :  { %6622 = vst [vmem:[%s12933_s9 + $0xc0] sm:$0xff] %v6442_v60  ;;  %v10991_v44 = vmul.f32 %v4899_v25, %v4107_v57  ;;  %v3859_v27 = vsub.f32 %v3679_v21, %v3769_v28  ;;  %v3537_v15 = vadd.f32 %v3536_v45, %v3222_v41  ;;  %v11008_v21 = vpop.f32.mrf.mxu3  ;;  %v11012_v41 = vpop.f32.mrf.mxu2 }
 0x83c   :  { %6623 = vst.msk [vmem:[%s12933_s9 + $0xc8] sm:$0xff] %vm1185_vm8, %v6443_v32  ;;  %v4140_v32 = vmul.f32 %v7246_v8, %v4139_v13  ;;  %v2938_v28 = vsel %vm1185_vm8, %v11008_v21, 0.0  ;;  %v3239_v13 = vmul.f32 %v11008_v21, %v11008_v21 }
 0x83d   :  { %6702 = vst [vmem:[%s12933_s9 + $0x340] sm:$0xff] %v6522_v18  ;;  %v3949_v60 = vadd.f32 1e-05, %v3859_v27  ;;  %v11001_v18 = vmul.f32 0.0051020407, %v10223_v1 }
 0x83e   :  { %6703 = vst.msk [vmem:[%s12933_s9 + $0x348] sm:$0xff] %vm1185_vm8, %v6523_v11  ;;  %2908 = vadd.xlane.f32.xlu0 %v2907_v9  ;;  %v3650_v9 = vmul.f32 0.0051020407, %v10241_v3  ;;  %v4141_v11 = vmul.f32 0.5, %v4140_v32  ;;  %v2939_v3 = vadd.f32 %v2938_v28, %v11012_v41  ;;  %v11022_v32 = vmul.f32 0.0051020407, %v10340_v12 }
 0x83f   :  { %7247 = vrsqrt.f32 %v3949_v60  ;;  %v3740_v35 = vmul.f32 %v11001_v18, %v11001_v18  ;;  %13325 = vst [vmem:[#allocation16_spill] sm:$0xff] %v11008_v21  ;;  %v4903_v28 = vld [vmem:[%s12931_s7 + $0x78] sm:$0xff]  ;;  %v3686_v12 = vmul.f32 0.0051020407, %v10344_v7  ;;  %vm4504_vm0 = vweird.f32 %v3949_v60 }
 0x840   :  { %v4142_v25 = vsub.f32 1.5, %v4141_v11  ;;  %13326 = vst [vmem:[#allocation28_spill] sm:$0xff] %v11012_v41  ;;  %v3238_v11 = vmul.f32 %v11012_v41, %v11012_v41  ;;  %v3776_v61 = vmul.f32 %v11022_v32, %v11022_v32 }
 0x841   :  { %5125 = vperm.xlu2 %7132, %v10991_v44   ;;  %v3830_v57 = vsub.f32 %v3650_v9, %v3740_v35  ;;  %v5291_v9 = vpop.permute.xlu2 %5290 }
 0x842   :  { %v3866_v41 = vsub.f32 %v3686_v12, %v3776_v61  ;;  %v13329_v61 = vld [vmem:[#allocation21_spill] sm:$0xff] }
 0x843   :  { %v11014_v45 = vadd.f32 1e-05, %v3830_v57  ;;  %v5607_v12 = vmul.f32 %v5291_v9, %v13329_v61 }
 0x844   :  { %v3956_v14 = vadd.f32 1e-05, %v3866_v41 }
 0x845   :  { %v7248_v1 = vpop.eup %7247  ;;  %7249 = vrsqrt.f32 %v11014_v45  ;;  %vm4214_vm12 = vweird.f32 %v11014_v45 }
 0x846   :  { %3538 = vadd.xlane.f32.xlu0 %v3537_v15  ;;  %v4499_v27 = vmul.f32 %v7248_v1, %v3949_v60  ;;  %v4143_v15 = vmul.f32 %v7246_v8, %v4142_v25  ;;  %v3568_v25 = vsel %vm1185_vm8, %v3239_v13, 0.0  ;;  %v5713_v13 = vld [vmem:[%s12932_s8 + $0x78] sm:$0xff]  ;;  %vm4505_vm7 = vweird.f32 %v7248_v1 }
 0x847   :  { %v3569_v21 = vadd.f32 %v3568_v25, %v3238_v11  ;;  %v3147_v11 = vmul.f32 %v10359_v20, %v10359_v20  ;;  %7251 = vrsqrt.f32 %v3956_v14  ;;  %vm4506_vm10 = vmor %vm4504_vm0, %vm4505_vm7  ;;  %vm4574_vm14 = vweird.f32 %v3956_v14 }
 0x848   :  { %v4500_v35 = vmul.f32 %v7248_v1, %v4499_v27  ;;  %v4147_v57 = vsel %vm4146_vm6, %v7246_v8, %v4143_v15 }
 0x849   :  { %v4993_v10 = vmul.f32 %v4903_v28, %v4147_v57  ;;  %v13328_v28 = vld [vmem:[#allocation23_spill] sm:$0xff] }
 0x84a   :  { %v4501_v17 = vmul.f32 0.5, %v4500_v35  ;;  %v5606_v25 = vmul.f32 %v5291_v9, %v13328_v28 }
 0x84b   :  { %v7250_v46 = vpop.eup %7249  ;;  %v5803_v27 = vmul.f32 %v4993_v10, %v10937_v39 }
 0x84c   :  { %v4209_v8 = vmul.f32 %v7250_v46, %v11014_v45  ;;  %v4502_v15 = vsub.f32 1.5, %v4501_v17  ;;  %vm4215_vm11 = vweird.f32 %v7250_v46  ;;  %v5720_v45 = vld [vmem:[%s12932_s8 + $0xb0] sm:$0xff] }
 0x84d   :  { %v5893_v57 = vsub.f32 %v5713_v13, %v5803_v27  ;;  %v3384_v27 = vsel %vm1185_vm8, %v3147_v11, 0.0  ;;  %v5311_v11 = vpop.permute.xlu0 %5310  ;;  %vm4216_vm13 = vmor %vm4214_vm12, %vm4215_vm11 }
 0x84e   :  { %v4210_v7 = vmul.f32 %v7250_v46, %v4209_v8  ;;  %v4503_v35 = vmul.f32 %v7248_v1, %v4502_v15  ;;  %v4939_v15 = vld [vmem:[%s12931_s7 + $0x198] sm:$0xff] }
 0x850   :  { %v4211_v17 = vmul.f32 0.5, %v4210_v7  ;;  %v4507_v13 = vsel %vm4506_vm10, %v7248_v1, %v4503_v35  ;;  %v7252_v1 = vpop.eup %7251  ;;  %v7108_v35 = vld [vmem:[%s12930_s6 + $0x140] sm:$0xff] }
 0x851   :  { %7063 = vmatmul.msk.bf16.gmra.mxu3 %vm2027_vm9, %v7108_v35  ;;  %7018 = vmatmul.msk.bf16.gmra.mxu2 %vm2027_vm9, %v7108_v35  ;;  %vm4575_vm15 = vweird.f32 %v7252_v1  ;;  %v5799_v35 = vmul.f32 %v10991_v44, %v10904_v56 }
 0x852   :  { %v4212_v9 = vsub.f32 1.5, %v4211_v17  ;;  %vm4576_vm1 = vmor %vm4574_vm14, %vm4575_vm15 }
 0x854   :  { %2940 = vadd.xlane.f32.xlu1 %v2939_v3  ;;  %v4213_v61 = vmul.f32 %v7250_v46, %v4212_v9 }
 0x85a   :  { %5145 = vperm.xlu0 %7130, %v4993_v10   ;;  %v3146_v10 = vmul.f32 %v10361_v5, %v10361_v5 }
 0x85b   :  { %v11033_v3 = vpop.xlane.xlu2 %3518 }
 0x85c   :  { %13327 = vst [vmem:[#allocation26_spill] sm:$0xff] %v11033_v3  ;;  %3570 = vadd.xlane.f32.xlu1 %v3569_v21  ;;  %v3385_v7 = vadd.f32 %v3384_v27, %v3146_v10 }
 0x862   :  { %6045 = vperm.xlu0 %7130, %v5893_v57   ;;  %v11059_v57 = vmul.f32 %v4939_v15, %v4507_v13 }
 0x863   :  { %v6191_v39 = vpop.permute.xlu2 %6190 }
 0x864   :  { %v6506_v21 = vadd.f32 %v6191_v39, %v5606_v25  ;;  %v6507_v41 = vadd.f32 %v6191_v39, %v5607_v12  ;;  %v2929_v8 = vpop.xlane.xlu1 %2928  ;;  %v4569_v25 = vmul.f32 %v7252_v1, %v3956_v14  ;;  %v4946_v14 = vld [vmem:[%s12931_s7 + $0x1d0] sm:$0xff] }
 0x865   :  { %v11057_v60 = vmul.f32 0.0051020407, %v2929_v8 }
 0x866   :  { %6686 = vst [vmem:[%s12933_s9 + $0x2c0] sm:$0xff] %v6506_v21  ;;  %v4570_v10 = vmul.f32 %v7252_v1, %v4569_v25  ;;  %v4217_v21 = vsel %vm4216_vm13, %v7250_v46, %v4213_v61 }
 0x867   :  { %6687 = vst.msk [vmem:[%s12933_s9 + $0x2c8] sm:$0xff] %vm1185_vm8, %v6507_v41  ;;  %v11067_v28 = vmul.f32 %v11057_v60, %v11057_v60  ;;  %v4910_v41 = vld [vmem:[%s12931_s7 + $0xb0] sm:$0xff] }
 0x868   :  { %13330 = vst [vmem:[#allocation80_spill] sm:$0xff] %v11057_v60  ;;  %v5000_v27 = vmul.f32 %v4910_v41, %v4217_v21  ;;  %v4571_v13 = vmul.f32 0.5, %v4570_v10  ;;  %v13332_v41 = vld [vmem:[#allocation39_spill] sm:$0xff] }
 0x869   :  { %13331 = vst [vmem:[#allocation84_spill] sm:$0xff] %v11067_v28  ;;  %v3229_v28 = vmul.f32 %v10805_v19, %v10805_v19 }
 0x86a   :  { %3386 = vadd.xlane.f32.xlu2 %v3385_v7  ;;  %5325 = vperm.xlu0 %7130, %v11059_v57   ;;  %v5810_v15 = vmul.f32 %v5000_v27, %v11001_v18  ;;  %v4572_v9 = vsub.f32 1.5, %v4571_v13  ;;  %v5709_v18 = vld [vmem:[%s12932_s8 + $0x58] sm:$0xff]  ;;  %v13333_v13 = vld [vmem:[#allocation38_spill] sm:$0xff] }
 0x86b   :  { %v11079_v8 = vpop.xlane.xlu0 %2764  ;;  %v5889_v61 = vsub.f32 %v5709_v18, %v5799_v35  ;;  %v5615_v56 = vmul.f32 %v5311_v11, %v13333_v13  ;;  %v13336_v13 = vld [vmem:[#allocation87_spill] sm:$0xff] }
 0x86c   :  { %v3559_v12 = vpop.xlane.xlu1 %3558  ;;  %v5900_v7 = vsub.f32 %v5720_v45, %v5810_v15  ;;  %v4573_v25 = vmul.f32 %v7252_v1, %v4572_v9 }
 0x86d   :  { %v11071_v39 = vmul.f32 0.0051020407, %v3559_v12 }
 0x86e   :  { %v4577_v12 = vsel %vm4576_vm1, %v7252_v1, %v4573_v25  ;;  %v5756_v1 = vld [vmem:[%s12932_s8 + $0x1d0] sm:$0xff]  ;;  %v13335_v25 = vld [vmem:[#allocation61_spill] sm:$0xff] }
 0x86f   :  { %v5036_v10 = vmul.f32 %v4946_v14, %v4577_v12 }
 0x871   :  { %v5846_v45 = vmul.f32 %v5036_v10, %v11022_v32 }
 0x873   :  { %v11085_v46 = vpop.xlane.xlu0 %3394  ;;  %v5936_v32 = vsub.f32 %v5756_v1, %v5846_v45 }
 0x875   :  { %5180 = vperm.xlu1 %7131, %v5000_v27   ;;  %v5614_v27 = vmul.f32 %v5311_v11, %v13332_v41  ;;  %v11108_v11 = vpop.f32.mrf.mxu1  ;;  %v11114_v41 = vpop.f32.mrf.mxu0 }
 0x87d   :  { %6080 = vperm.xlu1 %7131, %v5900_v7   ;;  %v13334_v7 = vld [vmem:[#allocation62_spill] sm:$0xff] }
 0x882   :  { %6025 = vperm.xlu2 %7132, %v5889_v61  }
 0x884   :  { %v5166_v21 = vpop.permute.xlu1 %5165 }
 0x885   :  { %5360 = vperm.xlu1 %7131, %v5036_v10   ;;  %v5556_v35 = vmul.f32 %v5166_v21, %v13334_v7  ;;  %v5557_v18 = vmul.f32 %v5166_v21, %v13335_v25  ;;  %v2774_v10 = vsel %vm1185_vm8, %v11108_v11, 0.0 }
 0x886   :  { %v6211_v44 = vpop.permute.xlu0 %6210  ;;  %v2775_v21 = vadd.f32 %v2774_v10, %v11114_v41  ;;  %v11139_v10 = vpop.f32.mrf.mxu2 }
 0x887   :  { %v6514_v15 = vadd.f32 %v6211_v44, %v5614_v27  ;;  %v6515_v9 = vadd.f32 %v6211_v44, %v5615_v56  ;;  %v3157_v27 = vmul.f32 %v11108_v11, %v11108_v11  ;;  %v11127_v56 = vmul.f32 0.0051020407, %v13336_v13 }
 0x888   :  { %v3156_v44 = vmul.f32 %v11114_v41, %v11114_v41 }
 0x889   :  { %6694 = vst [vmem:[%s12933_s9 + $0x300] sm:$0xff] %v6514_v15  ;;  %v3404_v1 = vsel %vm1185_vm8, %v3157_v27, 0.0  ;;  %v3765_v7 = vmul.f32 %v11127_v56, %v11127_v56  ;;  %v11151_v27 = vmul.f32 0.0051020407, %v10486_v30  ;;  %v5749_v30 = vld [vmem:[%s12932_s8 + $0x198] sm:$0xff] }
 0x88a   :  { %6695 = vst.msk [vmem:[%s12933_s9 + $0x308] sm:$0xff] %vm1185_vm8, %v6515_v9  ;;  %v13337_v9 = vld [vmem:[#allocation88_spill] sm:$0xff] }
 0x88b   :  { %v3675_v45 = vmul.f32 0.0051020407, %v13337_v9 }
 0x88c   :  { %v6066_v61 = vpop.permute.xlu1 %6065 }
 0x88d   :  { %v6456_v12 = vadd.f32 %v6066_v61, %v5556_v35  ;;  %v6457_v14 = vadd.f32 %v6066_v61, %v5557_v18  ;;  %6260 = vperm.xlu1 %7131, %v5936_v32   ;;  %v3405_v35 = vadd.f32 %v3404_v1, %v3156_v44  ;;  %v3855_v25 = vsub.f32 %v3675_v45, %v3765_v7  ;;  %v11135_v18 = vpop.f32.mrf.mxu3  ;;  %v13338_v61 = vld [vmem:[#allocation95_spill] sm:$0xff] }
 0x88e   :  { %v2898_v44 = vsel %vm1185_vm8, %v10400_v6, 0.0  ;;  %v3743_v1 = vmul.f32 %v11151_v27, %v11151_v27  ;;  %v3653_v7 = vmul.f32 0.0051020407, %v10497_v59 }
 0x88f   :  { %6636 = vst [vmem:[%s12933_s9 + $0x130] sm:$0xff] %v6456_v12 }
 0x890   :  { %6637 = vst.msk [vmem:[%s12933_s9 + $0x138] sm:$0xff] %vm1185_vm8, %v6457_v14 }
 0x894   :  { %v5346_v15 = vpop.permute.xlu1 %5345  ;;  %2776 = vadd.xlane.f32.xlu0 %v2775_v21  ;;  %v3945_v21 = vadd.f32 1e-05, %v3855_v25 }
 0x895   :  { %v5628_v32 = vmul.f32 %v5346_v15, %v9729_v2  ;;  %v5629_v12 = vmul.f32 %v5346_v15, %v13338_v61  ;;  %v11148_v2 = vpop.f32.mrf.mxu3  ;;  %v11155_v15 = vpop.f32.mrf.mxu2  ;;  %v3833_v61 = vsub.f32 %v3653_v7, %v3743_v1  ;;  %v11176_v1 = vmul.f32 0.0051020407, %v10608_v48 }
 0x896   :  { %7253 = vrsqrt.f32 %v3945_v21  ;;  %13339 = vst [vmem:[#allocation49_spill] sm:$0xff] %v11148_v2  ;;  %vm4464_vm3 = vweird.f32 %v3945_v21 }
 0x897   :  { %13340 = vst [vmem:[#allocation48_spill] sm:$0xff] %v11155_v15 }
 0x89c   :  { %v6246_v14 = vpop.permute.xlu1 %6245  ;;  %3406 = vadd.xlane.f32.xlu0 %v3405_v35  ;;  %v7254_v45 = vpop.eup %7253  ;;  %v2899_v35 = vadd.f32 %v2898_v44, %v10405_v58  ;;  %v3923_v44 = vadd.f32 1e-05, %v3833_v61  ;;  %v3689_v61 = vmul.f32 0.0051020407, %v10624_v34  ;;  %v13343_v34 = vld [vmem:[#allocation96_spill] sm:$0xff] }
 0x89d   :  { %v6528_v13 = vadd.f32 %v6246_v14, %v5628_v32  ;;  %v6529_v9 = vadd.f32 %v6246_v14, %v5629_v12  ;;  %v4459_v25 = vmul.f32 %v7254_v45, %v3945_v21  ;;  %v5839_v32 = vmul.f32 %v11059_v57, %v10963_v62  ;;  %v11166_v12 = vpop.f32.mrf.mxu3 }
 0x89e   :  { %13341 = vst [vmem:[#allocation33_spill] sm:$0xff] %v11166_v12  ;;  %v2950_v59 = vsel %vm1185_vm8, %v11166_v12, 0.0  ;;  %v3245_v57 = vmul.f32 %v11166_v12, %v11166_v12  ;;  %7255 = vrsqrt.f32 %v3923_v44  ;;  %vm4465_vm2 = vweird.f32 %v7254_v45  ;;  %v13350_v12 = vld [vmem:[#allocation44_spill] sm:$0xff] }
 0x89f   :  { %6708 = vst [vmem:[%s12933_s9 + $0x370] sm:$0xff] %v6528_v13  ;;  %v4460_v14 = vmul.f32 %v7254_v45, %v4459_v25  ;;  %v5929_v13 = vsub.f32 %v5749_v30, %v5839_v32  ;;  %v3779_v30 = vmul.f32 %v11176_v1, %v11176_v1  ;;  %vm4466_vm4 = vmor %vm4464_vm3, %vm4465_vm2  ;;  %v11197_v21 = vmul.f32 0.0051020407, %v13343_v34 }
 0x8a0   :  { %6709 = vst.msk [vmem:[%s12933_s9 + $0x378] sm:$0xff] %vm1185_vm8, %v6529_v9  ;;  %v11170_v9 = vpop.f32.mrf.mxu2  ;;  %v3580_v32 = vsel %vm1185_vm8, %v3245_v57, 0.0  ;;  %vm4244_vm5 = vweird.f32 %v3923_v44 }
 0x8a1   :  { %13342 = vst [vmem:[#allocation32_spill] sm:$0xff] %v11170_v9  ;;  %v4461_v17 = vmul.f32 0.5, %v4460_v14  ;;  %v2951_v62 = vadd.f32 %v2950_v59, %v11170_v9  ;;  %v3244_v7 = vmul.f32 %v11170_v9, %v11170_v9  ;;  %v3869_v59 = vsub.f32 %v3689_v61, %v3779_v30  ;;  %v11203_v61 = vpop.xlane.xlu2 %2756 }
 0x8a2   :  { %13345 = vst [vmem:[#allocation55_spill] sm:$0xff] %v11203_v61  ;;  %v13349_v61 = vld [vmem:[#allocation46_spill] sm:$0xff] }
 0x8a3   :  { %v11191_v3 = vadd.f32 1e-05, %v3869_v59 }
 0x8a5   :  { %7257 = vrsqrt.f32 %v11191_v3  ;;  %vm4604_vm0 = vweird.f32 %v11191_v3 }
 0x8ab   :  { %2900 = vadd.xlane.f32.xlu2 %v2899_v35  ;;  %v4462_v35 = vsub.f32 1.5, %v4461_v17  ;;  %v3581_v17 = vadd.f32 %v3580_v32, %v3244_v7  ;;  %v13344_v7 = vld [vmem:[#allocation108_spill] sm:$0xff] }
 0x8ac   :  { %v3646_v32 = vmul.f32 0.0051020407, %v13344_v7 }
 0x8ad   :  { %v4463_v14 = vmul.f32 %v7254_v45, %v4462_v35 }
 0x8af   :  { %v4467_v20 = vsel %vm4466_vm4, %v7254_v45, %v4463_v14 }
 0x8b0   :  { %6225 = vperm.xlu0 %7130, %v5929_v13   ;;  %v7256_v13 = vpop.eup %7255 }
 0x8b1   :  { %v11180_v25 = vpop.xlane.xlu0 %2908  ;;  %v4239_v48 = vmul.f32 %v7256_v13, %v3923_v44  ;;  %v11205_v14 = vpop.eup %7257  ;;  %vm4245_vm6 = vweird.f32 %v7256_v13  ;;  %v7109_v44 = vld [vmem:[%s12930_s6 + $0x148] sm:$0xff] }
 0x8b2   :  { %vm11209_vm7 = vmor %vm4244_vm5, %vm4245_vm6  ;;  %v4599_v34 = vmul.f32 %v11205_v14, %v11191_v3  ;;  %7064 = vmatmul.msk.bf16.gmra.mxu3 %vm2027_vm9, %v7109_v44  ;;  %7019 = vmatmul.msk.bf16.gmra.mxu2 %vm2027_vm9, %v7109_v44  ;;  %v3682_v44 = vmul.f32 0.0051020407, %v9874_v33  ;;  %v3548_v33 = vsel %vm1185_vm8, %v3229_v28, 0.0  ;;  %vm4605_vm10 = vweird.f32 %v11205_v14 }
 0x8b3   :  { %v4240_v5 = vmul.f32 %v7256_v13, %v4239_v48  ;;  %vm11276_vm11 = vmor %vm4604_vm0, %vm4605_vm10 }
 0x8b5   :  { %v4241_v35 = vmul.f32 0.5, %v4240_v5 }
 0x8b7   :  { %2952 = vadd.xlane.f32.xlu1 %v2951_v62  ;;  %v4935_v62 = vld [vmem:[%s12931_s7 + $0x178] sm:$0xff]  ;;  %v4242_v30 = vsub.f32 1.5, %v4241_v35 }
 0x8b8   :  { %v11189_v57 = vmul.f32 %v4935_v62, %v4467_v20  ;;  %v3736_v20 = vmul.f32 %v11197_v21, %v11197_v21 }
 0x8b9   :  { %v11193_v15 = vpop.xlane.xlu0 %3538  ;;  %v4243_v5 = vmul.f32 %v7256_v13, %v4242_v30  ;;  %v4600_v30 = vmul.f32 %v11205_v14, %v4599_v34 }
 0x8bb   :  { %v4601_v60 = vmul.f32 0.5, %v4600_v30  ;;  %v5723_v30 = vld [vmem:[%s12932_s8 + $0xc8] sm:$0xff] }
 0x8bf   :  { %3582 = vadd.xlane.f32.xlu1 %v3581_v17  ;;  %v3826_v17 = vsub.f32 %v3646_v32, %v3736_v20 }
 0x8c1   :  { %v11215_v7 = vadd.f32 1e-05, %v3826_v17  ;;  %v2918_v17 = vsel %vm1185_vm8, %v10805_v19, 0.0 }
 0x8c3   :  { %5305 = vperm.xlu2 %7132, %v11189_v57   ;;  %7259 = vrsqrt.f32 %v11215_v7  ;;  %vm4174_vm13 = vweird.f32 %v11215_v7 }
 0x8c7   :  { %v2941_v45 = vpop.xlane.xlu1 %2940 }
 0x8c8   :  { %v11207_v59 = vmul.f32 0.0051020407, %v2941_v45  ;;  %v4247_v45 = vsel %vm11209_vm7, %v7256_v13, %v4243_v5  ;;  %v11240_v13 = vmul.f32 0.0051020407, %v9844_v23 }
 0x8ca   :  { %13346 = vst [vmem:[#allocation54_spill] sm:$0xff] %v11207_v59  ;;  %v11219_v35 = vmul.f32 %v11207_v59, %v11207_v59  ;;  %v4913_v59 = vld [vmem:[%s12931_s7 + $0xc8] sm:$0xff]  ;;  %v3772_v23 = vmul.f32 %v11240_v13, %v11240_v13 }
 0x8cc   :  { %v5146_v48 = vpop.permute.xlu0 %5145 }
 0x8cd   :  { %v5548_v2 = vmul.f32 %v5146_v48, %v13349_v61  ;;  %v5549_v9 = vmul.f32 %v5146_v48, %v13350_v12  ;;  %v5126_v61 = vpop.permute.xlu2 %5125  ;;  %v2919_v48 = vadd.f32 %v2918_v17, %v10809_v51  ;;  %v3862_v17 = vsub.f32 %v3682_v44, %v3772_v23 }
 0x8ce   :  { %v3219_v23 = vmul.f32 %v10400_v6, %v10400_v6 }
 0x8cf   :  { %v3571_v32 = vpop.xlane.xlu1 %3570 }
 0x8d0   :  { %v11226_v20 = vmul.f32 0.0051020407, %v3571_v32  ;;  %v5003_v32 = vmul.f32 %v4913_v59, %v4247_v45  ;;  %v4602_v45 = vsub.f32 1.5, %v4601_v60  ;;  %v3528_v62 = vsel %vm1185_vm8, %v3219_v23, 0.0 }
 0x8d2   :  { %v5813_v59 = vmul.f32 %v5003_v32, %v11151_v27  ;;  %v4603_v60 = vmul.f32 %v11205_v14, %v4602_v45  ;;  %v7110_v27 = vld [vmem:[%s12930_s6 + $0x150] sm:$0xff] }
 0x8d3   :  { %7065 = vmatmul.msk.bf16.gmra.mxu3 %vm2027_vm9, %v7110_v27  ;;  %7020 = vmatmul.msk.bf16.gmra.mxu2 %vm2027_vm9, %v7110_v27 }
 0x8d4   :  { %v6046_v5 = vpop.permute.xlu0 %6045  ;;  %v4607_v44 = vsel %vm11276_vm11, %v11205_v14, %v4603_v60 }
 0x8d5   :  { %v6448_v34 = vadd.f32 %v6046_v5, %v5548_v2  ;;  %v6449_v12 = vadd.f32 %v6046_v5, %v5549_v9  ;;  %v11257_v2 = vpop.eup %7259  ;;  %v3228_v9 = vmul.f32 %v10809_v51, %v10809_v51 }
 0x8d6   :  { %v4169_v5 = vmul.f32 %v11257_v2, %v11215_v7  ;;  %vm4175_vm12 = vweird.f32 %v11257_v2 }
 0x8d7   :  { %6628 = vst [vmem:[%s12933_s9 + $0xf0] sm:$0xff] %v6448_v34  ;;  %vm4176_vm14 = vmor %vm4174_vm13, %vm4175_vm12 }
 0x8d8   :  { %6629 = vst.msk [vmem:[%s12933_s9 + $0xf8] sm:$0xff] %vm1185_vm8, %v6449_v12  ;;  %5195 = vperm.xlu1 %7131, %v5003_v32   ;;  %v5903_v12 = vsub.f32 %v5723_v30, %v5813_v59  ;;  %v3952_v32 = vadd.f32 1e-05, %v3862_v17  ;;  %v4170_v3 = vmul.f32 %v11257_v2, %v4169_v5  ;;  %v13354_v59 = vld [vmem:[#allocation29_spill] sm:$0xff]  ;;  %v13355_v30 = vld [vmem:[#allocation27_spill] sm:$0xff] }
 0x8d9   :  { %v5540_v45 = vmul.f32 %v5126_v61, %v13354_v59 }
 0x8da   :  { %2920 = vadd.xlane.f32.xlu0 %v2919_v48  ;;  %v3549_v48 = vadd.f32 %v3548_v33, %v3228_v9  ;;  %v4949_v9 = vld [vmem:[%s12931_s7 + $0x1e8] sm:$0xff]  ;;  %7261 = vrsqrt.f32 %v3952_v32  ;;  %v5541_v33 = vmul.f32 %v5126_v61, %v13355_v30  ;;  %v4171_v17 = vmul.f32 0.5, %v4170_v3 }
 0x8db   :  { %v5039_v60 = vmul.f32 %v4949_v9, %v4607_v44  ;;  %v5759_v44 = vld [vmem:[%s12932_s8 + $0x1e8] sm:$0xff]  ;;  %vm4534_vm15 = vweird.f32 %v3952_v32 }
 0x8dc   :  { %v4172_v27 = vsub.f32 1.5, %v4171_v17 }
 0x8dd   :  { %v11270_v34 = vpop.xlane.xlu2 %3386  ;;  %v5849_v59 = vmul.f32 %v5039_v60, %v11176_v1 }
 0x8de   :  { %13351 = vst [vmem:[#allocation91_spill] sm:$0xff] %v11270_v34  ;;  %v4173_v9 = vmul.f32 %v11257_v2, %v4172_v27  ;;  %v11327_v27 = vpop.f32.mrf.mxu3 }
 0x8e0   :  { %6095 = vperm.xlu1 %7131, %v5903_v12   ;;  %v3218_v12 = vmul.f32 %v10405_v58, %v10405_v58  ;;  %v7262_v61 = vpop.eup %7261  ;;  %v3234_v58 = vmul.f32 %v10960_v54, %v10960_v54 }
 0x8e1   :  { %v4529_v23 = vmul.f32 %v7262_v61, %v3952_v32  ;;  %vm4535_vm1 = vweird.f32 %v7262_v61  ;;  %v5745_v32 = vld [vmem:[%s12932_s8 + $0x178] sm:$0xff] }
 0x8e2   :  { %3550 = vadd.xlane.f32.xlu0 %v3549_v48  ;;  %v3529_v3 = vadd.f32 %v3528_v62, %v3218_v12  ;;  %v4177_v12 = vsel %vm4176_vm14, %v11257_v2, %v4173_v9  ;;  %vm11329_vm2 = vmor %vm4534_vm15, %vm4535_vm1 }
 0x8e5   :  { %v6026_v5 = vpop.permute.xlu2 %6025 }
 0x8e6   :  { %v6440_v48 = vadd.f32 %v6026_v5, %v5540_v45  ;;  %v6441_v14 = vadd.f32 %v6026_v5, %v5541_v33  ;;  %v5939_v33 = vsub.f32 %v5759_v44, %v5849_v59  ;;  %v4530_v5 = vmul.f32 %v7262_v61, %v4529_v23 }
 0x8e7   :  { %v5181_v28 = vpop.permute.xlu1 %5180 }
 0x8e8   :  { %6620 = vst [vmem:[%s12933_s9 + $0xb0] sm:$0xff] %v6440_v48  ;;  %5375 = vperm.xlu1 %7131, %v5039_v60   ;;  %v5562_v45 = vmul.f32 %v5181_v28, %v9951_v55  ;;  %v5563_v30 = vmul.f32 %v5181_v28, %v9948_v52  ;;  %v4906_v48 = vld [vmem:[%s12931_s7 + $0x90] sm:$0xff]  ;;  %v4531_v55 = vmul.f32 0.5, %v4530_v5 }
 0x8e9   :  { %6621 = vst.msk [vmem:[%s12933_s9 + $0xb8] sm:$0xff] %vm1185_vm8, %v6441_v14  ;;  %v4996_v52 = vmul.f32 %v4906_v48, %v4177_v12  ;;  %v5716_v60 = vld [vmem:[%s12932_s8 + $0x90] sm:$0xff] }
 0x8ea   :  { %v4532_v2 = vsub.f32 1.5, %v4531_v55  ;;  %v5752_v5 = vld [vmem:[%s12932_s8 + $0x1b0] sm:$0xff]  ;;  %v3656_v55 = vmul.f32 0.0051020407, %v10819_v43 }
 0x8eb   :  { %v5806_v14 = vmul.f32 %v4996_v52, %v11197_v21  ;;  %v5835_v21 = vmul.f32 %v11189_v57, %v11127_v56  ;;  %v5326_v57 = vpop.permute.xlu0 %5325 }
 0x8ec   :  { %3530 = vadd.xlane.f32.xlu2 %v3529_v3  ;;  %v4533_v3 = vmul.f32 %v7262_v61, %v4532_v2 }
 0x8ed   :  { %v5896_v28 = vsub.f32 %v5716_v60, %v5806_v14  ;;  %v13362_v60 = vld [vmem:[#allocation89_spill] sm:$0xff] }
 0x8ef   :  { %v6081_v62 = vpop.permute.xlu1 %6080 }
 0x8f0   :  { %v6462_v1 = vadd.f32 %v6081_v62, %v5562_v45  ;;  %v6463_v17 = vadd.f32 %v6081_v62, %v5563_v30  ;;  %6275 = vperm.xlu1 %7131, %v5939_v33   ;;  %v11340_v45 = vpop.f32.mrf.mxu2  ;;  %v4537_v62 = vsel %vm11329_vm2, %v7262_v61, %v4533_v3 }
 0x8f2   :  { %6642 = vst [vmem:[%s12933_s9 + $0x160] sm:$0xff] %v6462_v1  ;;  %v11354_v1 = vpop.f32.mrf.mxu3 }
 0x8f3   :  { %6643 = vst.msk [vmem:[%s12933_s9 + $0x168] sm:$0xff] %vm1185_vm8, %v6463_v17  ;;  %v11358_v17 = vmul.f32 0.0051020407, %v10807_v63 }
 0x8f4   :  { %13358 = vst [vmem:[#allocation93_spill] sm:$0xff] %v11354_v1 }
 0x8f6   :  { %5160 = vperm.xlu0 %7130, %v4996_v52   ;;  %v3746_v52 = vmul.f32 %v11358_v17, %v11358_v17 }
 0x8f7   :  { %v5361_v7 = vpop.permute.xlu1 %5360 }
 0x8f8   :  { %v5634_v44 = vmul.f32 %v5361_v7, %v9974_v29  ;;  %v5635_v23 = vmul.f32 %v5361_v7, %v9965_v38  ;;  %v4942_v38 = vld [vmem:[%s12931_s7 + $0x1b0] sm:$0xff]  ;;  %v5925_v29 = vsub.f32 %v5745_v32, %v5835_v21  ;;  %v11363_v12 = vpop.f32.mrf.mxu2  ;;  %v11388_v32 = vmul.f32 0.0051020407, %v10920_v49 }
 0x8f9   :  { %v5032_v56 = vmul.f32 %v4942_v38, %v4537_v62  ;;  %13359 = vst [vmem:[#allocation23_spill] sm:$0xff] %v11363_v12 }
 0x8fa   :  { %v11370_v14 = vpop.f32.mrf.mxu3  ;;  %v3782_v38 = vmul.f32 %v11388_v32, %v11388_v32 }
 0x8fb   :  { %v5842_v61 = vmul.f32 %v5032_v56, %v11240_v13  ;;  %13360 = vst [vmem:[#allocation21_spill] sm:$0xff] %v11370_v14  ;;  %v3836_v13 = vsub.f32 %v3656_v55, %v3746_v52  ;;  %v2962_v63 = vsel %vm1185_vm8, %v11370_v14, 0.0  ;;  %v3251_v43 = vmul.f32 %v11370_v14, %v11370_v14  ;;  %v13364_v52 = vld [vmem:[#allocation52_spill] sm:$0xff]  ;;  %v13365_v55 = vld [vmem:[#allocation50_spill] sm:$0xff] }
 0x8fc   :  { %v5620_v49 = vmul.f32 %v5326_v57, %v13364_v52 }
 0x8fd   :  { %v5932_v48 = vsub.f32 %v5752_v5, %v5842_v61  ;;  %v3926_v3 = vadd.f32 1e-05, %v3836_v13  ;;  %v3592_v62 = vsel %vm1185_vm8, %v3251_v43, 0.0  ;;  %v5621_v13 = vmul.f32 %v5326_v57, %v13365_v55 }
 0x8fe   :  { %6060 = vperm.xlu0 %7130, %v5896_v28   ;;  %v11377_v28 = vmul.f32 0.0051020407, %v13362_v60  ;;  %v3649_v43 = vmul.f32 0.0051020407, %v10032_v50  ;;  %v2766_v57 = vsel %vm1185_vm8, %v10571_v31, 0.0 }
 0x8ff   :  { %v6261_v9 = vpop.permute.xlu1 %6260  ;;  %7263 = vrsqrt.f32 %v3926_v3  ;;  %vm4274_vm3 = vweird.f32 %v3926_v3 }
 0x900   :  { %v6534_v30 = vadd.f32 %v6261_v9, %v5634_v44  ;;  %v6535_v33 = vadd.f32 %v6261_v9, %v5635_v23  ;;  %v11374_v2 = vpop.f32.mrf.mxu2  ;;  %v13363_v44 = vld [vmem:[#allocation90_spill] sm:$0xff]  ;;  %v3732_v9 = vmul.f32 %v11377_v28, %v11377_v28 }
 0x901   :  { %13361 = vst [vmem:[#allocation39_spill] sm:$0xff] %v11374_v2  ;;  %v2963_v59 = vadd.f32 %v2962_v63, %v11374_v2  ;;  %v3642_v23 = vmul.f32 0.0051020407, %v13363_v44 }
 0x902   :  { %6714 = vst [vmem:[%s12933_s9 + $0x3a0] sm:$0xff] %v6534_v30  ;;  %v3250_v30 = vmul.f32 %v11374_v2, %v11374_v2 }
 0x903   :  { %6715 = vst.msk [vmem:[%s12933_s9 + $0x3a8] sm:$0xff] %vm1185_vm8, %v6535_v33  ;;  %v3822_v33 = vsub.f32 %v3642_v23, %v3732_v9  ;;  %v11402_v23 = vmul.f32 0.0051020407, %v10015_v42 }
 0x904   :  { %6205 = vperm.xlu2 %7132, %v5925_v29   ;;  %v3692_v29 = vmul.f32 0.0051020407, %v10931_v36 }
 0x905   :  { %v7264_v61 = vpop.eup %7263  ;;  %v11396_v5 = vadd.f32 1e-05, %v3822_v33  ;;  %v3739_v42 = vmul.f32 %v11402_v23, %v11402_v23  ;;  %v2767_v33 = vadd.f32 %v2766_v57, %v10573_v53 }
 0x906   :  { %5340 = vperm.xlu0 %7130, %v5032_v56   ;;  %v3593_v56 = vadd.f32 %v3592_v62, %v3250_v30  ;;  %v4269_v63 = vmul.f32 %v7264_v61, %v3926_v3  ;;  %vm4275_vm4 = vweird.f32 %v7264_v61 }
 0x907   :  { %v11368_v7 = vpop.xlane.xlu0 %2776  ;;  %7265 = vrsqrt.f32 %v11396_v5  ;;  %v3829_v62 = vsub.f32 %v3649_v43, %v3739_v42  ;;  %vm11442_vm5 = vmor %vm4274_vm3, %vm4275_vm4  ;;  %v13368_v42 = vld [vmem:[#allocation119_spill] sm:$0xff]  ;;  %vm4134_vm7 = vweird.f32 %v11396_v5 }
 0x908   :  { %v4270_v9 = vmul.f32 %v7264_v61, %v4269_v63  ;;  %v2930_v63 = vsel %vm1185_vm8, %v10951_v22, 0.0 }
 0x909   :  { %v11430_v52 = vadd.f32 1e-05, %v3829_v62  ;;  %v2931_v62 = vadd.f32 %v2930_v63, %v10960_v54 }
 0x90a   :  { %v4271_v50 = vmul.f32 0.5, %v4270_v9 }
 0x90b   :  { %vm4204_vm14 = vweird.f32 %v11430_v52 }
 0x90d   :  { %v11418_v30 = vpop.eup %7265 }
 0x90e   :  { %6240 = vperm.xlu0 %7130, %v5932_v48   ;;  %v3872_v48 = vsub.f32 %v3692_v29, %v3782_v38  ;;  %v7111_v29 = vld [vmem:[%s12930_s6 + $0x158] sm:$0xff]  ;;  %vm4135_vm6 = vweird.f32 %v11418_v30 }
 0x90f   :  { %v11383_v21 = vpop.xlane.xlu0 %3406  ;;  %7066 = vmatmul.msk.bf16.gmra.mxu3 %vm2027_vm9, %v7111_v29  ;;  %7021 = vmatmul.msk.bf16.gmra.mxu2 %vm2027_vm9, %v7111_v29  ;;  %v13369_v29 = vld [vmem:[#allocation120_spill] sm:$0xff]  ;;  %vm4136_vm0 = vmor %vm4134_vm7, %vm4135_vm6 }
 0x910   :  { %v11404_v36 = vadd.f32 1e-05, %v3872_v48 }
 0x912   :  { %7267 = vrsqrt.f32 %v11404_v36  ;;  %vm4634_vm10 = vweird.f32 %v11404_v36 }
 0x913   :  { %7269 = vrsqrt.f32 %v11430_v52 }
 0x918   :  { %v7268_v55 = vpop.eup %7267 }
 0x919   :  { %vm4635_vm11 = vweird.f32 %v7268_v55 }
 0x91a   :  { %2964 = vadd.xlane.f32.xlu1 %v2963_v59  ;;  %vm4636_vm12 = vmor %vm4634_vm10, %vm4635_vm11 }
 0x922   :  { %3594 = vadd.xlane.f32.xlu1 %v3593_v56  ;;  %v6226_v60 = vpop.permute.xlu0 %6225  ;;  %v4129_v56 = vmul.f32 %v11418_v30, %v11396_v5 }
 0x923   :  { %v6520_v59 = vadd.f32 %v6226_v60, %v5620_v49  ;;  %v6521_v44 = vadd.f32 %v6226_v60, %v5621_v13  ;;  %v4272_v49 = vsub.f32 1.5, %v4271_v50  ;;  %v3235_v50 = vmul.f32 %v10951_v22, %v10951_v22 }
 0x924   :  { %v4130_v13 = vmul.f32 %v11418_v30, %v4129_v56  ;;  %v3685_v56 = vmul.f32 0.0051020407, %v13369_v29 }
 0x925   :  { %6700 = vst [vmem:[%s12933_s9 + $0x330] sm:$0xff] %v6520_v59  ;;  %v4629_v59 = vmul.f32 %v7268_v55, %v11404_v36  ;;  %v3560_v29 = vsel %vm1185_vm8, %v3235_v50, 0.0  ;;  %v4952_v36 = vld [vmem:[%s12931_s7 + $0x200] sm:$0xff] }
 0x926   :  { %6701 = vst.msk [vmem:[%s12933_s9 + $0x338] sm:$0xff] %vm1185_vm8, %v6521_v44  ;;  %v4273_v44 = vmul.f32 %v7264_v61, %v4272_v49  ;;  %v4131_v3 = vmul.f32 0.5, %v4130_v13  ;;  %v4916_v13 = vld [vmem:[%s12931_s7 + $0xe0] sm:$0xff] }
 0x927   :  { %v4630_v49 = vmul.f32 %v7268_v55, %v4629_v59 }
 0x928   :  { %v4277_v6 = vsel %vm11442_vm5, %v7264_v61, %v4273_v44  ;;  %v3561_v44 = vadd.f32 %v3560_v29, %v3234_v58  ;;  %v11487_v29 = vpop.xlane.xlu2 %2900 }
 0x929   :  { %v4631_v34 = vmul.f32 0.5, %v4630_v49  ;;  %13370 = vst [vmem:[#allocation38_spill] sm:$0xff] %v11487_v29 }
 0x92a   :  { %v2953_v38 = vpop.xlane.xlu1 %2952 }
 0x92b   :  { %v11427_v48 = vmul.f32 0.0051020407, %v2953_v38  ;;  %v5006_v38 = vmul.f32 %v4916_v13, %v4277_v6  ;;  %v4632_v1 = vsub.f32 1.5, %v4631_v34  ;;  %v5726_v6 = vld [vmem:[%s12932_s8 + $0xe0] sm:$0xff] }
 0x92d   :  { %2768 = vadd.xlane.f32.xlu2 %v2767_v33  ;;  %v11438_v60 = vmul.f32 %v11427_v48, %v11427_v48  ;;  %v11449_v33 = vmul.f32 0.0051020407, %v13368_v42  ;;  %v4132_v42 = vsub.f32 1.5, %v4131_v3  ;;  %v5816_v3 = vmul.f32 %v5006_v38, %v11358_v17  ;;  %v4902_v17 = vld [vmem:[%s12931_s7 + $0x70] sm:$0xff] }
 0x92e   :  { %v4633_v5 = vmul.f32 %v7268_v55, %v4632_v1 }
 0x92f   :  { %v3775_v63 = vmul.f32 %v11449_v33, %v11449_v33  ;;  %v4133_v57 = vmul.f32 %v11418_v30, %v4132_v42  ;;  %v5906_v50 = vsub.f32 %v5726_v6, %v5816_v3  ;;  %v13371_v3 = vld [vmem:[#allocation7_spill] sm:$0xff] }
 0x931   :  { %v3865_v59 = vsub.f32 %v3685_v56, %v3775_v63  ;;  %v4137_v58 = vsel %vm4136_vm0, %v11418_v30, %v4133_v57  ;;  %v4637_v56 = vsel %vm4636_vm12, %v7268_v55, %v4633_v5  ;;  %v5762_v55 = vld [vmem:[%s12932_s8 + $0x200] sm:$0xff]  ;;  %v4909_v57 = vld [vmem:[%s12931_s7 + $0xa8] sm:$0xff] }
 0x932   :  { %v3583_v43 = vpop.xlane.xlu1 %3582  ;;  %v5042_v13 = vmul.f32 %v4952_v36, %v4637_v56 }
 0x933   :  { %v11446_v9 = vmul.f32 0.0051020407, %v3583_v43  ;;  %v7270_v43 = vpop.eup %7269  ;;  %v3955_v12 = vadd.f32 1e-05, %v3865_v59 }
 0x934   :  { %v4199_v61 = vmul.f32 %v7270_v43, %v11430_v52  ;;  %vm4205_vm13 = vweird.f32 %v7270_v43  ;;  %v5852_v59 = vmul.f32 %v5042_v13, %v11388_v32 }
 0x935   :  { %7271 = vrsqrt.f32 %v3955_v12  ;;  %vm4206_vm15 = vmor %vm4204_vm14, %vm4205_vm13  ;;  %vm4564_vm2 = vweird.f32 %v3955_v12 }
 0x936   :  { %v5942_v52 = vsub.f32 %v5762_v55, %v5852_v59 }
 0x938   :  { %2932 = vadd.xlane.f32.xlu0 %v2931_v62  ;;  %v4200_v62 = vmul.f32 %v7270_v43, %v4199_v61 }
 0x93a   :  { %v4201_v34 = vmul.f32 0.5, %v4200_v62  ;;  %v13372_v62 = vld [vmem:[#allocation65_spill] sm:$0xff] }
 0x93b   :  { %5210 = vperm.xlu1 %7131, %v5006_v38   ;;  %v11480_v38 = vmul.f32 %v4902_v17, %v4137_v58  ;;  %v7272_v49 = vpop.eup %7271 }
 0x93c   :  { %v4202_v30 = vsub.f32 1.5, %v4201_v34  ;;  %v4559_v63 = vmul.f32 %v7272_v49, %v3955_v12  ;;  %vm4565_vm1 = vweird.f32 %v7272_v49 }
 0x93d   :  { %vm4566_vm3 = vmor %vm4564_vm2, %vm4565_vm1 }
 0x93e   :  { %v4203_v1 = vmul.f32 %v7270_v43, %v4202_v30  ;;  %v4560_v61 = vmul.f32 %v7272_v49, %v4559_v63  ;;  %v5306_v30 = vpop.permute.xlu2 %5305 }
 0x940   :  { %3562 = vadd.xlane.f32.xlu0 %v3561_v44  ;;  %v4207_v44 = vsel %vm4206_vm15, %v7270_v43, %v4203_v1  ;;  %v4561_v5 = vmul.f32 0.5, %v4560_v61 }
 0x942   :  { %v4562_v36 = vsub.f32 1.5, %v4561_v5  ;;  %v13376_v5 = vld [vmem:[#allocation35_spill] sm:$0xff] }
 0x943   :  { %6110 = vperm.xlu1 %7131, %v5906_v50   ;;  %v4999_v50 = vmul.f32 %v4909_v57, %v4207_v44  ;;  %v11518_v44 = vpop.f32.mrf.mxu3  ;;  %v13374_v57 = vld [vmem:[#allocation60_spill] sm:$0xff] }
 0x944   :  { %v4563_v1 = vmul.f32 %v7272_v49, %v4562_v36 }
 0x945   :  { %5140 = vperm.xlu2 %7132, %v11480_v38   ;;  %v5809_v43 = vmul.f32 %v4999_v50, %v11402_v23  ;;  %v4945_v23 = vld [vmem:[%s12931_s7 + $0x1c8] sm:$0xff] }
 0x946   :  { %v4567_v61 = vsel %vm4566_vm3, %v7272_v49, %v4563_v1  ;;  %v3153_v49 = vmul.f32 %v10571_v31, %v10571_v31 }
 0x94a   :  { %v5196_v42 = vpop.permute.xlu1 %5195 }
 0x94b   :  { %5390 = vperm.xlu1 %7131, %v5042_v13   ;;  %v5568_v6 = vmul.f32 %v5196_v42, %v13371_v3  ;;  %v5569_v58 = vmul.f32 %v5196_v42, %v13372_v62  ;;  %v5719_v13 = vld [vmem:[%s12932_s8 + $0xa8] sm:$0xff] }
 0x94c   :  { %v5899_v63 = vsub.f32 %v5719_v13, %v5809_v43 }
 0x94d   :  { %v11498_v56 = vpop.xlane.xlu0 %2920 }
 0x952   :  { %v6096_v17 = vpop.permute.xlu1 %6095 }
 0x953   :  { %v6468_v32 = vadd.f32 %v6096_v17, %v5568_v6  ;;  %v6469_v34 = vadd.f32 %v6096_v17, %v5569_v58  ;;  %6290 = vperm.xlu1 %7131, %v5942_v52   ;;  %v13375_v6 = vld [vmem:[#allocation123_spill] sm:$0xff]  ;;  %v5035_v52 = vmul.f32 %v4945_v23, %v4567_v61  ;;  %v11522_v17 = vpop.f32.mrf.mxu2 }
 0x954   :  { %5175 = vperm.xlu0 %7130, %v4999_v50  }
 0x955   :  { %6648 = vst [vmem:[%s12933_s9 + $0x190] sm:$0xff] %v6468_v32  ;;  %v11511_v59 = vpop.xlane.xlu0 %3550  ;;  %v5612_v32 = vmul.f32 %v5306_v30, %v13376_v5  ;;  %v5845_v36 = vmul.f32 %v5035_v52, %v11449_v33  ;;  %v3659_v5 = vmul.f32 0.0051020407, %v11085_v46 }
 0x956   :  { %6649 = vst.msk [vmem:[%s12933_s9 + $0x198] sm:$0xff] %vm1185_vm8, %v6469_v34  ;;  %v13377_v34 = vld [vmem:[#allocation34_spill] sm:$0xff] }
 0x957   :  { %v5613_v43 = vmul.f32 %v5306_v30, %v13377_v34  ;;  %v3396_v30 = vsel %vm1185_vm8, %v3153_v49, 0.0 }
 0x95a   :  { %v5376_v42 = vpop.permute.xlu1 %5375 }
 0x95b   :  { %v5640_v3 = vmul.f32 %v5376_v42, %v13374_v57  ;;  %v5641_v62 = vmul.f32 %v5376_v42, %v13375_v6  ;;  %v5755_v42 = vld [vmem:[%s12932_s8 + $0x1c8] sm:$0xff]  ;;  %v11542_v57 = vpop.f32.mrf.mxu3 }
 0x95c   :  { %6075 = vperm.xlu0 %7130, %v5899_v63   ;;  %v3152_v63 = vmul.f32 %v10573_v53, %v10573_v53  ;;  %13378 = vst [vmem:[#allocation61_spill] sm:$0xff] %v11542_v57  ;;  %v5935_v33 = vsub.f32 %v5755_v42, %v5845_v36  ;;  %v13393_v57 = vld [vmem:[#allocation94_spill] sm:$0xff] }
 0x95e   :  { %v3397_v6 = vadd.f32 %v3396_v30, %v3152_v63 }
 0x95f   :  { %v11513_v55 = vpop.xlane.xlu2 %3530 }
 0x960   :  { %13373 = vst [vmem:[#allocation62_spill] sm:$0xff] %v11513_v55  ;;  %v3678_v55 = vmul.f32 0.0051020407, %v13393_v57 }
 0x962   :  { %v6276_v58 = vpop.permute.xlu1 %6275 }
 0x963   :  { %v6540_v12 = vadd.f32 %v6276_v58, %v5640_v3  ;;  %v6541_v50 = vadd.f32 %v6276_v58, %v5641_v62  ;;  %v11552_v3 = vmul.f32 0.0051020407, %v11079_v8  ;;  %v11554_v62 = vpop.f32.mrf.mxu2  ;;  %v13380_v58 = vld [vmem:[#allocation57_spill] sm:$0xff]  ;;  %v11564_v8 = vpop.f32.mrf.mxu3 }
 0x964   :  { %5355 = vperm.xlu0 %7130, %v5035_v52   ;;  %13379 = vst [vmem:[#allocation87_spill] sm:$0xff] %v11554_v62 }
 0x965   :  { %6720 = vst [vmem:[%s12933_s9 + $0x3d0] sm:$0xff] %v6540_v12  ;;  %v13381_v12 = vld [vmem:[#allocation56_spill] sm:$0xff]  ;;  %v3749_v49 = vmul.f32 %v11552_v3, %v11552_v3 }
 0x966   :  { %6721 = vst.msk [vmem:[%s12933_s9 + $0x3d8] sm:$0xff] %vm1185_vm8, %v6541_v50 }
 0x967   :  { %v6206_v13 = vpop.permute.xlu2 %6205  ;;  %13382 = vst [vmem:[#allocation88_spill] sm:$0xff] %v11564_v8  ;;  %v3839_v36 = vsub.f32 %v3659_v5, %v3749_v49  ;;  %v13386_v49 = vld [vmem:[#allocation72_spill] sm:$0xff] }
 0x968   :  { %v6512_v1 = vadd.f32 %v6206_v13, %v5612_v32  ;;  %v6513_v61 = vadd.f32 %v6206_v13, %v5613_v43  ;;  %v5161_v23 = vpop.permute.xlu0 %5160  ;;  %v2974_v13 = vsel %vm1185_vm8, %v11564_v8, 0.0  ;;  %v11589_v5 = vmul.f32 0.0051020407, %v13386_v49 }
 0x969   :  { %v5554_v52 = vmul.f32 %v5161_v23, %v13380_v58  ;;  %v5555_v50 = vmul.f32 %v5161_v23, %v13381_v12  ;;  %v3929_v46 = vadd.f32 1e-05, %v3839_v36  ;;  %v3257_v23 = vmul.f32 %v11564_v8, %v11564_v8 }
 0x96a   :  { %6692 = vst [vmem:[%s12933_s9 + $0x2f0] sm:$0xff] %v6512_v1  ;;  %v2942_v49 = vsel %vm1185_vm8, %v11135_v18, 0.0 }
 0x96b   :  { %6693 = vst.msk [vmem:[%s12933_s9 + $0x2f8] sm:$0xff] %vm1185_vm8, %v6513_v61  ;;  %v11572_v42 = vpop.f32.mrf.mxu2  ;;  %v11576_v61 = vmul.f32 0.0051020407, %v11180_v25  ;;  %7273 = vrsqrt.f32 %v3929_v46  ;;  %v3604_v58 = vsel %vm1185_vm8, %v3257_v23, 0.0  ;;  %vm4304_vm4 = vweird.f32 %v3929_v46 }
 0x96c   :  { %6255 = vperm.xlu0 %7130, %v5935_v33   ;;  %13383 = vst [vmem:[#allocation95_spill] sm:$0xff] %v11572_v42  ;;  %v2975_v1 = vadd.f32 %v2974_v13, %v11572_v42  ;;  %v3256_v30 = vmul.f32 %v11572_v42, %v11572_v42  ;;  %v5712_v13 = vld [vmem:[%s12932_s8 + $0x70] sm:$0xff] }
 0x96d   :  { %v3785_v33 = vmul.f32 %v11576_v61, %v11576_v61 }
 0x96e   :  { %3398 = vadd.xlane.f32.xlu2 %v3397_v6  ;;  %v3695_v6 = vmul.f32 0.0051020407, %v11193_v15  ;;  %v3605_v15 = vadd.f32 %v3604_v58, %v3256_v30 }
 0x970   :  { %v6061_v32 = vpop.permute.xlu0 %6060  ;;  %v3875_v23 = vsub.f32 %v3695_v6, %v3785_v33 }
 0x971   :  { %v6454_v34 = vadd.f32 %v6061_v32, %v5554_v52  ;;  %v6455_v43 = vadd.f32 %v6061_v32, %v5555_v50  ;;  %v13384_v52 = vld [vmem:[#allocation85_spill] sm:$0xff]  ;;  %v13385_v50 = vld [vmem:[#allocation83_spill] sm:$0xff] }
 0x972   :  { %v3965_v30 = vadd.f32 1e-05, %v3875_v23  ;;  %v3241_v23 = vmul.f32 %v11135_v18, %v11135_v18 }
 0x973   :  { %6634 = vst [vmem:[%s12933_s9 + $0x120] sm:$0xff] %v6454_v34  ;;  %v5802_v34 = vmul.f32 %v11480_v38, %v11377_v28 }
 0x974   :  { %6635 = vst.msk [vmem:[%s12933_s9 + $0x128] sm:$0xff] %vm1185_vm8, %v6455_v43  ;;  %7275 = vrsqrt.f32 %v3965_v30  ;;  %v3572_v53 = vsel %vm1185_vm8, %v3241_v23, 0.0  ;;  %vm4664_vm7 = vweird.f32 %v3965_v30 }
 0x975   :  { %v5892_v28 = vsub.f32 %v5712_v13, %v5802_v34 }
 0x978   :  { %v5341_v63 = vpop.permute.xlu0 %5340 }
 0x979   :  { %v5626_v12 = vmul.f32 %v5341_v63, %v13384_v52  ;;  %v5627_v25 = vmul.f32 %v5341_v63, %v13385_v50  ;;  %v3742_v63 = vmul.f32 %v11589_v5, %v11589_v5  ;;  %v13387_v52 = vld [vmem:[#allocation75_spill] sm:$0xff] }
 0x97a   :  { %v3652_v50 = vmul.f32 0.0051020407, %v13387_v52 }
 0x97c   :  { %v3832_v33 = vsub.f32 %v3652_v50, %v3742_v63  ;;  %v13389_v50 = vld [vmem:[#allocation3_spill] sm:$0xff] }
 0x97d   :  { %2976 = vadd.xlane.f32.xlu1 %v2975_v1  ;;  %v7274_v1 = vpop.eup %7273 }
 0x97e   :  { %v4299_v38 = vmul.f32 %v7274_v1, %v3929_v46  ;;  %v11606_v58 = vadd.f32 1e-05, %v3832_v33  ;;  %vm4305_vm5 = vweird.f32 %v7274_v1  ;;  %v3240_v46 = vmul.f32 %v11139_v10, %v11139_v10 }
 0x97f   :  { %vm11626_vm6 = vmor %vm4304_vm4, %vm4305_vm5 }
 0x980   :  { %v6241_v32 = vpop.permute.xlu0 %6240  ;;  %v4300_v6 = vmul.f32 %v7274_v1, %v4299_v38  ;;  %7277 = vrsqrt.f32 %v11606_v58  ;;  %vm4234_vm11 = vweird.f32 %v11606_v58 }
 0x981   :  { %v6526_v43 = vadd.f32 %v6241_v32, %v5626_v12  ;;  %v6527_v36 = vadd.f32 %v6241_v32, %v5627_v25  ;;  %v7276_v32 = vpop.eup %7275 }
 0x982   :  { %v4301_v12 = vmul.f32 0.5, %v4300_v6  ;;  %v4659_v63 = vmul.f32 %v7276_v32, %v3965_v30  ;;  %vm4665_vm0 = vweird.f32 %v7276_v32  ;;  %v4955_v30 = vld [vmem:[%s12931_s7 + $0x218] sm:$0xff] }
 0x983   :  { %6706 = vst [vmem:[%s12933_s9 + $0x360] sm:$0xff] %v6526_v43  ;;  %v13388_v43 = vld [vmem:[#allocation79_spill] sm:$0xff]  ;;  %vm4666_vm10 = vmor %vm4664_vm7, %vm4665_vm0 }
 0x984   :  { %6707 = vst.msk [vmem:[%s12933_s9 + $0x368] sm:$0xff] %vm1185_vm8, %v6527_v36  ;;  %v11612_v36 = vmul.f32 0.0051020407, %v13388_v43  ;;  %v4302_v13 = vsub.f32 1.5, %v4301_v12  ;;  %v13392_v43 = vld [vmem:[#allocation92_spill] sm:$0xff] }
 0x985   :  { %3606 = vadd.xlane.f32.xlu1 %v3605_v15  ;;  %v2943_v15 = vadd.f32 %v2942_v49, %v11139_v10  ;;  %v11635_v31 = vmul.f32 0.0051020407, %v13392_v43 }
 0x986   :  { %6040 = vperm.xlu2 %7132, %v5892_v28   ;;  %v3778_v52 = vmul.f32 %v11612_v36, %v11612_v36  ;;  %v3688_v28 = vmul.f32 0.0051020407, %v13389_v50  ;;  %v4303_v33 = vmul.f32 %v7274_v1, %v4302_v13  ;;  %v7278_v12 = vpop.eup %7277  ;;  %v4660_v50 = vmul.f32 %v7276_v32, %v4659_v63 }
 0x987   :  { %v4229_v29 = vmul.f32 %v7278_v12, %v11606_v58  ;;  %v3768_v63 = vmul.f32 %v11635_v31, %v11635_v31  ;;  %vm4235_vm12 = vweird.f32 %v7278_v12 }
 0x988   :  { %v3868_v62 = vsub.f32 %v3688_v28, %v3778_v52  ;;  %v4307_v8 = vsel %vm11626_vm6, %v7274_v1, %v4303_v33  ;;  %v4661_v23 = vmul.f32 0.5, %v4660_v50  ;;  %vm4236_vm13 = vmor %vm4234_vm11, %vm4235_vm12 }
 0x989   :  { %v3858_v43 = vsub.f32 %v3678_v55, %v3768_v63  ;;  %v4230_v13 = vmul.f32 %v7278_v12, %v4229_v29 }
 0x98a   :  { %v11649_v52 = vadd.f32 1e-05, %v3868_v62  ;;  %v4662_v57 = vsub.f32 1.5, %v4661_v23  ;;  %v13395_v23 = vld [vmem:[#allocation10_spill] sm:$0xff] }
 0x98b   :  { %v11653_v33 = vadd.f32 1e-05, %v3858_v43 }
 0x98c   :  { %7279 = vrsqrt.f32 %v11649_v52  ;;  %v4663_v62 = vmul.f32 %v7276_v32, %v4662_v57  ;;  %vm4594_vm14 = vweird.f32 %v11649_v52 }
 0x98d   :  { %v2965_v25 = vpop.xlane.xlu1 %2964  ;;  %7281 = vrsqrt.f32 %v11653_v33  ;;  %vm4494_vm3 = vweird.f32 %v11653_v33 }
 0x98e   :  { %v11614_v34 = vmul.f32 0.0051020407, %v2965_v25  ;;  %v4231_v25 = vmul.f32 0.5, %v4230_v13 }
 0x990   :  { %v11624_v38 = vmul.f32 %v11614_v34, %v11614_v34  ;;  %v4232_v29 = vsub.f32 1.5, %v4231_v25 }
 0x995   :  { %v3595_v6 = vpop.xlane.xlu1 %3594 }
 0x996   :  { %2944 = vadd.xlane.f32.xlu0 %v2943_v15  ;;  %v11632_v49 = vmul.f32 0.0051020407, %v3595_v6  ;;  %v4919_v15 = vld [vmem:[%s12931_s7 + $0xf8] sm:$0xff]  ;;  %v3573_v6 = vadd.f32 %v3572_v53, %v3240_v46  ;;  %v13394_v46 = vld [vmem:[#allocation11_spill] sm:$0xff] }
 0x997   :  { %v5009_v28 = vmul.f32 %v4919_v15, %v4307_v8  ;;  %v5729_v53 = vld [vmem:[%s12932_s8 + $0xf8] sm:$0xff]  ;;  %v7280_v8 = vpop.eup %7279  ;;  %v2910_v50 = vsel %vm1185_vm8, %v13394_v46, 0.0  ;;  %v4233_v15 = vmul.f32 %v7278_v12, %v4232_v29 }
 0x998   :  { %v4589_v13 = vmul.f32 %v7280_v8, %v11649_v52  ;;  %v7282_v63 = vpop.eup %7281  ;;  %vm4595_vm15 = vweird.f32 %v7280_v8  ;;  %v4948_v52 = vld [vmem:[%s12931_s7 + $0x1e0] sm:$0xff] }
 0x999   :  { %v5819_v1 = vmul.f32 %v5009_v28, %v11552_v3  ;;  %v4667_v3 = vsel %vm4666_vm10, %v7276_v32, %v4663_v62  ;;  %v4912_v32 = vld [vmem:[%s12931_s7 + $0xc0] sm:$0xff]  ;;  %v4489_v25 = vmul.f32 %v7282_v63, %v11653_v33  ;;  %vm4596_vm1 = vmor %vm4594_vm14, %vm4595_vm15  ;;  %vm4495_vm2 = vweird.f32 %v7282_v63 }
 0x99a   :  { %v4590_v57 = vmul.f32 %v7280_v8, %v4589_v13  ;;  %vm4496_vm4 = vmor %vm4494_vm3, %vm4495_vm2  ;;  %v5758_v33 = vld [vmem:[%s12932_s8 + $0x1e0] sm:$0xff] }
 0x99b   :  { %v5909_v55 = vsub.f32 %v5729_v53, %v5819_v1  ;;  %v4237_v1 = vsel %vm4236_vm13, %v7278_v12, %v4233_v15  ;;  %v13396_v15 = vld [vmem:[#allocation5_spill] sm:$0xff] }
 0x99c   :  { %v5002_v29 = vmul.f32 %v4912_v32, %v4237_v1 }
 0x99e   :  { %5225 = vperm.xlu1 %7131, %v5009_v28   ;;  %3574 = vadd.xlane.f32.xlu0 %v3573_v6  ;;  %v5045_v6 = vmul.f32 %v4955_v30, %v4667_v3  ;;  %v2911_v28 = vadd.f32 %v2910_v50, %v13395_v23  ;;  %v4591_v3 = vmul.f32 0.5, %v4590_v57  ;;  %v4490_v30 = vmul.f32 %v7282_v63, %v4489_v25  ;;  %v5722_v57 = vld [vmem:[%s12932_s8 + $0xc0] sm:$0xff] }
 0x9a0   :  { %v5855_v53 = vmul.f32 %v5045_v6, %v11576_v61  ;;  %v13397_v61 = vld [vmem:[#allocation12_spill] sm:$0xff]  ;;  %v4592_v14 = vsub.f32 1.5, %v4591_v3  ;;  %v4491_v1 = vmul.f32 0.5, %v4490_v30 }
 0x9a6   :  { %6125 = vperm.xlu1 %7131, %v5909_v55   ;;  %v5765_v55 = vld [vmem:[%s12932_s8 + $0x218] sm:$0xff] }
 0x9a7   :  { %v5945_v12 = vsub.f32 %v5765_v55, %v5855_v53 }
 0x9ab   :  { %v2933_v43 = vpop.xlane.xlu0 %2932 }
 0x9ac   :  { %v11672_v62 = vmul.f32 0.0051020407, %v2933_v43 }
 0x9ad   :  { %v5211_v58 = vpop.permute.xlu1 %5210 }
 0x9ae   :  { %5405 = vperm.xlu1 %7131, %v5045_v6   ;;  %v11679_v50 = vmul.f32 %v11672_v62, %v11672_v62  ;;  %v5574_v42 = vmul.f32 %v5211_v58, %v13396_v15  ;;  %v5575_v6 = vmul.f32 %v5211_v58, %v13397_v61  ;;  %v4593_v58 = vmul.f32 %v7280_v8, %v4592_v14  ;;  %v4938_v14 = vld [vmem:[%s12931_s7 + $0x190] sm:$0xff]  ;;  %v13399_v15 = vld [vmem:[#allocation18_spill] sm:$0xff] }
 0x9af   :  { %2912 = vadd.xlane.f32.xlu2 %v2911_v28  ;;  %v5812_v28 = vmul.f32 %v5002_v29, %v11589_v5 }
 0x9b0   :  { %v4597_v55 = vsel %vm4596_vm1, %v7280_v8, %v4593_v58 }
 0x9b1   :  { %v5902_v5 = vsub.f32 %v5722_v57, %v5812_v28  ;;  %v5038_v3 = vmul.f32 %v4948_v52, %v4597_v55  ;;  %v13402_v55 = vld [vmem:[#allocation101_spill] sm:$0xff] }
 0x9b2   :  { %5190 = vperm.xlu0 %7130, %v5002_v29  }
 0x9b3   :  { %v3563_v13 = vpop.xlane.xlu0 %3562 }
 0x9b4   :  { %v11684_v43 = vmul.f32 0.0051020407, %v3563_v13  ;;  %v13398_v13 = vld [vmem:[#allocation68_spill] sm:$0xff] }
 0x9b5   :  { %v6111_v2 = vpop.permute.xlu1 %6110 }
 0x9b6   :  { %v6474_v32 = vadd.f32 %v6111_v2, %v5574_v42  ;;  %v6475_v25 = vadd.f32 %v6111_v2, %v5575_v6  ;;  %6305 = vperm.xlu1 %7131, %v5945_v12   ;;  %v3881_v53 = vsub.f32 %v11684_v43, %v11679_v50  ;;  %v4492_v42 = vsub.f32 1.5, %v4491_v1  ;;  %v11706_v12 = vpop.f32.mrf.mxu3 }
 0x9b7   :  { %v5848_v6 = vmul.f32 %v5038_v3, %v11612_v36  ;;  %v11727_v36 = vmul.f32 0.0051020407, %v11368_v7 }
 0x9b8   :  { %6654 = vst [vmem:[%s12933_s9 + $0x1c0] sm:$0xff] %v6474_v32  ;;  %v4493_v29 = vmul.f32 %v7282_v63, %v4492_v42  ;;  %v13401_v42 = vld [vmem:[#allocation103_spill] sm:$0xff] }
 0x9b9   :  { %6655 = vst.msk [vmem:[%s12933_s9 + $0x1c8] sm:$0xff] %vm1185_vm8, %v6475_v25 }
 0x9ba   :  { %6090 = vperm.xlu0 %7130, %v5902_v5   ;;  %v4497_v30 = vsel %vm4496_vm4, %v7282_v63, %v4493_v29  ;;  %v11716_v63 = vpop.f32.mrf.mxu2  ;;  %v5938_v5 = vsub.f32 %v5758_v33, %v5848_v6 }
 0x9bb   :  { %v11711_v57 = vmul.f32 %v4938_v14, %v4497_v30 }
 0x9bd   :  { %v5391_v2 = vpop.permute.xlu1 %5390 }
 0x9be   :  { %v5646_v8 = vmul.f32 %v5391_v2, %v13398_v13  ;;  %v5647_v61 = vmul.f32 %v5391_v2, %v13399_v15  ;;  %v11729_v58 = vpop.f32.mrf.mxu3  ;;  %v3662_v15 = vmul.f32 0.0051020407, %v11383_v21 }
 0x9bf   :  { %13400 = vst [vmem:[#allocation96_spill] sm:$0xff] %v11729_v58 }
 0x9c2   :  { %5370 = vperm.xlu0 %7130, %v5038_v3   ;;  %v11733_v3 = vpop.xlane.xlu2 %2768  ;;  %v11735_v13 = vpop.f32.mrf.mxu2 }
 0x9c3   :  { %13403 = vst [vmem:[#allocation108_spill] sm:$0xff] %v11733_v3 }
 0x9c4   :  { %13404 = vst [vmem:[#allocation46_spill] sm:$0xff] %v11735_v13  ;;  %v13412_v13 = vld [vmem:[#allocation41_spill] sm:$0xff] }
 0x9c5   :  { %v6291_v28 = vpop.permute.xlu1 %6290 }
 0x9c6   :  { %v6546_v1 = vadd.f32 %v6291_v28, %v5646_v8  ;;  %v6547_v32 = vadd.f32 %v6291_v28, %v5647_v61  ;;  %v5176_v25 = vpop.permute.xlu0 %5175  ;;  %v3752_v8 = vmul.f32 %v11727_v36, %v11727_v36  ;;  %v11747_v6 = vpop.f32.mrf.mxu3 }
 0x9c7   :  { %5320 = vperm.xlu2 %7132, %v11711_v57   ;;  %v5560_v2 = vmul.f32 %v5176_v25, %v13401_v42  ;;  %v5561_v52 = vmul.f32 %v5176_v25, %v13402_v55  ;;  %13405 = vst [vmem:[#allocation44_spill] sm:$0xff] %v11747_v6  ;;  %v11761_v42 = vmul.f32 0.0051020407, %v11498_v56 }
 0x9c8   :  { %6726 = vst [vmem:[%s12933_s9 + $0x400] sm:$0xff] %v6546_v1  ;;  %v3842_v7 = vsub.f32 %v3662_v15, %v3752_v8  ;;  %v2986_v1 = vsel %vm1185_vm8, %v11747_v6, 0.0 }
 0x9c9   :  { %6727 = vst.msk [vmem:[%s12933_s9 + $0x408] sm:$0xff] %vm1185_vm8, %v6547_v32  ;;  %v13407_v32 = vld [vmem:[#allocation82_spill] sm:$0xff] }
 0x9ca   :  { %6270 = vperm.xlu0 %7130, %v5938_v5   ;;  %v11749_v28 = vadd.f32 1e-05, %v3842_v7  ;;  %v5141_v33 = vpop.permute.xlu2 %5140  ;;  %v11753_v21 = vpop.f32.mrf.mxu2  ;;  %v11756_v25 = vmul.f32 0.0051020407, %v13407_v32 }
 0x9cb   :  { %13406 = vst [vmem:[#allocation29_spill] sm:$0xff] %v11753_v21  ;;  %v2987_v5 = vadd.f32 %v2986_v1, %v11753_v21  ;;  %v3262_v32 = vmul.f32 %v11753_v21, %v11753_v21  ;;  %v13410_v1 = vld [vmem:[#allocation71_spill] sm:$0xff]  ;;  %v5546_v58 = vmul.f32 %v5141_v33, %v13412_v13  ;;  %v2954_v13 = vsel %vm1185_vm8, %v11327_v27, 0.0 }
 0x9cc   :  { %7283 = vrsqrt.f32 %v11749_v28  ;;  %v3745_v7 = vmul.f32 %v11756_v25, %v11756_v25  ;;  %v3655_v56 = vmul.f32 0.0051020407, %v13410_v1  ;;  %vm4334_vm5 = vweird.f32 %v11749_v28 }
 0x9ce   :  { %v6076_v29 = vpop.permute.xlu0 %6075 }
 0x9cf   :  { %v6460_v30 = vadd.f32 %v6076_v29, %v5560_v2  ;;  %v6461_v14 = vadd.f32 %v6076_v29, %v5561_v52  ;;  %v13408_v2 = vld [vmem:[#allocation106_spill] sm:$0xff]  ;;  %v13409_v52 = vld [vmem:[#allocation105_spill] sm:$0xff] }
 0x9d1   :  { %6640 = vst [vmem:[%s12933_s9 + $0x150] sm:$0xff] %v6460_v30  ;;  %v3263_v30 = vmul.f32 %v11747_v6, %v11747_v6 }
 0x9d2   :  { %6641 = vst.msk [vmem:[%s12933_s9 + $0x158] sm:$0xff] %vm1185_vm8, %v6461_v14 }
 0x9d6   :  { %v5356_v61 = vpop.permute.xlu0 %5355 }
 0x9d7   :  { %v5632_v55 = vmul.f32 %v5356_v61, %v13408_v2  ;;  %v5633_v29 = vmul.f32 %v5356_v61, %v13409_v52  ;;  %v3788_v2 = vmul.f32 %v11761_v42, %v11761_v42  ;;  %v3698_v61 = vmul.f32 0.0051020407, %v11511_v59 }
 0x9d8   :  { %v3616_v52 = vsel %vm1185_vm8, %v3263_v30, 0.0  ;;  %v3225_v30 = vmul.f32 %v13394_v46, %v13394_v46 }
 0x9d9   :  { %v3878_v1 = vsub.f32 %v3698_v61, %v3788_v2 }
 0x9da   :  { %v3540_v2 = vsel %vm1185_vm8, %v3225_v30, 0.0 }
 0x9de   :  { %v6256_v14 = vpop.permute.xlu0 %6255 }
 0x9df   :  { %v6532_v8 = vadd.f32 %v6256_v14, %v5632_v55  ;;  %v6533_v15 = vadd.f32 %v6256_v14, %v5633_v29  ;;  %v11781_v29 = vpop.eup %7283  ;;  %v3835_v14 = vsub.f32 %v3655_v56, %v3745_v7  ;;  %v3224_v7 = vmul.f32 %v13395_v23, %v13395_v23 }
 0x9e0   :  { %2988 = vadd.xlane.f32.xlu1 %v2987_v5  ;;  %v3617_v5 = vadd.f32 %v3616_v52, %v3262_v32  ;;  %v4329_v59 = vmul.f32 %v11781_v29, %v11749_v28  ;;  %v11802_v32 = vadd.f32 1e-05, %v3878_v1  ;;  %v2955_v52 = vadd.f32 %v2954_v13, %v11340_v45 }
 0x9e1   :  { %6712 = vst [vmem:[%s12933_s9 + $0x390] sm:$0xff] %v6532_v8  ;;  %v11778_v55 = vpop.xlane.xlu2 %3398  ;;  %v11792_v8 = vadd.f32 1e-05, %v3881_v53  ;;  %v3541_v61 = vadd.f32 %v3540_v2, %v3224_v7  ;;  %v3246_v2 = vmul.f32 %v11340_v45, %v11340_v45  ;;  %vm4335_vm6 = vweird.f32 %v11781_v29 }
 0x9e2   :  { %13411 = vst [vmem:[#allocation27_spill] sm:$0xff] %v11778_v55  ;;  %v13413_v55 = vld [vmem:[#allocation40_spill] sm:$0xff]  ;;  %v4330_v50 = vmul.f32 %v11781_v29, %v4329_v59  ;;  %v13415_v59 = vld [vmem:[#allocation129_spill] sm:$0xff]  ;;  %vm4336_vm7 = vmor %vm4334_vm5, %vm4335_vm6  ;;  %vm4694_vm11 = vweird.f32 %v11802_v32 }
 0x9e3   :  { %6713 = vst.msk [vmem:[%s12933_s9 + $0x398] sm:$0xff] %vm1185_vm8, %v6533_v15  ;;  %v5547_v3 = vmul.f32 %v5141_v33, %v13413_v55  ;;  %v11798_v15 = vadd.f32 1e-05, %v3835_v14  ;;  %7285 = vrsqrt.f32 %v11792_v8  ;;  %v3247_v14 = vmul.f32 %v11327_v27, %v11327_v27 }
 0x9e4   :  { %7287 = vrsqrt.f32 %v11802_v32  ;;  %v4331_v33 = vmul.f32 0.5, %v4330_v50  ;;  %v3691_v30 = vmul.f32 0.0051020407, %v13415_v59  ;;  %vm4724_vm0 = vweird.f32 %v11792_v8 }
 0x9e5   :  { %7289 = vrsqrt.f32 %v11798_v15  ;;  %v3584_v13 = vsel %vm1185_vm8, %v3247_v14, 0.0  ;;  %vm4264_vm14 = vweird.f32 %v11798_v15 }
 0x9e6   :  { %v3585_v46 = vadd.f32 %v3584_v13, %v3246_v2 }
 0x9e8   :  { %3618 = vadd.xlane.f32.xlu1 %v3617_v5 }
 0x9e9   :  { %v6041_v56 = vpop.permute.xlu2 %6040  ;;  %v11821_v55 = vpop.eup %7285 }
 0x9ea   :  { %v6446_v43 = vadd.f32 %v6041_v56, %v5546_v58  ;;  %v6447_v53 = vadd.f32 %v6041_v56, %v5547_v3  ;;  %v13414_v58 = vld [vmem:[#allocation128_spill] sm:$0xff]  ;;  %v4332_v56 = vsub.f32 1.5, %v4331_v33  ;;  %v4719_v7 = vmul.f32 %v11821_v55, %v11792_v8 }
 0x9eb   :  { %v11819_v3 = vmul.f32 0.0051020407, %v13414_v58  ;;  %vm4725_vm10 = vweird.f32 %v11821_v55 }
 0x9ec   :  { %6626 = vst [vmem:[%s12933_s9 + $0xe0] sm:$0xff] %v6446_v43  ;;  %v11829_v43 = vpop.eup %7287  ;;  %v4720_v59 = vmul.f32 %v11821_v55, %v4719_v7  ;;  %vm11881_vm13 = vmor %vm4724_vm0, %vm4725_vm10 }
 0x9ed   :  { %6627 = vst.msk [vmem:[%s12933_s9 + $0xe8] sm:$0xff] %vm1185_vm8, %v6447_v53  ;;  %v3781_v1 = vmul.f32 %v11819_v3, %v11819_v3  ;;  %v11835_v53 = vpop.eup %7289  ;;  %v4689_v33 = vmul.f32 %v11829_v43, %v11802_v32  ;;  %vm4695_vm12 = vweird.f32 %v11829_v43 }
 0x9ee   :  { %v4721_v6 = vmul.f32 0.5, %v4720_v59  ;;  %vm4265_vm15 = vweird.f32 %v11835_v53  ;;  %vm11890_vm1 = vmor %vm4694_vm11, %vm4695_vm12 }
 0x9ef   :  { %v3871_v58 = vsub.f32 %v3691_v30, %v3781_v1  ;;  %v4690_v1 = vmul.f32 %v11829_v43, %v4689_v33  ;;  %vm4266_vm2 = vmor %vm4264_vm14, %vm4265_vm15 }
 0x9f0   :  { %3542 = vadd.xlane.f32.xlu2 %v3541_v61  ;;  %v2977_v5 = vpop.xlane.xlu1 %2976  ;;  %v4333_v61 = vmul.f32 %v11781_v29, %v4332_v56  ;;  %v4922_v56 = vld [vmem:[%s12931_s7 + $0x110] sm:$0xff] }
 0x9f1   :  { %v11833_v50 = vmul.f32 0.0051020407, %v2977_v5  ;;  %v4259_v5 = vmul.f32 %v11835_v53, %v11798_v15  ;;  %v11854_v14 = vadd.f32 1e-05, %v3871_v58  ;;  %v4691_v13 = vmul.f32 0.5, %v4690_v1  ;;  %v4961_v15 = vld [vmem:[%s12931_s7 + $0x248] sm:$0xff] }
 0x9f2   :  { %v4337_v30 = vsel %vm4336_vm7, %v11781_v29, %v4333_v61  ;;  %v5838_v61 = vmul.f32 %v11711_v57, %v11635_v31 }
 0x9f3   :  { %v11850_v28 = vmul.f32 %v11833_v50, %v11833_v50  ;;  %v4260_v7 = vmul.f32 %v11835_v53, %v4259_v5  ;;  %v5012_v2 = vmul.f32 %v4922_v56, %v4337_v30  ;;  %7291 = vrsqrt.f32 %v11854_v14  ;;  %v5725_v56 = vld [vmem:[%s12932_s8 + $0xd8] sm:$0xff] }
 0x9f4   :  { %2956 = vadd.xlane.f32.xlu0 %v2955_v52  ;;  %v4692_v33 = vsub.f32 1.5, %v4691_v13  ;;  %vm4624_vm3 = vweird.f32 %v11854_v14 }
 0x9f5   :  { %v4261_v58 = vmul.f32 0.5, %v4260_v7  ;;  %v5822_v29 = vmul.f32 %v5012_v2, %v11727_v36 }
 0x9f6   :  { %v4693_v57 = vmul.f32 %v11829_v43, %v4692_v33  ;;  %v4915_v33 = vld [vmem:[%s12931_s7 + $0xd8] sm:$0xff] }
 0x9f7   :  { %v4262_v5 = vsub.f32 1.5, %v4261_v58  ;;  %v4958_v58 = vld [vmem:[%s12931_s7 + $0x230] sm:$0xff] }
 0x9f8   :  { %v3607_v52 = vpop.xlane.xlu1 %3606  ;;  %v4697_v13 = vsel %vm11890_vm1, %v11829_v43, %v4693_v57 }
 0x9f9   :  { %v11852_v23 = vmul.f32 0.0051020407, %v3607_v52  ;;  %v4722_v52 = vsub.f32 1.5, %v4721_v6  ;;  %v5748_v6 = vld [vmem:[%s12932_s8 + $0x190] sm:$0xff]  ;;  %v11877_v8 = vpop.eup %7291  ;;  %v4263_v32 = vmul.f32 %v11835_v53, %v4262_v5  ;;  %v5048_v5 = vmul.f32 %v4958_v58, %v4697_v13 }
 0x9fa   :  { %v5928_v1 = vsub.f32 %v5748_v6, %v5838_v61  ;;  %v4619_v30 = vmul.f32 %v11877_v8, %v11854_v14  ;;  %vm4625_vm4 = vweird.f32 %v11877_v8 }
 0x9fb   :  { %v3892_v21 = vsub.f32 %v11852_v23, %v11850_v28  ;;  %v4723_v59 = vmul.f32 %v11821_v55, %v4722_v52  ;;  %vm4626_vm5 = vmor %vm4624_vm3, %vm4625_vm4 }
 0x9fc   :  { %3586 = vadd.xlane.f32.xlu0 %v3585_v46  ;;  %v5732_v46 = vld [vmem:[%s12932_s8 + $0x110] sm:$0xff] }
 0x9fd   :  { %v5912_v31 = vsub.f32 %v5732_v46, %v5822_v29  ;;  %v4727_v7 = vsel %vm11881_vm13, %v11821_v55, %v4723_v59  ;;  %v4620_v29 = vmul.f32 %v11877_v8, %v4619_v30  ;;  %v4267_v55 = vsel %vm4266_vm2, %v11835_v53, %v4263_v32 }
 0x9fe   :  { %v5051_v52 = vmul.f32 %v4961_v15, %v4727_v7  ;;  %v5005_v43 = vmul.f32 %v4915_v33, %v4267_v55  ;;  %v5858_v53 = vmul.f32 %v5048_v5, %v11761_v42 }
 0x9ff   :  { %v4621_v59 = vmul.f32 0.5, %v4620_v29  ;;  %v13420_v29 = vld [vmem:[#allocation97_spill] sm:$0xff] }
 0xa00   :  { %v11915_v46 = vmul.f32 %v5051_v52, %v11672_v62  ;;  %v5768_v62 = vld [vmem:[%s12932_s8 + $0x230] sm:$0xff]  ;;  %v11933_v55 = vmul.f32 0.0051020407, %v13420_v29 }
 0xa01   :  { %5240 = vperm.xlu1 %7131, %v5012_v2   ;;  %v4622_v30 = vsub.f32 1.5, %v4621_v59  ;;  %v5948_v7 = vsub.f32 %v5768_v62, %v5858_v53  ;;  %v5771_v62 = vld [vmem:[%s12932_s8 + $0x248] sm:$0xff] }
 0xa02   :  { %v3735_v59 = vmul.f32 %v11933_v55, %v11933_v55 }
 0xa03   :  { %v4623_v13 = vmul.f32 %v11877_v8, %v4622_v30 }
 0xa08   :  { %6220 = vperm.xlu2 %7132, %v5928_v1   ;;  %v5815_v1 = vmul.f32 %v5005_v43, %v11756_v25 }
 0xa09   :  { %6140 = vperm.xlu1 %7131, %v5912_v31   ;;  %v2945_v2 = vpop.xlane.xlu0 %2944 }
 0xa0a   :  { %v11912_v61 = vmul.f32 0.0051020407, %v2945_v2  ;;  %v5905_v42 = vsub.f32 %v5725_v56, %v5815_v1 }
 0xa0c   :  { %v3794_v6 = vmul.f32 %v11912_v61, %v11912_v61 }
 0xa10   :  { %v5226_v36 = vpop.permute.xlu1 %5225  ;;  %5205 = vperm.xlu0 %7130, %v5005_v43  }
 0xa11   :  { %5420 = vperm.xlu1 %7131, %v5048_v5   ;;  %v3575_v31 = vpop.xlane.xlu0 %3574  ;;  %v5580_v2 = vmul.f32 %v5226_v36, %v10569_v24  ;;  %v5581_v25 = vmul.f32 %v5226_v36, %v10559_v47  ;;  %v13421_v5 = vld [vmem:[#allocation100_spill] sm:$0xff]  ;;  %v4627_v47 = vsel %vm4626_vm5, %v11877_v8, %v4623_v13  ;;  %v4951_v24 = vld [vmem:[%s12931_s7 + $0x1f8] sm:$0xff] }
 0xa12   :  { %v3704_v57 = vmul.f32 0.0051020407, %v3575_v31  ;;  %v3645_v43 = vmul.f32 0.0051020407, %v13421_v5  ;;  %v5041_v36 = vmul.f32 %v4951_v24, %v4627_v47  ;;  %v4964_v5 = vld [vmem:[%s12931_s7 + $0x260] sm:$0xff]  ;;  %v13425_v24 = vld [vmem:[#allocation112_spill] sm:$0xff] }
 0xa14   :  { %v3884_v32 = vsub.f32 %v3704_v57, %v3794_v6  ;;  %v3825_v31 = vsub.f32 %v3645_v43, %v3735_v59  ;;  %v5851_v8 = vmul.f32 %v5041_v36, %v11819_v3  ;;  %v13424_v43 = vld [vmem:[#allocation113_spill] sm:$0xff]  ;;  %v13427_v3 = vld [vmem:[#allocation116_spill] sm:$0xff] }
 0xa16   :  { %v3974_v15 = vadd.f32 1e-05, %v3884_v32  ;;  %v3915_v30 = vadd.f32 1e-05, %v3825_v31  ;;  %v5761_v32 = vld [vmem:[%s12932_s8 + $0x1f8] sm:$0xff] }
 0xa18   :  { %7293 = vrsqrt.f32 %v3974_v15  ;;  %v6126_v58 = vpop.permute.xlu1 %6125  ;;  %6105 = vperm.xlu0 %7130, %v5905_v42   ;;  %vm4754_vm6 = vweird.f32 %v3974_v15  ;;  %vm4164_vm11 = vweird.f32 %v3915_v30 }
 0xa19   :  { %v6480_v33 = vadd.f32 %v6126_v58, %v5580_v2  ;;  %v6481_v14 = vadd.f32 %v6126_v58, %v5581_v25  ;;  %6320 = vperm.xlu1 %7131, %v5948_v7   ;;  %v5951_v2 = vsub.f32 %v5771_v62, %v11915_v46  ;;  %v5941_v25 = vsub.f32 %v5761_v32, %v5851_v8 }
 0xa1a   :  { %7295 = vrsqrt.f32 %v3915_v30 }
 0xa1b   :  { %6660 = vst [vmem:[%s12933_s9 + $0x1f0] sm:$0xff] %v6480_v33 }
 0xa1c   :  { %6661 = vst.msk [vmem:[%s12933_s9 + $0x1f8] sm:$0xff] %vm1185_vm8, %v6481_v14  ;;  %v11963_v14 = vpop.f32.mrf.mxu1 }
 0xa1e   :  { %v7294_v6 = vpop.eup %7293 }
 0xa1f   :  { %v4749_v53 = vmul.f32 %v7294_v6, %v3974_v15  ;;  %vm4755_vm7 = vweird.f32 %v7294_v6 }
 0xa20   :  { %v5406_v57 = vpop.permute.xlu1 %5405  ;;  %5385 = vperm.xlu0 %7130, %v5041_v36   ;;  %vm11957_vm0 = vmor %vm4754_vm6, %vm4755_vm7  ;;  %v7296_v36 = vpop.eup %7295 }
 0xa21   :  { %v4750_v1 = vmul.f32 %v7294_v6, %v4749_v53  ;;  %5435 = vperm.xlu1 %7131, %v5051_v52   ;;  %v5652_v13 = vmul.f32 %v5406_v57, %v10582_v16  ;;  %v5653_v58 = vmul.f32 %v5406_v57, %v10575_v40  ;;  %v2778_v40 = vsel %vm1185_vm8, %v11963_v14, 0.0 }
 0xa22   :  { %v4159_v8 = vmul.f32 %v7296_v36, %v3915_v30  ;;  %vm4165_vm10 = vweird.f32 %v7296_v36 }
 0xa23   :  { %v4751_v56 = vmul.f32 0.5, %v4750_v1  ;;  %vm4166_vm12 = vmor %vm4164_vm11, %vm4165_vm10 }
 0xa24   :  { %v5191_v7 = vpop.permute.xlu0 %5190  ;;  %v4160_v32 = vmul.f32 %v7296_v36, %v4159_v8 }
 0xa25   :  { %v4752_v42 = vsub.f32 1.5, %v4751_v56  ;;  %v5566_v47 = vmul.f32 %v5191_v7, %v13424_v43  ;;  %v5567_v16 = vmul.f32 %v5191_v7, %v13425_v24  ;;  %v5774_v56 = vld [vmem:[%s12932_s8 + $0x260] sm:$0xff] }
 0xa26   :  { %v13429_v43 = vld [vmem:[#allocation78_spill] sm:$0xff] }
 0xa27   :  { %v4753_v52 = vmul.f32 %v7294_v6, %v4752_v42 }
 0xa28   :  { %v6306_v29 = vpop.permute.xlu1 %6305  ;;  %6285 = vperm.xlu0 %7130, %v5941_v25   ;;  %v13426_v25 = vld [vmem:[#allocation117_spill] sm:$0xff] }
 0xa29   :  { %v6552_v33 = vadd.f32 %v6306_v29, %v5652_v13  ;;  %v6553_v15 = vadd.f32 %v6306_v29, %v5653_v58  ;;  %6335 = vperm.xlu1 %7131, %v5951_v2   ;;  %v4757_v46 = vsel %vm11957_vm0, %v7294_v6, %v4753_v52  ;;  %v11981_v6 = vpop.f32.mrf.mxu0  ;;  %v4161_v2 = vmul.f32 0.5, %v4160_v32  ;;  %v13428_v29 = vld [vmem:[#allocation131_spill] sm:$0xff] }
 0xa2a   :  { %v5054_v57 = vmul.f32 %v4964_v5, %v4757_v46  ;;  %v2779_v1 = vadd.f32 %v2778_v40, %v11981_v6 }
 0xa2b   :  { %6732 = vst [vmem:[%s12933_s9 + $0x430] sm:$0xff] %v6552_v33  ;;  %v4162_v58 = vsub.f32 1.5, %v4161_v2  ;;  %v11998_v33 = vmul.f32 0.0051020407, %v13428_v29  ;;  %v3252_v2 = vmul.f32 %v11522_v17, %v11522_v17 }
 0xa2c   :  { %6733 = vst.msk [vmem:[%s12933_s9 + $0x438] sm:$0xff] %vm1185_vm8, %v6553_v15  ;;  %v6091_v59 = vpop.permute.xlu0 %6090  ;;  %v5864_v62 = vmul.f32 %v5054_v57, %v11912_v61 }
 0xa2d   :  { %v6466_v31 = vadd.f32 %v6091_v59, %v5566_v47  ;;  %v6467_v53 = vadd.f32 %v6091_v59, %v5567_v16  ;;  %v3748_v5 = vmul.f32 %v11998_v33, %v11998_v33  ;;  %v3658_v47 = vmul.f32 0.0051020407, %v13429_v43  ;;  %v4905_v59 = vld [vmem:[%s12931_s7 + $0x88] sm:$0xff] }
 0xa2e   :  { %v5954_v42 = vsub.f32 %v5774_v56, %v5864_v62  ;;  %v4163_v24 = vmul.f32 %v7296_v36, %v4162_v58  ;;  %v13431_v56 = vld [vmem:[#allocation81_spill] sm:$0xff] }
 0xa2f   :  { %6646 = vst [vmem:[%s12933_s9 + $0x180] sm:$0xff] %v6466_v31  ;;  %v3838_v16 = vsub.f32 %v3658_v47, %v3748_v5  ;;  %v3694_v32 = vmul.f32 0.0051020407, %v13431_v56 }
 0xa30   :  { %6647 = vst.msk [vmem:[%s12933_s9 + $0x188] sm:$0xff] %vm1185_vm8, %v6467_v53  ;;  %v4167_v40 = vsel %vm4166_vm12, %v7296_v36, %v4163_v24  ;;  %v3253_v36 = vmul.f32 %v11518_v44, %v11518_v44 }
 0xa31   :  { %2780 = vadd.xlane.f32.xlu2 %v2779_v1  ;;  %5450 = vperm.xlu1 %7131, %v5054_v57   ;;  %v12013_v31 = vmul.f32 %v4905_v59, %v4167_v40  ;;  %v3928_v53 = vadd.f32 1e-05, %v3838_v16  ;;  %v2966_v57 = vsel %vm1185_vm8, %v11518_v44, 0.0  ;;  %v13430_v1 = vld [vmem:[#allocation74_spill] sm:$0xff] }
 0xa32   :  { %v12019_v8 = vmul.f32 0.0051020407, %v13430_v1  ;;  %v2967_v30 = vadd.f32 %v2966_v57, %v11522_v17 }
 0xa33   :  { %7297 = vrsqrt.f32 %v3928_v53  ;;  %vm4294_vm13 = vweird.f32 %v3928_v53 }
 0xa34   :  { %v5371_v7 = vpop.permute.xlu0 %5370  ;;  %v3784_v62 = vmul.f32 %v12019_v8, %v12019_v8 }
 0xa35   :  { %v5638_v52 = vmul.f32 %v5371_v7, %v13426_v25  ;;  %v5639_v13 = vmul.f32 %v5371_v7, %v13427_v3  ;;  %v12027_v7 = vpop.xlane.xlu2 %2912  ;;  %v3596_v25 = vsel %vm1185_vm8, %v3253_v36, 0.0 }
 0xa39   :  { %6350 = vperm.xlu1 %7131, %v5954_v42   ;;  %v7298_v42 = vpop.eup %7297 }
 0xa3a   :  { %v4289_v3 = vmul.f32 %v7298_v42, %v3928_v53  ;;  %vm4295_vm14 = vweird.f32 %v7298_v42  ;;  %v3159_v53 = vmul.f32 %v11963_v14, %v11963_v14 }
 0xa3b   :  { %vm12044_vm15 = vmor %vm4294_vm13, %vm4295_vm14 }
 0xa3c   :  { %v6271_v15 = vpop.permute.xlu0 %6270 }
 0xa3d   :  { %v6538_v46 = vadd.f32 %v6271_v15, %v5638_v52  ;;  %v6539_v61 = vadd.f32 %v6271_v15, %v5639_v13  ;;  %v3874_v52 = vsub.f32 %v3694_v32, %v3784_v62  ;;  %v3597_v13 = vadd.f32 %v3596_v25, %v3252_v2  ;;  %v7112_v62 = vld [vmem:[%s12930_s6 + $0x160] sm:$0xff]  ;;  %v4918_v25 = vld [vmem:[%s12931_s7 + $0xf0] sm:$0xff] }
 0xa3e   :  { %v4290_v15 = vmul.f32 %v7298_v42, %v4289_v3  ;;  %7067 = vmatmul.msk.bf16.gmra.mxu3 %vm2027_vm9, %v7112_v62  ;;  %7022 = vmatmul.msk.bf16.gmra.mxu2 %vm2027_vm9, %v7112_v62 }
 0xa3f   :  { %6718 = vst [vmem:[%s12933_s9 + $0x3c0] sm:$0xff] %v6538_v46  ;;  %v3964_v29 = vadd.f32 1e-05, %v3874_v52  ;;  %v13434_v52 = vld [vmem:[#allocation47_spill] sm:$0xff] }
 0xa40   :  { %6719 = vst.msk [vmem:[%s12933_s9 + $0x3c8] sm:$0xff] %vm1185_vm8, %v6539_v61  ;;  %v5321_v61 = vpop.permute.xlu2 %5320  ;;  %v4291_v5 = vmul.f32 0.5, %v4290_v15 }
 0xa41   :  { %7299 = vrsqrt.f32 %v3964_v29  ;;  %v5618_v3 = vmul.f32 %v5321_v61, %v13434_v52  ;;  %vm4654_vm9 = vweird.f32 %v3964_v29 }
 0xa42   :  { %v4292_v16 = vsub.f32 1.5, %v4291_v5 }
 0xa47   :  { %v7300_v40 = vpop.eup %7299 }
 0xa48   :  { %v4649_v1 = vmul.f32 %v7300_v40, %v3964_v29  ;;  %vm4655_vm1 = vweird.f32 %v7300_v40 }
 0xa49   :  { %5155 = vperm.xlu2 %7132, %v12013_v31   ;;  %vm4656_vm2 = vmor %vm4654_vm9, %vm4655_vm1 }
 0xa4a   :  { %v4650_v32 = vmul.f32 %v7300_v40, %v4649_v1 }
 0xa4c   :  { %v4651_v59 = vmul.f32 0.5, %v4650_v32 }
 0xa52   :  { %2968 = vadd.xlane.f32.xlu0 %v2967_v30  ;;  %v4293_v30 = vmul.f32 %v7298_v42, %v4292_v16 }
 0xa53   :  { %v2989_v58 = vpop.xlane.xlu1 %2988 }
 0xa54   :  { %v12032_v46 = vmul.f32 0.0051020407, %v2989_v58  ;;  %v4297_v2 = vsel %vm12044_vm15, %v7298_v42, %v4293_v30  ;;  %v3408_v42 = vsel %vm1185_vm8, %v3159_v53, 0.0  ;;  %v5728_v53 = vld [vmem:[%s12932_s8 + $0xf0] sm:$0xff] }
 0xa55   :  { %v5008_v62 = vmul.f32 %v4918_v25, %v4297_v2  ;;  %v4652_v2 = vsub.f32 1.5, %v4651_v59 }
 0xa56   :  { %v12036_v43 = vmul.f32 %v12032_v46, %v12032_v46 }
 0xa57   :  { %v5818_v32 = vmul.f32 %v5008_v62, %v11998_v33  ;;  %v4954_v33 = vld [vmem:[%s12931_s7 + $0x210] sm:$0xff] }
 0xa5a   :  { %3598 = vadd.xlane.f32.xlu0 %v3597_v13  ;;  %v13435_v13 = vld [vmem:[#allocation45_spill] sm:$0xff] }
 0xa5b   :  { %v3619_v47 = vpop.xlane.xlu1 %3618  ;;  %v5619_v58 = vmul.f32 %v5321_v61, %v13435_v13  ;;  %v5908_v13 = vsub.f32 %v5728_v53, %v5818_v32  ;;  %v5805_v53 = vmul.f32 %v12013_v31, %v11933_v55 }
 0xa5c   :  { %v12038_v24 = vmul.f32 0.0051020407, %v3619_v47  ;;  %v3158_v47 = vmul.f32 %v11981_v6, %v11981_v6 }
 0xa5e   :  { %v3409_v36 = vadd.f32 %v3408_v42, %v3158_v47 }
 0xa63   :  { %v12042_v57 = vpop.xlane.xlu2 %3542 }
 0xa67   :  { %v2957_v56 = vpop.xlane.xlu0 %2956 }
 0xa68   :  { %v12062_v15 = vmul.f32 0.0051020407, %v2957_v56 }
 0xa6a   :  { %v3797_v30 = vmul.f32 %v12062_v15, %v12062_v15 }
 0xa6b   :  { %v6221_v5 = vpop.permute.xlu2 %6220 }
 0xa6c   :  { %v6518_v16 = vadd.f32 %v6221_v5, %v5618_v3  ;;  %v6519_v1 = vadd.f32 %v6221_v5, %v5619_v58  ;;  %v4653_v58 = vmul.f32 %v7300_v40, %v4652_v2 }
 0xa6e   :  { %6698 = vst [vmem:[%s12933_s9 + $0x320] sm:$0xff] %v6518_v16  ;;  %5220 = vperm.xlu0 %7130, %v5008_v62   ;;  %v4657_v5 = vsel %vm4656_vm2, %v7300_v40, %v4653_v58 }
 0xa6f   :  { %6699 = vst.msk [vmem:[%s12933_s9 + $0x328] sm:$0xff] %vm1185_vm8, %v6519_v1  ;;  %v3587_v61 = vpop.xlane.xlu0 %3586  ;;  %v5044_v42 = vmul.f32 %v4954_v33, %v4657_v5  ;;  %v13436_v5 = vld [vmem:[#allocation124_spill] sm:$0xff] }
 0xa70   :  { %v3707_v56 = vmul.f32 0.0051020407, %v3587_v61  ;;  %v5764_v61 = vld [vmem:[%s12932_s8 + $0x210] sm:$0xff] }
 0xa72   :  { %v3887_v25 = vsub.f32 %v3707_v56, %v3797_v30  ;;  %3410 = vadd.xlane.f32.xlu2 %v3409_v36 }
 0xa73   :  { %v5241_v52 = vpop.permute.xlu1 %5240 }
 0xa74   :  { %v3977_v3 = vadd.f32 1e-05, %v3887_v25  ;;  %v5586_v59 = vmul.f32 %v5241_v52, %v11114_v41  ;;  %v5587_v47 = vmul.f32 %v5241_v52, %v11108_v11  ;;  %v5854_v41 = vmul.f32 %v5044_v42, %v12019_v8  ;;  %v5715_v8 = vld [vmem:[%s12932_s8 + $0x88] sm:$0xff]  ;;  %v4967_v52 = vld [vmem:[%s12931_s7 + $0x278] sm:$0xff] }
 0xa76   :  { %7301 = vrsqrt.f32 %v3977_v3  ;;  %6120 = vperm.xlu0 %7130, %v5908_v13   ;;  %vm4784_vm3 = vweird.f32 %v3977_v3  ;;  %v5944_v2 = vsub.f32 %v5764_v61, %v5854_v41  ;;  %v5895_v13 = vsub.f32 %v5715_v8, %v5805_v53  ;;  %v13440_v8 = vld [vmem:[#allocation102_spill] sm:$0xff] }
 0xa7b   :  { %v6141_v16 = vpop.permute.xlu1 %6140 }
 0xa7c   :  { %v7302_v1 = vpop.eup %7301  ;;  %v6486_v29 = vadd.f32 %v6141_v16, %v5586_v59  ;;  %v6487_v62 = vadd.f32 %v6141_v16, %v5587_v47  ;;  %v13437_v59 = vld [vmem:[#allocation63_spill] sm:$0xff] }
 0xa7d   :  { %v4779_v30 = vmul.f32 %v7302_v1, %v3977_v3  ;;  %vm4785_vm4 = vweird.f32 %v7302_v1 }
 0xa7e   :  { %6666 = vst [vmem:[%s12933_s9 + $0x220] sm:$0xff] %v6486_v29  ;;  %5400 = vperm.xlu0 %7130, %v5044_v42   ;;  %vm4786_vm5 = vmor %vm4784_vm3, %vm4785_vm4 }
 0xa7f   :  { %v4780_v40 = vmul.f32 %v7302_v1, %v4779_v30  ;;  %6667 = vst.msk [vmem:[%s12933_s9 + $0x228] sm:$0xff] %vm1185_vm8, %v6487_v62 }
 0xa81   :  { %v4781_v11 = vmul.f32 0.5, %v4780_v40 }
 0xa82   :  { %v5206_v36 = vpop.permute.xlu0 %5205 }
 0xa83   :  { %v4782_v56 = vsub.f32 1.5, %v4781_v11  ;;  %v5421_v32 = vpop.permute.xlu1 %5420  ;;  %v5572_v33 = vmul.f32 %v5206_v36, %v13436_v5  ;;  %v5573_v47 = vmul.f32 %v5206_v36, %v13437_v59  ;;  %v13438_v11 = vld [vmem:[#allocation127_spill] sm:$0xff]  ;;  %v13439_v36 = vld [vmem:[#allocation69_spill] sm:$0xff]  ;;  %v13441_v59 = vld [vmem:[#allocation104_spill] sm:$0xff] }
 0xa84   :  { %v5658_v16 = vmul.f32 %v5421_v32, %v10809_v51  ;;  %v5659_v55 = vmul.f32 %v5421_v32, %v10805_v19  ;;  %v12129_v32 = vmul.f32 0.0051020407, %v10879_v37  ;;  %v3661_v37 = vmul.f32 0.0051020407, %v10891_v26 }
 0xa85   :  { %v4783_v25 = vmul.f32 %v7302_v1, %v4782_v56 }
 0xa86   :  { %6300 = vperm.xlu0 %7130, %v5944_v2  }
 0xa87   :  { %v4787_v3 = vsel %vm4786_vm5, %v7302_v1, %v4783_v25  ;;  %v5777_v1 = vld [vmem:[%s12932_s8 + $0x278] sm:$0xff] }
 0xa88   :  { %v5057_v58 = vmul.f32 %v4967_v52, %v4787_v3  ;;  %v12134_v52 = vmul.f32 0.0051020407, %v13440_v8 }
 0xa8a   :  { %6055 = vperm.xlu2 %7132, %v5895_v13   ;;  %5465 = vperm.xlu1 %7131, %v5057_v58   ;;  %v6106_v31 = vpop.permute.xlu0 %6105  ;;  %v5867_v29 = vmul.f32 %v5057_v58, %v12062_v15 }
 0xa8b   :  { %v6472_v62 = vadd.f32 %v6106_v31, %v5572_v33  ;;  %v6473_v42 = vadd.f32 %v6106_v31, %v5573_v47  ;;  %v6321_v30 = vpop.permute.xlu1 %6320  ;;  %v3681_v47 = vmul.f32 0.0051020407, %v13441_v59 }
 0xa8c   :  { %v6558_v40 = vadd.f32 %v6321_v30, %v5658_v16  ;;  %v6559_v41 = vadd.f32 %v6321_v30, %v5659_v55  ;;  %v5957_v19 = vsub.f32 %v5777_v1, %v5867_v29 }
 0xa8d   :  { %6652 = vst [vmem:[%s12933_s9 + $0x1b0] sm:$0xff] %v6472_v62  ;;  %v2978_v62 = vsel %vm1185_vm8, %v11706_v12, 0.0 }
 0xa8e   :  { %6653 = vst.msk [vmem:[%s12933_s9 + $0x1b8] sm:$0xff] %vm1185_vm8, %v6473_v42  ;;  %v12159_v42 = vmul.f32 0.0051020407, %v10893_v4  ;;  %v13442_v4 = vld [vmem:[#allocation36_spill] sm:$0xff] }
 0xa8f   :  { %6738 = vst [vmem:[%s12933_s9 + $0x460] sm:$0xff] %v6558_v40 }
 0xa90   :  { %6739 = vst.msk [vmem:[%s12933_s9 + $0x468] sm:$0xff] %vm1185_vm8, %v6559_v41  ;;  %v2979_v41 = vadd.f32 %v2978_v62, %v11716_v63 }
 0xa92   :  { %6365 = vperm.xlu1 %7131, %v5957_v19   ;;  %v5386_v51 = vpop.permute.xlu0 %5385 }
 0xa93   :  { %v5436_v15 = vpop.permute.xlu1 %5435  ;;  %v5644_v61 = vmul.f32 %v5386_v51, %v13438_v11  ;;  %v5645_v56 = vmul.f32 %v5386_v51, %v13439_v36  ;;  %v2922_v11 = vsel %vm1185_vm8, %v10813_v0, 0.0  ;;  %v3697_v36 = vmul.f32 0.0051020407, %v13442_v4 }
 0xa94   :  { %v5664_v2 = vmul.f32 %v5436_v15, %v10960_v54  ;;  %v5665_v53 = vmul.f32 %v5436_v15, %v10951_v22  ;;  %v3751_v54 = vmul.f32 %v12129_v32, %v12129_v32  ;;  %v3771_v22 = vmul.f32 %v12134_v52, %v12134_v52 }
 0xa95   :  { %v3259_v15 = vmul.f32 %v11706_v12, %v11706_v12 }
 0xa96   :  { %v3861_v16 = vsub.f32 %v3681_v47, %v3771_v22  ;;  %v3841_v55 = vsub.f32 %v3661_v37, %v3751_v54 }
 0xa98   :  { %v3951_v31 = vadd.f32 1e-05, %v3861_v16  ;;  %v3931_v29 = vadd.f32 1e-05, %v3841_v55 }
 0xa9a   :  { %v6286_v25 = vpop.permute.xlu0 %6285  ;;  %7303 = vrsqrt.f32 %v3951_v31  ;;  %vm4324_vm6 = vweird.f32 %v3931_v29  ;;  %vm4524_vm10 = vweird.f32 %v3951_v31 }
 0xa9b   :  { %v6544_v3 = vadd.f32 %v6286_v25, %v5644_v61  ;;  %v6545_v13 = vadd.f32 %v6286_v25, %v5645_v56  ;;  %v6336_v58 = vpop.permute.xlu1 %6335  ;;  %7305 = vrsqrt.f32 %v3931_v29  ;;  %v3787_v61 = vmul.f32 %v12159_v42, %v12159_v42 }
 0xa9c   :  { %v6564_v5 = vadd.f32 %v6336_v58, %v5664_v2  ;;  %v6565_v33 = vadd.f32 %v6336_v58, %v5665_v53  ;;  %v3258_v56 = vmul.f32 %v11716_v63, %v11716_v63  ;;  %v13443_v2 = vld [vmem:[#allocation20_spill] sm:$0xff]  ;;  %v3608_v25 = vsel %vm1185_vm8, %v3259_v15, 0.0 }
 0xa9d   :  { %6724 = vst [vmem:[%s12933_s9 + $0x3f0] sm:$0xff] %v6544_v3  ;;  %v2923_v53 = vadd.f32 %v2922_v11, %v13443_v2  ;;  %v3877_v3 = vsub.f32 %v3697_v36, %v3787_v61 }
 0xa9e   :  { %6725 = vst.msk [vmem:[%s12933_s9 + $0x3f8] sm:$0xff] %vm1185_vm8, %v6545_v13  ;;  %v3609_v58 = vadd.f32 %v3608_v25, %v3258_v56 }
 0xa9f   :  { %6744 = vst [vmem:[%s12933_s9 + $0x490] sm:$0xff] %v6564_v5 }
 0xaa0   :  { %6745 = vst.msk [vmem:[%s12933_s9 + $0x498] sm:$0xff] %vm1185_vm8, %v6565_v33  ;;  %v3967_v33 = vadd.f32 1e-05, %v3877_v3 }
 0xaa2   :  { %7307 = vrsqrt.f32 %v3967_v33  ;;  %vm4684_vm13 = vweird.f32 %v3967_v33 }
 0xaa3   :  { %v5451_v26 = vpop.permute.xlu1 %5450 }
 0xaa4   :  { %v5670_v30 = vmul.f32 %v5451_v26, %v11139_v10  ;;  %v5671_v1 = vmul.f32 %v5451_v26, %v11135_v18  ;;  %v7304_v18 = vpop.eup %7303  ;;  %v12195_v3 = vpop.xlane.xlu2 %2780 }
 0xaa5   :  { %v7306_v10 = vpop.eup %7305  ;;  %v4519_v8 = vmul.f32 %v7304_v18, %v3951_v31  ;;  %vm4525_vm0 = vweird.f32 %v7304_v18 }
 0xaa6   :  { %v4319_v13 = vmul.f32 %v7306_v10, %v3931_v29  ;;  %vm4325_vm7 = vweird.f32 %v7306_v10  ;;  %vm4526_vm12 = vmor %vm4524_vm10, %vm4525_vm0  ;;  %v4921_v29 = vld [vmem:[%s12931_s7 + $0x108] sm:$0xff] }
 0xaa7   :  { %v4520_v5 = vmul.f32 %v7304_v18, %v4519_v8  ;;  %vm4326_vm11 = vmor %vm4324_vm6, %vm4325_vm7 }
 0xaa8   :  { %v4320_v59 = vmul.f32 %v7306_v10, %v4319_v13  ;;  %v7308_v16 = vpop.eup %7307 }
 0xaa9   :  { %v4521_v47 = vmul.f32 0.5, %v4520_v5  ;;  %v4679_v26 = vmul.f32 %v7308_v16, %v3967_v33  ;;  %vm4685_vm14 = vweird.f32 %v7308_v16 }
 0xaaa   :  { %v4321_v54 = vmul.f32 0.5, %v4320_v59  ;;  %vm4686_vm15 = vmor %vm4684_vm13, %vm4685_vm14 }
 0xaab   :  { %v6351_v40 = vpop.permute.xlu1 %6350  ;;  %v4522_v37 = vsub.f32 1.5, %v4521_v47 }
 0xaac   :  { %v6570_v19 = vadd.f32 %v6351_v40, %v5670_v30  ;;  %v6571_v51 = vadd.f32 %v6351_v40, %v5671_v1  ;;  %v4322_v22 = vsub.f32 1.5, %v4321_v54  ;;  %v4941_v40 = vld [vmem:[%s12931_s7 + $0x1a8] sm:$0xff]  ;;  %v5156_v54 = vpop.permute.xlu2 %5155 }
 0xaad   :  { %v4523_v55 = vmul.f32 %v7304_v18, %v4522_v37 }
 0xaae   :  { %6750 = vst [vmem:[%s12933_s9 + $0x4c0] sm:$0xff] %v6570_v19  ;;  %v4323_v62 = vmul.f32 %v7306_v10, %v4322_v22 }
 0xaaf   :  { %6751 = vst.msk [vmem:[%s12933_s9 + $0x4c8] sm:$0xff] %vm1185_vm8, %v6571_v51  ;;  %v4527_v1 = vsel %vm4526_vm12, %v7304_v18, %v4523_v55  ;;  %v5767_v55 = vld [vmem:[%s12932_s8 + $0x228] sm:$0xff] }
 0xab0   :  { %2980 = vadd.xlane.f32.xlu0 %v2979_v41  ;;  %v4680_v41 = vmul.f32 %v7308_v16, %v4679_v26  ;;  %v4327_v19 = vsel %vm4326_vm11, %v7306_v10, %v4323_v62  ;;  %v12188_v15 = vmul.f32 %v4941_v40, %v4527_v1  ;;  %v5731_v10 = vld [vmem:[%s12932_s8 + $0x108] sm:$0xff]  ;;  %v4970_v1 = vld [vmem:[%s12931_s7 + $0x290] sm:$0xff] }
 0xab1   :  { %v5011_v11 = vmul.f32 %v4921_v29, %v4327_v19  ;;  %v13444_v40 = vld [vmem:[#allocation107_spill] sm:$0xff]  ;;  %v13445_v29 = vld [vmem:[#allocation109_spill] sm:$0xff] }
 0xab2   :  { %v4681_v61 = vmul.f32 0.5, %v4680_v41  ;;  %v12208_v41 = vmul.f32 0.0051020407, %v13444_v40 }
 0xab3   :  { %2924 = vadd.xlane.f32.xlu2 %v2923_v53  ;;  %v5821_v18 = vmul.f32 %v5011_v11, %v12129_v32  ;;  %v4957_v32 = vld [vmem:[%s12931_s7 + $0x228] sm:$0xff] }
 0xab4   :  { %v4682_v56 = vsub.f32 1.5, %v4681_v61 }
 0xab5   :  { %v5911_v8 = vsub.f32 %v5731_v10, %v5821_v18 }
 0xab6   :  { %v4683_v13 = vmul.f32 %v7308_v16, %v4682_v56  ;;  %v3738_v56 = vmul.f32 %v12208_v41, %v12208_v41 }
 0xab8   :  { %3610 = vadd.xlane.f32.xlu0 %v3609_v58  ;;  %v4687_v58 = vsel %vm4686_vm15, %v7308_v16, %v4683_v13  ;;  %v5780_v13 = vld [vmem:[%s12932_s8 + $0x290] sm:$0xff] }
 0xab9   :  { %v5047_v59 = vmul.f32 %v4957_v32, %v4687_v58  ;;  %v3231_v32 = vmul.f32 %v10813_v0, %v10813_v0 }
 0xabb   :  { %v5857_v37 = vmul.f32 %v5047_v59, %v12159_v42 }
 0xabd   :  { %v5947_v62 = vsub.f32 %v5767_v55, %v5857_v37  ;;  %v3230_v55 = vmul.f32 %v13443_v2, %v13443_v2 }
 0xac5   :  { %v2969_v30 = vpop.xlane.xlu0 %2968 }
 0xac6   :  { %v3080_v51 = vmul.f32 0.0051020407, %v2969_v30 }
 0xac8   :  { %v3800_v31 = vmul.f32 %v3080_v51, %v3080_v51 }
 0xacb   :  { %5335 = vperm.xlu2 %7132, %v12188_v15  }
 0xacc   :  { %5235 = vperm.xlu0 %7130, %v5011_v11   ;;  %v3648_v11 = vmul.f32 0.0051020407, %v13445_v29 }
 0xacd   :  { %v3599_v4 = vpop.xlane.xlu0 %3598 }
 0xace   :  { %v3710_v36 = vmul.f32 0.0051020407, %v3599_v4  ;;  %v3828_v58 = vsub.f32 %v3648_v11, %v3738_v56 }
 0xad0   :  { %v3890_v53 = vsub.f32 %v3710_v36, %v3800_v31  ;;  %v13446_v31 = vld [vmem:[#allocation9_spill] sm:$0xff]  ;;  %v13447_v36 = vld [vmem:[#allocation70_spill] sm:$0xff] }
 0xad2   :  { %v3980_v25 = vadd.f32 1e-05, %v3890_v53 }
 0xad4   :  { %7309 = vrsqrt.f32 %v3980_v25  ;;  %6135 = vperm.xlu0 %7130, %v5911_v8   ;;  %vm4814_vm9 = vweird.f32 %v3980_v25 }
 0xada   :  { %v7310_v5 = vpop.eup %7309 }
 0xadb   :  { %v4809_v47 = vmul.f32 %v7310_v5, %v3980_v25  ;;  %vm4815_vm1 = vweird.f32 %v7310_v5 }
 0xadc   :  { %5415 = vperm.xlu0 %7130, %v5047_v59   ;;  %vm4816_vm2 = vmor %vm4814_vm9, %vm4815_vm1 }
 0xadd   :  { %v4810_v33 = vmul.f32 %v7310_v5, %v4809_v47  ;;  %v13449_v47 = vld [vmem:[#allocation51_spill] sm:$0xff] }
 0xadf   :  { %v4811_v22 = vmul.f32 0.5, %v4810_v33  ;;  %v5553_v33 = vmul.f32 %v5156_v54, %v13449_v47 }
 0xae0   :  { %v5221_v16 = vpop.permute.xlu0 %5220 }
 0xae1   :  { %v4812_v26 = vsub.f32 1.5, %v4811_v22  ;;  %v5578_v4 = vmul.f32 %v5221_v16, %v13446_v31  ;;  %v5579_v18 = vmul.f32 %v5221_v16, %v13447_v36  ;;  %v3918_v22 = vadd.f32 1e-05, %v3828_v58 }
 0xae3   :  { %v4813_v30 = vmul.f32 %v7310_v5, %v4812_v26  ;;  %7311 = vrsqrt.f32 %v3918_v22  ;;  %vm4194_vm4 = vweird.f32 %v3918_v22 }
 0xae4   :  { %6315 = vperm.xlu0 %7130, %v5947_v62   ;;  %v3552_v62 = vsel %vm1185_vm8, %v3231_v32, 0.0 }
 0xae5   :  { %v12210_v42 = vpop.xlane.xlu2 %3410  ;;  %v4817_v19 = vsel %vm4816_vm2, %v7310_v5, %v4813_v30  ;;  %v13448_v5 = vld [vmem:[#allocation53_spill] sm:$0xff]  ;;  %v3553_v30 = vadd.f32 %v3552_v62, %v3230_v55 }
 0xae6   :  { %v5060_v61 = vmul.f32 %v4970_v1, %v4817_v19  ;;  %v5552_v59 = vmul.f32 %v5156_v54, %v13448_v5  ;;  %v13450_v1 = vld [vmem:[#allocation67_spill] sm:$0xff]  ;;  %v13451_v19 = vld [vmem:[#allocation76_spill] sm:$0xff] }
 0xae8   :  { %5480 = vperm.xlu1 %7131, %v5060_v61   ;;  %v6121_v10 = vpop.permute.xlu0 %6120  ;;  %v5870_v53 = vmul.f32 %v5060_v61, %v3080_v51 }
 0xae9   :  { %v6478_v25 = vadd.f32 %v6121_v10, %v5578_v4  ;;  %v6479_v8 = vadd.f32 %v6121_v10, %v5579_v18  ;;  %v7312_v11 = vpop.eup %7311  ;;  %v13452_v18 = vld [vmem:[#allocation84_spill] sm:$0xff] }
 0xaea   :  { %v5960_v51 = vsub.f32 %v5780_v13, %v5870_v53  ;;  %v4189_v36 = vmul.f32 %v7312_v11, %v3918_v22  ;;  %v13453_v56 = vsub.f32 %v11071_v39, %v13452_v18  ;;  %vm4195_vm3 = vweird.f32 %v7312_v11 }
 0xaeb   :  { %6658 = vst [vmem:[%s12933_s9 + $0x1e0] sm:$0xff] %v6478_v25  ;;  %vm4196_vm5 = vmor %vm4194_vm4, %vm4195_vm3 }
 0xaec   :  { %6659 = vst.msk [vmem:[%s12933_s9 + $0x1e8] sm:$0xff] %vm1185_vm8, %v6479_v8  ;;  %v3970_v10 = vadd.f32 1e-05, %v13453_v56  ;;  %v4190_v25 = vmul.f32 %v7312_v11, %v4189_v36  ;;  %v13454_v8 = vsub.f32 %v11226_v20, %v11219_v35  ;;  %v12270_v20 = vpop.f32.mrf.mxu2 }
 0xaed   :  { %v6056_v37 = vpop.permute.xlu2 %6055 }
 0xaee   :  { %v6452_v16 = vadd.f32 %v6056_v37, %v5552_v59  ;;  %v6453_v26 = vadd.f32 %v6056_v37, %v5553_v33  ;;  %7313 = vrsqrt.f32 %v3970_v10  ;;  %v12256_v13 = vadd.f32 1e-05, %v13454_v8  ;;  %v12261_v59 = vpop.f32.mrf.mxu3 }
 0xaef   :  { %v4191_v58 = vmul.f32 0.5, %v4190_v25  ;;  %v5841_v37 = vmul.f32 %v12188_v15, %v12134_v52  ;;  %v2990_v35 = vsel %vm1185_vm8, %v12261_v59, 0.0  ;;  %v13455_v52 = vsub.f32 %v11446_v9, %v11438_v60  ;;  %v5718_v25 = vld [vmem:[%s12932_s8 + $0xa0] sm:$0xff] }
 0xaf0   :  { %6632 = vst [vmem:[%s12933_s9 + $0x110] sm:$0xff] %v6452_v16  ;;  %6380 = vperm.xlu1 %7131, %v5960_v51   ;;  %v5401_v54 = vpop.permute.xlu0 %5400  ;;  %7315 = vrsqrt.f32 %v12256_v13  ;;  %v3264_v60 = vmul.f32 %v12270_v20, %v12270_v20  ;;  %vm4714_vm6 = vweird.f32 %v3970_v10  ;;  %vm4744_vm10 = vweird.f32 %v12256_v13 }
 0xaf1   :  { %6633 = vst.msk [vmem:[%s12933_s9 + $0x118] sm:$0xff] %vm1185_vm8, %v6453_v26  ;;  %v5650_v40 = vmul.f32 %v5401_v54, %v13450_v1  ;;  %v5651_v29 = vmul.f32 %v5401_v54, %v13451_v19  ;;  %v4192_v55 = vsub.f32 1.5, %v4191_v58  ;;  %v3976_v15 = vadd.f32 1e-05, %v13455_v52  ;;  %v4908_v19 = vld [vmem:[%s12931_s7 + $0xa0] sm:$0xff] }
 0xaf2   :  { %v2991_v26 = vadd.f32 %v2990_v35, %v12270_v20  ;;  %v3265_v54 = vmul.f32 %v12261_v59, %v12261_v59  ;;  %v13457_v35 = vld [vmem:[#allocation80_spill] sm:$0xff] }
 0xaf3   :  { %7317 = vrsqrt.f32 %v3976_v15  ;;  %vm4774_vm13 = vweird.f32 %v3976_v15 }
 0xaf4   :  { %3554 = vadd.xlane.f32.xlu2 %v3553_v30  ;;  %v7314_v47 = vpop.eup %7313  ;;  %v4193_v30 = vmul.f32 %v7312_v11, %v4192_v55 }
 0xaf5   :  { %vm4715_vm7 = vweird.f32 %v7314_v47 }
 0xaf6   :  { %v7316_v16 = vpop.eup %7315  ;;  %v4197_v9 = vsel %vm4196_vm5, %v7312_v11, %v4193_v30  ;;  %vm4716_vm0 = vmor %vm4714_vm6, %vm4715_vm7 }
 0xaf7   :  { %vm4745_vm11 = vweird.f32 %v7316_v16 }
 0xaf8   :  { %v6301_v61 = vpop.permute.xlu0 %6300  ;;  %vm4746_vm12 = vmor %vm4744_vm10, %vm4745_vm11 }
 0xaf9   :  { %v6550_v31 = vadd.f32 %v6301_v61, %v5650_v40  ;;  %v6551_v4 = vadd.f32 %v6301_v61, %v5651_v29  ;;  %v4739_v40 = vmul.f32 %v7316_v16, %v12256_v13  ;;  %v3620_v29 = vsel %vm1185_vm8, %v3265_v54, 0.0  ;;  %v7318_v22 = vpop.eup %7317 }
 0xafa   :  { %v3621_v36 = vadd.f32 %v3620_v29, %v3264_v60  ;;  %vm4775_vm14 = vweird.f32 %v7318_v22 }
 0xafb   :  { %6730 = vst [vmem:[%s12933_s9 + $0x420] sm:$0xff] %v6550_v31  ;;  %v4740_v31 = vmul.f32 %v7316_v16, %v4739_v40  ;;  %vm4776_vm15 = vmor %vm4774_vm13, %vm4775_vm14 }
 0xafc   :  { %6731 = vst.msk [vmem:[%s12933_s9 + $0x428] sm:$0xff] %vm1185_vm8, %v6551_v4  ;;  %v5466_v53 = vpop.permute.xlu1 %5465  ;;  %v4998_v4 = vmul.f32 %v4908_v19, %v4197_v9  ;;  %v4966_v9 = vld [vmem:[%s12931_s7 + $0x270] sm:$0xff] }
 0xafd   :  { %v5676_v39 = vmul.f32 %v5466_v53, %v11340_v45  ;;  %v5677_v32 = vmul.f32 %v5466_v53, %v11327_v27  ;;  %v5751_v27 = vld [vmem:[%s12932_s8 + $0x1a8] sm:$0xff]  ;;  %v4709_v45 = vmul.f32 %v7314_v47, %v3970_v10  ;;  %v4741_v56 = vmul.f32 0.5, %v4740_v31 }
 0xafe   :  { %v5931_v62 = vsub.f32 %v5751_v27, %v5841_v37  ;;  %v4769_v53 = vmul.f32 %v7318_v22, %v3976_v15  ;;  %v5808_v11 = vmul.f32 %v4998_v4, %v12208_v41  ;;  %v4960_v41 = vld [vmem:[%s12931_s7 + $0x240] sm:$0xff] }
 0xaff   :  { %v4710_v1 = vmul.f32 %v7314_v47, %v4709_v45  ;;  %v4742_v58 = vsub.f32 1.5, %v4741_v56  ;;  %v5770_v15 = vld [vmem:[%s12932_s8 + $0x240] sm:$0xff] }
 0xb01   :  { %v4711_v61 = vmul.f32 0.5, %v4710_v1 }
 0xb03   :  { %v4712_v18 = vsub.f32 1.5, %v4711_v61  ;;  %v13459_v61 = vld [vmem:[#allocation118_spill] sm:$0xff] }
 0xb04   :  { %v6366_v5 = vpop.permute.xlu1 %6365  ;;  %v12319_v31 = vmul.f32 0.0051020407, %v13459_v61 }
 0xb05   :  { %v6576_v33 = vadd.f32 %v6366_v5, %v5676_v39  ;;  %v6577_v51 = vadd.f32 %v6366_v5, %v5677_v32  ;;  %v4713_v8 = vmul.f32 %v7314_v47, %v4712_v18  ;;  %v13456_v39 = vsub.f32 %v11632_v49, %v11624_v38  ;;  %v4963_v49 = vld [vmem:[%s12931_s7 + $0x258] sm:$0xff] }
 0xb06   :  { %v4770_v5 = vmul.f32 %v7318_v22, %v4769_v53  ;;  %v13460_v53 = vld [vmem:[#allocation121_spill] sm:$0xff] }
 0xb07   :  { %6756 = vst [vmem:[%s12933_s9 + $0x4f0] sm:$0xff] %v6576_v33  ;;  %v3979_v32 = vadd.f32 1e-05, %v13456_v39  ;;  %v5898_v33 = vsub.f32 %v5718_v25, %v5808_v11  ;;  %v4717_v10 = vsel %vm4716_vm0, %v7314_v47, %v4713_v8  ;;  %v3684_v11 = vmul.f32 0.0051020407, %v13460_v53 }
 0xb08   :  { %6757 = vst.msk [vmem:[%s12933_s9 + $0x4f8] sm:$0xff] %vm1185_vm8, %v6577_v51  ;;  %v4743_v51 = vmul.f32 %v7316_v16, %v4742_v58  ;;  %v4771_v37 = vmul.f32 0.5, %v4770_v5  ;;  %v5050_v55 = vmul.f32 %v4960_v41, %v4717_v10  ;;  %v3774_v8 = vmul.f32 %v12319_v31, %v12319_v31 }
 0xb09   :  { %7319 = vrsqrt.f32 %v3979_v32  ;;  %vm4804_vm9 = vweird.f32 %v3979_v32 }
 0xb0a   :  { %v5860_v27 = vmul.f32 %v5050_v55, %v13457_v35  ;;  %v4747_v38 = vsel %vm4746_vm12, %v7316_v16, %v4743_v51  ;;  %v4772_v13 = vsub.f32 1.5, %v4771_v37  ;;  %v3864_v39 = vsub.f32 %v3684_v11, %v3774_v8  ;;  %v4969_v37 = vld [vmem:[%s12931_s7 + $0x288] sm:$0xff] }
 0xb0b   :  { %v5053_v45 = vmul.f32 %v4963_v49, %v4747_v38  ;;  %v13462_v38 = vsub.f32 %v12038_v24, %v12036_v43 }
 0xb0c   :  { %6235 = vperm.xlu2 %7132, %v5931_v62   ;;  %v4773_v54 = vmul.f32 %v7318_v22, %v4772_v13  ;;  %v5950_v56 = vsub.f32 %v5770_v15, %v5860_v27 }
 0xb0d   :  { %v12353_v49 = vadd.f32 1e-05, %v13462_v38 }
 0xb0e   :  { %2992 = vadd.xlane.f32.xlu0 %v2991_v26  ;;  %v13458_v26 = vld [vmem:[#allocation54_spill] sm:$0xff]  ;;  %v4777_v60 = vsel %vm4776_vm15, %v7318_v22, %v4773_v54 }
 0xb0f   :  { %v7320_v52 = vpop.eup %7319  ;;  %v5863_v62 = vmul.f32 %v5053_v45, %v13458_v26  ;;  %v13463_v26 = vld [vmem:[#allocation42_spill] sm:$0xff]  ;;  %vm4864_vm13 = vweird.f32 %v12353_v49 }
 0xb10   :  { %v4799_v30 = vmul.f32 %v7320_v52, %v3979_v32  ;;  %vm4805_vm1 = vweird.f32 %v7320_v52 }
 0xb11   :  { %vm4806_vm2 = vmor %vm4804_vm9, %vm4805_vm1 }
 0xb12   :  { %v4800_v40 = vmul.f32 %v7320_v52, %v4799_v30  ;;  %v4973_v30 = vld [vmem:[%s12931_s7 + $0x2a8] sm:$0xff] }
 0xb14   :  { %5170 = vperm.xlu2 %7132, %v4998_v4   ;;  %v5056_v4 = vmul.f32 %v4966_v9, %v4777_v60  ;;  %v13465_v9 = vld [vmem:[#allocation31_spill] sm:$0xff] }
 0xb16   :  { %3622 = vadd.xlane.f32.xlu0 %v3621_v36  ;;  %v4801_v36 = vmul.f32 0.5, %v4800_v40  ;;  %v12323_v22 = vmul.f32 %v5056_v4, %v11427_v48  ;;  %v12332_v48 = vadd.f32 1e-05, %v3892_v21  ;;  %v13461_v21 = vld [vmem:[#allocation43_spill] sm:$0xff] }
 0xb17   :  { %v2934_v28 = vsel %vm1185_vm8, %v13461_v21, 0.0 }
 0xb18   :  { %v4802_v58 = vsub.f32 1.5, %v4801_v36  ;;  %v2935_v54 = vadd.f32 %v2934_v28, %v13463_v26  ;;  %vm4834_vm7 = vweird.f32 %v12332_v48  ;;  %v13466_v28 = vld [vmem:[#allocation132_spill] sm:$0xff] }
 0xb1a   :  { %v4803_v5 = vmul.f32 %v7320_v52, %v4802_v58  ;;  %v5776_v58 = vld [vmem:[%s12932_s8 + $0x270] sm:$0xff] }
 0xb1c   :  { %6070 = vperm.xlu2 %7132, %v5898_v33   ;;  %v12327_v33 = vadd.f32 1e-05, %v3864_v39  ;;  %v4807_v51 = vsel %vm4806_vm2, %v7320_v52, %v4803_v5 }
 0xb1d   :  { %v12341_v35 = vmul.f32 %v4969_v37, %v4807_v51 }
 0xb1e   :  { %vm4554_vm10 = vweird.f32 %v12327_v33 }
 0xb1f   :  { %v12345_v23 = vmul.f32 %v12341_v35, %v11614_v34 }
 0xb23   :  { %v2981_v47 = vpop.xlane.xlu0 %2980 }
 0xb24   :  { %v12308_v1 = vmul.f32 0.0051020407, %v2981_v47 }
 0xb26   :  { %v3803_v16 = vmul.f32 %v12308_v1, %v12308_v1 }
 0xb2a   :  { %5430 = vperm.xlu0 %7130, %v5050_v55   ;;  %v5773_v55 = vld [vmem:[%s12932_s8 + $0x258] sm:$0xff] }
 0xb2b   :  { %v3611_v19 = vpop.xlane.xlu0 %3610 }
 0xb2c   :  { %v3713_v29 = vmul.f32 0.0051020407, %v3611_v19 }
 0xb2e   :  { %v3893_v18 = vsub.f32 %v3713_v29, %v3803_v16  ;;  %v13464_v16 = vld [vmem:[#allocation30_spill] sm:$0xff] }
 0xb30   :  { %v3983_v25 = vadd.f32 1e-05, %v3893_v18 }
 0xb32   :  { %7321 = vrsqrt.f32 %v3983_v25  ;;  %6330 = vperm.xlu0 %7130, %v5950_v56   ;;  %vm4844_vm3 = vweird.f32 %v3983_v25  ;;  %v5783_v56 = vld [vmem:[%s12932_s8 + $0x2a8] sm:$0xff] }
 0xb33   :  { %7323 = vrsqrt.f32 %v12327_v33 }
 0xb34   :  { %7325 = vrsqrt.f32 %v12332_v48 }
 0xb35   :  { %7327 = vrsqrt.f32 %v12353_v49 }
 0xb38   :  { %v7322_v10 = vpop.eup %7321 }
 0xb39   :  { %v4839_v41 = vmul.f32 %v7322_v10, %v3983_v25  ;;  %vm4845_vm4 = vweird.f32 %v7322_v10  ;;  %v12355_v47 = vpop.eup %7323 }
 0xb3a   :  { %5445 = vperm.xlu0 %7130, %v5053_v45   ;;  %v5953_v45 = vsub.f32 %v5773_v55, %v5863_v62  ;;  %vm4846_vm5 = vmor %vm4844_vm3, %vm4845_vm4  ;;  %v7326_v43 = vpop.eup %7325  ;;  %v4549_v24 = vmul.f32 %v12355_v47, %v12327_v33  ;;  %vm4555_vm6 = vweird.f32 %v12355_v47 }
 0xb3b   :  { %v4840_v32 = vmul.f32 %v7322_v10, %v4839_v41  ;;  %v4829_v61 = vmul.f32 %v7326_v43, %v12332_v48  ;;  %v7328_v53 = vpop.eup %7327  ;;  %vm4835_vm0 = vweird.f32 %v7326_v43  ;;  %vm4556_vm11 = vmor %vm4554_vm10, %vm4555_vm6 }
 0xb3c   :  { %v4550_v11 = vmul.f32 %v12355_v47, %v4549_v24  ;;  %v4859_v8 = vmul.f32 %v7328_v53, %v12353_v49  ;;  %vm12392_vm12 = vmor %vm4834_vm7, %vm4835_vm0  ;;  %v4944_v24 = vld [vmem:[%s12931_s7 + $0x1c0] sm:$0xff]  ;;  %vm4865_vm14 = vweird.f32 %v7328_v53  ;;  %v5779_v49 = vld [vmem:[%s12932_s8 + $0x288] sm:$0xff] }
 0xb3d   :  { %v4841_v27 = vmul.f32 0.5, %v4840_v32  ;;  %v4830_v25 = vmul.f32 %v7326_v43, %v4829_v61  ;;  %vm4866_vm15 = vmor %vm4864_vm13, %vm4865_vm14  ;;  %v4975_v61 = vld [vmem:[%s12931_s7 + $0x2b8] sm:$0xff] }
 0xb3e   :  { %v5236_v13 = vpop.permute.xlu0 %5235  ;;  %v4551_v39 = vmul.f32 0.5, %v4550_v11  ;;  %v4860_v51 = vmul.f32 %v7328_v53, %v4859_v8 }
 0xb3f   :  { %v4842_v52 = vsub.f32 1.5, %v4841_v27  ;;  %v5584_v60 = vmul.f32 %v5236_v13, %v13464_v16  ;;  %v5585_v19 = vmul.f32 %v5236_v13, %v13465_v9  ;;  %v4831_v41 = vmul.f32 0.5, %v4830_v25  ;;  %v12387_v27 = vpop.xlane.xlu2 %2924  ;;  %v13467_v13 = vld [vmem:[#allocation130_spill] sm:$0xff] }
 0xb40   :  { %v4552_v37 = vsub.f32 1.5, %v4551_v39  ;;  %v4861_v55 = vmul.f32 0.5, %v4860_v51 }
 0xb41   :  { %v4843_v34 = vmul.f32 %v7322_v10, %v4842_v52  ;;  %v4832_v32 = vsub.f32 1.5, %v4831_v41 }
 0xb42   :  { %6345 = vperm.xlu0 %7130, %v5953_v45  }
 0xb43   :  { %v4847_v40 = vsel %vm4846_vm5, %v7322_v10, %v4843_v34  ;;  %v5956_v10 = vsub.f32 %v5776_v58, %v12323_v22  ;;  %v4833_v52 = vmul.f32 %v7326_v43, %v4832_v32 }
 0xb44   :  { %v5063_v62 = vmul.f32 %v4973_v30, %v4847_v40  ;;  %v3236_v40 = vmul.f32 %v13463_v26, %v13463_v26 }
 0xb45   :  { %2936 = vadd.xlane.f32.xlu2 %v2935_v54  ;;  %v4862_v54 = vsub.f32 1.5, %v4861_v55  ;;  %v4837_v16 = vsel %vm12392_vm12, %v7326_v43, %v4833_v52 }
 0xb46   :  { %5495 = vperm.xlu1 %7131, %v5063_v62   ;;  %v6136_v15 = vpop.permute.xlu0 %6135  ;;  %v5873_v29 = vmul.f32 %v5063_v62, %v12308_v1 }
 0xb47   :  { %v6484_v36 = vadd.f32 %v6136_v15, %v5584_v60  ;;  %v6485_v18 = vadd.f32 %v6136_v15, %v5585_v19  ;;  %v4972_v60 = vld [vmem:[%s12931_s7 + $0x2a0] sm:$0xff]  ;;  %v5336_v15 = vpop.permute.xlu2 %5335 }
 0xb48   :  { %v5963_v1 = vsub.f32 %v5783_v56, %v5873_v29  ;;  %v5062_v9 = vmul.f32 %v4972_v60, %v4837_v16 }
 0xb49   :  { %6664 = vst [vmem:[%s12933_s9 + $0x210] sm:$0xff] %v6484_v36 }
 0xb4a   :  { %6665 = vst.msk [vmem:[%s12933_s9 + $0x218] sm:$0xff] %vm1185_vm8, %v6485_v18  ;;  %5460 = vperm.xlu0 %7130, %v5056_v4   ;;  %v4553_v4 = vmul.f32 %v12355_v47, %v4552_v37  ;;  %v5872_v19 = vmul.f32 %v5062_v9, %v11833_v50  ;;  %v13473_v37 = vld [vmem:[#allocation13_spill] sm:$0xff] }
 0xb4b   :  { %v3651_v32 = vmul.f32 0.0051020407, %v13473_v37 }
 0xb4c   :  { %v4557_v48 = vsel %vm4556_vm11, %v12355_v47, %v4553_v4  ;;  %v4863_v47 = vmul.f32 %v7328_v53, %v4862_v54  ;;  %v5785_v4 = vld [vmem:[%s12932_s8 + $0x2b8] sm:$0xff] }
 0xb4d   :  { %v12409_v62 = vmul.f32 %v4944_v24, %v4557_v48 }
 0xb4e   :  { %6395 = vperm.xlu1 %7131, %v5963_v1   ;;  %v5416_v5 = vpop.permute.xlu0 %5415  ;;  %v4867_v29 = vsel %vm4866_vm15, %v7328_v53, %v4863_v47  ;;  %v13471_v53 = vld [vmem:[#allocation58_spill] sm:$0xff] }
 0xb4f   :  { %v5656_v38 = vmul.f32 %v5416_v5, %v13466_v28  ;;  %v5657_v45 = vmul.f32 %v5416_v5, %v13467_v13  ;;  %v5065_v56 = vmul.f32 %v4975_v61, %v4867_v29  ;;  %v13474_v13 = vld [vmem:[#allocation66_spill] sm:$0xff] }
 0xb51   :  { %v5875_v25 = vmul.f32 %v5065_v56, %v12032_v46  ;;  %v5625_v46 = vmul.f32 %v5336_v15, %v13471_v53 }
 0xb52   :  { %6360 = vperm.xlu0 %7130, %v5956_v10   ;;  %v13472_v10 = vld [vmem:[#allocation4_spill] sm:$0xff] }
 0xb53   :  { %v12450_v41 = vmul.f32 0.0051020407, %v13472_v10  ;;  %v5965_v54 = vsub.f32 %v5785_v4, %v5875_v25 }
 0xb55   :  { %v3741_v55 = vmul.f32 %v12450_v41, %v12450_v41 }
 0xb56   :  { %v6316_v22 = vpop.permute.xlu0 %6315 }
 0xb57   :  { %v6556_v34 = vadd.f32 %v6316_v22, %v5656_v38  ;;  %v6557_v30 = vadd.f32 %v6316_v22, %v5657_v45  ;;  %v3831_v28 = vsub.f32 %v3651_v32, %v3741_v55  ;;  %v3237_v38 = vmul.f32 %v13461_v21, %v13461_v21  ;;  %v13475_v22 = vld [vmem:[#allocation64_spill] sm:$0xff]  ;;  %v13477_v32 = vld [vmem:[#allocation86_spill] sm:$0xff] }
 0xb59   :  { %6736 = vst [vmem:[%s12933_s9 + $0x450] sm:$0xff] %v6556_v34  ;;  %v3564_v47 = vsel %vm1185_vm8, %v3237_v38, 0.0 }
 0xb5a   :  { %6737 = vst.msk [vmem:[%s12933_s9 + $0x458] sm:$0xff] %vm1185_vm8, %v6557_v30  ;;  %5475 = vperm.xlu0 %7130, %v12341_v35   ;;  %v5481_v33 = vpop.permute.xlu1 %5480  ;;  %v5959_v35 = vsub.f32 %v5779_v49, %v12345_v23  ;;  %v3921_v30 = vadd.f32 1e-05, %v3831_v28  ;;  %v3565_v16 = vadd.f32 %v3564_v47, %v3236_v40 }
 0xb5b   :  { %v5682_v43 = vmul.f32 %v5481_v33, %v11522_v17  ;;  %v5683_v36 = vmul.f32 %v5481_v33, %v11518_v44  ;;  %v5782_v44 = vld [vmem:[%s12932_s8 + $0x2a0] sm:$0xff]  ;;  %v13470_v17 = vld [vmem:[#allocation59_spill] sm:$0xff] }
 0xb5c   :  { %v5624_v23 = vmul.f32 %v5336_v15, %v13470_v17  ;;  %v5962_v8 = vsub.f32 %v5782_v44, %v5872_v19  ;;  %7329 = vrsqrt.f32 %v3921_v30  ;;  %v5754_v44 = vld [vmem:[%s12932_s8 + $0x1c0] sm:$0xff]  ;;  %vm4224_vm4 = vweird.f32 %v3921_v30 }
 0xb5d   :  { %5350 = vperm.xlu2 %7132, %v12409_v62  }
 0xb62   :  { %6375 = vperm.xlu0 %7130, %v5959_v35   ;;  %v6381_v18 = vpop.permute.xlu1 %6380  ;;  %v7330_v35 = vpop.eup %7329 }
 0xb63   :  { %v6582_v11 = vadd.f32 %v6381_v18, %v5682_v43  ;;  %v6583_v1 = vadd.f32 %v6381_v18, %v5683_v36  ;;  %v4219_v29 = vmul.f32 %v7330_v35, %v3921_v30  ;;  %vm4225_vm2 = vweird.f32 %v7330_v35 }
 0xb64   :  { %vm4226_vm5 = vmor %vm4224_vm4, %vm4225_vm2 }
 0xb65   :  { %6762 = vst [vmem:[%s12933_s9 + $0x520] sm:$0xff] %v6582_v11  ;;  %v4220_v43 = vmul.f32 %v7330_v35, %v4219_v29  ;;  %v5844_v11 = vmul.f32 %v12409_v62, %v12319_v31  ;;  %v4976_v31 = vld [vmem:[%s12931_s7 + $0x2c0] sm:$0xff] }
 0xb66   :  { %6763 = vst.msk [vmem:[%s12933_s9 + $0x528] sm:$0xff] %vm1185_vm8, %v6583_v1 }
 0xb67   :  { %v12435_v50 = vpop.xlane.xlu2 %3554  ;;  %v4221_v36 = vmul.f32 0.5, %v4220_v43  ;;  %v5934_v53 = vsub.f32 %v5754_v44, %v5844_v11  ;;  %v13481_v43 = vld [vmem:[#allocation24_spill] sm:$0xff]  ;;  %v13483_v44 = vld [vmem:[#allocation33_spill] sm:$0xff] }
 0xb69   :  { %v4222_v1 = vsub.f32 1.5, %v4221_v36  ;;  %v3687_v36 = vmul.f32 0.0051020407, %v13481_v43 }
 0xb6a   :  { %5490 = vperm.xlu0 %7130, %v5062_v9  }
 0xb6f   :  { %v6236_v58 = vpop.permute.xlu2 %6235 }
 0xb70   :  { %v6524_v39 = vadd.f32 %v6236_v58, %v5624_v23  ;;  %v6525_v5 = vadd.f32 %v6236_v58, %v5625_v46 }
 0xb72   :  { %6704 = vst [vmem:[%s12933_s9 + $0x350] sm:$0xff] %v6524_v39  ;;  %6390 = vperm.xlu0 %7130, %v5962_v8   ;;  %v4223_v8 = vmul.f32 %v7330_v35, %v4222_v1  ;;  %v13482_v1 = vld [vmem:[#allocation32_spill] sm:$0xff] }
 0xb73   :  { %6705 = vst.msk [vmem:[%s12933_s9 + $0x358] sm:$0xff] %vm1185_vm8, %v6525_v5  ;;  %v4911_v5 = vld [vmem:[%s12931_s7 + $0xb8] sm:$0xff] }
 0xb74   :  { %v4227_v39 = vsel %vm4226_vm5, %v7330_v35, %v4223_v8  ;;  %v13480_v35 = vld [vmem:[#allocation25_spill] sm:$0xff] }
 0xb75   :  { %v5001_v28 = vmul.f32 %v4911_v5, %v4227_v39  ;;  %v13485_v39 = vld [vmem:[#allocation39_spill] sm:$0xff] }
 0xb77   :  { %v5171_v51 = vpop.permute.xlu2 %5170 }
 0xb78   :  { %v5558_v45 = vmul.f32 %v5171_v51, %v13474_v13  ;;  %v5559_v52 = vmul.f32 %v5171_v51, %v13475_v22  ;;  %v13476_v51 = vld [vmem:[#allocation37_spill] sm:$0xff]  ;;  %v5786_v22 = vld [vmem:[%s12932_s8 + $0x2c0] sm:$0xff] }
 0xb7a   :  { %5505 = vperm.xlu0 %7130, %v5065_v56  }
 0xb7f   :  { %v6071_v34 = vpop.permute.xlu2 %6070 }
 0xb80   :  { %v6458_v48 = vadd.f32 %v6071_v34, %v5558_v45  ;;  %v6459_v24 = vadd.f32 %v6071_v34, %v5559_v52  ;;  %v5721_v34 = vld [vmem:[%s12932_s8 + $0xb8] sm:$0xff] }
 0xb81   :  { %v2993_v33 = vpop.xlane.xlu0 %2992 }
 0xb82   :  { %6638 = vst [vmem:[%s12933_s9 + $0x140] sm:$0xff] %v6458_v48  ;;  %6405 = vperm.xlu0 %7130, %v5965_v54   ;;  %v3086_v49 = vmul.f32 0.0051020407, %v2993_v33  ;;  %v5811_v54 = vmul.f32 %v5001_v28, %v12450_v41  ;;  %v13478_v48 = vld [vmem:[#allocation28_spill] sm:$0xff] }
 0xb83   :  { %6639 = vst.msk [vmem:[%s12933_s9 + $0x148] sm:$0xff] %vm1185_vm8, %v6459_v24  ;;  %v13479_v33 = vld [vmem:[#allocation16_spill] sm:$0xff] }
 0xb84   :  { %v3806_v60 = vmul.f32 %v3086_v49, %v3086_v49  ;;  %v5901_v40 = vsub.f32 %v5721_v34, %v5811_v54  ;;  %v13488_v54 = vld [vmem:[#allocation95_spill] sm:$0xff] }
 0xb86   :  { %3566 = vadd.xlane.f32.xlu2 %v3565_v16 }
 0xb89   :  { %v3623_v9 = vpop.xlane.xlu0 %3622 }
 0xb8a   :  { %v3716_v19 = vmul.f32 0.0051020407, %v3623_v9 }
 0xb8c   :  { %v3896_v15 = vsub.f32 %v3716_v19, %v3806_v60  ;;  %v12509_v19 = vmul.f32 0.0051020407, %v13480_v35 }
 0xb8e   :  { %v3986_v61 = vadd.f32 1e-05, %v3896_v15  ;;  %v3777_v11 = vmul.f32 %v12509_v19, %v12509_v19 }
 0xb90   :  { %7331 = vrsqrt.f32 %v3986_v61  ;;  %vm4874_vm9 = vweird.f32 %v3986_v61 }
 0xb96   :  { %v7332_v18 = vpop.eup %7331 }
 0xb97   :  { %v4869_v56 = vmul.f32 %v7332_v18, %v3986_v61  ;;  %vm4875_vm1 = vweird.f32 %v7332_v18 }
 0xb98   :  { %vm4876_vm3 = vmor %vm4874_vm9, %vm4875_vm1 }
 0xb99   :  { %v4870_v25 = vmul.f32 %v7332_v18, %v4869_v56 }
 0xb9b   :  { %v4871_v17 = vmul.f32 0.5, %v4870_v25 }
 0xb9c   :  { %v5431_v23 = vpop.permute.xlu0 %5430 }
 0xb9d   :  { %v4872_v46 = vsub.f32 1.5, %v4871_v17  ;;  %v5662_v37 = vmul.f32 %v5431_v23, %v13476_v51  ;;  %v5663_v55 = vmul.f32 %v5431_v23, %v13477_v32  ;;  %v13487_v32 = vld [vmem:[#allocation48_spill] sm:$0xff] }
 0xb9e   :  { %6250 = vperm.xlu2 %7132, %v5934_v53  }
 0xb9f   :  { %v4873_v58 = vmul.f32 %v7332_v18, %v4872_v46 }
 0xba1   :  { %v4877_v62 = vsel %vm4876_vm3, %v7332_v18, %v4873_v58  ;;  %v13484_v58 = vld [vmem:[#allocation49_spill] sm:$0xff] }
 0xba2   :  { %v5066_v10 = vmul.f32 %v4976_v31, %v4877_v62  ;;  %v2946_v31 = vsel %vm1185_vm8, %v13484_v58, 0.0 }
 0xba4   :  { %5510 = vperm.xlu1 %7131, %v5066_v10   ;;  %v6331_v4 = vpop.permute.xlu0 %6330  ;;  %v5876_v38 = vmul.f32 %v5066_v10, %v3086_v49  ;;  %v13486_v10 = vld [vmem:[#allocation21_spill] sm:$0xff] }
 0xba5   :  { %v6562_v13 = vadd.f32 %v6331_v4, %v5662_v37  ;;  %v6563_v45 = vadd.f32 %v6331_v4, %v5663_v55  ;;  %v2947_v55 = vadd.f32 %v2946_v31, %v13487_v32 }
 0xba6   :  { %5185 = vperm.xlu2 %7132, %v5001_v28   ;;  %v5966_v52 = vsub.f32 %v5786_v22, %v5876_v38 }
 0xba7   :  { %6742 = vst [vmem:[%s12933_s9 + $0x480] sm:$0xff] %v6562_v13 }
 0xba8   :  { %6743 = vst.msk [vmem:[%s12933_s9 + $0x488] sm:$0xff] %vm1185_vm8, %v6563_v45 }
 0xbac   :  { %6410 = vperm.xlu1 %7131, %v5966_v52   ;;  %v5446_v30 = vpop.permute.xlu0 %5445 }
 0xbad   :  { %v5668_v24 = vmul.f32 %v5446_v30, %v13478_v48  ;;  %v5669_v47 = vmul.f32 %v5446_v30, %v13479_v33  ;;  %v13489_v30 = vld [vmem:[#allocation88_spill] sm:$0xff] }
 0xbae   :  { %6085 = vperm.xlu2 %7132, %v5901_v40  }
 0xbb4   :  { %v6346_v49 = vpop.permute.xlu0 %6345 }
 0xbb5   :  { %v6568_v16 = vadd.f32 %v6346_v49, %v5668_v24  ;;  %v6569_v60 = vadd.f32 %v6346_v49, %v5669_v47 }
 0xbb7   :  { %6748 = vst [vmem:[%s12933_s9 + $0x4b0] sm:$0xff] %v6568_v16 }
 0xbb8   :  { %6749 = vst.msk [vmem:[%s12933_s9 + $0x4b8] sm:$0xff] %vm1185_vm8, %v6569_v60  ;;  %v5496_v41 = vpop.permute.xlu1 %5495  ;;  %v2937_v49 = vpop.xlane.xlu2 %2936  ;;  %v4947_v60 = vld [vmem:[%s12931_s7 + $0x1d8] sm:$0xff] }
 0xbb9   :  { %v5688_v15 = vmul.f32 %v5496_v41, %v11716_v63  ;;  %v5689_v29 = vmul.f32 %v5496_v41, %v11706_v12  ;;  %v3867_v63 = vsub.f32 %v3687_v36, %v3777_v11  ;;  %v3072_v11 = vmul.f32 0.0051020407, %v2937_v49 }
 0xbbb   :  { %v3957_v46 = vadd.f32 1e-05, %v3867_v63  ;;  %v13492_v63 = vld [vmem:[#allocation99_spill] sm:$0xff] }
 0xbbc   :  { %v5461_v9 = vpop.permute.xlu0 %5460 }
 0xbbd   :  { %v5674_v25 = vmul.f32 %v5461_v9, %v13482_v1  ;;  %v5675_v17 = vmul.f32 %v5461_v9, %v13483_v44  ;;  %7333 = vrsqrt.f32 %v3957_v46  ;;  %vm4584_vm7 = vweird.f32 %v3957_v46 }
 0xbc0   :  { %v6396_v61 = vpop.permute.xlu1 %6395  ;;  %v5351_v35 = vpop.permute.xlu2 %5350 }
 0xbc1   :  { %v6588_v18 = vadd.f32 %v6396_v61, %v5688_v15  ;;  %v6589_v56 = vadd.f32 %v6396_v61, %v5689_v29  ;;  %v13490_v15 = vld [vmem:[#allocation29_spill] sm:$0xff]  ;;  %v13491_v61 = vld [vmem:[#allocation44_spill] sm:$0xff] }
 0xbc3   :  { %6768 = vst [vmem:[%s12933_s9 + $0x550] sm:$0xff] %v6588_v18  ;;  %v7334_v62 = vpop.eup %7333 }
 0xbc4   :  { %6769 = vst.msk [vmem:[%s12933_s9 + $0x558] sm:$0xff] %vm1185_vm8, %v6589_v56  ;;  %v6361_v12 = vpop.permute.xlu0 %6360  ;;  %v4579_v38 = vmul.f32 %v7334_v62, %v3957_v46  ;;  %vm4585_vm6 = vweird.f32 %v7334_v62 }
 0xbc5   :  { %v6574_v23 = vadd.f32 %v6361_v12, %v5674_v25  ;;  %v6575_v53 = vadd.f32 %v6361_v12, %v5675_v17  ;;  %vm4586_vm0 = vmor %vm4584_vm7, %vm4585_vm6  ;;  %v3792_v25 = vmul.f32 %v3072_v11, %v3072_v11 }
 0xbc6   :  { %v4580_v13 = vmul.f32 %v7334_v62, %v4579_v38 }
 0xbc7   :  { %6754 = vst [vmem:[%s12933_s9 + $0x4e0] sm:$0xff] %v6574_v23  ;;  %v5630_v23 = vmul.f32 %v5351_v35, %v13492_v63 }
 0xbc8   :  { %6755 = vst.msk [vmem:[%s12933_s9 + $0x4e8] sm:$0xff] %vm1185_vm8, %v6575_v53  ;;  %v4581_v22 = vmul.f32 0.5, %v4580_v13  ;;  %v13493_v53 = vld [vmem:[#allocation98_spill] sm:$0xff] }
 0xbc9   :  { %v5631_v46 = vmul.f32 %v5351_v35, %v13493_v53 }
 0xbca   :  { %v4582_v52 = vsub.f32 1.5, %v4581_v22  ;;  %v3243_v22 = vmul.f32 %v13484_v58, %v13484_v58 }
 0xbcc   :  { %v5476_v8 = vpop.permute.xlu0 %5475  ;;  %v4583_v47 = vmul.f32 %v7334_v62, %v4582_v52 }
 0xbcd   :  { %v5680_v5 = vmul.f32 %v5476_v8, %v13485_v39  ;;  %v5681_v51 = vmul.f32 %v5476_v8, %v13486_v10  ;;  %v13494_v10 = vld [vmem:[#allocation77_spill] sm:$0xff] }
 0xbce   :  { %v4587_v16 = vsel %vm4586_vm0, %v7334_v62, %v4583_v47 }
 0xbcf   :  { %v12556_v9 = vmul.f32 %v4947_v60, %v4587_v16  ;;  %v3576_v60 = vsel %vm1185_vm8, %v3243_v22, 0.0 }
 0xbd4   :  { %v6376_v37 = vpop.permute.xlu0 %6375 }
 0xbd5   :  { %v6580_v4 = vadd.f32 %v6376_v37, %v5680_v5  ;;  %v6581_v28 = vadd.f32 %v6376_v37, %v5681_v51  ;;  %v3024_v51 = vmul.f32 0.0051020407, %v13494_v10  ;;  %v13499_v10 = vld [vmem:[#allocation26_spill] sm:$0xff] }
 0xbd7   :  { %6760 = vst [vmem:[%s12933_s9 + $0x510] sm:$0xff] %v6580_v4  ;;  %2948 = vadd.xlane.f32.xlu2 %v2947_v55  ;;  %v13495_v4 = vld [vmem:[#allocation22_spill] sm:$0xff]  ;;  %v3744_v13 = vmul.f32 %v3024_v51, %v3024_v51 }
 0xbd8   :  { %6761 = vst.msk [vmem:[%s12933_s9 + $0x518] sm:$0xff] %vm1185_vm8, %v6581_v28  ;;  %v3654_v28 = vmul.f32 0.0051020407, %v13495_v4 }
 0xbdc   :  { %v5491_v45 = vpop.permute.xlu0 %5490 }
 0xbdd   :  { %v5686_v34 = vmul.f32 %v5491_v45, %v13488_v54  ;;  %v5687_v40 = vmul.f32 %v5491_v45, %v13489_v30  ;;  %v3834_v45 = vsub.f32 %v3654_v28, %v3744_v13  ;;  %v13496_v54 = vld [vmem:[#allocation111_spill] sm:$0xff]  ;;  %v13497_v30 = vld [vmem:[#allocation110_spill] sm:$0xff] }
 0xbe4   :  { %v6391_v48 = vpop.permute.xlu0 %6390 }
 0xbe5   :  { %v6586_v24 = vadd.f32 %v6391_v48, %v5686_v34  ;;  %v6587_v33 = vadd.f32 %v6391_v48, %v5687_v40 }
 0xbe7   :  { %6766 = vst [vmem:[%s12933_s9 + $0x540] sm:$0xff] %v6586_v24  ;;  %v3924_v24 = vadd.f32 1e-05, %v3834_v45  ;;  %v13501_v45 = vld [vmem:[#allocation23_spill] sm:$0xff] }
 0xbe8   :  { %6767 = vst.msk [vmem:[%s12933_s9 + $0x548] sm:$0xff] %vm1185_vm8, %v6587_v33  ;;  %v3242_v33 = vmul.f32 %v13487_v32, %v13487_v32 }
 0xbe9   :  { %vm4254_vm14 = vweird.f32 %v3924_v24 }
 0xbea   :  { %v3577_v35 = vadd.f32 %v3576_v60, %v3242_v33  ;;  %v4950_v33 = vld [vmem:[%s12931_s7 + $0x1f0] sm:$0xff] }
 0xbec   :  { %v5506_v41 = vpop.permute.xlu0 %5505 }
 0xbed   :  { %v5692_v29 = vmul.f32 %v5506_v41, %v13490_v15  ;;  %v5693_v43 = vmul.f32 %v5506_v41, %v13491_v61 }
 0xbef   :  { %5365 = vperm.xlu2 %7132, %v12556_v9  }
 0xbf4   :  { %v6406_v36 = vpop.permute.xlu0 %6405 }
 0xbf5   :  { %v6592_v18 = vadd.f32 %v6406_v36, %v5692_v29  ;;  %v6593_v56 = vadd.f32 %v6406_v36, %v5693_v43  ;;  %v4962_v29 = vld [vmem:[%s12931_s7 + $0x250] sm:$0xff] }
 0xbf7   :  { %6772 = vst [vmem:[%s12933_s9 + $0x570] sm:$0xff] %v6592_v18 }
 0xbf8   :  { %6773 = vst.msk [vmem:[%s12933_s9 + $0x578] sm:$0xff] %vm1185_vm8, %v6593_v56 }
 0xbf9   :  { %v3567_v1 = vpop.xlane.xlu2 %3566 }
 0xbfa   :  { %v3702_v44 = vmul.f32 0.0051020407, %v3567_v1 }
 0xbfc   :  { %v3882_v17 = vsub.f32 %v3702_v44, %v3792_v25 }
 0xbfe   :  { %v3972_v12 = vadd.f32 1e-05, %v3882_v17 }
 0xc00   :  { %7335 = vrsqrt.f32 %v3972_v12  ;;  %vm4734_vm11 = vweird.f32 %v3972_v12 }
 0xc01   :  { %v6251_v8 = vpop.permute.xlu2 %6250  ;;  %7337 = vrsqrt.f32 %v3924_v24 }
 0xc02   :  { %v6530_v31 = vadd.f32 %v6251_v8, %v5630_v23  ;;  %v6531_v62 = vadd.f32 %v6251_v8, %v5631_v46  ;;  %v4914_v8 = vld [vmem:[%s12931_s7 + $0xd0] sm:$0xff] }
 0xc04   :  { %6710 = vst [vmem:[%s12933_s9 + $0x380] sm:$0xff] %v6530_v31 }
 0xc05   :  { %6711 = vst.msk [vmem:[%s12933_s9 + $0x388] sm:$0xff] %vm1185_vm8, %v6531_v62 }
 0xc06   :  { %v7336_v39 = vpop.eup %7335 }
 0xc07   :  { %v4729_v5 = vmul.f32 %v7336_v39, %v3972_v12  ;;  %vm4735_vm10 = vweird.f32 %v7336_v39  ;;  %v7338_v36 = vpop.eup %7337 }
 0xc08   :  { %vm4736_vm12 = vmor %vm4734_vm11, %vm4735_vm10  ;;  %v4249_v25 = vmul.f32 %v7338_v36, %v3924_v24  ;;  %vm4255_vm13 = vweird.f32 %v7338_v36 }
 0xc09   :  { %v4730_v37 = vmul.f32 %v7336_v39, %v4729_v5  ;;  %v5186_v55 = vpop.permute.xlu2 %5185  ;;  %vm4256_vm15 = vmor %vm4254_vm14, %vm4255_vm13 }
 0xc0a   :  { %v5564_v34 = vmul.f32 %v5186_v55, %v13496_v54  ;;  %v5565_v40 = vmul.f32 %v5186_v55, %v13497_v30 }
 0xc0b   :  { %v4731_v38 = vmul.f32 0.5, %v4730_v37  ;;  %v3690_v37 = vmul.f32 0.0051020407, %v13499_v10 }
 0xc0d   :  { %v4732_v52 = vsub.f32 1.5, %v4731_v38  ;;  %v13500_v38 = vld [vmem:[#allocation93_spill] sm:$0xff] }
 0xc0f   :  { %v4733_v16 = vmul.f32 %v7336_v39, %v4732_v52 }
 0xc11   :  { %v6086_v48 = vpop.permute.xlu2 %6085  ;;  %v4737_v15 = vsel %vm4736_vm12, %v7336_v39, %v4733_v16  ;;  %v13498_v39 = vld [vmem:[#allocation17_spill] sm:$0xff] }
 0xc12   :  { %v6464_v47 = vadd.f32 %v6086_v48, %v5564_v34  ;;  %v6465_v49 = vadd.f32 %v6086_v48, %v5565_v40  ;;  %v12596_v61 = vmul.f32 %v4962_v29, %v4737_v15  ;;  %v12622_v5 = vmul.f32 0.0051020407, %v13498_v39  ;;  %v13506_v39 = vld [vmem:[#allocation122_spill] sm:$0xff] }
 0xc14   :  { %6644 = vst [vmem:[%s12933_s9 + $0x170] sm:$0xff] %v6464_v47  ;;  %v12599_v43 = vmul.f32 %v12596_v61, %v3072_v11  ;;  %v4250_v11 = vmul.f32 %v7338_v36, %v4249_v25  ;;  %v3780_v55 = vmul.f32 %v12622_v5, %v12622_v5 }
 0xc15   :  { %6645 = vst.msk [vmem:[%s12933_s9 + $0x178] sm:$0xff] %vm1185_vm8, %v6465_v49 }
 0xc16   :  { %v5511_v41 = vpop.permute.xlu1 %5510  ;;  %v4251_v12 = vmul.f32 0.5, %v4250_v11  ;;  %v3870_v4 = vsub.f32 %v3690_v37, %v3780_v55  ;;  %v13507_v37 = vld [vmem:[#allocation6_spill] sm:$0xff] }
 0xc17   :  { %v5694_v18 = vmul.f32 %v5511_v41, %v12270_v20  ;;  %v5695_v56 = vmul.f32 %v5511_v41, %v12261_v59  ;;  %v5847_v20 = vmul.f32 %v12556_v9, %v12509_v19  ;;  %v5757_v59 = vld [vmem:[%s12932_s8 + $0x1d8] sm:$0xff]  ;;  %v5724_v19 = vld [vmem:[%s12932_s8 + $0xd0] sm:$0xff] }
 0xc18   :  { %3578 = vadd.xlane.f32.xlu2 %v3577_v35  ;;  %v4252_v63 = vsub.f32 1.5, %v4251_v12  ;;  %v3960_v28 = vadd.f32 1e-05, %v3870_v4 }
 0xc19   :  { %v5937_v23 = vsub.f32 %v5757_v59, %v5847_v20  ;;  %v13504_v20 = vld [vmem:[#allocation55_spill] sm:$0xff] }
 0xc1a   :  { %v4253_v53 = vmul.f32 %v7338_v36, %v4252_v63  ;;  %7339 = vrsqrt.f32 %v3960_v28  ;;  %vm4614_vm1 = vweird.f32 %v3960_v28  ;;  %v3027_v63 = vmul.f32 0.0051020407, %v13504_v20 }
 0xc1c   :  { %v4257_v46 = vsel %vm4256_vm15, %v7338_v36, %v4253_v53  ;;  %v13502_v36 = vld [vmem:[#allocation115_spill] sm:$0xff] }
 0xc1d   :  { %v5004_v31 = vmul.f32 %v4914_v8, %v4257_v46  ;;  %v13505_v53 = vld [vmem:[#allocation91_spill] sm:$0xff] }
 0xc1e   :  { %v6411_v1 = vpop.permute.xlu1 %6410  ;;  %v3657_v46 = vmul.f32 0.0051020407, %v13505_v53  ;;  %v13510_v53 = vld [vmem:[#allocation61_spill] sm:$0xff] }
 0xc1f   :  { %v6594_v44 = vadd.f32 %v6411_v1, %v5694_v18  ;;  %v6595_v17 = vadd.f32 %v6411_v1, %v5695_v56  ;;  %v5814_v62 = vmul.f32 %v5004_v31, %v3024_v51  ;;  %v2958_v51 = vsel %vm1185_vm8, %v13500_v38, 0.0  ;;  %v13503_v56 = vld [vmem:[#allocation114_spill] sm:$0xff] }
 0xc20   :  { %v7340_v13 = vpop.eup %7339  ;;  %v2959_v22 = vadd.f32 %v2958_v51, %v13501_v45  ;;  %v3248_v51 = vmul.f32 %v13501_v45, %v13501_v45 }
 0xc21   :  { %6774 = vst [vmem:[%s12933_s9 + $0x580] sm:$0xff] %v6594_v44  ;;  %v5904_v9 = vsub.f32 %v5724_v19, %v5814_v62  ;;  %v4609_v52 = vmul.f32 %v7340_v13, %v3960_v28  ;;  %vm4615_vm9 = vweird.f32 %v7340_v13  ;;  %v3249_v19 = vmul.f32 %v13500_v38, %v13500_v38 }
 0xc22   :  { %6775 = vst.msk [vmem:[%s12933_s9 + $0x588] sm:$0xff] %vm1185_vm8, %v6595_v17  ;;  %vm4616_vm2 = vmor %vm4614_vm1, %vm4615_vm9 }
 0xc23   :  { %v4610_v54 = vmul.f32 %v7340_v13, %v4609_v52 }
 0xc25   :  { %v4611_v34 = vmul.f32 0.5, %v4610_v54  ;;  %v3588_v54 = vsel %vm1185_vm8, %v3249_v19, 0.0 }
 0xc27   :  { %v4612_v30 = vsub.f32 1.5, %v4611_v34  ;;  %v3589_v34 = vadd.f32 %v3588_v54, %v3248_v51 }
 0xc29   :  { %v4613_v40 = vmul.f32 %v7340_v13, %v4612_v30 }
 0xc2b   :  { %v4617_v24 = vsel %vm4616_vm2, %v7340_v13, %v4613_v40  ;;  %v4965_v40 = vld [vmem:[%s12931_s7 + $0x268] sm:$0xff] }
 0xc2c   :  { %v5040_v47 = vmul.f32 %v4950_v33, %v4617_v24 }
 0xc30   :  { %6265 = vperm.xlu2 %7132, %v5937_v23  }
 0xc38   :  { %5200 = vperm.xlu2 %7132, %v5004_v31   ;;  %v3747_v31 = vmul.f32 %v3027_v63, %v3027_v63 }
 0xc3a   :  { %v3837_v62 = vsub.f32 %v3657_v46, %v3747_v31 }
 0xc3c   :  { %v3927_v28 = vadd.f32 1e-05, %v3837_v62 }
 0xc3e   :  { %vm4284_vm7 = vweird.f32 %v3927_v28 }
 0xc40   :  { %6100 = vperm.xlu2 %7132, %v5904_v9  }
 0xc4a   :  { %v2949_v48 = vpop.xlane.xlu2 %2948 }
 0xc4b   :  { %v3075_v16 = vmul.f32 0.0051020407, %v2949_v48 }
 0xc4d   :  { %v3795_v41 = vmul.f32 %v3075_v16, %v3075_v16 }
 0xc52   :  { %v5366_v49 = vpop.permute.xlu2 %5365 }
 0xc53   :  { %v5636_v18 = vmul.f32 %v5366_v49, %v13502_v36  ;;  %v5637_v1 = vmul.f32 %v5366_v49, %v13503_v56 }
 0xc69   :  { %2960 = vadd.xlane.f32.xlu2 %v2959_v22 }
 0xc81   :  { %5380 = vperm.xlu2 %7132, %v5040_v47  }
 0xc8b   :  { %v3579_v60 = vpop.xlane.xlu2 %3578 }
 0xc8c   :  { %v3705_v35 = vmul.f32 0.0051020407, %v3579_v60 }
 0xc8e   :  { %v3885_v15 = vsub.f32 %v3705_v35, %v3795_v41  ;;  %v5850_v35 = vmul.f32 %v5040_v47, %v12622_v5  ;;  %v5727_v5 = vld [vmem:[%s12932_s8 + $0xe8] sm:$0xff] }
 0xc90   :  { %v3975_v29 = vadd.f32 1e-05, %v3885_v15 }
 0xc92   :  { %7341 = vrsqrt.f32 %v3975_v29  ;;  %vm4764_vm4 = vweird.f32 %v3975_v29 }
 0xc93   :  { %v6266_v25 = vpop.permute.xlu2 %6265  ;;  %7343 = vrsqrt.f32 %v3927_v28 }
 0xc94   :  { %v6536_v44 = vadd.f32 %v6266_v25, %v5636_v18  ;;  %v6537_v17 = vadd.f32 %v6266_v25, %v5637_v1 }
 0xc96   :  { %6716 = vst [vmem:[%s12933_s9 + $0x3b0] sm:$0xff] %v6536_v44  ;;  %v13508_v44 = vld [vmem:[#allocation38_spill] sm:$0xff] }
 0xc97   :  { %6717 = vst.msk [vmem:[%s12933_s9 + $0x3b8] sm:$0xff] %vm1185_vm8, %v6537_v17  ;;  %v12677_v17 = vmul.f32 0.0051020407, %v13508_v44 }
 0xc98   :  { %v7342_v11 = vpop.eup %7341 }
 0xc99   :  { %v4759_v12 = vmul.f32 %v7342_v11, %v3975_v29  ;;  %vm4765_vm3 = vweird.f32 %v7342_v11  ;;  %v7344_v33 = vpop.eup %7343  ;;  %v5760_v29 = vld [vmem:[%s12932_s8 + $0x1f0] sm:$0xff]  ;;  %v3783_v20 = vmul.f32 %v12677_v17, %v12677_v17 }
 0xc9a   :  { %vm4766_vm5 = vmor %vm4764_vm4, %vm4765_vm3  ;;  %v4279_v49 = vmul.f32 %v7344_v33, %v3927_v28  ;;  %v5940_v36 = vsub.f32 %v5760_v29, %v5850_v35  ;;  %vm4285_vm6 = vweird.f32 %v7344_v33 }
 0xc9b   :  { %v4760_v59 = vmul.f32 %v7342_v11, %v4759_v12  ;;  %v5201_v23 = vpop.permute.xlu2 %5200  ;;  %vm4286_vm0 = vmor %vm4284_vm7, %vm4285_vm6 }
 0xc9c   :  { %v5570_v10 = vmul.f32 %v5201_v23, %v13506_v39  ;;  %v5571_v55 = vmul.f32 %v5201_v23, %v13507_v37  ;;  %v4280_v60 = vmul.f32 %v7344_v33, %v4279_v49  ;;  %v13513_v49 = vld [vmem:[#allocation125_spill] sm:$0xff] }
 0xc9d   :  { %v4761_v8 = vmul.f32 0.5, %v4760_v59 }
 0xc9e   :  { %v4281_v41 = vmul.f32 0.5, %v4280_v60 }
 0xc9f   :  { %v4762_v9 = vsub.f32 1.5, %v4761_v8  ;;  %v13511_v8 = vld [vmem:[#allocation87_spill] sm:$0xff] }
 0xca0   :  { %v4282_v15 = vsub.f32 1.5, %v4281_v41 }
 0xca1   :  { %v4763_v52 = vmul.f32 %v7342_v11, %v4762_v9 }
 0xca2   :  { %v4283_v18 = vmul.f32 %v7344_v33, %v4282_v15 }
 0xca3   :  { %v6101_v4 = vpop.permute.xlu2 %6100  ;;  %v4767_v30 = vsel %vm4766_vm5, %v7342_v11, %v4763_v52  ;;  %v13509_v11 = vld [vmem:[#allocation62_spill] sm:$0xff] }
 0xca4   :  { %v6470_v13 = vadd.f32 %v6101_v4, %v5570_v10  ;;  %v6471_v22 = vadd.f32 %v6101_v4, %v5571_v55  ;;  %v12661_v48 = vmul.f32 %v4965_v40, %v4767_v30  ;;  %v4287_v56 = vsel %vm4286_vm0, %v7344_v33, %v4283_v18  ;;  %v4953_v4 = vld [vmem:[%s12931_s7 + $0x208] sm:$0xff]  ;;  %v13512_v40 = vld [vmem:[#allocation126_spill] sm:$0xff]  ;;  %v13514_v18 = vld [vmem:[#allocation108_spill] sm:$0xff] }
 0xca5   :  { %v3693_v12 = vmul.f32 0.0051020407, %v13509_v11 }
 0xca6   :  { %6650 = vst [vmem:[%s12933_s9 + $0x1a0] sm:$0xff] %v6470_v13  ;;  %v12664_v24 = vmul.f32 %v12661_v48, %v3075_v16  ;;  %v4917_v16 = vld [vmem:[%s12931_s7 + $0xe8] sm:$0xff] }
 0xca7   :  { %6651 = vst.msk [vmem:[%s12933_s9 + $0x1a8] sm:$0xff] %vm1185_vm8, %v6471_v22  ;;  %v5007_v1 = vmul.f32 %v4917_v16, %v4287_v56  ;;  %v3873_v59 = vsub.f32 %v3693_v12, %v3783_v20  ;;  %v3030_v56 = vmul.f32 0.0051020407, %v13514_v18  ;;  %v3255_v12 = vmul.f32 %v13510_v53, %v13510_v53 }
 0xca8   :  { %v12732_v18 = vmul.f32 0.0051020407, %v12027_v7 }
 0xca9   :  { %v5817_v25 = vmul.f32 %v5007_v1, %v3027_v63  ;;  %v3963_v23 = vadd.f32 1e-05, %v3873_v59  ;;  %v2970_v63 = vsel %vm1185_vm8, %v13510_v53, 0.0  ;;  %v3750_v44 = vmul.f32 %v3030_v56, %v3030_v56  ;;  %v13516_v59 = vld [vmem:[#allocation19_spill] sm:$0xff] }
 0xcaa   :  { %3590 = vadd.xlane.f32.xlu2 %v3589_v34  ;;  %v2971_v31 = vadd.f32 %v2970_v63, %v13511_v8  ;;  %v13517_v63 = vld [vmem:[#allocation2_spill] sm:$0xff] }
 0xcab   :  { %v5907_v47 = vsub.f32 %v5727_v5, %v5817_v25  ;;  %7345 = vrsqrt.f32 %v3963_v23  ;;  %vm4644_vm11 = vweird.f32 %v3963_v23  ;;  %v13515_v25 = vld [vmem:[#allocation27_spill] sm:$0xff] }
 0xcac   :  { %v3660_v5 = vmul.f32 0.0051020407, %v13515_v25 }
 0xcae   :  { %v3840_v11 = vsub.f32 %v3660_v5, %v3750_v44 }
 0xcb1   :  { %v7346_v46 = vpop.eup %7345 }
 0xcb2   :  { %v4639_v62 = vmul.f32 %v7346_v46, %v3963_v23  ;;  %vm4645_vm10 = vweird.f32 %v7346_v46 }
 0xcb3   :  { %vm4646_vm12 = vmor %vm4644_vm11, %vm4645_vm10 }
 0xcb4   :  { %v4640_v19 = vmul.f32 %v7346_v46, %v4639_v62  ;;  %v3254_v62 = vmul.f32 %v13511_v8, %v13511_v8 }
 0xcb6   :  { %v4641_v9 = vmul.f32 0.5, %v4640_v19  ;;  %v3930_v19 = vadd.f32 1e-05, %v3840_v11  ;;  %v13519_v11 = vld [vmem:[#allocation46_spill] sm:$0xff] }
 0xcb8   :  { %v4642_v39 = vsub.f32 1.5, %v4641_v9  ;;  %vm4314_vm1 = vweird.f32 %v3930_v19 }
 0xcba   :  { %v4643_v10 = vmul.f32 %v7346_v46, %v4642_v39 }
 0xcbc   :  { %v4647_v55 = vsel %vm4646_vm12, %v7346_v46, %v4643_v10 }
 0xcbd   :  { %v5043_v28 = vmul.f32 %v4953_v4, %v4647_v55 }
 0xcc2   :  { %6280 = vperm.xlu2 %7132, %v5940_v36  }
 0xcca   :  { %5215 = vperm.xlu2 %7132, %v5007_v1  }
 0xcd2   :  { %6115 = vperm.xlu2 %7132, %v5907_v47  }
 0xcdc   :  { %v2961_v37 = vpop.xlane.xlu2 %2960 }
 0xcdd   :  { %v3078_v13 = vmul.f32 0.0051020407, %v2961_v37  ;;  %v3600_v37 = vsel %vm1185_vm8, %v3255_v12, 0.0 }
 0xcde   :  { %v3601_v55 = vadd.f32 %v3600_v37, %v3254_v62 }
 0xcdf   :  { %v3798_v52 = vmul.f32 %v3078_v13, %v3078_v13 }
 0xce4   :  { %v5381_v51 = vpop.permute.xlu2 %5380 }
 0xce5   :  { %v5642_v33 = vmul.f32 %v5381_v51, %v13512_v40  ;;  %v5643_v60 = vmul.f32 %v5381_v51, %v13513_v49  ;;  %v4968_v51 = vld [vmem:[%s12931_s7 + $0x280] sm:$0xff] }
 0xcfb   :  { %2972 = vadd.xlane.f32.xlu2 %v2971_v31 }
 0xd13   :  { %5395 = vperm.xlu2 %7132, %v5043_v28  }
 0xd1d   :  { %v3591_v22 = vpop.xlane.xlu2 %3590 }
 0xd1e   :  { %v3708_v54 = vmul.f32 0.0051020407, %v3591_v22 }
 0xd20   :  { %v3888_v34 = vsub.f32 %v3708_v54, %v3798_v52 }
 0xd22   :  { %v3978_v30 = vadd.f32 1e-05, %v3888_v34 }
 0xd24   :  { %7347 = vrsqrt.f32 %v3978_v30  ;;  %vm4794_vm14 = vweird.f32 %v3978_v30 }
 0xd25   :  { %v6281_v41 = vpop.permute.xlu2 %6280  ;;  %7349 = vrsqrt.f32 %v3930_v19 }
 0xd26   :  { %v6542_v35 = vadd.f32 %v6281_v41, %v5642_v33  ;;  %v6543_v15 = vadd.f32 %v6281_v41, %v5643_v60  ;;  %v5853_v33 = vmul.f32 %v5043_v28, %v12677_v17  ;;  %v5763_v60 = vld [vmem:[%s12932_s8 + $0x208] sm:$0xff]  ;;  %v5730_v17 = vld [vmem:[%s12932_s8 + $0x100] sm:$0xff] }
 0xd28   :  { %6722 = vst [vmem:[%s12933_s9 + $0x3e0] sm:$0xff] %v6542_v35  ;;  %v5943_v41 = vsub.f32 %v5763_v60, %v5853_v33 }
 0xd29   :  { %6723 = vst.msk [vmem:[%s12933_s9 + $0x3e8] sm:$0xff] %vm1185_vm8, %v6543_v15 }
 0xd2a   :  { %v7348_v29 = vpop.eup %7347 }
 0xd2b   :  { %v4789_v36 = vmul.f32 %v7348_v29, %v3978_v30  ;;  %vm4795_vm13 = vweird.f32 %v7348_v29  ;;  %v7350_v54 = vpop.eup %7349 }
 0xd2c   :  { %vm4796_vm15 = vmor %vm4794_vm14, %vm4795_vm13  ;;  %v4309_v34 = vmul.f32 %v7350_v54, %v3930_v19  ;;  %vm4315_vm9 = vweird.f32 %v7350_v54 }
 0xd2d   :  { %v4790_v16 = vmul.f32 %v7348_v29, %v4789_v36  ;;  %v5216_v1 = vpop.permute.xlu2 %5215  ;;  %vm4316_vm2 = vmor %vm4314_vm1, %vm4315_vm9 }
 0xd2e   :  { %v5576_v23 = vmul.f32 %v5216_v1, %v13516_v59  ;;  %v5577_v46 = vmul.f32 %v5216_v1, %v13517_v63  ;;  %v4310_v30 = vmul.f32 %v7350_v54, %v4309_v34  ;;  %v3786_v1 = vmul.f32 %v12732_v18, %v12732_v18  ;;  %v13521_v34 = vld [vmem:[#allocation8_spill] sm:$0xff] }
 0xd2f   :  { %v4791_v47 = vmul.f32 0.5, %v4790_v16  ;;  %v3696_v16 = vmul.f32 0.0051020407, %v12042_v57 }
 0xd30   :  { %v4311_v40 = vmul.f32 0.5, %v4310_v30 }
 0xd31   :  { %v4792_v20 = vsub.f32 1.5, %v4791_v47  ;;  %v3876_v25 = vsub.f32 %v3696_v16, %v3786_v1  ;;  %v13518_v47 = vld [vmem:[#allocation96_spill] sm:$0xff] }
 0xd32   :  { %v4312_v49 = vsub.f32 1.5, %v4311_v40  ;;  %v3261_v16 = vmul.f32 %v13518_v47, %v13518_v47 }
 0xd33   :  { %v4793_v10 = vmul.f32 %v7348_v29, %v4792_v20  ;;  %v3966_v5 = vadd.f32 1e-05, %v3876_v25  ;;  %v13522_v25 = vld [vmem:[#allocation14_spill] sm:$0xff] }
 0xd34   :  { %v4313_v35 = vmul.f32 %v7350_v54, %v4312_v49 }
 0xd35   :  { %v6116_v31 = vpop.permute.xlu2 %6115  ;;  %v4797_v4 = vsel %vm4796_vm15, %v7348_v29, %v4793_v10  ;;  %7351 = vrsqrt.f32 %v3966_v5  ;;  %vm4674_vm4 = vweird.f32 %v3966_v5 }
 0xd36   :  { %v6476_v9 = vadd.f32 %v6116_v31, %v5576_v23  ;;  %v6477_v39 = vadd.f32 %v6116_v31, %v5577_v46  ;;  %v12716_v22 = vmul.f32 %v4968_v51, %v4797_v4  ;;  %v4317_v15 = vsel %vm4316_vm2, %v7350_v54, %v4313_v35  ;;  %v4956_v31 = vld [vmem:[%s12931_s7 + $0x220] sm:$0xff]  ;;  %v13520_v51 = vld [vmem:[#allocation73_spill] sm:$0xff] }
 0xd37   :  { %v3033_v35 = vmul.f32 0.0051020407, %v12195_v3 }
 0xd38   :  { %6656 = vst [vmem:[%s12933_s9 + $0x1d0] sm:$0xff] %v6476_v9  ;;  %v12719_v52 = vmul.f32 %v12716_v22, %v3078_v13  ;;  %v4920_v13 = vld [vmem:[%s12931_s7 + $0x100] sm:$0xff] }
 0xd39   :  { %6657 = vst.msk [vmem:[%s12933_s9 + $0x1d8] sm:$0xff] %vm1185_vm8, %v6477_v39  ;;  %v5010_v29 = vmul.f32 %v4920_v13, %v4317_v15 }
 0xd3b   :  { %v5820_v36 = vmul.f32 %v5010_v29, %v3030_v56  ;;  %v2982_v56 = vsel %vm1185_vm8, %v13518_v47, 0.0  ;;  %v7352_v44 = vpop.eup %7351 }
 0xd3c   :  { %3602 = vadd.xlane.f32.xlu2 %v3601_v55  ;;  %v2983_v12 = vadd.f32 %v2982_v56, %v13519_v11  ;;  %v4669_v20 = vmul.f32 %v7352_v44, %v3966_v5  ;;  %vm4675_vm3 = vweird.f32 %v7352_v44  ;;  %v13523_v56 = vld [vmem:[#allocation15_spill] sm:$0xff] }
 0xd3d   :  { %v5910_v28 = vsub.f32 %v5730_v17, %v5820_v36  ;;  %vm4676_vm5 = vmor %vm4674_vm4, %vm4675_vm3  ;;  %v3753_v17 = vmul.f32 %v3033_v35, %v3033_v35 }
 0xd3e   :  { %v4670_v59 = vmul.f32 %v7352_v44, %v4669_v20  ;;  %v3260_v20 = vmul.f32 %v13519_v11, %v13519_v11 }
 0xd40   :  { %v4671_v23 = vmul.f32 0.5, %v4670_v59 }
 0xd42   :  { %v4672_v7 = vsub.f32 1.5, %v4671_v23 }
 0xd44   :  { %v4673_v63 = vmul.f32 %v7352_v44, %v4672_v7 }
 0xd46   :  { %v4677_v46 = vsel %vm4676_vm5, %v7352_v44, %v4673_v63 }
 0xd47   :  { %v5046_v62 = vmul.f32 %v4956_v31, %v4677_v46  ;;  %v4971_v46 = vld [vmem:[%s12931_s7 + $0x298] sm:$0xff] }
 0xd54   :  { %6295 = vperm.xlu2 %7132, %v5943_v41  }
 0xd5c   :  { %5230 = vperm.xlu2 %7132, %v5010_v29   ;;  %v3663_v29 = vmul.f32 0.0051020407, %v12210_v42  ;;  %v3612_v42 = vsel %vm1185_vm8, %v3261_v16, 0.0 }
 0xd5d   :  { %v3613_v63 = vadd.f32 %v3612_v42, %v3260_v20 }
 0xd64   :  { %6130 = vperm.xlu2 %7132, %v5910_v28   ;;  %v3843_v28 = vsub.f32 %v3663_v29, %v3753_v17  ;;  %v12796_v17 = vpop.f32.mrf.mxu2 }
 0xd66   :  { %v3933_v3 = vadd.f32 1e-05, %v3843_v28 }
 0xd68   :  { %vm4344_vm11 = vweird.f32 %v3933_v3 }
 0xd6e   :  { %v2973_v57 = vpop.xlane.xlu2 %2972 }
 0xd6f   :  { %v3081_v9 = vmul.f32 0.0051020407, %v2973_v57 }
 0xd71   :  { %v3801_v10 = vmul.f32 %v3081_v9, %v3081_v9 }
 0xd76   :  { %v5396_v19 = vpop.permute.xlu2 %5395 }
 0xd77   :  { %v5648_v54 = vmul.f32 %v5396_v19, %v13520_v51  ;;  %v5649_v30 = vmul.f32 %v5396_v19, %v13521_v34 }
 0xd8d   :  { %2984 = vadd.xlane.f32.xlu2 %v2983_v12 }
 0xda5   :  { %5410 = vperm.xlu2 %7132, %v5046_v62  }
 0xdaf   :  { %v3603_v39 = vpop.xlane.xlu2 %3602 }
 0xdb0   :  { %v3711_v37 = vmul.f32 0.0051020407, %v3603_v39 }
 0xdb2   :  { %v3891_v55 = vsub.f32 %v3711_v37, %v3801_v10 }
 0xdb4   :  { %v3981_v4 = vadd.f32 1e-05, %v3891_v55 }
 0xdb6   :  { %7353 = vrsqrt.f32 %v3981_v4  ;;  %vm4824_vm7 = vweird.f32 %v3981_v4 }
 0xdb7   :  { %v6296_v40 = vpop.permute.xlu2 %6295  ;;  %7355 = vrsqrt.f32 %v3933_v3 }
 0xdb8   :  { %v6548_v33 = vadd.f32 %v6296_v40, %v5648_v54  ;;  %v6549_v49 = vadd.f32 %v6296_v40, %v5649_v30  ;;  %v5766_v54 = vld [vmem:[%s12932_s8 + $0x220] sm:$0xff] }
 0xdba   :  { %6728 = vst [vmem:[%s12933_s9 + $0x410] sm:$0xff] %v6548_v33 }
 0xdbb   :  { %6729 = vst.msk [vmem:[%s12933_s9 + $0x418] sm:$0xff] %vm1185_vm8, %v6549_v49 }
 0xdbc   :  { %v7354_v60 = vpop.eup %7353 }
 0xdbd   :  { %v4819_v41 = vmul.f32 %v7354_v60, %v3981_v4  ;;  %vm4825_vm6 = vweird.f32 %v7354_v60  ;;  %v7356_v39 = vpop.eup %7355  ;;  %v5856_v4 = vmul.f32 %v5046_v62, %v12732_v18  ;;  %v5733_v18 = vld [vmem:[%s12932_s8 + $0x118] sm:$0xff] }
 0xdbe   :  { %vm4826_vm0 = vmor %vm4824_vm7, %vm4825_vm6  ;;  %v4339_v10 = vmul.f32 %v7356_v39, %v3933_v3  ;;  %vm4345_vm10 = vweird.f32 %v7356_v39 }
 0xdbf   :  { %v4820_v15 = vmul.f32 %v7354_v60, %v4819_v41  ;;  %v5231_v13 = vpop.permute.xlu2 %5230  ;;  %v5946_v34 = vsub.f32 %v5766_v54, %v5856_v4  ;;  %vm4346_vm12 = vmor %vm4344_vm11, %vm4345_vm10  ;;  %v3699_v41 = vmul.f32 0.0051020407, %v12435_v50 }
 0xdc0   :  { %v5582_v5 = vmul.f32 %v5231_v13, %v13522_v25  ;;  %v5583_v44 = vmul.f32 %v5231_v13, %v13523_v56  ;;  %v4340_v37 = vmul.f32 %v7356_v39, %v4339_v10  ;;  %v13525_v10 = vld [vmem:[#allocation11_spill] sm:$0xff] }
 0xdc1   :  { %v4821_v36 = vmul.f32 0.5, %v4820_v15 }
 0xdc2   :  { %v4341_v55 = vmul.f32 0.5, %v4340_v37 }
 0xdc3   :  { %v4822_v1 = vsub.f32 1.5, %v4821_v36  ;;  %v12792_v36 = vpop.f32.mrf.mxu3 }
 0xdc4   :  { %v4342_v51 = vsub.f32 1.5, %v4341_v55 }
 0xdc5   :  { %v4823_v7 = vmul.f32 %v7354_v60, %v4822_v1 }
 0xdc6   :  { %v4343_v30 = vmul.f32 %v7356_v39, %v4342_v51 }
 0xdc7   :  { %v6131_v12 = vpop.permute.xlu2 %6130  ;;  %v4827_v57 = vsel %vm4826_vm0, %v7354_v60, %v4823_v7  ;;  %v12787_v60 = vmul.f32 0.0051020407, %v12387_v27 }
 0xdc8   :  { %v6482_v59 = vadd.f32 %v6131_v12, %v5582_v5  ;;  %v6483_v23 = vadd.f32 %v6131_v12, %v5583_v44  ;;  %v12771_v31 = vmul.f32 %v4971_v46, %v4827_v57  ;;  %v4347_v40 = vsel %vm4346_vm12, %v7356_v39, %v4343_v30  ;;  %v4959_v12 = vld [vmem:[%s12931_s7 + $0x238] sm:$0xff]  ;;  %v13524_v46 = vld [vmem:[#allocation10_spill] sm:$0xff] }
 0xdc9   :  { %v3789_v15 = vmul.f32 %v12787_v60, %v12787_v60 }
 0xdca   :  { %6662 = vst [vmem:[%s12933_s9 + $0x200] sm:$0xff] %v6482_v59  ;;  %v12774_v19 = vmul.f32 %v12771_v31, %v3081_v9  ;;  %v4923_v9 = vld [vmem:[%s12931_s7 + $0x118] sm:$0xff] }
 0xdcb   :  { %6663 = vst.msk [vmem:[%s12933_s9 + $0x208] sm:$0xff] %vm1185_vm8, %v6483_v23  ;;  %v5013_v33 = vmul.f32 %v4923_v9, %v4347_v40  ;;  %v3879_v13 = vsub.f32 %v3699_v41, %v3789_v15  ;;  %v3266_v15 = vmul.f32 %v12796_v17, %v12796_v17 }
 0xdcd   :  { %v5823_v49 = vmul.f32 %v5013_v33, %v3033_v35  ;;  %v3969_v29 = vadd.f32 1e-05, %v3879_v13  ;;  %v2994_v35 = vsel %vm1185_vm8, %v12792_v36, 0.0 }
 0xdce   :  { %3614 = vadd.xlane.f32.xlu2 %v3613_v63  ;;  %v2995_v16 = vadd.f32 %v2994_v35, %v12796_v17 }
 0xdcf   :  { %v5913_v62 = vsub.f32 %v5733_v18, %v5823_v49  ;;  %7357 = vrsqrt.f32 %v3969_v29  ;;  %vm4704_vm14 = vweird.f32 %v3969_v29 }
 0xdd5   :  { %v7358_v28 = vpop.eup %7357 }
 0xdd6   :  { %v4699_v27 = vmul.f32 %v7358_v28, %v3969_v29  ;;  %vm4705_vm13 = vweird.f32 %v7358_v28 }
 0xdd7   :  { %vm4706_vm15 = vmor %vm4704_vm14, %vm4705_vm13 }
 0xdd8   :  { %v4700_v1 = vmul.f32 %v7358_v28, %v4699_v27 }
 0xdda   :  { %v4701_v50 = vmul.f32 0.5, %v4700_v1 }
 0xddc   :  { %v4702_v25 = vsub.f32 1.5, %v4701_v50 }
 0xdde   :  { %v4703_v5 = vmul.f32 %v7358_v28, %v4702_v25  ;;  %v5769_v25 = vld [vmem:[%s12932_s8 + $0x238] sm:$0xff] }
 0xde0   :  { %v4707_v44 = vsel %vm4706_vm15, %v7358_v28, %v4703_v5 }
 0xde1   :  { %v5049_v20 = vmul.f32 %v4959_v12, %v4707_v44 }
 0xde3   :  { %v5859_v50 = vmul.f32 %v5049_v20, %v12787_v60  ;;  %v5775_v60 = vld [vmem:[%s12932_s8 + $0x268] sm:$0xff] }
 0xde4   :  { %v5955_v12 = vsub.f32 %v5775_v60, %v12664_v24 }
 0xde5   :  { %v5949_v5 = vsub.f32 %v5769_v25, %v5859_v50 }
 0xde6   :  { %6310 = vperm.xlu2 %7132, %v5946_v34  }
 0xdee   :  { %5245 = vperm.xlu2 %7132, %v5013_v33   ;;  %v3267_v33 = vmul.f32 %v12792_v36, %v12792_v36 }
 0xdf0   :  { %v3624_v35 = vsel %vm1185_vm8, %v3267_v33, 0.0 }
 0xdf6   :  { %6145 = vperm.xlu2 %7132, %v5913_v62  }
 0xe00   :  { %v2985_v56 = vpop.xlane.xlu2 %2984 }
 0xe01   :  { %v3084_v59 = vmul.f32 0.0051020407, %v2985_v56  ;;  %v5772_v56 = vld [vmem:[%s12932_s8 + $0x250] sm:$0xff] }
 0xe02   :  { %v5952_v44 = vsub.f32 %v5772_v56, %v12599_v43  ;;  %v5781_v43 = vld [vmem:[%s12932_s8 + $0x298] sm:$0xff] }
 0xe03   :  { %v3804_v7 = vmul.f32 %v3084_v59, %v3084_v59 }
 0xe08   :  { %v5411_v3 = vpop.permute.xlu2 %5410 }
 0xe09   :  { %v5654_v39 = vmul.f32 %v5411_v3, %v13524_v46  ;;  %v5655_v37 = vmul.f32 %v5411_v3, %v13525_v10 }
 0xe1f   :  { %2996 = vadd.xlane.f32.xlu2 %v2995_v16  ;;  %v4974_v16 = vld [vmem:[%s12931_s7 + $0x2b0] sm:$0xff] }
 0xe37   :  { %5425 = vperm.xlu2 %7132, %v5049_v20  }
 0xe41   :  { %v3615_v23 = vpop.xlane.xlu2 %3614 }
 0xe42   :  { %v3714_v42 = vmul.f32 0.0051020407, %v3615_v23 }
 0xe44   :  { %v3894_v63 = vsub.f32 %v3714_v42, %v3804_v7 }
 0xe46   :  { %v3984_v57 = vadd.f32 1e-05, %v3894_v63 }
 0xe48   :  { %7359 = vrsqrt.f32 %v3984_v57  ;;  %vm4854_vm1 = vweird.f32 %v3984_v57 }
 0xe49   :  { %v6311_v55 = vpop.permute.xlu2 %6310 }
 0xe4a   :  { %v6554_v4 = vadd.f32 %v6311_v55, %v5654_v39  ;;  %v6555_v51 = vadd.f32 %v6311_v55, %v5655_v37 }
 0xe4c   :  { %6734 = vst [vmem:[%s12933_s9 + $0x440] sm:$0xff] %v6554_v4 }
 0xe4d   :  { %6735 = vst.msk [vmem:[%s12933_s9 + $0x448] sm:$0xff] %vm1185_vm8, %v6555_v51 }
 0xe4e   :  { %v7360_v54 = vpop.eup %7359 }
 0xe4f   :  { %v4849_v34 = vmul.f32 %v7360_v54, %v3984_v57  ;;  %vm4855_vm9 = vweird.f32 %v7360_v54 }
 0xe50   :  { %vm4856_vm2 = vmor %vm4854_vm1, %vm4855_vm9 }
 0xe51   :  { %v4850_v30 = vmul.f32 %v7360_v54, %v4849_v34  ;;  %v5246_v40 = vpop.permute.xlu2 %5245  ;;  %v4977_v34 = vld [vmem:[%s12931_s7 + $0x2c8] sm:$0xff] }
 0xe52   :  { %v5588_v18 = vmul.f32 %v5246_v40, %v11981_v6  ;;  %v5589_v62 = vmul.f32 %v5246_v40, %v11963_v14  ;;  %v3625_v14 = vadd.f32 %v3624_v35, %v3266_v15 }
 0xe53   :  { %v4851_v9 = vmul.f32 0.5, %v4850_v30 }
 0xe55   :  { %v4852_v49 = vsub.f32 1.5, %v4851_v9 }
 0xe57   :  { %v4853_v28 = vmul.f32 %v7360_v54, %v4852_v49 }
 0xe59   :  { %v6146_v41 = vpop.permute.xlu2 %6145  ;;  %v4857_v6 = vsel %vm4856_vm2, %v7360_v54, %v4853_v28 }
 0xe5a   :  { %v6488_v13 = vadd.f32 %v6146_v41, %v5588_v18  ;;  %v6489_v29 = vadd.f32 %v6146_v41, %v5589_v62  ;;  %v5064_v27 = vmul.f32 %v4974_v16, %v4857_v6 }
 0xe5c   :  { %6668 = vst [vmem:[%s12933_s9 + $0x230] sm:$0xff] %v6488_v13  ;;  %v5874_v1 = vmul.f32 %v5064_v27, %v3084_v59 }
 0xe5d   :  { %6669 = vst.msk [vmem:[%s12933_s9 + $0x238] sm:$0xff] %vm1185_vm8, %v6489_v29 }
 0xe60   :  { %3626 = vadd.xlane.f32.xlu2 %v3625_v14 }
 0xe78   :  { %6325 = vperm.xlu2 %7132, %v5949_v5  }
 0xe80   :  { %5440 = vperm.xlu2 %7132, %v12596_v61   ;;  %v5778_v61 = vld [vmem:[%s12932_s8 + $0x280] sm:$0xff] }
 0xe81   :  { %v5958_v20 = vsub.f32 %v5778_v61, %v12719_v52 }
 0xe88   :  { %6340 = vperm.xlu2 %7132, %v5952_v44  }
 0xe90   :  { %5455 = vperm.xlu2 %7132, %v12661_v48   ;;  %v5961_v48 = vsub.f32 %v5781_v43, %v12774_v19 }
 0xe92   :  { %v2997_v24 = vpop.xlane.xlu2 %2996 }
 0xe93   :  { %v3087_v52 = vmul.f32 0.0051020407, %v2997_v24 }
 0xe95   :  { %v3807_v7 = vmul.f32 %v3087_v52, %v3087_v52 }
 0xe98   :  { %6355 = vperm.xlu2 %7132, %v5955_v12  }
 0xe9a   :  { %v5426_v59 = vpop.permute.xlu2 %5425 }
 0xe9b   :  { %v5660_v57 = vmul.f32 %v5426_v59, %v13443_v2  ;;  %v5661_v19 = vmul.f32 %v5426_v59, %v10813_v0 }
 0xea0   :  { %5470 = vperm.xlu2 %7132, %v12716_v22   ;;  %v5784_v22 = vld [vmem:[%s12932_s8 + $0x2b0] sm:$0xff] }
 0xea1   :  { %v5964_v3 = vsub.f32 %v5784_v22, %v5874_v1 }
 0xea8   :  { %6370 = vperm.xlu2 %7132, %v5958_v20  }
 0xeb0   :  { %5485 = vperm.xlu2 %7132, %v12771_v31  }
 0xeb8   :  { %6385 = vperm.xlu2 %7132, %v5961_v48  }
 0xec0   :  { %5500 = vperm.xlu2 %7132, %v5064_v27  }
 0xec8   :  { %6400 = vperm.xlu2 %7132, %v5964_v3  }
 0xed3   :  { %v3627_v23 = vpop.xlane.xlu2 %3626 }
 0xed4   :  { %v3717_v31 = vmul.f32 0.0051020407, %v3627_v23 }
 0xed6   :  { %v3897_v42 = vsub.f32 %v3717_v31, %v3807_v7 }
 0xed8   :  { %v3987_v63 = vadd.f32 1e-05, %v3897_v42 }
 0xeda   :  { %7361 = vrsqrt.f32 %v3987_v63  ;;  %vm4884_vm4 = vweird.f32 %v3987_v63 }
 0xedb   :  { %v6326_v46 = vpop.permute.xlu2 %6325 }
 0xedc   :  { %v6560_v39 = vadd.f32 %v6326_v46, %v5660_v57  ;;  %v6561_v10 = vadd.f32 %v6326_v46, %v5661_v19 }
 0xede   :  { %6740 = vst [vmem:[%s12933_s9 + $0x470] sm:$0xff] %v6560_v39 }
 0xedf   :  { %6741 = vst.msk [vmem:[%s12933_s9 + $0x478] sm:$0xff] %vm1185_vm8, %v6561_v10 }
 0xee0   :  { %v7362_v37 = vpop.eup %7361 }
 0xee1   :  { %v4879_v55 = vmul.f32 %v7362_v37, %v3987_v63  ;;  %vm4885_vm3 = vweird.f32 %v7362_v37 }
 0xee2   :  { %vm4886_vm5 = vmor %vm4884_vm4, %vm4885_vm3 }
 0xee3   :  { %v4880_v4 = vmul.f32 %v7362_v37, %v4879_v55  ;;  %v5441_v51 = vpop.permute.xlu2 %5440 }
 0xee4   :  { %v5666_v30 = vmul.f32 %v5441_v51, %v13463_v26  ;;  %v5667_v40 = vmul.f32 %v5441_v51, %v13461_v21  ;;  %v5787_v21 = vld [vmem:[%s12932_s8 + $0x2c8] sm:$0xff] }
 0xee5   :  { %v4881_v2 = vmul.f32 0.5, %v4880_v4 }
 0xee7   :  { %v4882_v54 = vsub.f32 1.5, %v4881_v2 }
 0xee9   :  { %v4883_v0 = vmul.f32 %v7362_v37, %v4882_v54 }
 0xeeb   :  { %v6341_v9 = vpop.permute.xlu2 %6340  ;;  %v4887_v33 = vsel %vm4886_vm5, %v7362_v37, %v4883_v0 }
 0xeec   :  { %v6566_v49 = vadd.f32 %v6341_v9, %v5666_v30  ;;  %v6567_v18 = vadd.f32 %v6341_v9, %v5667_v40  ;;  %v5067_v62 = vmul.f32 %v4977_v34, %v4887_v33 }
 0xeee   :  { %6746 = vst [vmem:[%s12933_s9 + $0x4a0] sm:$0xff] %v6566_v49  ;;  %5515 = vperm.xlu2 %7132, %v5067_v62   ;;  %v5877_v41 = vmul.f32 %v5067_v62, %v3087_v52 }
 0xeef   :  { %6747 = vst.msk [vmem:[%s12933_s9 + $0x4a8] sm:$0xff] %vm1185_vm8, %v6567_v18 }
 0xef0   :  { %v5967_v15 = vsub.f32 %v5787_v21, %v5877_v41 }
 0xef3   :  { %v5456_v26 = vpop.permute.xlu2 %5455 }
 0xef4   :  { %v5672_v13 = vmul.f32 %v5456_v26, %v13487_v32  ;;  %v5673_v29 = vmul.f32 %v5456_v26, %v13484_v58 }
 0xef6   :  { %6415 = vperm.xlu2 %7132, %v5967_v15  }
 0xefb   :  { %v6356_v35 = vpop.permute.xlu2 %6355 }
 0xefc   :  { %v6572_v28 = vadd.f32 %v6356_v35, %v5672_v13  ;;  %v6573_v14 = vadd.f32 %v6356_v35, %v5673_v29 }
 0xefe   :  { %6752 = vst [vmem:[%s12933_s9 + $0x4d0] sm:$0xff] %v6572_v28 }
 0xeff   :  { %6753 = vst.msk [vmem:[%s12933_s9 + $0x4d8] sm:$0xff] %vm1185_vm8, %v6573_v14 }
 0xf03   :  { %v5471_v6 = vpop.permute.xlu2 %5470 }
 0xf04   :  { %v5678_v16 = vmul.f32 %v5471_v6, %v13501_v45  ;;  %v5679_v27 = vmul.f32 %v5471_v6, %v13500_v38 }
 0xf0b   :  { %v6371_v32 = vpop.permute.xlu2 %6370 }
 0xf0c   :  { %v6578_v1 = vadd.f32 %v6371_v32, %v5678_v16  ;;  %v6579_v58 = vadd.f32 %v6371_v32, %v5679_v27 }
 0xf0e   :  { %6758 = vst [vmem:[%s12933_s9 + $0x500] sm:$0xff] %v6578_v1 }
 0xf0f   :  { %6759 = vst.msk [vmem:[%s12933_s9 + $0x508] sm:$0xff] %vm1185_vm8, %v6579_v58 }
 0xf13   :  { %v5486_v50 = vpop.permute.xlu2 %5485 }
 0xf14   :  { %v5684_v25 = vmul.f32 %v5486_v50, %v13511_v8  ;;  %v5685_v5 = vmul.f32 %v5486_v50, %v13510_v53 }
 0xf1b   :  { %v6386_v45 = vpop.permute.xlu2 %6385 }
 0xf1c   :  { %v6584_v56 = vadd.f32 %v6386_v45, %v5684_v25  ;;  %v6585_v38 = vadd.f32 %v6386_v45, %v5685_v5 }
 0xf1e   :  { %6764 = vst [vmem:[%s12933_s9 + $0x530] sm:$0xff] %v6584_v56 }
 0xf1f   :  { %6765 = vst.msk [vmem:[%s12933_s9 + $0x538] sm:$0xff] %vm1185_vm8, %v6585_v38 }
 0xf23   :  { %v5501_v44 = vpop.permute.xlu2 %5500 }
 0xf24   :  { %v5690_v60 = vmul.f32 %v5501_v44, %v13519_v11  ;;  %v5691_v12 = vmul.f32 %v5501_v44, %v13518_v47 }
 0xf2b   :  { %v6401_v8 = vpop.permute.xlu2 %6400 }
 0xf2c   :  { %v6590_v61 = vadd.f32 %v6401_v8, %v5690_v60  ;;  %v6591_v53 = vadd.f32 %v6401_v8, %v5691_v12 }
 0xf2e   :  { %6770 = vst [vmem:[%s12933_s9 + $0x560] sm:$0xff] %v6590_v61 }
 0xf2f   :  { %6771 = vst.msk [vmem:[%s12933_s9 + $0x568] sm:$0xff] %vm1185_vm8, %v6591_v53 }
 0xf48   :  { %v5516_v20 = vpop.permute.xlu2 %5515 }
 0xf49   :  { %v5696_v43 = vmul.f32 %v5516_v20, %v12796_v17  ;;  %v5697_v48 = vmul.f32 %v5516_v20, %v12792_v36 }
 0xf50   :  { %v6416_v11 = vpop.permute.xlu2 %6415 }
 0xf51   :  { %v6596_v24 = vadd.f32 %v6416_v11, %v5696_v43  ;;  %v6597_v47 = vadd.f32 %v6416_v11, %v5697_v48 }
 0xf53   :  { %6776 = vst [vmem:[%s12933_s9 + $0x590] sm:$0xff] %v6596_v24 }
 0xf54   :  { %6777 = vst.msk [vmem:[%s12933_s9 + $0x598] sm:$0xff] %vm1185_vm8, %v6597_v47 }

</bundles_post_ra>
